<compile_context>
chip_gen: v7x
topology: tpu7x:2x2x1
jax: 0.10.0
libtpu: 0.0.40
codegen_flags: <defaults>
</compile_context>

<pallas_src>
import functools
import numpy as np
import jax
import jax.numpy as jnp
from jax.experimental import pallas as pl
from jax.experimental.pallas import tpu as pltpu

F32 = jnp.float32
BF16 = jnp.bfloat16


def _cdiv(a, b):
    return (a + b - 1) // b


def _round_up(a, b):
    return _cdiv(a, b) * b


def _pick_bm(M):
    # >=2 row tiles when there is enough work (gives v7x's second TensorCore a
    # "parallel" slice); multiples of 16 keep bf16 blocks tile-aligned; small M uses
    # a full-extent block (always legal).
    return _round_up(_cdiv(M, 2), 16) if M >= 32 else M


# ----------------------------------------------------------------------------
# Generic linear / MLP / LayerNorm kernels
# ----------------------------------------------------------------------------
def _linear_kernel(x_ref, w_ref, b_ref, o_ref, acc_ref, *, act, nk):
    k = pl.program_id(1)

    @pl.when(k == 0)
    def _():
        acc_ref[...] = jnp.zeros_like(acc_ref)

    acc_ref[...] += jnp.dot(x_ref[...], w_ref[...], preferred_element_type=jnp.float32)

    @pl.when(k == nk - 1)
    def _():
        y = acc_ref[...] + b_ref[...]
        if act == "relu":
            y = jnp.maximum(y, 0.0)
        elif act == "tanh":
            y = jnp.tanh(y)
        o_ref[...] = y.astype(o_ref.dtype)


def linear_pallas(x, w, b, act=None):
    """y = act(x @ w + b); bf16 operands, f32 accumulation, N padded to 128 lanes,
    grid = (row tiles ["parallel"], K tiles ["arbitrary"]) with a VMEM accumulator."""
    orig = x.shape
    K = orig[-1]
    M = int(np.prod(orig[:-1]))
    N = w.shape[1]
    Np = _round_up(N, 128)
    if Np != N:
        w = jnp.pad(w, ((0, 0), (0, Np - N)))
        b = jnp.pad(b, ((0, Np - N),))
    bm = _pick_bm(M)
    bk = 512 if (K > 1024 and K % 512 == 0) else K
    nk = K // bk
    out = pl.pallas_call(
        functools.partial(_linear_kernel, act=act, nk=nk),
        out_shape=jax.ShapeDtypeStruct((M, Np), F32),
        grid=(_cdiv(M, bm), nk),
        in_specs=[pl.BlockSpec((bm, bk), lambda i, k: (i, k)),
                  pl.BlockSpec((bk, Np), lambda i, k: (k, 0)),
                  pl.BlockSpec((1, Np), lambda i, k: (0, 0))],
        out_specs=pl.BlockSpec((bm, Np), lambda i, k: (i, 0)),
        scratch_shapes=[pltpu.VMEM((bm, Np), jnp.float32)],
        compiler_params=pltpu.CompilerParams(
            dimension_semantics=("parallel", "arbitrary")),
    )(x.reshape(M, K).astype(BF16), w.astype(BF16), b.reshape(1, Np).astype(F32))
    if Np != N:
        out = out[:, :N]
    return out.reshape(orig[:-1] + (N,))


def _mlp_kernel(x_ref, *refs, acts):
    o_ref = refs[-1]
    h = x_ref[...]
    for i, a in enumerate(acts):
        w = refs[2 * i][...]
        bias = refs[2 * i + 1][...]
        h = jnp.dot(h, w, preferred_element_type=jnp.float32) + bias
        if a == "relu":
            h = jnp.maximum(h, 0.0)
        elif a == "tanh":
            h = jnp.tanh(h)
        if i + 1 < len(acts):
            h = h.astype(BF16)
    o_ref[...] = h.astype(o_ref.dtype)


def mlp_pallas(x, layers):
    """Fused chain of small linears (no HBM round-trips between layers).
    layers: list of (w, b, act); final N padded to 128 lanes."""
    orig = x.shape
    K0 = orig[-1]
    M = int(np.prod(orig[:-1]))
    acts = tuple(a for _, _, a in layers)
    ws = [w for w, _, _ in layers]
    bs_ = [b for _, b, _ in layers]
    N = ws[-1].shape[1]
    Np = _round_up(N, 128)
    if Np != N:
        ws[-1] = jnp.pad(ws[-1], ((0, 0), (0, Np - N)))
        bs_[-1] = jnp.pad(bs_[-1], ((0, Np - N),))
    bm = _pick_bm(M)
    in_specs = [pl.BlockSpec((bm, K0), lambda i: (i, 0))]
    args = [x.reshape(M, K0).astype(BF16)]
    for w, b in zip(ws, bs_):
        kin, nout = w.shape
        in_specs.append(pl.BlockSpec((kin, nout), lambda i: (0, 0)))
        in_specs.append(pl.BlockSpec((1, nout), lambda i: (0, 0)))
        args.append(w.astype(BF16))
        args.append(b.reshape(1, nout).astype(F32))
    out = pl.pallas_call(
        functools.partial(_mlp_kernel, acts=acts),
        out_shape=jax.ShapeDtypeStruct((M, Np), F32),
        grid=(_cdiv(M, bm),),
        in_specs=in_specs,
        out_specs=pl.BlockSpec((bm, Np), lambda i: (i, 0)),
        compiler_params=pltpu.CompilerParams(dimension_semantics=("parallel",)),
    )(*args)
    if Np != N:
        out = out[:, :N]
    return out.reshape(orig[:-1] + (N,))


def _ln_kernel(x_ref, o_ref):
    x = x_ref[...]
    mu = jnp.mean(x, axis=-1, keepdims=True)
    var = jnp.mean(jnp.square(x - mu), axis=-1, keepdims=True)
    o_ref[...] = ((x - mu) * jax.lax.rsqrt(var + 1e-5)).astype(o_ref.dtype)


def layernorm_pallas(x):
    """LayerNorm over the last dim, elementwise_affine=False, eps=1e-5."""
    orig = x.shape
    H = orig[-1]
    M = int(np.prod(orig[:-1]))
    bm = _pick_bm(M)
    out = pl.pallas_call(
        _ln_kernel,
        out_shape=jax.ShapeDtypeStruct((M, H), F32),
        grid=(_cdiv(M, bm),),
        in_specs=[pl.BlockSpec((bm, H), lambda i: (i, 0))],
        out_specs=pl.BlockSpec((bm, H), lambda i: (i, 0)),
        compiler_params=pltpu.CompilerParams(dimension_semantics=("parallel",)),
    )(x.reshape(M, H).astype(F32))
    return out.reshape(orig)


# ----------------------------------------------------------------------------
# Fused bidirectional GRU recurrence (input GEMM hoisted outside)
# ----------------------------------------------------------------------------
def _bigru_kernel(gi_ref, m_ref, whh_ref, bhh_ref, out_ref, hfin_ref, h_scr):
    t = pl.program_id(0)

    @pl.when(t == 0)
    def _():
        h_scr[...] = jnp.zeros_like(h_scr)

    h = h_scr[...]                      # (G, 2D): fwd hidden lanes [0:D], bwd lanes [D:2D]
    m = m_ref[0]                        # (G, 2D) validity mask (fwd | reversed bwd)
    gh_r = jnp.dot(h, whh_ref[0], preferred_element_type=jnp.float32) + bhh_ref[0]
    gh_z = jnp.dot(h, whh_ref[1], preferred_element_type=jnp.float32) + bhh_ref[1]
    gh_n = jnp.dot(h, whh_ref[2], preferred_element_type=jnp.float32) + bhh_ref[2]
    r = jax.nn.sigmoid(gi_ref[0, 0] + gh_r)
    z = jax.nn.sigmoid(gi_ref[0, 1] + gh_z)
    n = jnp.tanh(gi_ref[0, 2] + r * gh_n)          # bhh_n stays inside r*(...) as in torch
    h_new = (1.0 - z) * n + z * h
    h_upd = m * h_new + (1.0 - m) * h              # packed-seq: carry h through padded steps
    h_scr[...] = h_upd
    out_ref[0] = m * h_new                         # pad_packed pads outputs with zeros
    hfin_ref[...] = h_upd                          # last write == hidden at last valid step


def bi_gru(x, lengths, p):
    """PyTorch packed bidirectional GRU (batch_first) via masked recurrence.
    Both directions share one grid=(T,) loop; the input GEMM is hoisted."""
    G, T, E = x.shape
    D = p["f"]["whh"].shape[0]
    H2 = 2 * D

    # 1) hoisted input-to-hidden GEMM for both directions in one lane-dense matmul
    wih_cat = jnp.concatenate([p["f"]["wih"], p["b"]["wih"]], axis=1)      # (E, 6D)
    bih_cat = jnp.concatenate([p["f"]["bih"], p["b"]["bih"]], axis=0)      # (6D,)
    gi = linear_pallas(x.reshape(G * T, E), wih_cat, bih_cat)              # (G*T, 6D)
    gi = gi.reshape(G, T, 2, 3, D)                                         # [dir, gate, D]
    gi_f = gi[:, :, 0]                                                     # (G, T, 3, D)
    gi_b = jnp.flip(gi[:, :, 1], axis=1)                                   # time-reversed
    gik = jnp.transpose(jnp.concatenate([gi_f, gi_b], axis=-1), (1, 2, 0, 3))  # (T,3,G,2D)

    # 2) validity masks (fwd order | reversed order), broadcast to full lane width
    mask = (jnp.arange(T, dtype=F32)[None, :] < lengths[:, None].astype(F32)).astype(F32)
    m_f = jnp.broadcast_to(mask[:, :, None], (G, T, D))
    m_b = jnp.broadcast_to(jnp.flip(mask, axis=1)[:, :, None], (G, T, D))
    mk = jnp.transpose(jnp.concatenate([m_f, m_b], axis=-1), (1, 0, 2))    # (T, G, 2D)

    # 3) per-gate block-diagonal hidden weights (fwd ⊕ bwd) and packed hidden biases
    zz = jnp.zeros((D, D), F32)

    def bd(g):
        wf = p["f"]["whh"][:, g * D:(g + 1) * D]
        wb = p["b"]["whh"][:, g * D:(g + 1) * D]
        top = jnp.concatenate([wf, zz], axis=1)
        bot = jnp.concatenate([zz, wb], axis=1)
        return jnp.concatenate([top, bot], axis=0)                          # (2D, 2D)

    whh_bd = jnp.stack([bd(g) for g in range(3)])                           # (3, 2D, 2D)
    bhh_pk = jnp.stack([
        jnp.concatenate([p["f"]["bhh"][g * D:(g + 1) * D],
                         p["b"]["bhh"][g * D:(g + 1) * D]]) for g in range(3)
    ]).reshape(3, 1, H2)

    out, hfin = pl.pallas_call(
        _bigru_kernel,
        out_shape=(jax.ShapeDtypeStruct((T, G, H2), F32),
                   jax.ShapeDtypeStruct((G, H2), F32)),
        grid=(T,),
        in_specs=[pl.BlockSpec((1, 3, G, H2), lambda t: (t, 0, 0, 0)),
                  pl.BlockSpec((1, G, H2), lambda t: (t, 0, 0)),
                  pl.BlockSpec((3, H2, H2), lambda t: (0, 0, 0)),
                  pl.BlockSpec((3, 1, H2), lambda t: (0, 0, 0))],
        out_specs=(pl.BlockSpec((1, G, H2), lambda t: (t, 0, 0)),
                   pl.BlockSpec((G, H2), lambda t: (0, 0))),
        scratch_shapes=[pltpu.VMEM((G, H2), F32)],
        compiler_params=pltpu.CompilerParams(dimension_semantics=("arbitrary",)),
    )(gik.astype(F32), mk.astype(F32), whh_bd.astype(F32), bhh_pk.astype(F32))

    out_f = out[:, :, :D]                                 # fwd output at time t
    out_b = jnp.flip(out, axis=0)[:, :, D:]               # bwd output re-aligned to time t
    seq = jnp.transpose(jnp.concatenate([out_f, out_b], axis=-1), (1, 0, 2))  # (G, T, 2D)
    return seq, hfin                                      # hfin == cat(h_fwd, h_bwd)


# ----------------------------------------------------------------------------
# Fused graph kernel: AdjLearner + GCN(1 layer) + atten_pool + masked pooling
# ----------------------------------------------------------------------------
def _graph_kernel(nodes_ref, mask_ref, we1_ref, be1_ref, we2_ref, be2_ref,
                  wg_ref, bg_ref, wp1_ref, bp1_ref, wp2t_ref, bp2_ref, o_ref):
    x = nodes_ref[0]                                               # (Nn, H) bf16
    eh = jnp.maximum(jnp.dot(x, we1_ref[...],
                             preferred_element_type=jnp.float32) + be1_ref[...], 0.0)
    eh = jnp.maximum(jnp.dot(eh.astype(BF16), we2_ref[...],
                             preferred_element_type=jnp.float32) + be2_ref[...], 0.0)
    ehb = eh.astype(BF16)
    adj = jax.lax.dot_general(ehb, ehb, (((1,), (1,)), ((), ())),
                              preferred_element_type=jnp.float32)  # (Nn, Nn) = h @ h^T
    sup = jnp.dot(x, wg_ref[...], preferred_element_type=jnp.float32) + bg_ref[...]
    qv = jnp.maximum(jnp.dot(adj.astype(BF16), sup.astype(BF16),
                             preferred_element_type=jnp.float32), 0.0)      # (Nn, H)
    a1 = jnp.tanh(jnp.dot(qv.astype(BF16), wp1_ref[...],
                          preferred_element_type=jnp.float32) + bp1_ref[...])
    a2 = jnp.sum(a1 * wp2t_ref[...], axis=-1, keepdims=True) + bp2_ref[...]  # (Nn, 1)
    a2 = a2 - jnp.max(a2, axis=0, keepdims=True)                   # softmax over nodes
    e = jnp.exp(a2)
    attn = e / jnp.sum(e, axis=0, keepdims=True)
    pooled = jnp.sum(qv * mask_ref[0] * attn, axis=0, keepdims=True)         # (1, H)
    o_ref[0] = pooled.astype(o_ref.dtype)


def graph_pool_pallas(nodes, pool_mask, p):
    G, Nn, H = nodes.shape
    Hh = p["pool"]["l1"]["w"].shape[1]
    wp2t = p["pool"]["l2"]["w"].reshape(1, Hh)
    bp2 = p["pool"]["l2"]["b"].reshape(1, 1)

    def cspec(shape):
        nd = len(shape)
        return pl.BlockSpec(shape, lambda g, _n=nd: (0,) * _n)

    out = pl.pallas_call(
        _graph_kernel,
        out_shape=jax.ShapeDtypeStruct((G, 1, H), F32),
        grid=(G,),
        in_specs=[pl.BlockSpec((1, Nn, H), lambda g: (g, 0, 0)),
                  pl.BlockSpec((1, Nn, 1), lambda g: (g, 0, 0)),
                  cspec((H, H)), cspec((1, H)),
                  cspec((H, H)), cspec((1, H)),
                  cspec((H, H)), cspec((1, H)),
                  cspec((H, Hh)), cspec((1, Hh)),
                  cspec((1, Hh)), cspec((1, 1))],
        out_specs=pl.BlockSpec((1, 1, H), lambda g: (g, 0, 0)),
        compiler_params=pltpu.CompilerParams(dimension_semantics=("parallel",)),
    )(nodes.astype(BF16), pool_mask.astype(F32),
      p["adj"]["e1"]["w"].astype(BF16), p["adj"]["e1"]["b"].reshape(1, H).astype(F32),
      p["adj"]["e2"]["w"].astype(BF16), p["adj"]["e2"]["b"].reshape(1, H).astype(F32),
      p["gcn"]["l1"]["w"].astype(BF16), p["gcn"]["l1"]["b"].reshape(1, H).astype(F32),
      p["pool"]["l1"]["w"].astype(BF16), p["pool"]["l1"]["b"].reshape(1, Hh).astype(F32),
      wp2t.astype(F32), bp2.astype(F32))
    return out.reshape(G, H)


# ----------------------------------------------------------------------------
# fusions.Block (mm_dim=1600, chunks=20, rank=15, pos_norm='before_cat')
# ----------------------------------------------------------------------------
def _block_proj_kernel(x_ref, w_ref, b_ref, z_ref):
    z_ref[0] = (jnp.dot(x_ref[0], w_ref[0], preferred_element_type=jnp.float32)
                + b_ref[0]).astype(z_ref.dtype)


def _block_core_kernel(z0_ref, z1_ref, mw0_ref, mb0_ref, mw1_ref, mb1_ref, sm_ref, o_ref):
    m0 = jnp.dot(z0_ref[0], mw0_ref[0], preferred_element_type=jnp.float32) + mb0_ref[0]
    m1 = jnp.dot(z1_ref[0], mw1_ref[0], preferred_element_type=jnp.float32) + mb1_ref[0]
    m = m0 * m1                                                        # (Bv, S*R)
    z = jnp.dot(m, sm_ref[...], preferred_element_type=jnp.float32)    # rank-sum -> (Bv, S)
    z = jnp.sqrt(jnp.maximum(z, 0.0)) - jnp.sqrt(jnp.maximum(-z, 0.0))  # signed sqrt
    nrm = jnp.sqrt(jnp.sum(z * z, axis=-1, keepdims=True))
    o_ref[0] = (z / jnp.maximum(nrm, 1e-12)).astype(o_ref.dtype)        # F.normalize


def block_fusion(p, x0, x1):
    Bv, H = x0.shape
    C, S, SR = p["mw0"].shape
    R = SR // S
    mm = C * S
    # 1) both input projections in one pallas_call (grid over the two projections)
    xs = jnp.stack([x0, x1], axis=0)
    ws = jnp.stack([p["w0"], p["w1"]], axis=0)
    bs_ = jnp.stack([p["b0"], p["b1"]], axis=0).reshape(2, 1, mm)
    z = pl.pallas_call(
        _block_proj_kernel,
        out_shape=jax.ShapeDtypeStruct((2, Bv, mm), BF16),
        grid=(2,),
        in_specs=[pl.BlockSpec((1, Bv, H), lambda i: (i, 0, 0)),
                  pl.BlockSpec((1, H, mm), lambda i: (i, 0, 0)),
                  pl.BlockSpec((1, 1, mm), lambda i: (i, 0, 0))],
        out_specs=pl.BlockSpec((1, Bv, mm), lambda i: (i, 0, 0)),
        compiler_params=pltpu.CompilerParams(dimension_semantics=("parallel",)),
    )(xs.astype(BF16), ws.astype(BF16), bs_.astype(F32))
    z0c = jnp.transpose(z[0].reshape(Bv, C, S), (1, 0, 2))             # (C, Bv, S)
    z1c = jnp.transpose(z[1].reshape(Bv, C, S), (1, 0, 2))
    # 2) fused merge + rank-sum + signed-sqrt + L2-normalize, gridded over chunks
    sum_mat = jnp.tile(jnp.eye(S, dtype=F32), (R, 1))                  # (R*S, S) rank-sum
    zc = pl.pallas_call(
        _block_core_kernel,
        out_shape=jax.ShapeDtypeStruct((C, Bv, S), F32),
        grid=(C,),
        in_specs=[pl.BlockSpec((1, Bv, S), lambda c: (c, 0, 0)),
                  pl.BlockSpec((1, Bv, S), lambda c: (c, 0, 0)),
                  pl.BlockSpec((1, S, SR), lambda c: (c, 0, 0)),
                  pl.BlockSpec((1, 1, SR), lambda c: (c, 0, 0)),
                  pl.BlockSpec((1, S, SR), lambda c: (c, 0, 0)),
                  pl.BlockSpec((1, 1, SR), lambda c: (c, 0, 0)),
                  pl.BlockSpec((SR, S), lambda c: (0, 0))],
        out_specs=pl.BlockSpec((1, Bv, S), lambda c: (c, 0, 0)),
        compiler_params=pltpu.CompilerParams(dimension_semantics=("parallel",)),
    )(z0c, z1c,
      p["mw0"].astype(BF16), p["mb0"].reshape(C, 1, SR).astype(F32),
      p["mw1"].astype(BF16), p["mb1"].reshape(C, 1, SR).astype(F32), sum_mat)
    zflat = jnp.transpose(zc, (1, 0, 2)).reshape(Bv, mm)
    return linear_pallas(zflat, p["wout"], p["bout"])


# ----------------------------------------------------------------------------
# Module building blocks
# ----------------------------------------------------------------------------
def length_to_mask(lengths, max_len):
    return (jnp.arange(max_len, dtype=F32)[None, :]
            < lengths[:, None].astype(F32)).astype(F32)


def qns_encoder(p, qns, qns_lengths):
    # TODO(synk): pad_packed_sequence trims to max(qns_lengths); we keep static T with
    # zeroed padded outputs instead (JAX requires static shapes).
    emb = linear_pallas(qns, p["emb"]["w"], p["emb"]["b"], act="relu")
    out, hidden = bi_gru(emb, qns_lengths.astype(F32), p["gru"])
    return layernorm_pallas(out), hidden


def vid_encoder(p, vid_feats, fg_mask=None):
    G, T, _ = vid_feats.shape
    h = linear_pallas(vid_feats, p["v2h"]["w"], p["v2h"]["b"], act="relu")   # vid2hid
    if fg_mask is None:
        out, hidden = bi_gru(h, jnp.full((G,), T, F32), p["gru"])
        return layernorm_pallas(out), hidden
    fg_len = fg_mask.astype(jnp.int32).sum(-1)
    mask_fixed = jnp.where((fg_len == 0)[:, None], jnp.ones_like(fg_mask), fg_mask)
    lengths = mask_fixed.astype(jnp.int32).sum(-1)
    # compact foreground frames to the front, preserving order (== vid_feat_i[fg_mask_i])
    order = jnp.argsort(jnp.logical_not(mask_fixed.astype(bool)).astype(jnp.int32),
                        axis=1, stable=True)
    temp = jnp.take_along_axis(h, order[:, :, None], axis=1)
    pos_valid = (jnp.arange(T)[None, :] < lengths[:, None]).astype(F32)
    temp = temp * pos_valid[:, :, None]
    out, hidden = bi_gru(temp, lengths.astype(F32), p["gru"])
    return layernorm_pallas(out), hidden, mask_fixed.astype(F32)


def grounding_indicator(p, q_global, v_local, tau, key):
    # TODO(synk): exact Grounding_Indicator class is not in the reference file; this is a
    # shape-faithful stand-in: per-frame 2-way hard Gumbel-Softmax fg/bg gate (fused MLP).
    B, T, H = v_local.shape
    q_t = jnp.broadcast_to(q_global[:, None, :], (B, T, H))
    x = jnp.concatenate([v_local, q_t], axis=-1).reshape(B * T, 2 * H)
    w1 = jnp.concatenate([p["v"]["w"], p["q"]["w"]], axis=0)
    b1 = p["v"]["b"] + p["q"]["b"]
    logits = mlp_pallas(x, [(w1, b1, "tanh"),
                            (p["fc"]["w"], p["fc"]["b"], None)]).reshape(B, T, 2)
    g = jax.random.gumbel(key, logits.shape, dtype=F32)
    idx = jnp.argmax((logits + g) / tau, axis=-1)
    fg = (idx == 0).astype(F32)
    return fg, 1.0 - fg


def fusion_predict(p, q_global, v_global, q_local, v_local, q_len, v_len=None):
    G, Tq, H = q_local.shape
    Tv = v_local.shape[1]
    nodes = jnp.concatenate([q_local, v_local], axis=1)                 # (G, Nn, H)
    q_mask = length_to_mask(q_len, Tq)
    v_mask = length_to_mask(v_len, Tv) if v_len is not None else jnp.ones((G, Tv), F32)
    pool_mask = jnp.concatenate([q_mask, v_mask], axis=-1)[:, :, None]
    local_out = graph_pool_pallas(nodes, pool_mask, p)                  # (G, H)
    global_out = block_fusion(p["gfuse"], q_global, v_global)
    out = block_fusion(p["fuse"], global_out, local_out)                # .squeeze() no-op
    return linear_pallas(out, p["dec"]["w"], p["dec"]["b"])             # decoder


def intervene(bg_mask, vid_feats, vid_idx):
    # TODO(synk): `intervene` / memory_bank are external and memory=None in the module;
    # stand-in: replace background frames with features from another sample in the batch.
    mem = jnp.roll(vid_feats, shift=1, axis=0)
    return vid_feats * (1.0 - bg_mask)[..., None] + mem * bg_mask[..., None]


def hga_forward(params, vid_feats, qns, qns_lengths, vid_idx, key, tau=1.0):
    B = qns.shape[0]
    Tv = vid_feats.shape[1]
    qns = qns.reshape(B, -1, qns.shape[-1])
    qns_lengths = qns_lengths.reshape(-1)[:B]
    q_local, q_global = qns_encoder(params["qns"], qns, qns_lengths)
    v_local, _ = vid_encoder(params["vid"], vid_feats)
    fg_mask, bg_mask = grounding_indicator(params["ind"], q_global, v_local, tau, key)

    # the "all-zero mask -> all-ones" fix from EncoderVidHGA, hoisted so the three
    # counterfactual branches can be batched through one encoder / fusion pass
    def fix(m):
        return jnp.where((m.sum(-1) == 0)[:, None], jnp.ones_like(m), m)

    bg_fixed = fix(bg_mask)
    fg_fixed = fix(fg_mask)
    vid_feats_m = intervene(1.0 - fg_fixed, vid_feats, vid_idx)

    vid_in = jnp.concatenate([vid_feats * bg_mask[..., None],
                              vid_feats * fg_mask[..., None],
                              vid_feats_m], axis=0)                         # (3B, Tv, Dv)
    mask_in = jnp.concatenate([bg_fixed, fg_fixed, jnp.ones((B, Tv), F32)], axis=0)
    v_local3, v_global3, mask3 = vid_encoder(params["vid"], vid_in, mask_in)
    v_len3 = mask3.sum(-1)              # branch m has an all-ones mask == no-mask case
    q_local3 = jnp.tile(q_local, (3, 1, 1))
    q_global3 = jnp.tile(q_global, (3, 1))
    q_len3 = jnp.tile(qns_lengths, (3,))
    out3 = fusion_predict(params, q_global3, v_global3, q_local3, v_local3,
                          q_len3, v_len=v_len3)
    out_b, out_f, out_m = out3[:B], out3[B:2 * B], out3[2 * B:]
    return out_f, out_m, out_b


# ----------------------------------------------------------------------------
# Deterministic parameter initialization (synthetic; shapes follow the module)
# ----------------------------------------------------------------------------
class KeyGen:
    def __init__(self, key):
        self.key = key

    def __call__(self):
        self.key, sub = jax.random.split(self.key)
        return sub


def _xavier(key, shape):
    fan_in, fan_out = shape[-2], shape[-1]
    std = float(np.sqrt(2.0 / (fan_in + fan_out)))
    return std * jax.random.normal(key, shape, dtype=F32)


def init_params(key, hidden_dim, word_dim, vocab_num, vid_dim=4096,
                mm_dim=1600, chunks=20, rank=15):
    kg = KeyGen(key)
    H = hidden_dim * 2  # bidirectional hidden size

    def lin(i, o):
        return dict(w=_xavier(kg(), (i, o)), b=jnp.zeros((o,), F32))

    def gru(E, D):
        def one():
            return dict(wih=_xavier(kg(), (E, 3 * D)), whh=_xavier(kg(), (D, 3 * D)),
                        bih=jnp.zeros((3 * D,), F32), bhh=jnp.zeros((3 * D,), F32))
        return dict(f=one(), b=one())

    def block(in0, in1, out):
        size = mm_dim // chunks
        return dict(w0=_xavier(kg(), (in0, mm_dim)), b0=jnp.zeros((mm_dim,), F32),
                    w1=_xavier(kg(), (in1, mm_dim)), b1=jnp.zeros((mm_dim,), F32),
                    mw0=_xavier(kg(), (chunks, size, size * rank)),
                    mb0=jnp.zeros((chunks, size * rank), F32),
                    mw1=_xavier(kg(), (chunks, size, size * rank)),
                    mb1=jnp.zeros((chunks, size * rank), F32),
                    wout=_xavier(kg(), (mm_dim, out)), bout=jnp.zeros((out,), F32))

    return dict(
        qns=dict(emb=lin(768, word_dim), gru=gru(word_dim, hidden_dim)),
        vid=dict(v2h=lin(vid_dim, hidden_dim), gru=gru(hidden_dim, hidden_dim)),
        ind=dict(q=lin(H, H // 2), v=lin(H, H // 2), fc=lin(H // 2, 2)),
        adj=dict(e1=lin(H, H), e2=lin(H, H)),
        gcn=dict(l1=lin(H, H)),
        pool=dict(l1=lin(H, H // 2), l2=lin(H // 2, 1)),
        gfuse=block(H, H, H),
        fuse=block(H, H, H),
        dec=lin(H, vocab_num + 1),
    )


# ----------------------------------------------------------------------------
if __name__ == "__main__":
    key = jax.random.PRNGKey(0)
    k_param, k_vid, k_qns, k_gumbel = jax.random.split(key, 4)

    B, T_V, DIM_VID = 2, 16, 2048 + 2048      # vid_feats: [bs, 16, 4096]
    T_Q, DIM_TXT = 8, 768                     # qns:       [bs, 8, 768]
    hidden_dim, word_dim, vocab_num = 64, 64, 50

    params = init_params(k_param, hidden_dim, word_dim, vocab_num, vid_dim=DIM_VID)

    vid_feats = jax.random.normal(k_vid, (B, T_V, DIM_VID), dtype=F32)
    qns = jax.random.normal(k_qns, (B, T_Q, DIM_TXT), dtype=F32)
    qns_lengths = jnp.array([T_Q, 5], dtype=jnp.int32)
    vid_idx = jnp.arange(B, dtype=jnp.int32)

    fwd = jax.jit(hga_forward)
    out_f, out_m, out_b = fwd(params, vid_feats, qns, qns_lengths, vid_idx,
                              k_gumbel, 1.0)
    jax.block_until_ready((out_f, out_m, out_b))
    assert out_f.shape == (B, vocab_num + 1)
    assert out_m.shape == (B, vocab_num + 1)
    assert out_b.shape == (B, vocab_num + 1)
    print("KERNEL_OK")
</pallas_src>

<mosaic_0001>
module attributes {stable_mosaic.version = 11 : i64} {
  func.func @_linear_kernel(%arg0: i32, %arg1: i32, %arg2: memref<16x768xbf16, #tpu.memory_space<vmem>>, %arg3: memref<768x128xbf16, #tpu.memory_space<vmem>>, %arg4: memref<1x128xf32, #tpu.memory_space<vmem>>, %arg5: memref<16x128xf32, #tpu.memory_space<vmem>>, %arg6: memref<16x128xf32, #tpu.memory_space<vmem>>) attributes {dimension_semantics = [#tpu.dimension_semantics<parallel>, #tpu.dimension_semantics<arbitrary>], iteration_bounds = array<i64: 1, 1>, scalar_prefetch = 0 : i64, scratch_operands = 1 : i64, tpu.core_type = #tpu.core_type<tc>, window_params = [{transform_indices = @transform_0, window_bounds = array<i64: 16, 768>}, {transform_indices = @transform_1, window_bounds = array<i64: 768, 128>}, {pipeline_mode = #tpu.pipeline_mode<synchronous>, transform_indices = @transform_2, window_bounds = array<i64: 1, 128>}, {transform_indices = @transform_3, window_bounds = array<i64: 16, 128>}]} {
    %c0_i32 = arith.constant 0 : i32
    %0 = arith.cmpi eq, %arg1, %c0_i32 : i32
    %1 = arith.extui %0 : i1 to i32
    %c0_i32_0 = arith.constant 0 : i32
    %2 = arith.cmpi ne, %1, %c0_i32_0 : i32
    scf.if %2 {
      %cst_10 = arith.constant 0.000000e+00 : f32
      %12 = vector.broadcast %cst_10 : f32 to vector<16x128xf32>
      %c0_11 = arith.constant 0 : index
      %c0_12 = arith.constant 0 : index
      %13 = vector.load %arg6[%c0_11, %c0_12] : memref<16x128xf32, #tpu.memory_space<vmem>>, vector<16x128xf32>
      tpu.vector_store %arg6[%c0_11, %c0_12], %12 {strides = array<i32>} : memref<16x128xf32, #tpu.memory_space<vmem>>, vector<16x128xf32>,
    } else {
    }
    %c0 = arith.constant 0 : index
    %c0_1 = arith.constant 0 : index
    %3 = vector.load %arg6[%c0, %c0_1] : memref<16x128xf32, #tpu.memory_space<vmem>>, vector<16x128xf32>
    %c0_2 = arith.constant 0 : index
    %c0_3 = arith.constant 0 : index
    %4 = vector.load %arg2[%c0_2, %c0_3] : memref<16x768xbf16, #tpu.memory_space<vmem>>, vector<16x768xbf16>
    %c0_4 = arith.constant 0 : index
    %c0_5 = arith.constant 0 : index
    %5 = vector.load %arg3[%c0_4, %c0_5] : memref<768x128xbf16, #tpu.memory_space<vmem>>, vector<768x128xbf16>
    %cst = arith.constant dense<0.000000e+00> : vector<16x128xf32>
    %6 = tpu.matmul %4, %5, %cst {dimension_numbers = #tpu.dot_dimension_numbers<[1], [0], [0], [1], [0, 0, 1, 1], [], []>} : vector<16x768xbf16>, vector<768x128xbf16>, vector<16x128xf32> -> vector<16x128xf32>
    %7 = arith.addf %3, %6 : vector<16x128xf32>
    %c0_6 = arith.constant 0 : index
    %c0_7 = arith.constant 0 : index
    %8 = vector.load %arg6[%c0_6, %c0_7] : memref<16x128xf32, #tpu.memory_space<vmem>>, vector<16x128xf32>
    tpu.vector_store %arg6[%c0_6, %c0_7], %7 {strides = array<i32>} : memref<16x128xf32, #tpu.memory_space<vmem>>, vector<16x128xf32>,
    %c0_i32_8 = arith.constant 0 : i32
    %9 = arith.cmpi eq, %arg1, %c0_i32_8 : i32
    %10 = arith.extui %9 : i1 to i32
    %c0_i32_9 = arith.constant 0 : i32
    %11 = arith.cmpi ne, %10, %c0_i32_9 : i32
    scf.if %11 {
      %c0_10 = arith.constant 0 : index
      %c0_11 = arith.constant 0 : index
      %12 = vector.load %arg6[%c0_10, %c0_11] : memref<16x128xf32, #tpu.memory_space<vmem>>, vector<16x128xf32>
      %c0_12 = arith.constant 0 : index
      %c0_13 = arith.constant 0 : index
      %13 = vector.load %arg4[%c0_12, %c0_13] : memref<1x128xf32, #tpu.memory_space<vmem>>, vector<1x128xf32>
      %14 = vector.broadcast %13 : vector<1x128xf32> to vector<16x128xf32>
      %15 = arith.addf %12, %14 : vector<16x128xf32>
      %cst_14 = arith.constant 0.000000e+00 : f32
      %16 = vector.broadcast %cst_14 : f32 to vector<16x128xf32>
      %17 = arith.maximumf %15, %16 : vector<16x128xf32>
      %c0_15 = arith.constant 0 : index
      %c0_16 = arith.constant 0 : index
      %18 = vector.load %arg5[%c0_15, %c0_16] : memref<16x128xf32, #tpu.memory_space<vmem>>, vector<16x128xf32>
      tpu.vector_store %arg5[%c0_15, %c0_16], %17 {strides = array<i32>} : memref<16x128xf32, #tpu.memory_space<vmem>>, vector<16x128xf32>,
    } else {
    }
    return
  }
  func.func @transform_0(%arg0: i32, %arg1: i32) -> (i32, i32) {
    %c0_i32 = arith.constant 0 : i32
    return %arg0, %arg1 : i32, i32
  }
  func.func @transform_1(%arg0: i32, %arg1: i32) -> (i32, i32) {
    %c0_i32 = arith.constant 0 : i32
    %c0_i32_0 = arith.constant 0 : i32
    return %arg1, %c0_i32 : i32, i32
  }
  func.func @transform_2(%arg0: i32, %arg1: i32) -> (i32, i32) {
    %c0_i32 = arith.constant 0 : i32
    %c0_i32_0 = arith.constant 0 : i32
    %c0_i32_1 = arith.constant 0 : i32
    return %c0_i32, %c0_i32_0 : i32, i32
  }
  func.func @transform_3(%arg0: i32, %arg1: i32) -> (i32, i32) {
    %c0_i32 = arith.constant 0 : i32
    %c0_i32_0 = arith.constant 0 : i32
    return %arg0, %c0_i32 : i32, i32
  }
}

module attributes {stable_mosaic.version = 11 : i64} {
  func.func @_linear_kernel(%arg0: i32, %arg1: i32, %arg2: memref<16x64xbf16, #tpu.memory_space<vmem>>, %arg3: memref<64x384xbf16, #tpu.memory_space<vmem>>, %arg4: memref<1x384xf32, #tpu.memory_space<vmem>>, %arg5: memref<16x384xf32, #tpu.memory_space<vmem>>, %arg6: memref<16x384xf32, #tpu.memory_space<vmem>>) attributes {dimension_semantics = [#tpu.dimension_semantics<parallel>, #tpu.dimension_semantics<arbitrary>], iteration_bounds = array<i64: 1, 1>, scalar_prefetch = 0 : i64, scratch_operands = 1 : i64, tpu.core_type = #tpu.core_type<tc>, window_params = [{transform_indices = @transform_0, window_bounds = array<i64: 16, 64>}, {transform_indices = @transform_1, window_bounds = array<i64: 64, 384>}, {pipeline_mode = #tpu.pipeline_mode<synchronous>, transform_indices = @transform_2, window_bounds = array<i64: 1, 384>}, {transform_indices = @transform_3, window_bounds = array<i64: 16, 384>}]} {
    %c0_i32 = arith.constant 0 : i32
    %0 = arith.cmpi eq, %arg1, %c0_i32 : i32
    %1 = arith.extui %0 : i1 to i32
    %c0_i32_0 = arith.constant 0 : i32
    %2 = arith.cmpi ne, %1, %c0_i32_0 : i32
    scf.if %2 {
      %cst_10 = arith.constant 0.000000e+00 : f32
      %12 = vector.broadcast %cst_10 : f32 to vector<16x384xf32>
      %c0_11 = arith.constant 0 : index
      %c0_12 = arith.constant 0 : index
      %13 = vector.load %arg6[%c0_11, %c0_12] : memref<16x384xf32, #tpu.memory_space<vmem>>, vector<16x384xf32>
      tpu.vector_store %arg6[%c0_11, %c0_12], %12 {strides = array<i32>} : memref<16x384xf32, #tpu.memory_space<vmem>>, vector<16x384xf32>,
    } else {
    }
    %c0 = arith.constant 0 : index
    %c0_1 = arith.constant 0 : index
    %3 = vector.load %arg6[%c0, %c0_1] : memref<16x384xf32, #tpu.memory_space<vmem>>, vector<16x384xf32>
    %c0_2 = arith.constant 0 : index
    %c0_3 = arith.constant 0 : index
    %4 = vector.load %arg2[%c0_2, %c0_3] : memref<16x64xbf16, #tpu.memory_space<vmem>>, vector<16x64xbf16>
    %c0_4 = arith.constant 0 : index
    %c0_5 = arith.constant 0 : index
    %5 = vector.load %arg3[%c0_4, %c0_5] : memref<64x384xbf16, #tpu.memory_space<vmem>>, vector<64x384xbf16>
    %cst = arith.constant dense<0.000000e+00> : vector<16x384xf32>
    %6 = tpu.matmul %4, %5, %cst {dimension_numbers = #tpu.dot_dimension_numbers<[1], [0], [0], [1], [0, 0, 1, 1], [], []>} : vector<16x64xbf16>, vector<64x384xbf16>, vector<16x384xf32> -> vector<16x384xf32>
    %7 = arith.addf %3, %6 : vector<16x384xf32>
    %c0_6 = arith.constant 0 : index
    %c0_7 = arith.constant 0 : index
    %8 = vector.load %arg6[%c0_6, %c0_7] : memref<16x384xf32, #tpu.memory_space<vmem>>, vector<16x384xf32>
    tpu.vector_store %arg6[%c0_6, %c0_7], %7 {strides = array<i32>} : memref<16x384xf32, #tpu.memory_space<vmem>>, vector<16x384xf32>,
    %c0_i32_8 = arith.constant 0 : i32
    %9 = arith.cmpi eq, %arg1, %c0_i32_8 : i32
    %10 = arith.extui %9 : i1 to i32
    %c0_i32_9 = arith.constant 0 : i32
    %11 = arith.cmpi ne, %10, %c0_i32_9 : i32
    scf.if %11 {
      %c0_10 = arith.constant 0 : index
      %c0_11 = arith.constant 0 : index
      %12 = vector.load %arg6[%c0_10, %c0_11] : memref<16x384xf32, #tpu.memory_space<vmem>>, vector<16x384xf32>
      %c0_12 = arith.constant 0 : index
      %c0_13 = arith.constant 0 : index
      %13 = vector.load %arg4[%c0_12, %c0_13] : memref<1x384xf32, #tpu.memory_space<vmem>>, vector<1x384xf32>
      %14 = vector.broadcast %13 : vector<1x384xf32> to vector<16x384xf32>
      %15 = arith.addf %12, %14 : vector<16x384xf32>
      %c0_14 = arith.constant 0 : index
      %c0_15 = arith.constant 0 : index
      %16 = vector.load %arg5[%c0_14, %c0_15] : memref<16x384xf32, #tpu.memory_space<vmem>>, vector<16x384xf32>
      tpu.vector_store %arg5[%c0_14, %c0_15], %15 {strides = array<i32>} : memref<16x384xf32, #tpu.memory_space<vmem>>, vector<16x384xf32>,
    } else {
    }
    return
  }
  func.func @transform_0(%arg0: i32, %arg1: i32) -> (i32, i32) {
    %c0_i32 = arith.constant 0 : i32
    return %arg0, %arg1 : i32, i32
  }
  func.func @transform_1(%arg0: i32, %arg1: i32) -> (i32, i32) {
    %c0_i32 = arith.constant 0 : i32
    %c0_i32_0 = arith.constant 0 : i32
    return %arg1, %c0_i32 : i32, i32
  }
  func.func @transform_2(%arg0: i32, %arg1: i32) -> (i32, i32) {
    %c0_i32 = arith.constant 0 : i32
    %c0_i32_0 = arith.constant 0 : i32
    %c0_i32_1 = arith.constant 0 : i32
    return %c0_i32, %c0_i32_0 : i32, i32
  }
  func.func @transform_3(%arg0: i32, %arg1: i32) -> (i32, i32) {
    %c0_i32 = arith.constant 0 : i32
    %c0_i32_0 = arith.constant 0 : i32
    return %arg0, %c0_i32 : i32, i32
  }
}

module attributes {stable_mosaic.version = 11 : i64} {
  func.func @_bigru_kernel(%arg0: i32, %arg1: memref<1x3x2x128xf32, #tpu.memory_space<vmem>>, %arg2: memref<1x2x128xf32, #tpu.memory_space<vmem>>, %arg3: memref<3x128x128xf32, #tpu.memory_space<vmem>>, %arg4: memref<3x1x128xf32, #tpu.memory_space<vmem>>, %arg5: memref<1x2x128xf32, #tpu.memory_space<vmem>>, %arg6: memref<2x128xf32, #tpu.memory_space<vmem>>, %arg7: memref<2x128xf32, #tpu.memory_space<vmem>>) attributes {dimension_semantics = [#tpu.dimension_semantics<arbitrary>], iteration_bounds = array<i64: 8>, scalar_prefetch = 0 : i64, scratch_operands = 1 : i64, tpu.core_type = #tpu.core_type<tc>, window_params = [{transform_indices = @transform_0, window_bounds = array<i64: 1, 3, 2, 128>}, {transform_indices = @transform_1, window_bounds = array<i64: 1, 2, 128>}, {pipeline_mode = #tpu.pipeline_mode<synchronous>, transform_indices = @transform_2, window_bounds = array<i64: 3, 128, 128>}, {pipeline_mode = #tpu.pipeline_mode<synchronous>, transform_indices = @transform_3, window_bounds = array<i64: 3, 1, 128>}, {transform_indices = @transform_4, window_bounds = array<i64: 1, 2, 128>}, {pipeline_mode = #tpu.pipeline_mode<synchronous>, transform_indices = @transform_5, window_bounds = array<i64: 2, 128>}]} {
    %c0_i32 = arith.constant 0 : i32
    %0 = arith.cmpi eq, %arg0, %c0_i32 : i32
    %1 = arith.extui %0 : i1 to i32
    %c0_i32_0 = arith.constant 0 : i32
    %2 = arith.cmpi ne, %1, %c0_i32_0 : i32
    scf.if %2 {
      %cst_46 = arith.constant 0.000000e+00 : f32
      %64 = vector.broadcast %cst_46 : f32 to vector<2x128xf32>
      %c0_47 = arith.constant 0 : index
      %c0_48 = arith.constant 0 : index
      %65 = vector.load %arg7[%c0_47, %c0_48] : memref<2x128xf32, #tpu.memory_space<vmem>>, vector<2x128xf32>
      tpu.vector_store %arg7[%c0_47, %c0_48], %64 {strides = array<i32>} : memref<2x128xf32, #tpu.memory_space<vmem>>, vector<2x128xf32>,
    } else {
    }
    %c0 = arith.constant 0 : index
    %c0_1 = arith.constant 0 : index
    %3 = vector.load %arg7[%c0, %c0_1] : memref<2x128xf32, #tpu.memory_space<vmem>>, vector<2x128xf32>
    %c0_2 = arith.constant 0 : index
    %c0_3 = arith.constant 0 : index
    %c0_4 = arith.constant 0 : index
    %4 = vector.load %arg2[%c0_2, %c0_3, %c0_4] : memref<1x2x128xf32, #tpu.memory_space<vmem>>, vector<1x2x128xf32>
    %5 = vector.shape_cast %4 : vector<1x2x128xf32> to vector<2x128xf32>
    %c0_5 = arith.constant 0 : index
    %c0_6 = arith.constant 0 : index
    %c0_7 = arith.constant 0 : index
    %6 = vector.load %arg3[%c0_5, %c0_6, %c0_7] : memref<3x128x128xf32, #tpu.memory_space<vmem>>, vector<1x128x128xf32>
    %7 = vector.shape_cast %6 : vector<1x128x128xf32> to vector<128x128xf32>
    %cst = arith.constant dense<0.000000e+00> : vector<2x128xf32>
    %8 = tpu.matmul %3, %7, %cst {dimension_numbers = #tpu.dot_dimension_numbers<[1], [0], [0], [1], [0, 0, 1, 1], [], []>} : vector<2x128xf32>, vector<128x128xf32>, vector<2x128xf32> -> vector<2x128xf32>
    %c0_8 = arith.constant 0 : index
    %c0_9 = arith.constant 0 : index
    %c0_10 = arith.constant 0 : index
    %9 = vector.load %arg4[%c0_8, %c0_9, %c0_10] : memref<3x1x128xf32, #tpu.memory_space<vmem>>, vector<1x1x128xf32>
    %10 = vector.shape_cast %9 : vector<1x1x128xf32> to vector<1x128xf32>
    %11 = vector.broadcast %10 : vector<1x128xf32> to vector<2x128xf32>
    %12 = arith.addf %8, %11 : vector<2x128xf32>
    %c1 = arith.constant 1 : index
    %c0_11 = arith.constant 0 : index
    %c0_12 = arith.constant 0 : index
    %13 = vector.load %arg3[%c1, %c0_11, %c0_12] : memref<3x128x128xf32, #tpu.memory_space<vmem>>, vector<1x128x128xf32>
    %14 = vector.shape_cast %13 : vector<1x128x128xf32> to vector<128x128xf32>
    %cst_13 = arith.constant dense<0.000000e+00> : vector<2x128xf32>
    %15 = tpu.matmul %3, %14, %cst_13 {dimension_numbers = #tpu.dot_dimension_numbers<[1], [0], [0], [1], [0, 0, 1, 1], [], []>} : vector<2x128xf32>, vector<128x128xf32>, vector<2x128xf32> -> vector<2x128xf32>
    %c1_14 = arith.constant 1 : index
    %c0_15 = arith.constant 0 : index
    %c0_16 = arith.constant 0 : index
    %16 = vector.load %arg4[%c1_14, %c0_15, %c0_16] : memref<3x1x128xf32, #tpu.memory_space<vmem>>, vector<1x1x128xf32>
    %17 = vector.shape_cast %16 : vector<1x1x128xf32> to vector<1x128xf32>
    %18 = vector.broadcast %17 : vector<1x128xf32> to vector<2x128xf32>
    %19 = arith.addf %15, %18 : vector<2x128xf32>
    %c2 = arith.constant 2 : index
    %c0_17 = arith.constant 0 : index
    %c0_18 = arith.constant 0 : index
    %20 = vector.load %arg3[%c2, %c0_17, %c0_18] : memref<3x128x128xf32, #tpu.memory_space<vmem>>, vector<1x128x128xf32>
    %21 = vector.shape_cast %20 : vector<1x128x128xf32> to vector<128x128xf32>
    %cst_19 = arith.constant dense<0.000000e+00> : vector<2x128xf32>
    %22 = tpu.matmul %3, %21, %cst_19 {dimension_numbers = #tpu.dot_dimension_numbers<[1], [0], [0], [1], [0, 0, 1, 1], [], []>} : vector<2x128xf32>, vector<128x128xf32>, vector<2x128xf32> -> vector<2x128xf32>
    %c2_20 = arith.constant 2 : index
    %c0_21 = arith.constant 0 : index
    %c0_22 = arith.constant 0 : index
    %23 = vector.load %arg4[%c2_20, %c0_21, %c0_22] : memref<3x1x128xf32, #tpu.memory_space<vmem>>, vector<1x1x128xf32>
    %24 = vector.shape_cast %23 : vector<1x1x128xf32> to vector<1x128xf32>
    %25 = vector.broadcast %24 : vector<1x128xf32> to vector<2x128xf32>
    %26 = arith.addf %22, %25 : vector<2x128xf32>
    %c0_23 = arith.constant 0 : index
    %c0_24 = arith.constant 0 : index
    %c0_25 = arith.constant 0 : index
    %c0_26 = arith.constant 0 : index
    %27 = vector.load %arg1[%c0_23, %c0_24, %c0_25, %c0_26] : memref<1x3x2x128xf32, #tpu.memory_space<vmem>>, vector<1x1x2x128xf32>
    %28 = vector.shape_cast %27 : vector<1x1x2x128xf32> to vector<2x128xf32>
    %29 = arith.addf %28, %12 : vector<2x128xf32>
    %30 = arith.negf %29 : vector<2x128xf32>
    %31 = math.exp %30 : vector<2x128xf32>
    %cst_27 = arith.constant 1.000000e+00 : f32
    %32 = vector.broadcast %cst_27 : f32 to vector<2x128xf32>
    %33 = arith.addf %32, %31 : vector<2x128xf32>
    %34 = arith.divf %32, %33 : vector<2x128xf32>
    %c0_28 = arith.constant 0 : index
    %c1_29 = arith.constant 1 : index
    %c0_30 = arith.constant 0 : index
    %c0_31 = arith.constant 0 : index
    %35 = vector.load %arg1[%c0_28, %c1_29, %c0_30, %c0_31] : memref<1x3x2x128xf32, #tpu.memory_space<vmem>>, vector<1x1x2x128xf32>
    %36 = vector.shape_cast %35 : vector<1x1x2x128xf32> to vector<2x128xf32>
    %37 = arith.addf %36, %19 : vector<2x128xf32>
    %38 = arith.negf %37 : vector<2x128xf32>
    %39 = math.exp %38 : vector<2x128xf32>
    %cst_32 = arith.constant 1.000000e+00 : f32
    %40 = vector.broadcast %cst_32 : f32 to vector<2x128xf32>
    %41 = arith.addf %40, %39 : vector<2x128xf32>
    %42 = arith.divf %40, %41 : vector<2x128xf32>
    %c0_33 = arith.constant 0 : index
    %c2_34 = arith.constant 2 : index
    %c0_35 = arith.constant 0 : index
    %c0_36 = arith.constant 0 : index
    %43 = vector.load %arg1[%c0_33, %c2_34, %c0_35, %c0_36] : memref<1x3x2x128xf32, #tpu.memory_space<vmem>>, vector<1x1x2x128xf32>
    %44 = vector.shape_cast %43 : vector<1x1x2x128xf32> to vector<2x128xf32>
    %45 = arith.mulf %34, %26 : vector<2x128xf32>
    %46 = arith.addf %44, %45 : vector<2x128xf32>
    %47 = math.tanh %46 : vector<2x128xf32>
    %cst_37 = arith.constant 1.000000e+00 : f32
    %48 = vector.broadcast %cst_37 : f32 to vector<2x128xf32>
    %49 = arith.subf %48, %42 : vector<2x128xf32>
    %50 = arith.mulf %49, %47 : vector<2x128xf32>
    %51 = arith.mulf %42, %3 : vector<2x128xf32>
    %52 = arith.addf %50, %51 : vector<2x128xf32>
    %53 = arith.mulf %5, %52 : vector<2x128xf32>
    %cst_38 = arith.constant 1.000000e+00 : f32
    %54 = vector.broadcast %cst_38 : f32 to vector<2x128xf32>
    %55 = arith.subf %54, %5 : vector<2x128xf32>
    %56 = arith.mulf %55, %3 : vector<2x128xf32>
    %57 = arith.addf %53, %56 : vector<2x128xf32>
    %c0_39 = arith.constant 0 : index
    %c0_40 = arith.constant 0 : index
    %58 = vector.load %arg7[%c0_39, %c0_40] : memref<2x128xf32, #tpu.memory_space<vmem>>, vector<2x128xf32>
    tpu.vector_store %arg7[%c0_39, %c0_40], %57 {strides = array<i32>} : memref<2x128xf32, #tpu.memory_space<vmem>>, vector<2x128xf32>,
    %59 = arith.mulf %5, %52 : vector<2x128xf32>
    %c0_41 = arith.constant 0 : index
    %c0_42 = arith.constant 0 : index
    %c0_43 = arith.constant 0 : index
    %60 = vector.load %arg5[%c0_41, %c0_42, %c0_43] : memref<1x2x128xf32, #tpu.memory_space<vmem>>, vector<1x2x128xf32>
    %61 = vector.shape_cast %60 : vector<1x2x128xf32> to vector<2x128xf32>
    %62 = vector.shape_cast %59 : vector<2x128xf32> to vector<1x2x128xf32>
    tpu.vector_store %arg5[%c0_41, %c0_42, %c0_43], %62 {strides = array<i32>} : memref<1x2x128xf32, #tpu.memory_space<vmem>>, vector<1x2x128xf32>,
    %c0_44 = arith.constant 0 : index
    %c0_45 = arith.constant 0 : index
    %63 = vector.load %arg6[%c0_44, %c0_45] : memref<2x128xf32, #tpu.memory_space<vmem>>, vector<2x128xf32>
    tpu.vector_store %arg6[%c0_44, %c0_45], %57 {strides = array<i32>} : memref<2x128xf32, #tpu.memory_space<vmem>>, vector<2x128xf32>,
    return
  }
  func.func @transform_0(%arg0: i32) -> (i32, i32, i32, i32) {
    %c0_i32 = arith.constant 0 : i32
    %c0_i32_0 = arith.constant 0 : i32
    %c0_i32_1 = arith.constant 0 : i32
    %c0_i32_2 = arith.constant 0 : i32
    return %arg0, %c0_i32, %c0_i32_0, %c0_i32_1 : i32, i32, i32, i32
  }
  func.func @transform_1(%arg0: i32) -> (i32, i32, i32) {
    %c0_i32 = arith.constant 0 : i32
    %c0_i32_0 = arith.constant 0 : i32
    %c0_i32_1 = arith.constant 0 : i32
    return %arg0, %c0_i32, %c0_i32_0 : i32, i32, i32
  }
  func.func @transform_2(%arg0: i32) -> (i32, i32, i32) {
    %c0_i32 = arith.constant 0 : i32
    %c0_i32_0 = arith.constant 0 : i32
    %c0_i32_1 = arith.constant 0 : i32
    %c0_i32_2 = arith.constant 0 : i32
    return %c0_i32, %c0_i32_0, %c0_i32_1 : i32, i32, i32
  }
  func.func @transform_3(%arg0: i32) -> (i32, i32, i32) {
    %c0_i32 = arith.constant 0 : i32
    %c0_i32_0 = arith.constant 0 : i32
    %c0_i32_1 = arith.constant 0 : i32
    %c0_i32_2 = arith.constant 0 : i32
    return %c0_i32, %c0_i32_0, %c0_i32_1 : i32, i32, i32
  }
  func.func @transform_4(%arg0: i32) -> (i32, i32, i32) {
    %c0_i32 = arith.constant 0 : i32
    %c0_i32_0 = arith.constant 0 : i32
    %c0_i32_1 = arith.constant 0 : i32
    return %arg0, %c0_i32, %c0_i32_0 : i32, i32, i32
  }
  func.func @transform_5(%arg0: i32) -> (i32, i32) {
    %c0_i32 = arith.constant 0 : i32
    %c0_i32_0 = arith.constant 0 : i32
    %c0_i32_1 = arith.constant 0 : i32
    return %c0_i32, %c0_i32_0 : i32, i32
  }
}

module attributes {stable_mosaic.version = 11 : i64} {
  func.func @_linear_kernel(%arg0: i32, %arg1: i32, %arg2: memref<16x64xbf16, #tpu.memory_space<vmem>>, %arg3: memref<64x384xbf16, #tpu.memory_space<vmem>>, %arg4: memref<1x384xf32, #tpu.memory_space<vmem>>, %arg5: memref<16x384xf32, #tpu.memory_space<vmem>>, %arg6: memref<16x384xf32, #tpu.memory_space<vmem>>) attributes {dimension_semantics = [#tpu.dimension_semantics<parallel>, #tpu.dimension_semantics<arbitrary>], iteration_bounds = array<i64: 2, 1>, scalar_prefetch = 0 : i64, scratch_operands = 1 : i64, tpu.core_type = #tpu.core_type<tc>, window_params = [{transform_indices = @transform_0, window_bounds = array<i64: 16, 64>}, {transform_indices = @transform_1, window_bounds = array<i64: 64, 384>}, {pipeline_mode = #tpu.pipeline_mode<synchronous>, transform_indices = @transform_2, window_bounds = array<i64: 1, 384>}, {transform_indices = @transform_3, window_bounds = array<i64: 16, 384>}]} {
    %c0_i32 = arith.constant 0 : i32
    %0 = arith.cmpi eq, %arg1, %c0_i32 : i32
    %1 = arith.extui %0 : i1 to i32
    %c0_i32_0 = arith.constant 0 : i32
    %2 = arith.cmpi ne, %1, %c0_i32_0 : i32
    scf.if %2 {
      %cst_10 = arith.constant 0.000000e+00 : f32
      %12 = vector.broadcast %cst_10 : f32 to vector<16x384xf32>
      %c0_11 = arith.constant 0 : index
      %c0_12 = arith.constant 0 : index
      %13 = vector.load %arg6[%c0_11, %c0_12] : memref<16x384xf32, #tpu.memory_space<vmem>>, vector<16x384xf32>
      tpu.vector_store %arg6[%c0_11, %c0_12], %12 {strides = array<i32>} : memref<16x384xf32, #tpu.memory_space<vmem>>, vector<16x384xf32>,
    } else {
    }
    %c0 = arith.constant 0 : index
    %c0_1 = arith.constant 0 : index
    %3 = vector.load %arg6[%c0, %c0_1] : memref<16x384xf32, #tpu.memory_space<vmem>>, vector<16x384xf32>
    %c0_2 = arith.constant 0 : index
    %c0_3 = arith.constant 0 : index
    %4 = vector.load %arg2[%c0_2, %c0_3] : memref<16x64xbf16, #tpu.memory_space<vmem>>, vector<16x64xbf16>
    %c0_4 = arith.constant 0 : index
    %c0_5 = arith.constant 0 : index
    %5 = vector.load %arg3[%c0_4, %c0_5] : memref<64x384xbf16, #tpu.memory_space<vmem>>, vector<64x384xbf16>
    %cst = arith.constant dense<0.000000e+00> : vector<16x384xf32>
    %6 = tpu.matmul %4, %5, %cst {dimension_numbers = #tpu.dot_dimension_numbers<[1], [0], [0], [1], [0, 0, 1, 1], [], []>} : vector<16x64xbf16>, vector<64x384xbf16>, vector<16x384xf32> -> vector<16x384xf32>
    %7 = arith.addf %3, %6 : vector<16x384xf32>
    %c0_6 = arith.constant 0 : index
    %c0_7 = arith.constant 0 : index
    %8 = vector.load %arg6[%c0_6, %c0_7] : memref<16x384xf32, #tpu.memory_space<vmem>>, vector<16x384xf32>
    tpu.vector_store %arg6[%c0_6, %c0_7], %7 {strides = array<i32>} : memref<16x384xf32, #tpu.memory_space<vmem>>, vector<16x384xf32>,
    %c0_i32_8 = arith.constant 0 : i32
    %9 = arith.cmpi eq, %arg1, %c0_i32_8 : i32
    %10 = arith.extui %9 : i1 to i32
    %c0_i32_9 = arith.constant 0 : i32
    %11 = arith.cmpi ne, %10, %c0_i32_9 : i32
    scf.if %11 {
      %c0_10 = arith.constant 0 : index
      %c0_11 = arith.constant 0 : index
      %12 = vector.load %arg6[%c0_10, %c0_11] : memref<16x384xf32, #tpu.memory_space<vmem>>, vector<16x384xf32>
      %c0_12 = arith.constant 0 : index
      %c0_13 = arith.constant 0 : index
      %13 = vector.load %arg4[%c0_12, %c0_13] : memref<1x384xf32, #tpu.memory_space<vmem>>, vector<1x384xf32>
      %14 = vector.broadcast %13 : vector<1x384xf32> to vector<16x384xf32>
      %15 = arith.addf %12, %14 : vector<16x384xf32>
      %c0_14 = arith.constant 0 : index
      %c0_15 = arith.constant 0 : index
      %16 = vector.load %arg5[%c0_14, %c0_15] : memref<16x384xf32, #tpu.memory_space<vmem>>, vector<16x384xf32>
      tpu.vector_store %arg5[%c0_14, %c0_15], %15 {strides = array<i32>} : memref<16x384xf32, #tpu.memory_space<vmem>>, vector<16x384xf32>,
    } else {
    }
    return
  }
  func.func @transform_0(%arg0: i32, %arg1: i32) -> (i32, i32) {
    %c0_i32 = arith.constant 0 : i32
    return %arg0, %arg1 : i32, i32
  }
  func.func @transform_1(%arg0: i32, %arg1: i32) -> (i32, i32) {
    %c0_i32 = arith.constant 0 : i32
    %c0_i32_0 = arith.constant 0 : i32
    return %arg1, %c0_i32 : i32, i32
  }
  func.func @transform_2(%arg0: i32, %arg1: i32) -> (i32, i32) {
    %c0_i32 = arith.constant 0 : i32
    %c0_i32_0 = arith.constant 0 : i32
    %c0_i32_1 = arith.constant 0 : i32
    return %c0_i32, %c0_i32_0 : i32, i32
  }
  func.func @transform_3(%arg0: i32, %arg1: i32) -> (i32, i32) {
    %c0_i32 = arith.constant 0 : i32
    %c0_i32_0 = arith.constant 0 : i32
    return %arg0, %c0_i32 : i32, i32
  }
}

module attributes {stable_mosaic.version = 11 : i64} {
  func.func @_linear_kernel(%arg0: i32, %arg1: i32, %arg2: memref<16x512xbf16, #tpu.memory_space<vmem>>, %arg3: memref<512x128xbf16, #tpu.memory_space<vmem>>, %arg4: memref<1x128xf32, #tpu.memory_space<vmem>>, %arg5: memref<16x128xf32, #tpu.memory_space<vmem>>, %arg6: memref<16x128xf32, #tpu.memory_space<vmem>>) attributes {dimension_semantics = [#tpu.dimension_semantics<parallel>, #tpu.dimension_semantics<arbitrary>], iteration_bounds = array<i64: 2, 8>, scalar_prefetch = 0 : i64, scratch_operands = 1 : i64, tpu.core_type = #tpu.core_type<tc>, window_params = [{transform_indices = @transform_0, window_bounds = array<i64: 16, 512>}, {transform_indices = @transform_1, window_bounds = array<i64: 512, 128>}, {pipeline_mode = #tpu.pipeline_mode<synchronous>, transform_indices = @transform_2, window_bounds = array<i64: 1, 128>}, {transform_indices = @transform_3, window_bounds = array<i64: 16, 128>}]} {
    %c0_i32 = arith.constant 0 : i32
    %0 = arith.cmpi eq, %arg1, %c0_i32 : i32
    %1 = arith.extui %0 : i1 to i32
    %c0_i32_0 = arith.constant 0 : i32
    %2 = arith.cmpi ne, %1, %c0_i32_0 : i32
    scf.if %2 {
      %cst_9 = arith.constant 0.000000e+00 : f32
      %12 = vector.broadcast %cst_9 : f32 to vector<16x128xf32>
      %c0_10 = arith.constant 0 : index
      %c0_11 = arith.constant 0 : index
      %13 = vector.load %arg6[%c0_10, %c0_11] : memref<16x128xf32, #tpu.memory_space<vmem>>, vector<16x128xf32>
      tpu.vector_store %arg6[%c0_10, %c0_11], %12 {strides = array<i32>} : memref<16x128xf32, #tpu.memory_space<vmem>>, vector<16x128xf32>,
    } else {
    }
    %c0 = arith.constant 0 : index
    %c0_1 = arith.constant 0 : index
    %3 = vector.load %arg6[%c0, %c0_1] : memref<16x128xf32, #tpu.memory_space<vmem>>, vector<16x128xf32>
    %c0_2 = arith.constant 0 : index
    %c0_3 = arith.constant 0 : index
    %4 = vector.load %arg2[%c0_2, %c0_3] : memref<16x512xbf16, #tpu.memory_space<vmem>>, vector<16x512xbf16>
    %c0_4 = arith.constant 0 : index
    %c0_5 = arith.constant 0 : index
    %5 = vector.load %arg3[%c0_4, %c0_5] : memref<512x128xbf16, #tpu.memory_space<vmem>>, vector<512x128xbf16>
    %cst = arith.constant dense<0.000000e+00> : vector<16x128xf32>
    %6 = tpu.matmul %4, %5, %cst {dimension_numbers = #tpu.dot_dimension_numbers<[1], [0], [0], [1], [0, 0, 1, 1], [], []>} : vector<16x512xbf16>, vector<512x128xbf16>, vector<16x128xf32> -> vector<16x128xf32>
    %7 = arith.addf %3, %6 : vector<16x128xf32>
    %c0_6 = arith.constant 0 : index
    %c0_7 = arith.constant 0 : index
    %8 = vector.load %arg6[%c0_6, %c0_7] : memref<16x128xf32, #tpu.memory_space<vmem>>, vector<16x128xf32>
    tpu.vector_store %arg6[%c0_6, %c0_7], %7 {strides = array<i32>} : memref<16x128xf32, #tpu.memory_space<vmem>>, vector<16x128xf32>,
    %c7_i32 = arith.constant 7 : i32
    %9 = arith.cmpi eq, %arg1, %c7_i32 : i32
    %10 = arith.extui %9 : i1 to i32
    %c0_i32_8 = arith.constant 0 : i32
    %11 = arith.cmpi ne, %10, %c0_i32_8 : i32
    scf.if %11 {
      %c0_9 = arith.constant 0 : index
      %c0_10 = arith.constant 0 : index
      %12 = vector.load %arg6[%c0_9, %c0_10] : memref<16x128xf32, #tpu.memory_space<vmem>>, vector<16x128xf32>
      %c0_11 = arith.constant 0 : index
      %c0_12 = arith.constant 0 : index
      %13 = vector.load %arg4[%c0_11, %c0_12] : memref<1x128xf32, #tpu.memory_space<vmem>>, vector<1x128xf32>
      %14 = vector.broadcast %13 : vector<1x128xf32> to vector<16x128xf32>
      %15 = arith.addf %12, %14 : vector<16x128xf32>
      %cst_13 = arith.constant 0.000000e+00 : f32
      %16 = vector.broadcast %cst_13 : f32 to vector<16x128xf32>
      %17 = arith.maximumf %15, %16 : vector<16x128xf32>
      %c0_14 = arith.constant 0 : index
      %c0_15 = arith.constant 0 : index
      %18 = vector.load %arg5[%c0_14, %c0_15] : memref<16x128xf32, #tpu.memory_space<vmem>>, vector<16x128xf32>
      tpu.vector_store %arg5[%c0_14, %c0_15], %17 {strides = array<i32>} : memref<16x128xf32, #tpu.memory_space<vmem>>, vector<16x128xf32>,
    } else {
    }
    return
  }
  func.func @transform_0(%arg0: i32, %arg1: i32) -> (i32, i32) {
    %c0_i32 = arith.constant 0 : i32
    return %arg0, %arg1 : i32, i32
  }
  func.func @transform_1(%arg0: i32, %arg1: i32) -> (i32, i32) {
    %c0_i32 = arith.constant 0 : i32
    %c0_i32_0 = arith.constant 0 : i32
    return %arg1, %c0_i32 : i32, i32
  }
  func.func @transform_2(%arg0: i32, %arg1: i32) -> (i32, i32) {
    %c0_i32 = arith.constant 0 : i32
    %c0_i32_0 = arith.constant 0 : i32
    %c0_i32_1 = arith.constant 0 : i32
    return %c0_i32, %c0_i32_0 : i32, i32
  }
  func.func @transform_3(%arg0: i32, %arg1: i32) -> (i32, i32) {
    %c0_i32 = arith.constant 0 : i32
    %c0_i32_0 = arith.constant 0 : i32
    return %arg0, %c0_i32 : i32, i32
  }
}

module attributes {stable_mosaic.version = 11 : i64} {
  func.func @_bigru_kernel(%arg0: i32, %arg1: memref<1x3x2x128xf32, #tpu.memory_space<vmem>>, %arg2: memref<1x2x128xf32, #tpu.memory_space<vmem>>, %arg3: memref<3x128x128xf32, #tpu.memory_space<vmem>>, %arg4: memref<3x1x128xf32, #tpu.memory_space<vmem>>, %arg5: memref<1x2x128xf32, #tpu.memory_space<vmem>>, %arg6: memref<2x128xf32, #tpu.memory_space<vmem>>, %arg7: memref<2x128xf32, #tpu.memory_space<vmem>>) attributes {dimension_semantics = [#tpu.dimension_semantics<arbitrary>], iteration_bounds = array<i64: 16>, scalar_prefetch = 0 : i64, scratch_operands = 1 : i64, tpu.core_type = #tpu.core_type<tc>, window_params = [{transform_indices = @transform_0, window_bounds = array<i64: 1, 3, 2, 128>}, {transform_indices = @transform_1, window_bounds = array<i64: 1, 2, 128>}, {pipeline_mode = #tpu.pipeline_mode<synchronous>, transform_indices = @transform_2, window_bounds = array<i64: 3, 128, 128>}, {pipeline_mode = #tpu.pipeline_mode<synchronous>, transform_indices = @transform_3, window_bounds = array<i64: 3, 1, 128>}, {transform_indices = @transform_4, window_bounds = array<i64: 1, 2, 128>}, {pipeline_mode = #tpu.pipeline_mode<synchronous>, transform_indices = @transform_5, window_bounds = array<i64: 2, 128>}]} {
    %c0_i32 = arith.constant 0 : i32
    %0 = arith.cmpi eq, %arg0, %c0_i32 : i32
    %1 = arith.extui %0 : i1 to i32
    %c0_i32_0 = arith.constant 0 : i32
    %2 = arith.cmpi ne, %1, %c0_i32_0 : i32
    scf.if %2 {
      %cst_46 = arith.constant 0.000000e+00 : f32
      %64 = vector.broadcast %cst_46 : f32 to vector<2x128xf32>
      %c0_47 = arith.constant 0 : index
      %c0_48 = arith.constant 0 : index
      %65 = vector.load %arg7[%c0_47, %c0_48] : memref<2x128xf32, #tpu.memory_space<vmem>>, vector<2x128xf32>
      tpu.vector_store %arg7[%c0_47, %c0_48], %64 {strides = array<i32>} : memref<2x128xf32, #tpu.memory_space<vmem>>, vector<2x128xf32>,
    } else {
    }
    %c0 = arith.constant 0 : index
    %c0_1 = arith.constant 0 : index
    %3 = vector.load %arg7[%c0, %c0_1] : memref<2x128xf32, #tpu.memory_space<vmem>>, vector<2x128xf32>
    %c0_2 = arith.constant 0 : index
    %c0_3 = arith.constant 0 : index
    %c0_4 = arith.constant 0 : index
    %4 = vector.load %arg2[%c0_2, %c0_3, %c0_4] : memref<1x2x128xf32, #tpu.memory_space<vmem>>, vector<1x2x128xf32>
    %5 = vector.shape_cast %4 : vector<1x2x128xf32> to vector<2x128xf32>
    %c0_5 = arith.constant 0 : index
    %c0_6 = arith.constant 0 : index
    %c0_7 = arith.constant 0 : index
    %6 = vector.load %arg3[%c0_5, %c0_6, %c0_7] : memref<3x128x128xf32, #tpu.memory_space<vmem>>, vector<1x128x128xf32>
    %7 = vector.shape_cast %6 : vector<1x128x128xf32> to vector<128x128xf32>
    %cst = arith.constant dense<0.000000e+00> : vector<2x128xf32>
    %8 = tpu.matmul %3, %7, %cst {dimension_numbers = #tpu.dot_dimension_numbers<[1], [0], [0], [1], [0, 0, 1, 1], [], []>} : vector<2x128xf32>, vector<128x128xf32>, vector<2x128xf32> -> vector<2x128xf32>
    %c0_8 = arith.constant 0 : index
    %c0_9 = arith.constant 0 : index
    %c0_10 = arith.constant 0 : index
    %9 = vector.load %arg4[%c0_8, %c0_9, %c0_10] : memref<3x1x128xf32, #tpu.memory_space<vmem>>, vector<1x1x128xf32>
    %10 = vector.shape_cast %9 : vector<1x1x128xf32> to vector<1x128xf32>
    %11 = vector.broadcast %10 : vector<1x128xf32> to vector<2x128xf32>
    %12 = arith.addf %8, %11 : vector<2x128xf32>
    %c1 = arith.constant 1 : index
    %c0_11 = arith.constant 0 : index
    %c0_12 = arith.constant 0 : index
    %13 = vector.load %arg3[%c1, %c0_11, %c0_12] : memref<3x128x128xf32, #tpu.memory_space<vmem>>, vector<1x128x128xf32>
    %14 = vector.shape_cast %13 : vector<1x128x128xf32> to vector<128x128xf32>
    %cst_13 = arith.constant dense<0.000000e+00> : vector<2x128xf32>
    %15 = tpu.matmul %3, %14, %cst_13 {dimension_numbers = #tpu.dot_dimension_numbers<[1], [0], [0], [1], [0, 0, 1, 1], [], []>} : vector<2x128xf32>, vector<128x128xf32>, vector<2x128xf32> -> vector<2x128xf32>
    %c1_14 = arith.constant 1 : index
    %c0_15 = arith.constant 0 : index
    %c0_16 = arith.constant 0 : index
    %16 = vector.load %arg4[%c1_14, %c0_15, %c0_16] : memref<3x1x128xf32, #tpu.memory_space<vmem>>, vector<1x1x128xf32>
    %17 = vector.shape_cast %16 : vector<1x1x128xf32> to vector<1x128xf32>
    %18 = vector.broadcast %17 : vector<1x128xf32> to vector<2x128xf32>
    %19 = arith.addf %15, %18 : vector<2x128xf32>
    %c2 = arith.constant 2 : index
    %c0_17 = arith.constant 0 : index
    %c0_18 = arith.constant 0 : index
    %20 = vector.load %arg3[%c2, %c0_17, %c0_18] : memref<3x128x128xf32, #tpu.memory_space<vmem>>, vector<1x128x128xf32>
    %21 = vector.shape_cast %20 : vector<1x128x128xf32> to vector<128x128xf32>
    %cst_19 = arith.constant dense<0.000000e+00> : vector<2x128xf32>
    %22 = tpu.matmul %3, %21, %cst_19 {dimension_numbers = #tpu.dot_dimension_numbers<[1], [0], [0], [1], [0, 0, 1, 1], [], []>} : vector<2x128xf32>, vector<128x128xf32>, vector<2x128xf32> -> vector<2x128xf32>
    %c2_20 = arith.constant 2 : index
    %c0_21 = arith.constant 0 : index
    %c0_22 = arith.constant 0 : index
    %23 = vector.load %arg4[%c2_20, %c0_21, %c0_22] : memref<3x1x128xf32, #tpu.memory_space<vmem>>, vector<1x1x128xf32>
    %24 = vector.shape_cast %23 : vector<1x1x128xf32> to vector<1x128xf32>
    %25 = vector.broadcast %24 : vector<1x128xf32> to vector<2x128xf32>
    %26 = arith.addf %22, %25 : vector<2x128xf32>
    %c0_23 = arith.constant 0 : index
    %c0_24 = arith.constant 0 : index
    %c0_25 = arith.constant 0 : index
    %c0_26 = arith.constant 0 : index
    %27 = vector.load %arg1[%c0_23, %c0_24, %c0_25, %c0_26] : memref<1x3x2x128xf32, #tpu.memory_space<vmem>>, vector<1x1x2x128xf32>
    %28 = vector.shape_cast %27 : vector<1x1x2x128xf32> to vector<2x128xf32>
    %29 = arith.addf %28, %12 : vector<2x128xf32>
    %30 = arith.negf %29 : vector<2x128xf32>
    %31 = math.exp %30 : vector<2x128xf32>
    %cst_27 = arith.constant 1.000000e+00 : f32
    %32 = vector.broadcast %cst_27 : f32 to vector<2x128xf32>
    %33 = arith.addf %32, %31 : vector<2x128xf32>
    %34 = arith.divf %32, %33 : vector<2x128xf32>
    %c0_28 = arith.constant 0 : index
    %c1_29 = arith.constant 1 : index
    %c0_30 = arith.constant 0 : index
    %c0_31 = arith.constant 0 : index
    %35 = vector.load %arg1[%c0_28, %c1_29, %c0_30, %c0_31] : memref<1x3x2x128xf32, #tpu.memory_space<vmem>>, vector<1x1x2x128xf32>
    %36 = vector.shape_cast %35 : vector<1x1x2x128xf32> to vector<2x128xf32>
    %37 = arith.addf %36, %19 : vector<2x128xf32>
    %38 = arith.negf %37 : vector<2x128xf32>
    %39 = math.exp %38 : vector<2x128xf32>
    %cst_32 = arith.constant 1.000000e+00 : f32
    %40 = vector.broadcast %cst_32 : f32 to vector<2x128xf32>
    %41 = arith.addf %40, %39 : vector<2x128xf32>
    %42 = arith.divf %40, %41 : vector<2x128xf32>
    %c0_33 = arith.constant 0 : index
    %c2_34 = arith.constant 2 : index
    %c0_35 = arith.constant 0 : index
    %c0_36 = arith.constant 0 : index
    %43 = vector.load %arg1[%c0_33, %c2_34, %c0_35, %c0_36] : memref<1x3x2x128xf32, #tpu.memory_space<vmem>>, vector<1x1x2x128xf32>
    %44 = vector.shape_cast %43 : vector<1x1x2x128xf32> to vector<2x128xf32>
    %45 = arith.mulf %34, %26 : vector<2x128xf32>
    %46 = arith.addf %44, %45 : vector<2x128xf32>
    %47 = math.tanh %46 : vector<2x128xf32>
    %cst_37 = arith.constant 1.000000e+00 : f32
    %48 = vector.broadcast %cst_37 : f32 to vector<2x128xf32>
    %49 = arith.subf %48, %42 : vector<2x128xf32>
    %50 = arith.mulf %49, %47 : vector<2x128xf32>
    %51 = arith.mulf %42, %3 : vector<2x128xf32>
    %52 = arith.addf %50, %51 : vector<2x128xf32>
    %53 = arith.mulf %5, %52 : vector<2x128xf32>
    %cst_38 = arith.constant 1.000000e+00 : f32
    %54 = vector.broadcast %cst_38 : f32 to vector<2x128xf32>
    %55 = arith.subf %54, %5 : vector<2x128xf32>
    %56 = arith.mulf %55, %3 : vector<2x128xf32>
    %57 = arith.addf %53, %56 : vector<2x128xf32>
    %c0_39 = arith.constant 0 : index
    %c0_40 = arith.constant 0 : index
    %58 = vector.load %arg7[%c0_39, %c0_40] : memref<2x128xf32, #tpu.memory_space<vmem>>, vector<2x128xf32>
    tpu.vector_store %arg7[%c0_39, %c0_40], %57 {strides = array<i32>} : memref<2x128xf32, #tpu.memory_space<vmem>>, vector<2x128xf32>,
    %59 = arith.mulf %5, %52 : vector<2x128xf32>
    %c0_41 = arith.constant 0 : index
    %c0_42 = arith.constant 0 : index
    %c0_43 = arith.constant 0 : index
    %60 = vector.load %arg5[%c0_41, %c0_42, %c0_43] : memref<1x2x128xf32, #tpu.memory_space<vmem>>, vector<1x2x128xf32>
    %61 = vector.shape_cast %60 : vector<1x2x128xf32> to vector<2x128xf32>
    %62 = vector.shape_cast %59 : vector<2x128xf32> to vector<1x2x128xf32>
    tpu.vector_store %arg5[%c0_41, %c0_42, %c0_43], %62 {strides = array<i32>} : memref<1x2x128xf32, #tpu.memory_space<vmem>>, vector<1x2x128xf32>,
    %c0_44 = arith.constant 0 : index
    %c0_45 = arith.constant 0 : index
    %63 = vector.load %arg6[%c0_44, %c0_45] : memref<2x128xf32, #tpu.memory_space<vmem>>, vector<2x128xf32>
    tpu.vector_store %arg6[%c0_44, %c0_45], %57 {strides = array<i32>} : memref<2x128xf32, #tpu.memory_space<vmem>>, vector<2x128xf32>,
    return
  }
  func.func @transform_0(%arg0: i32) -> (i32, i32, i32, i32) {
    %c0_i32 = arith.constant 0 : i32
    %c0_i32_0 = arith.constant 0 : i32
    %c0_i32_1 = arith.constant 0 : i32
    %c0_i32_2 = arith.constant 0 : i32
    return %arg0, %c0_i32, %c0_i32_0, %c0_i32_1 : i32, i32, i32, i32
  }
  func.func @transform_1(%arg0: i32) -> (i32, i32, i32) {
    %c0_i32 = arith.constant 0 : i32
    %c0_i32_0 = arith.constant 0 : i32
    %c0_i32_1 = arith.constant 0 : i32
    return %arg0, %c0_i32, %c0_i32_0 : i32, i32, i32
  }
  func.func @transform_2(%arg0: i32) -> (i32, i32, i32) {
    %c0_i32 = arith.constant 0 : i32
    %c0_i32_0 = arith.constant 0 : i32
    %c0_i32_1 = arith.constant 0 : i32
    %c0_i32_2 = arith.constant 0 : i32
    return %c0_i32, %c0_i32_0, %c0_i32_1 : i32, i32, i32
  }
  func.func @transform_3(%arg0: i32) -> (i32, i32, i32) {
    %c0_i32 = arith.constant 0 : i32
    %c0_i32_0 = arith.constant 0 : i32
    %c0_i32_1 = arith.constant 0 : i32
    %c0_i32_2 = arith.constant 0 : i32
    return %c0_i32, %c0_i32_0, %c0_i32_1 : i32, i32, i32
  }
  func.func @transform_4(%arg0: i32) -> (i32, i32, i32) {
    %c0_i32 = arith.constant 0 : i32
    %c0_i32_0 = arith.constant 0 : i32
    %c0_i32_1 = arith.constant 0 : i32
    return %arg0, %c0_i32, %c0_i32_0 : i32, i32, i32
  }
  func.func @transform_5(%arg0: i32) -> (i32, i32) {
    %c0_i32 = arith.constant 0 : i32
    %c0_i32_0 = arith.constant 0 : i32
    %c0_i32_1 = arith.constant 0 : i32
    return %c0_i32, %c0_i32_0 : i32, i32
  }
}

module attributes {stable_mosaic.version = 11 : i64} {
  func.func @_ln_kernel(%arg0: i32, %arg1: memref<16x128xf32, #tpu.memory_space<vmem>>, %arg2: memref<16x128xf32, #tpu.memory_space<vmem>>) attributes {dimension_semantics = [#tpu.dimension_semantics<parallel>], iteration_bounds = array<i64: 2>, scalar_prefetch = 0 : i64, scratch_operands = 0 : i64, tpu.core_type = #tpu.core_type<tc>, window_params = [{transform_indices = @transform_0, window_bounds = array<i64: 16, 128>}, {transform_indices = @transform_1, window_bounds = array<i64: 16, 128>}]} {
    %c0 = arith.constant 0 : index
    %c0_0 = arith.constant 0 : index
    %0 = vector.load %arg1[%c0, %c0_0] : memref<16x128xf32, #tpu.memory_space<vmem>>, vector<16x128xf32>
    %cst = arith.constant dense<0.000000e+00> : vector<16xf32>
    %1 = vector.multi_reduction <add>, %0, %cst [1] : vector<16x128xf32> to vector<16xf32>
    %2 = vector.shape_cast %1 : vector<16xf32> to vector<16x1xf32>
    %cst_1 = arith.constant 1.280000e+02 : f32
    %3 = vector.broadcast %cst_1 : f32 to vector<16x1xf32>
    %4 = arith.divf %2, %3 : vector<16x1xf32>
    %5 = vector.broadcast %4 : vector<16x1xf32> to vector<16x128xf32>
    %6 = arith.subf %0, %5 : vector<16x128xf32>
    %7 = arith.mulf %6, %6 : vector<16x128xf32>
    %cst_2 = arith.constant dense<0.000000e+00> : vector<16xf32>
    %8 = vector.multi_reduction <add>, %7, %cst_2 [1] : vector<16x128xf32> to vector<16xf32>
    %9 = vector.shape_cast %8 : vector<16xf32> to vector<16x1xf32>
    %cst_3 = arith.constant 1.280000e+02 : f32
    %10 = vector.broadcast %cst_3 : f32 to vector<16x1xf32>
    %11 = arith.divf %9, %10 : vector<16x1xf32>
    %12 = vector.broadcast %4 : vector<16x1xf32> to vector<16x128xf32>
    %13 = arith.subf %0, %12 : vector<16x128xf32>
    %cst_4 = arith.constant 9.99999974E-6 : f32
    %14 = vector.broadcast %cst_4 : f32 to vector<16x1xf32>
    %15 = arith.addf %11, %14 : vector<16x1xf32>
    %16 = math.rsqrt %15 : vector<16x1xf32>
    %17 = vector.broadcast %16 : vector<16x1xf32> to vector<16x128xf32>
    %18 = arith.mulf %13, %17 : vector<16x128xf32>
    %c0_5 = arith.constant 0 : index
    %c0_6 = arith.constant 0 : index
    %19 = vector.load %arg2[%c0_5, %c0_6] : memref<16x128xf32, #tpu.memory_space<vmem>>, vector<16x128xf32>
    tpu.vector_store %arg2[%c0_5, %c0_6], %18 {strides = array<i32>} : memref<16x128xf32, #tpu.memory_space<vmem>>, vector<16x128xf32>,
    return
  }
  func.func @transform_0(%arg0: i32) -> (i32, i32) {
    %c0_i32 = arith.constant 0 : i32
    %c0_i32_0 = arith.constant 0 : i32
    return %arg0, %c0_i32 : i32, i32
  }
  func.func @transform_1(%arg0: i32) -> (i32, i32) {
    %c0_i32 = arith.constant 0 : i32
    %c0_i32_0 = arith.constant 0 : i32
    return %arg0, %c0_i32 : i32, i32
  }
}

module attributes {stable_mosaic.version = 11 : i64} {
  func.func @_mlp_kernel(%arg0: i32, %arg1: memref<16x256xbf16, #tpu.memory_space<vmem>>, %arg2: memref<256x64xbf16, #tpu.memory_space<vmem>>, %arg3: memref<1x64xf32, #tpu.memory_space<vmem>>, %arg4: memref<64x128xbf16, #tpu.memory_space<vmem>>, %arg5: memref<1x128xf32, #tpu.memory_space<vmem>>, %arg6: memref<16x128xf32, #tpu.memory_space<vmem>>) attributes {dimension_semantics = [#tpu.dimension_semantics<parallel>], iteration_bounds = array<i64: 2>, scalar_prefetch = 0 : i64, scratch_operands = 0 : i64, tpu.core_type = #tpu.core_type<tc>, window_params = [{transform_indices = @transform_0, window_bounds = array<i64: 16, 256>}, {pipeline_mode = #tpu.pipeline_mode<synchronous>, transform_indices = @transform_1, window_bounds = array<i64: 256, 64>}, {pipeline_mode = #tpu.pipeline_mode<synchronous>, transform_indices = @transform_2, window_bounds = array<i64: 1, 64>}, {pipeline_mode = #tpu.pipeline_mode<synchronous>, transform_indices = @transform_3, window_bounds = array<i64: 64, 128>}, {pipeline_mode = #tpu.pipeline_mode<synchronous>, transform_indices = @transform_4, window_bounds = array<i64: 1, 128>}, {transform_indices = @transform_5, window_bounds = array<i64: 16, 128>}]} {
    %c0 = arith.constant 0 : index
    %c0_0 = arith.constant 0 : index
    %0 = vector.load %arg1[%c0, %c0_0] : memref<16x256xbf16, #tpu.memory_space<vmem>>, vector<16x256xbf16>
    %c0_1 = arith.constant 0 : index
    %c0_2 = arith.constant 0 : index
    %1 = vector.load %arg2[%c0_1, %c0_2] : memref<256x64xbf16, #tpu.memory_space<vmem>>, vector<256x64xbf16>
    %c0_3 = arith.constant 0 : index
    %c0_4 = arith.constant 0 : index
    %2 = vector.load %arg3[%c0_3, %c0_4] : memref<1x64xf32, #tpu.memory_space<vmem>>, vector<1x64xf32>
    %cst = arith.constant dense<0.000000e+00> : vector<16x64xf32>
    %3 = tpu.matmul %0, %1, %cst {dimension_numbers = #tpu.dot_dimension_numbers<[1], [0], [0], [1], [0, 0, 1, 1], [], []>} : vector<16x256xbf16>, vector<256x64xbf16>, vector<16x64xf32> -> vector<16x64xf32>
    %4 = vector.broadcast %2 : vector<1x64xf32> to vector<16x64xf32>
    %5 = arith.addf %3, %4 : vector<16x64xf32>
    %6 = math.tanh %5 : vector<16x64xf32>
    %7 = arith.truncf %6 : vector<16x64xf32> to vector<16x64xbf16>
    %c0_5 = arith.constant 0 : index
    %c0_6 = arith.constant 0 : index
    %8 = vector.load %arg4[%c0_5, %c0_6] : memref<64x128xbf16, #tpu.memory_space<vmem>>, vector<64x128xbf16>
    %c0_7 = arith.constant 0 : index
    %c0_8 = arith.constant 0 : index
    %9 = vector.load %arg5[%c0_7, %c0_8] : memref<1x128xf32, #tpu.memory_space<vmem>>, vector<1x128xf32>
    %cst_9 = arith.constant dense<0.000000e+00> : vector<16x128xf32>
    %10 = tpu.matmul %7, %8, %cst_9 {dimension_numbers = #tpu.dot_dimension_numbers<[1], [0], [0], [1], [0, 0, 1, 1], [], []>} : vector<16x64xbf16>, vector<64x128xbf16>, vector<16x128xf32> -> vector<16x128xf32>
    %11 = vector.broadcast %9 : vector<1x128xf32> to vector<16x128xf32>
    %12 = arith.addf %10, %11 : vector<16x128xf32>
    %c0_10 = arith.constant 0 : index
    %c0_11 = arith.constant 0 : index
    %13 = vector.load %arg6[%c0_10, %c0_11] : memref<16x128xf32, #tpu.memory_space<vmem>>, vector<16x128xf32>
    tpu.vector_store %arg6[%c0_10, %c0_11], %12 {strides = array<i32>} : memref<16x128xf32, #tpu.memory_space<vmem>>, vector<16x128xf32>,
    return
  }
  func.func @transform_0(%arg0: i32) -> (i32, i32) {
    %c0_i32 = arith.constant 0 : i32
    %c0_i32_0 = arith.constant 0 : i32
    return %arg0, %c0_i32 : i32, i32
  }
  func.func @transform_1(%arg0: i32) -> (i32, i32) {
    %c0_i32 = arith.constant 0 : i32
    %c0_i32_0 = arith.constant 0 : i32
    %c0_i32_1 = arith.constant 0 : i32
    return %c0_i32, %c0_i32_0 : i32, i32
  }
  func.func @transform_2(%arg0: i32) -> (i32, i32) {
    %c0_i32 = arith.constant 0 : i32
    %c0_i32_0 = arith.constant 0 : i32
    %c0_i32_1 = arith.constant 0 : i32
    return %c0_i32, %c0_i32_0 : i32, i32
  }
  func.func @transform_3(%arg0: i32) -> (i32, i32) {
    %c0_i32 = arith.constant 0 : i32
    %c0_i32_0 = arith.constant 0 : i32
    %c0_i32_1 = arith.constant 0 : i32
    return %c0_i32, %c0_i32_0 : i32, i32
  }
  func.func @transform_4(%arg0: i32) -> (i32, i32) {
    %c0_i32 = arith.constant 0 : i32
    %c0_i32_0 = arith.constant 0 : i32
    %c0_i32_1 = arith.constant 0 : i32
    return %c0_i32, %c0_i32_0 : i32, i32
  }
  func.func @transform_5(%arg0: i32) -> (i32, i32) {
    %c0_i32 = arith.constant 0 : i32
    %c0_i32_0 = arith.constant 0 : i32
    return %arg0, %c0_i32 : i32, i32
  }
}

module attributes {stable_mosaic.version = 11 : i64} {
  func.func @_linear_kernel(%arg0: i32, %arg1: i32, %arg2: memref<48x512xbf16, #tpu.memory_space<vmem>>, %arg3: memref<512x128xbf16, #tpu.memory_space<vmem>>, %arg4: memref<1x128xf32, #tpu.memory_space<vmem>>, %arg5: memref<48x128xf32, #tpu.memory_space<vmem>>, %arg6: memref<48x128xf32, #tpu.memory_space<vmem>>) attributes {dimension_semantics = [#tpu.dimension_semantics<parallel>, #tpu.dimension_semantics<arbitrary>], iteration_bounds = array<i64: 2, 8>, scalar_prefetch = 0 : i64, scratch_operands = 1 : i64, tpu.core_type = #tpu.core_type<tc>, window_params = [{transform_indices = @transform_0, window_bounds = array<i64: 48, 512>}, {transform_indices = @transform_1, window_bounds = array<i64: 512, 128>}, {pipeline_mode = #tpu.pipeline_mode<synchronous>, transform_indices = @transform_2, window_bounds = array<i64: 1, 128>}, {transform_indices = @transform_3, window_bounds = array<i64: 48, 128>}]} {
    %c0_i32 = arith.constant 0 : i32
    %0 = arith.cmpi eq, %arg1, %c0_i32 : i32
    %1 = arith.extui %0 : i1 to i32
    %c0_i32_0 = arith.constant 0 : i32
    %2 = arith.cmpi ne, %1, %c0_i32_0 : i32
    scf.if %2 {
      %cst_9 = arith.constant 0.000000e+00 : f32
      %12 = vector.broadcast %cst_9 : f32 to vector<48x128xf32>
      %c0_10 = arith.constant 0 : index
      %c0_11 = arith.constant 0 : index
      %13 = vector.load %arg6[%c0_10, %c0_11] : memref<48x128xf32, #tpu.memory_space<vmem>>, vector<48x128xf32>
      tpu.vector_store %arg6[%c0_10, %c0_11], %12 {strides = array<i32>} : memref<48x128xf32, #tpu.memory_space<vmem>>, vector<48x128xf32>,
    } else {
    }
    %c0 = arith.constant 0 : index
    %c0_1 = arith.constant 0 : index
    %3 = vector.load %arg6[%c0, %c0_1] : memref<48x128xf32, #tpu.memory_space<vmem>>, vector<48x128xf32>
    %c0_2 = arith.constant 0 : index
    %c0_3 = arith.constant 0 : index
    %4 = vector.load %arg2[%c0_2, %c0_3] : memref<48x512xbf16, #tpu.memory_space<vmem>>, vector<48x512xbf16>
    %c0_4 = arith.constant 0 : index
    %c0_5 = arith.constant 0 : index
    %5 = vector.load %arg3[%c0_4, %c0_5] : memref<512x128xbf16, #tpu.memory_space<vmem>>, vector<512x128xbf16>
    %cst = arith.constant dense<0.000000e+00> : vector<48x128xf32>
    %6 = tpu.matmul %4, %5, %cst {dimension_numbers = #tpu.dot_dimension_numbers<[1], [0], [0], [1], [0, 0, 1, 1], [], []>} : vector<48x512xbf16>, vector<512x128xbf16>, vector<48x128xf32> -> vector<48x128xf32>
    %7 = arith.addf %3, %6 : vector<48x128xf32>
    %c0_6 = arith.constant 0 : index
    %c0_7 = arith.constant 0 : index
    %8 = vector.load %arg6[%c0_6, %c0_7] : memref<48x128xf32, #tpu.memory_space<vmem>>, vector<48x128xf32>
    tpu.vector_store %arg6[%c0_6, %c0_7], %7 {strides = array<i32>} : memref<48x128xf32, #tpu.memory_space<vmem>>, vector<48x128xf32>,
    %c7_i32 = arith.constant 7 : i32
    %9 = arith.cmpi eq, %arg1, %c7_i32 : i32
    %10 = arith.extui %9 : i1 to i32
    %c0_i32_8 = arith.constant 0 : i32
    %11 = arith.cmpi ne, %10, %c0_i32_8 : i32
    scf.if %11 {
      %c0_9 = arith.constant 0 : index
      %c0_10 = arith.constant 0 : index
      %12 = vector.load %arg6[%c0_9, %c0_10] : memref<48x128xf32, #tpu.memory_space<vmem>>, vector<48x128xf32>
      %c0_11 = arith.constant 0 : index
      %c0_12 = arith.constant 0 : index
      %13 = vector.load %arg4[%c0_11, %c0_12] : memref<1x128xf32, #tpu.memory_space<vmem>>, vector<1x128xf32>
      %14 = vector.broadcast %13 : vector<1x128xf32> to vector<48x128xf32>
      %15 = arith.addf %12, %14 : vector<48x128xf32>
      %cst_13 = arith.constant 0.000000e+00 : f32
      %16 = vector.broadcast %cst_13 : f32 to vector<48x128xf32>
      %17 = arith.maximumf %15, %16 : vector<48x128xf32>
      %c0_14 = arith.constant 0 : index
      %c0_15 = arith.constant 0 : index
      %18 = vector.load %arg5[%c0_14, %c0_15] : memref<48x128xf32, #tpu.memory_space<vmem>>, vector<48x128xf32>
      tpu.vector_store %arg5[%c0_14, %c0_15], %17 {strides = array<i32>} : memref<48x128xf32, #tpu.memory_space<vmem>>, vector<48x128xf32>,
    } else {
    }
    return
  }
  func.func @transform_0(%arg0: i32, %arg1: i32) -> (i32, i32) {
    %c0_i32 = arith.constant 0 : i32
    return %arg0, %arg1 : i32, i32
  }
  func.func @transform_1(%arg0: i32, %arg1: i32) -> (i32, i32) {
    %c0_i32 = arith.constant 0 : i32
    %c0_i32_0 = arith.constant 0 : i32
    return %arg1, %c0_i32 : i32, i32
  }
  func.func @transform_2(%arg0: i32, %arg1: i32) -> (i32, i32) {
    %c0_i32 = arith.constant 0 : i32
    %c0_i32_0 = arith.constant 0 : i32
    %c0_i32_1 = arith.constant 0 : i32
    return %c0_i32, %c0_i32_0 : i32, i32
  }
  func.func @transform_3(%arg0: i32, %arg1: i32) -> (i32, i32) {
    %c0_i32 = arith.constant 0 : i32
    %c0_i32_0 = arith.constant 0 : i32
    return %arg0, %c0_i32 : i32, i32
  }
}

module attributes {stable_mosaic.version = 11 : i64} {
  func.func @_linear_kernel(%arg0: i32, %arg1: i32, %arg2: memref<48x64xbf16, #tpu.memory_space<vmem>>, %arg3: memref<64x384xbf16, #tpu.memory_space<vmem>>, %arg4: memref<1x384xf32, #tpu.memory_space<vmem>>, %arg5: memref<48x384xf32, #tpu.memory_space<vmem>>, %arg6: memref<48x384xf32, #tpu.memory_space<vmem>>) attributes {dimension_semantics = [#tpu.dimension_semantics<parallel>, #tpu.dimension_semantics<arbitrary>], iteration_bounds = array<i64: 2, 1>, scalar_prefetch = 0 : i64, scratch_operands = 1 : i64, tpu.core_type = #tpu.core_type<tc>, window_params = [{transform_indices = @transform_0, window_bounds = array<i64: 48, 64>}, {transform_indices = @transform_1, window_bounds = array<i64: 64, 384>}, {pipeline_mode = #tpu.pipeline_mode<synchronous>, transform_indices = @transform_2, window_bounds = array<i64: 1, 384>}, {transform_indices = @transform_3, window_bounds = array<i64: 48, 384>}]} {
    %c0_i32 = arith.constant 0 : i32
    %0 = arith.cmpi eq, %arg1, %c0_i32 : i32
    %1 = arith.extui %0 : i1 to i32
    %c0_i32_0 = arith.constant 0 : i32
    %2 = arith.cmpi ne, %1, %c0_i32_0 : i32
    scf.if %2 {
      %cst_10 = arith.constant 0.000000e+00 : f32
      %12 = vector.broadcast %cst_10 : f32 to vector<48x384xf32>
      %c0_11 = arith.constant 0 : index
      %c0_12 = arith.constant 0 : index
      %13 = vector.load %arg6[%c0_11, %c0_12] : memref<48x384xf32, #tpu.memory_space<vmem>>, vector<48x384xf32>
      tpu.vector_store %arg6[%c0_11, %c0_12], %12 {strides = array<i32>} : memref<48x384xf32, #tpu.memory_space<vmem>>, vector<48x384xf32>,
    } else {
    }
    %c0 = arith.constant 0 : index
    %c0_1 = arith.constant 0 : index
    %3 = vector.load %arg6[%c0, %c0_1] : memref<48x384xf32, #tpu.memory_space<vmem>>, vector<48x384xf32>
    %c0_2 = arith.constant 0 : index
    %c0_3 = arith.constant 0 : index
    %4 = vector.load %arg2[%c0_2, %c0_3] : memref<48x64xbf16, #tpu.memory_space<vmem>>, vector<48x64xbf16>
    %c0_4 = arith.constant 0 : index
    %c0_5 = arith.constant 0 : index
    %5 = vector.load %arg3[%c0_4, %c0_5] : memref<64x384xbf16, #tpu.memory_space<vmem>>, vector<64x384xbf16>
    %cst = arith.constant dense<0.000000e+00> : vector<48x384xf32>
    %6 = tpu.matmul %4, %5, %cst {dimension_numbers = #tpu.dot_dimension_numbers<[1], [0], [0], [1], [0, 0, 1, 1], [], []>} : vector<48x64xbf16>, vector<64x384xbf16>, vector<48x384xf32> -> vector<48x384xf32>
    %7 = arith.addf %3, %6 : vector<48x384xf32>
    %c0_6 = arith.constant 0 : index
    %c0_7 = arith.constant 0 : index
    %8 = vector.load %arg6[%c0_6, %c0_7] : memref<48x384xf32, #tpu.memory_space<vmem>>, vector<48x384xf32>
    tpu.vector_store %arg6[%c0_6, %c0_7], %7 {strides = array<i32>} : memref<48x384xf32, #tpu.memory_space<vmem>>, vector<48x384xf32>,
    %c0_i32_8 = arith.constant 0 : i32
    %9 = arith.cmpi eq, %arg1, %c0_i32_8 : i32
    %10 = arith.extui %9 : i1 to i32
    %c0_i32_9 = arith.constant 0 : i32
    %11 = arith.cmpi ne, %10, %c0_i32_9 : i32
    scf.if %11 {
      %c0_10 = arith.constant 0 : index
      %c0_11 = arith.constant 0 : index
      %12 = vector.load %arg6[%c0_10, %c0_11] : memref<48x384xf32, #tpu.memory_space<vmem>>, vector<48x384xf32>
      %c0_12 = arith.constant 0 : index
      %c0_13 = arith.constant 0 : index
      %13 = vector.load %arg4[%c0_12, %c0_13] : memref<1x384xf32, #tpu.memory_space<vmem>>, vector<1x384xf32>
      %14 = vector.broadcast %13 : vector<1x384xf32> to vector<48x384xf32>
      %15 = arith.addf %12, %14 : vector<48x384xf32>
      %c0_14 = arith.constant 0 : index
      %c0_15 = arith.constant 0 : index
      %16 = vector.load %arg5[%c0_14, %c0_15] : memref<48x384xf32, #tpu.memory_space<vmem>>, vector<48x384xf32>
      tpu.vector_store %arg5[%c0_14, %c0_15], %15 {strides = array<i32>} : memref<48x384xf32, #tpu.memory_space<vmem>>, vector<48x384xf32>,
    } else {
    }
    return
  }
  func.func @transform_0(%arg0: i32, %arg1: i32) -> (i32, i32) {
    %c0_i32 = arith.constant 0 : i32
    return %arg0, %arg1 : i32, i32
  }
  func.func @transform_1(%arg0: i32, %arg1: i32) -> (i32, i32) {
    %c0_i32 = arith.constant 0 : i32
    %c0_i32_0 = arith.constant 0 : i32
    return %arg1, %c0_i32 : i32, i32
  }
  func.func @transform_2(%arg0: i32, %arg1: i32) -> (i32, i32) {
    %c0_i32 = arith.constant 0 : i32
    %c0_i32_0 = arith.constant 0 : i32
    %c0_i32_1 = arith.constant 0 : i32
    return %c0_i32, %c0_i32_0 : i32, i32
  }
  func.func @transform_3(%arg0: i32, %arg1: i32) -> (i32, i32) {
    %c0_i32 = arith.constant 0 : i32
    %c0_i32_0 = arith.constant 0 : i32
    return %arg0, %c0_i32 : i32, i32
  }
}

module attributes {stable_mosaic.version = 11 : i64} {
  func.func @_bigru_kernel(%arg0: i32, %arg1: memref<1x3x6x128xf32, #tpu.memory_space<vmem>>, %arg2: memref<1x6x128xf32, #tpu.memory_space<vmem>>, %arg3: memref<3x128x128xf32, #tpu.memory_space<vmem>>, %arg4: memref<3x1x128xf32, #tpu.memory_space<vmem>>, %arg5: memref<1x6x128xf32, #tpu.memory_space<vmem>>, %arg6: memref<6x128xf32, #tpu.memory_space<vmem>>, %arg7: memref<6x128xf32, #tpu.memory_space<vmem>>) attributes {dimension_semantics = [#tpu.dimension_semantics<arbitrary>], iteration_bounds = array<i64: 16>, scalar_prefetch = 0 : i64, scratch_operands = 1 : i64, tpu.core_type = #tpu.core_type<tc>, window_params = [{transform_indices = @transform_0, window_bounds = array<i64: 1, 3, 6, 128>}, {transform_indices = @transform_1, window_bounds = array<i64: 1, 6, 128>}, {pipeline_mode = #tpu.pipeline_mode<synchronous>, transform_indices = @transform_2, window_bounds = array<i64: 3, 128, 128>}, {pipeline_mode = #tpu.pipeline_mode<synchronous>, transform_indices = @transform_3, window_bounds = array<i64: 3, 1, 128>}, {transform_indices = @transform_4, window_bounds = array<i64: 1, 6, 128>}, {pipeline_mode = #tpu.pipeline_mode<synchronous>, transform_indices = @transform_5, window_bounds = array<i64: 6, 128>}]} {
    %c0_i32 = arith.constant 0 : i32
    %0 = arith.cmpi eq, %arg0, %c0_i32 : i32
    %1 = arith.extui %0 : i1 to i32
    %c0_i32_0 = arith.constant 0 : i32
    %2 = arith.cmpi ne, %1, %c0_i32_0 : i32
    scf.if %2 {
      %cst_46 = arith.constant 0.000000e+00 : f32
      %64 = vector.broadcast %cst_46 : f32 to vector<6x128xf32>
      %c0_47 = arith.constant 0 : index
      %c0_48 = arith.constant 0 : index
      %65 = vector.load %arg7[%c0_47, %c0_48] : memref<6x128xf32, #tpu.memory_space<vmem>>, vector<6x128xf32>
      tpu.vector_store %arg7[%c0_47, %c0_48], %64 {strides = array<i32>} : memref<6x128xf32, #tpu.memory_space<vmem>>, vector<6x128xf32>,
    } else {
    }
    %c0 = arith.constant 0 : index
    %c0_1 = arith.constant 0 : index
    %3 = vector.load %arg7[%c0, %c0_1] : memref<6x128xf32, #tpu.memory_space<vmem>>, vector<6x128xf32>
    %c0_2 = arith.constant 0 : index
    %c0_3 = arith.constant 0 : index
    %c0_4 = arith.constant 0 : index
    %4 = vector.load %arg2[%c0_2, %c0_3, %c0_4] : memref<1x6x128xf32, #tpu.memory_space<vmem>>, vector<1x6x128xf32>
    %5 = vector.shape_cast %4 : vector<1x6x128xf32> to vector<6x128xf32>
    %c0_5 = arith.constant 0 : index
    %c0_6 = arith.constant 0 : index
    %c0_7 = arith.constant 0 : index
    %6 = vector.load %arg3[%c0_5, %c0_6, %c0_7] : memref<3x128x128xf32, #tpu.memory_space<vmem>>, vector<1x128x128xf32>
    %7 = vector.shape_cast %6 : vector<1x128x128xf32> to vector<128x128xf32>
    %cst = arith.constant dense<0.000000e+00> : vector<6x128xf32>
    %8 = tpu.matmul %3, %7, %cst {dimension_numbers = #tpu.dot_dimension_numbers<[1], [0], [0], [1], [0, 0, 1, 1], [], []>} : vector<6x128xf32>, vector<128x128xf32>, vector<6x128xf32> -> vector<6x128xf32>
    %c0_8 = arith.constant 0 : index
    %c0_9 = arith.constant 0 : index
    %c0_10 = arith.constant 0 : index
    %9 = vector.load %arg4[%c0_8, %c0_9, %c0_10] : memref<3x1x128xf32, #tpu.memory_space<vmem>>, vector<1x1x128xf32>
    %10 = vector.shape_cast %9 : vector<1x1x128xf32> to vector<1x128xf32>
    %11 = vector.broadcast %10 : vector<1x128xf32> to vector<6x128xf32>
    %12 = arith.addf %8, %11 : vector<6x128xf32>
    %c1 = arith.constant 1 : index
    %c0_11 = arith.constant 0 : index
    %c0_12 = arith.constant 0 : index
    %13 = vector.load %arg3[%c1, %c0_11, %c0_12] : memref<3x128x128xf32, #tpu.memory_space<vmem>>, vector<1x128x128xf32>
    %14 = vector.shape_cast %13 : vector<1x128x128xf32> to vector<128x128xf32>
    %cst_13 = arith.constant dense<0.000000e+00> : vector<6x128xf32>
    %15 = tpu.matmul %3, %14, %cst_13 {dimension_numbers = #tpu.dot_dimension_numbers<[1], [0], [0], [1], [0, 0, 1, 1], [], []>} : vector<6x128xf32>, vector<128x128xf32>, vector<6x128xf32> -> vector<6x128xf32>
    %c1_14 = arith.constant 1 : index
    %c0_15 = arith.constant 0 : index
    %c0_16 = arith.constant 0 : index
    %16 = vector.load %arg4[%c1_14, %c0_15, %c0_16] : memref<3x1x128xf32, #tpu.memory_space<vmem>>, vector<1x1x128xf32>
    %17 = vector.shape_cast %16 : vector<1x1x128xf32> to vector<1x128xf32>
    %18 = vector.broadcast %17 : vector<1x128xf32> to vector<6x128xf32>
    %19 = arith.addf %15, %18 : vector<6x128xf32>
    %c2 = arith.constant 2 : index
    %c0_17 = arith.constant 0 : index
    %c0_18 = arith.constant 0 : index
    %20 = vector.load %arg3[%c2, %c0_17, %c0_18] : memref<3x128x128xf32, #tpu.memory_space<vmem>>, vector<1x128x128xf32>
    %21 = vector.shape_cast %20 : vector<1x128x128xf32> to vector<128x128xf32>
    %cst_19 = arith.constant dense<0.000000e+00> : vector<6x128xf32>
    %22 = tpu.matmul %3, %21, %cst_19 {dimension_numbers = #tpu.dot_dimension_numbers<[1], [0], [0], [1], [0, 0, 1, 1], [], []>} : vector<6x128xf32>, vector<128x128xf32>, vector<6x128xf32> -> vector<6x128xf32>
    %c2_20 = arith.constant 2 : index
    %c0_21 = arith.constant 0 : index
    %c0_22 = arith.constant 0 : index
    %23 = vector.load %arg4[%c2_20, %c0_21, %c0_22] : memref<3x1x128xf32, #tpu.memory_space<vmem>>, vector<1x1x128xf32>
    %24 = vector.shape_cast %23 : vector<1x1x128xf32> to vector<1x128xf32>
    %25 = vector.broadcast %24 : vector<1x128xf32> to vector<6x128xf32>
    %26 = arith.addf %22, %25 : vector<6x128xf32>
    %c0_23 = arith.constant 0 : index
    %c0_24 = arith.constant 0 : index
    %c0_25 = arith.constant 0 : index
    %c0_26 = arith.constant 0 : index
    %27 = vector.load %arg1[%c0_23, %c0_24, %c0_25, %c0_26] : memref<1x3x6x128xf32, #tpu.memory_space<vmem>>, vector<1x1x6x128xf32>
    %28 = vector.shape_cast %27 : vector<1x1x6x128xf32> to vector<6x128xf32>
    %29 = arith.addf %28, %12 : vector<6x128xf32>
    %30 = arith.negf %29 : vector<6x128xf32>
    %31 = math.exp %30 : vector<6x128xf32>
    %cst_27 = arith.constant 1.000000e+00 : f32
    %32 = vector.broadcast %cst_27 : f32 to vector<6x128xf32>
    %33 = arith.addf %32, %31 : vector<6x128xf32>
    %34 = arith.divf %32, %33 : vector<6x128xf32>
    %c0_28 = arith.constant 0 : index
    %c1_29 = arith.constant 1 : index
    %c0_30 = arith.constant 0 : index
    %c0_31 = arith.constant 0 : index
    %35 = vector.load %arg1[%c0_28, %c1_29, %c0_30, %c0_31] : memref<1x3x6x128xf32, #tpu.memory_space<vmem>>, vector<1x1x6x128xf32>
    %36 = vector.shape_cast %35 : vector<1x1x6x128xf32> to vector<6x128xf32>
    %37 = arith.addf %36, %19 : vector<6x128xf32>
    %38 = arith.negf %37 : vector<6x128xf32>
    %39 = math.exp %38 : vector<6x128xf32>
    %cst_32 = arith.constant 1.000000e+00 : f32
    %40 = vector.broadcast %cst_32 : f32 to vector<6x128xf32>
    %41 = arith.addf %40, %39 : vector<6x128xf32>
    %42 = arith.divf %40, %41 : vector<6x128xf32>
    %c0_33 = arith.constant 0 : index
    %c2_34 = arith.constant 2 : index
    %c0_35 = arith.constant 0 : index
    %c0_36 = arith.constant 0 : index
    %43 = vector.load %arg1[%c0_33, %c2_34, %c0_35, %c0_36] : memref<1x3x6x128xf32, #tpu.memory_space<vmem>>, vector<1x1x6x128xf32>
    %44 = vector.shape_cast %43 : vector<1x1x6x128xf32> to vector<6x128xf32>
    %45 = arith.mulf %34, %26 : vector<6x128xf32>
    %46 = arith.addf %44, %45 : vector<6x128xf32>
    %47 = math.tanh %46 : vector<6x128xf32>
    %cst_37 = arith.constant 1.000000e+00 : f32
    %48 = vector.broadcast %cst_37 : f32 to vector<6x128xf32>
    %49 = arith.subf %48, %42 : vector<6x128xf32>
    %50 = arith.mulf %49, %47 : vector<6x128xf32>
    %51 = arith.mulf %42, %3 : vector<6x128xf32>
    %52 = arith.addf %50, %51 : vector<6x128xf32>
    %53 = arith.mulf %5, %52 : vector<6x128xf32>
    %cst_38 = arith.constant 1.000000e+00 : f32
    %54 = vector.broadcast %cst_38 : f32 to vector<6x128xf32>
    %55 = arith.subf %54, %5 : vector<6x128xf32>
    %56 = arith.mulf %55, %3 : vector<6x128xf32>
    %57 = arith.addf %53, %56 : vector<6x128xf32>
    %c0_39 = arith.constant 0 : index
    %c0_40 = arith.constant 0 : index
    %58 = vector.load %arg7[%c0_39, %c0_40] : memref<6x128xf32, #tpu.memory_space<vmem>>, vector<6x128xf32>
    tpu.vector_store %arg7[%c0_39, %c0_40], %57 {strides = array<i32>} : memref<6x128xf32, #tpu.memory_space<vmem>>, vector<6x128xf32>,
    %59 = arith.mulf %5, %52 : vector<6x128xf32>
    %c0_41 = arith.constant 0 : index
    %c0_42 = arith.constant 0 : index
    %c0_43 = arith.constant 0 : index
    %60 = vector.load %arg5[%c0_41, %c0_42, %c0_43] : memref<1x6x128xf32, #tpu.memory_space<vmem>>, vector<1x6x128xf32>
    %61 = vector.shape_cast %60 : vector<1x6x128xf32> to vector<6x128xf32>
    %62 = vector.shape_cast %59 : vector<6x128xf32> to vector<1x6x128xf32>
    tpu.vector_store %arg5[%c0_41, %c0_42, %c0_43], %62 {strides = array<i32>} : memref<1x6x128xf32, #tpu.memory_space<vmem>>, vector<1x6x128xf32>,
    %c0_44 = arith.constant 0 : index
    %c0_45 = arith.constant 0 : index
    %63 = vector.load %arg6[%c0_44, %c0_45] : memref<6x128xf32, #tpu.memory_space<vmem>>, vector<6x128xf32>
    tpu.vector_store %arg6[%c0_44, %c0_45], %57 {strides = array<i32>} : memref<6x128xf32, #tpu.memory_space<vmem>>, vector<6x128xf32>,
    return
  }
  func.func @transform_0(%arg0: i32) -> (i32, i32, i32, i32) {
    %c0_i32 = arith.constant 0 : i32
    %c0_i32_0 = arith.constant 0 : i32
    %c0_i32_1 = arith.constant 0 : i32
    %c0_i32_2 = arith.constant 0 : i32
    return %arg0, %c0_i32, %c0_i32_0, %c0_i32_1 : i32, i32, i32, i32
  }
  func.func @transform_1(%arg0: i32) -> (i32, i32, i32) {
    %c0_i32 = arith.constant 0 : i32
    %c0_i32_0 = arith.constant 0 : i32
    %c0_i32_1 = arith.constant 0 : i32
    return %arg0, %c0_i32, %c0_i32_0 : i32, i32, i32
  }
  func.func @transform_2(%arg0: i32) -> (i32, i32, i32) {
    %c0_i32 = arith.constant 0 : i32
    %c0_i32_0 = arith.constant 0 : i32
    %c0_i32_1 = arith.constant 0 : i32
    %c0_i32_2 = arith.constant 0 : i32
    return %c0_i32, %c0_i32_0, %c0_i32_1 : i32, i32, i32
  }
  func.func @transform_3(%arg0: i32) -> (i32, i32, i32) {
    %c0_i32 = arith.constant 0 : i32
    %c0_i32_0 = arith.constant 0 : i32
    %c0_i32_1 = arith.constant 0 : i32
    %c0_i32_2 = arith.constant 0 : i32
    return %c0_i32, %c0_i32_0, %c0_i32_1 : i32, i32, i32
  }
  func.func @transform_4(%arg0: i32) -> (i32, i32, i32) {
    %c0_i32 = arith.constant 0 : i32
    %c0_i32_0 = arith.constant 0 : i32
    %c0_i32_1 = arith.constant 0 : i32
    return %arg0, %c0_i32, %c0_i32_0 : i32, i32, i32
  }
  func.func @transform_5(%arg0: i32) -> (i32, i32) {
    %c0_i32 = arith.constant 0 : i32
    %c0_i32_0 = arith.constant 0 : i32
    %c0_i32_1 = arith.constant 0 : i32
    return %c0_i32, %c0_i32_0 : i32, i32
  }
}

module attributes {stable_mosaic.version = 11 : i64} {
  func.func @_ln_kernel(%arg0: i32, %arg1: memref<48x128xf32, #tpu.memory_space<vmem>>, %arg2: memref<48x128xf32, #tpu.memory_space<vmem>>) attributes {dimension_semantics = [#tpu.dimension_semantics<parallel>], iteration_bounds = array<i64: 2>, scalar_prefetch = 0 : i64, scratch_operands = 0 : i64, tpu.core_type = #tpu.core_type<tc>, window_params = [{transform_indices = @transform_0, window_bounds = array<i64: 48, 128>}, {transform_indices = @transform_1, window_bounds = array<i64: 48, 128>}]} {
    %c0 = arith.constant 0 : index
    %c0_0 = arith.constant 0 : index
    %0 = vector.load %arg1[%c0, %c0_0] : memref<48x128xf32, #tpu.memory_space<vmem>>, vector<48x128xf32>
    %cst = arith.constant dense<0.000000e+00> : vector<48xf32>
    %1 = vector.multi_reduction <add>, %0, %cst [1] : vector<48x128xf32> to vector<48xf32>
    %2 = vector.shape_cast %1 : vector<48xf32> to vector<48x1xf32>
    %cst_1 = arith.constant 1.280000e+02 : f32
    %3 = vector.broadcast %cst_1 : f32 to vector<48x1xf32>
    %4 = arith.divf %2, %3 : vector<48x1xf32>
    %5 = vector.broadcast %4 : vector<48x1xf32> to vector<48x128xf32>
    %6 = arith.subf %0, %5 : vector<48x128xf32>
    %7 = arith.mulf %6, %6 : vector<48x128xf32>
    %cst_2 = arith.constant dense<0.000000e+00> : vector<48xf32>
    %8 = vector.multi_reduction <add>, %7, %cst_2 [1] : vector<48x128xf32> to vector<48xf32>
    %9 = vector.shape_cast %8 : vector<48xf32> to vector<48x1xf32>
    %cst_3 = arith.constant 1.280000e+02 : f32
    %10 = vector.broadcast %cst_3 : f32 to vector<48x1xf32>
    %11 = arith.divf %9, %10 : vector<48x1xf32>
    %12 = vector.broadcast %4 : vector<48x1xf32> to vector<48x128xf32>
    %13 = arith.subf %0, %12 : vector<48x128xf32>
    %cst_4 = arith.constant 9.99999974E-6 : f32
    %14 = vector.broadcast %cst_4 : f32 to vector<48x1xf32>
    %15 = arith.addf %11, %14 : vector<48x1xf32>
    %16 = math.rsqrt %15 : vector<48x1xf32>
    %17 = vector.broadcast %16 : vector<48x1xf32> to vector<48x128xf32>
    %18 = arith.mulf %13, %17 : vector<48x128xf32>
    %c0_5 = arith.constant 0 : index
    %c0_6 = arith.constant 0 : index
    %19 = vector.load %arg2[%c0_5, %c0_6] : memref<48x128xf32, #tpu.memory_space<vmem>>, vector<48x128xf32>
    tpu.vector_store %arg2[%c0_5, %c0_6], %18 {strides = array<i32>} : memref<48x128xf32, #tpu.memory_space<vmem>>, vector<48x128xf32>,
    return
  }
  func.func @transform_0(%arg0: i32) -> (i32, i32) {
    %c0_i32 = arith.constant 0 : i32
    %c0_i32_0 = arith.constant 0 : i32
    return %arg0, %c0_i32 : i32, i32
  }
  func.func @transform_1(%arg0: i32) -> (i32, i32) {
    %c0_i32 = arith.constant 0 : i32
    %c0_i32_0 = arith.constant 0 : i32
    return %arg0, %c0_i32 : i32, i32
  }
}

module attributes {stable_mosaic.version = 11 : i64} {
  func.func @_ln_kernel(%arg0: i32, %arg1: memref<16x128xf32, #tpu.memory_space<vmem>>, %arg2: memref<16x128xf32, #tpu.memory_space<vmem>>) attributes {dimension_semantics = [#tpu.dimension_semantics<parallel>], iteration_bounds = array<i64: 1>, scalar_prefetch = 0 : i64, scratch_operands = 0 : i64, tpu.core_type = #tpu.core_type<tc>, window_params = [{transform_indices = @transform_0, window_bounds = array<i64: 16, 128>}, {transform_indices = @transform_1, window_bounds = array<i64: 16, 128>}]} {
    %c0 = arith.constant 0 : index
    %c0_0 = arith.constant 0 : index
    %0 = vector.load %arg1[%c0, %c0_0] : memref<16x128xf32, #tpu.memory_space<vmem>>, vector<16x128xf32>
    %cst = arith.constant dense<0.000000e+00> : vector<16xf32>
    %1 = vector.multi_reduction <add>, %0, %cst [1] : vector<16x128xf32> to vector<16xf32>
    %2 = vector.shape_cast %1 : vector<16xf32> to vector<16x1xf32>
    %cst_1 = arith.constant 1.280000e+02 : f32
    %3 = vector.broadcast %cst_1 : f32 to vector<16x1xf32>
    %4 = arith.divf %2, %3 : vector<16x1xf32>
    %5 = vector.broadcast %4 : vector<16x1xf32> to vector<16x128xf32>
    %6 = arith.subf %0, %5 : vector<16x128xf32>
    %7 = arith.mulf %6, %6 : vector<16x128xf32>
    %cst_2 = arith.constant dense<0.000000e+00> : vector<16xf32>
    %8 = vector.multi_reduction <add>, %7, %cst_2 [1] : vector<16x128xf32> to vector<16xf32>
    %9 = vector.shape_cast %8 : vector<16xf32> to vector<16x1xf32>
    %cst_3 = arith.constant 1.280000e+02 : f32
    %10 = vector.broadcast %cst_3 : f32 to vector<16x1xf32>
    %11 = arith.divf %9, %10 : vector<16x1xf32>
    %12 = vector.broadcast %4 : vector<16x1xf32> to vector<16x128xf32>
    %13 = arith.subf %0, %12 : vector<16x128xf32>
    %cst_4 = arith.constant 9.99999974E-6 : f32
    %14 = vector.broadcast %cst_4 : f32 to vector<16x1xf32>
    %15 = arith.addf %11, %14 : vector<16x1xf32>
    %16 = math.rsqrt %15 : vector<16x1xf32>
    %17 = vector.broadcast %16 : vector<16x1xf32> to vector<16x128xf32>
    %18 = arith.mulf %13, %17 : vector<16x128xf32>
    %c0_5 = arith.constant 0 : index
    %c0_6 = arith.constant 0 : index
    %19 = vector.load %arg2[%c0_5, %c0_6] : memref<16x128xf32, #tpu.memory_space<vmem>>, vector<16x128xf32>
    tpu.vector_store %arg2[%c0_5, %c0_6], %18 {strides = array<i32>} : memref<16x128xf32, #tpu.memory_space<vmem>>, vector<16x128xf32>,
    return
  }
  func.func @transform_0(%arg0: i32) -> (i32, i32) {
    %c0_i32 = arith.constant 0 : i32
    %c0_i32_0 = arith.constant 0 : i32
    return %arg0, %c0_i32 : i32, i32
  }
  func.func @transform_1(%arg0: i32) -> (i32, i32) {
    %c0_i32 = arith.constant 0 : i32
    %c0_i32_0 = arith.constant 0 : i32
    return %arg0, %c0_i32 : i32, i32
  }
}

module attributes {stable_mosaic.version = 11 : i64} {
  func.func @_graph_kernel(%arg0: i32, %arg1: memref<1x24x128xbf16, #tpu.memory_space<vmem>>, %arg2: memref<1x24x1xf32, #tpu.memory_space<vmem>>, %arg3: memref<128x128xbf16, #tpu.memory_space<vmem>>, %arg4: memref<1x128xf32, #tpu.memory_space<vmem>>, %arg5: memref<128x128xbf16, #tpu.memory_space<vmem>>, %arg6: memref<1x128xf32, #tpu.memory_space<vmem>>, %arg7: memref<128x128xbf16, #tpu.memory_space<vmem>>, %arg8: memref<1x128xf32, #tpu.memory_space<vmem>>, %arg9: memref<128x64xbf16, #tpu.memory_space<vmem>>, %arg10: memref<1x64xf32, #tpu.memory_space<vmem>>, %arg11: memref<1x64xf32, #tpu.memory_space<vmem>>, %arg12: memref<1x1xf32, #tpu.memory_space<vmem>>, %arg13: memref<1x1x128xf32, #tpu.memory_space<vmem>>) attributes {dimension_semantics = [#tpu.dimension_semantics<parallel>], iteration_bounds = array<i64: 6>, scalar_prefetch = 0 : i64, scratch_operands = 0 : i64, tpu.core_type = #tpu.core_type<tc>, window_params = [{transform_indices = @transform_0, window_bounds = array<i64: 1, 24, 128>}, {transform_indices = @transform_1, window_bounds = array<i64: 1, 24, 1>}, {pipeline_mode = #tpu.pipeline_mode<synchronous>, transform_indices = @transform_2, window_bounds = array<i64: 128, 128>}, {pipeline_mode = #tpu.pipeline_mode<synchronous>, transform_indices = @transform_3, window_bounds = array<i64: 1, 128>}, {pipeline_mode = #tpu.pipeline_mode<synchronous>, transform_indices = @transform_4, window_bounds = array<i64: 128, 128>}, {pipeline_mode = #tpu.pipeline_mode<synchronous>, transform_indices = @transform_5, window_bounds = array<i64: 1, 128>}, {pipeline_mode = #tpu.pipeline_mode<synchronous>, transform_indices = @transform_6, window_bounds = array<i64: 128, 128>}, {pipeline_mode = #tpu.pipeline_mode<synchronous>, transform_indices = @transform_7, window_bounds = array<i64: 1, 128>}, {pipeline_mode = #tpu.pipeline_mode<synchronous>, transform_indices = @transform_8, window_bounds = array<i64: 128, 64>}, {pipeline_mode = #tpu.pipeline_mode<synchronous>, transform_indices = @transform_9, window_bounds = array<i64: 1, 64>}, {pipeline_mode = #tpu.pipeline_mode<synchronous>, transform_indices = @transform_10, window_bounds = array<i64: 1, 64>}, {pipeline_mode = #tpu.pipeline_mode<synchronous>, transform_indices = @transform_11, window_bounds = array<i64: 1, 1>}, {transform_indices = @transform_12, window_bounds = array<i64: 1, 1, 128>}]} {
    %c0 = arith.constant 0 : index
    %c0_0 = arith.constant 0 : index
    %c0_1 = arith.constant 0 : index
    %0 = vector.load %arg1[%c0, %c0_0, %c0_1] : memref<1x24x128xbf16, #tpu.memory_space<vmem>>, vector<1x24x128xbf16>
    %1 = vector.shape_cast %0 : vector<1x24x128xbf16> to vector<24x128xbf16>
    %c0_2 = arith.constant 0 : index
    %c0_3 = arith.constant 0 : index
    %2 = vector.load %arg3[%c0_2, %c0_3] : memref<128x128xbf16, #tpu.memory_space<vmem>>, vector<128x128xbf16>
    %cst = arith.constant dense<0.000000e+00> : vector<24x128xf32>
    %3 = tpu.matmul %1, %2, %cst {dimension_numbers = #tpu.dot_dimension_numbers<[1], [0], [0], [1], [0, 0, 1, 1], [], []>} : vector<24x128xbf16>, vector<128x128xbf16>, vector<24x128xf32> -> vector<24x128xf32>
    %c0_4 = arith.constant 0 : index
    %c0_5 = arith.constant 0 : index
    %4 = vector.load %arg4[%c0_4, %c0_5] : memref<1x128xf32, #tpu.memory_space<vmem>>, vector<1x128xf32>
    %5 = vector.broadcast %4 : vector<1x128xf32> to vector<24x128xf32>
    %6 = arith.addf %3, %5 : vector<24x128xf32>
    %cst_6 = arith.constant 0.000000e+00 : f32
    %7 = vector.broadcast %cst_6 : f32 to vector<24x128xf32>
    %8 = arith.maximumf %6, %7 : vector<24x128xf32>
    %9 = arith.truncf %8 : vector<24x128xf32> to vector<24x128xbf16>
    %c0_7 = arith.constant 0 : index
    %c0_8 = arith.constant 0 : index
    %10 = vector.load %arg5[%c0_7, %c0_8] : memref<128x128xbf16, #tpu.memory_space<vmem>>, vector<128x128xbf16>
    %cst_9 = arith.constant dense<0.000000e+00> : vector<24x128xf32>
    %11 = tpu.matmul %9, %10, %cst_9 {dimension_numbers = #tpu.dot_dimension_numbers<[1], [0], [0], [1], [0, 0, 1, 1], [], []>} : vector<24x128xbf16>, vector<128x128xbf16>, vector<24x128xf32> -> vector<24x128xf32>
    %c0_10 = arith.constant 0 : index
    %c0_11 = arith.constant 0 : index
    %12 = vector.load %arg6[%c0_10, %c0_11] : memref<1x128xf32, #tpu.memory_space<vmem>>, vector<1x128xf32>
    %13 = vector.broadcast %12 : vector<1x128xf32> to vector<24x128xf32>
    %14 = arith.addf %11, %13 : vector<24x128xf32>
    %cst_12 = arith.constant 0.000000e+00 : f32
    %15 = vector.broadcast %cst_12 : f32 to vector<24x128xf32>
    %16 = arith.maximumf %14, %15 : vector<24x128xf32>
    %17 = arith.truncf %16 : vector<24x128xf32> to vector<24x128xbf16>
    %cst_13 = arith.constant dense<0.000000e+00> : vector<24x24xf32>
    %18 = tpu.matmul %17, %17, %cst_13 {dimension_numbers = #tpu.dot_dimension_numbers<[1], [1], [0], [0], [0, 0, 1, 0], [], []>} : vector<24x128xbf16>, vector<24x128xbf16>, vector<24x24xf32> -> vector<24x24xf32>
    %c0_14 = arith.constant 0 : index
    %c0_15 = arith.constant 0 : index
    %19 = vector.load %arg7[%c0_14, %c0_15] : memref<128x128xbf16, #tpu.memory_space<vmem>>, vector<128x128xbf16>
    %cst_16 = arith.constant dense<0.000000e+00> : vector<24x128xf32>
    %20 = tpu.matmul %1, %19, %cst_16 {dimension_numbers = #tpu.dot_dimension_numbers<[1], [0], [0], [1], [0, 0, 1, 1], [], []>} : vector<24x128xbf16>, vector<128x128xbf16>, vector<24x128xf32> -> vector<24x128xf32>
    %c0_17 = arith.constant 0 : index
    %c0_18 = arith.constant 0 : index
    %21 = vector.load %arg8[%c0_17, %c0_18] : memref<1x128xf32, #tpu.memory_space<vmem>>, vector<1x128xf32>
    %22 = vector.broadcast %21 : vector<1x128xf32> to vector<24x128xf32>
    %23 = arith.addf %20, %22 : vector<24x128xf32>
    %24 = arith.truncf %18 : vector<24x24xf32> to vector<24x24xbf16>
    %25 = arith.truncf %23 : vector<24x128xf32> to vector<24x128xbf16>
    %cst_19 = arith.constant dense<0.000000e+00> : vector<24x128xf32>
    %26 = tpu.matmul %24, %25, %cst_19 {dimension_numbers = #tpu.dot_dimension_numbers<[1], [0], [0], [1], [0, 0, 1, 1], [], []>} : vector<24x24xbf16>, vector<24x128xbf16>, vector<24x128xf32> -> vector<24x128xf32>
    %cst_20 = arith.constant 0.000000e+00 : f32
    %27 = vector.broadcast %cst_20 : f32 to vector<24x128xf32>
    %28 = arith.maximumf %26, %27 : vector<24x128xf32>
    %29 = arith.truncf %28 : vector<24x128xf32> to vector<24x128xbf16>
    %c0_21 = arith.constant 0 : index
    %c0_22 = arith.constant 0 : index
    %30 = vector.load %arg9[%c0_21, %c0_22] : memref<128x64xbf16, #tpu.memory_space<vmem>>, vector<128x64xbf16>
    %cst_23 = arith.constant dense<0.000000e+00> : vector<24x64xf32>
    %31 = tpu.matmul %29, %30, %cst_23 {dimension_numbers = #tpu.dot_dimension_numbers<[1], [0], [0], [1], [0, 0, 1, 1], [], []>} : vector<24x128xbf16>, vector<128x64xbf16>, vector<24x64xf32> -> vector<24x64xf32>
    %c0_24 = arith.constant 0 : index
    %c0_25 = arith.constant 0 : index
    %32 = vector.load %arg10[%c0_24, %c0_25] : memref<1x64xf32, #tpu.memory_space<vmem>>, vector<1x64xf32>
    %33 = vector.broadcast %32 : vector<1x64xf32> to vector<24x64xf32>
    %34 = arith.addf %31, %33 : vector<24x64xf32>
    %35 = math.tanh %34 : vector<24x64xf32>
    %c0_26 = arith.constant 0 : index
    %c0_27 = arith.constant 0 : index
    %36 = vector.load %arg11[%c0_26, %c0_27] : memref<1x64xf32, #tpu.memory_space<vmem>>, vector<1x64xf32>
    %37 = vector.broadcast %36 : vector<1x64xf32> to vector<24x64xf32>
    %38 = arith.mulf %35, %37 : vector<24x64xf32>
    %cst_28 = arith.constant dense<0.000000e+00> : vector<24xf32>
    %39 = vector.multi_reduction <add>, %38, %cst_28 [1] : vector<24x64xf32> to vector<24xf32>
    %40 = vector.shape_cast %39 : vector<24xf32> to vector<24x1xf32>
    %c0_29 = arith.constant 0 : index
    %c0_30 = arith.constant 0 : index
    %41 = vector.load %arg12[%c0_29, %c0_30] : memref<1x1xf32, #tpu.memory_space<vmem>>, vector<1x1xf32>
    %42 = vector.broadcast %41 : vector<1x1xf32> to vector<24x1xf32>
    %43 = arith.addf %40, %42 : vector<24x1xf32>
    %cst_31 = arith.constant dense<0xFF800000> : vector<1xf32>
    %44 = vector.multi_reduction <maximumf>, %43, %cst_31 [0] : vector<24x1xf32> to vector<1xf32>
    %45 = vector.shape_cast %44 : vector<1xf32> to vector<1x1xf32>
    %46 = vector.broadcast %45 : vector<1x1xf32> to vector<24x1xf32>
    %47 = arith.subf %43, %46 : vector<24x1xf32>
    %48 = math.exp %47 : vector<24x1xf32>
    %cst_32 = arith.constant dense<0.000000e+00> : vector<1xf32>
    %49 = vector.multi_reduction <add>, %48, %cst_32 [0] : vector<24x1xf32> to vector<1xf32>
    %50 = vector.shape_cast %49 : vector<1xf32> to vector<1x1xf32>
    %51 = vector.broadcast %50 : vector<1x1xf32> to vector<24x1xf32>
    %52 = arith.divf %48, %51 : vector<24x1xf32>
    %c0_33 = arith.constant 0 : index
    %c0_34 = arith.constant 0 : index
    %c0_35 = arith.constant 0 : index
    %53 = vector.load %arg2[%c0_33, %c0_34, %c0_35] : memref<1x24x1xf32, #tpu.memory_space<vmem>>, vector<1x24x1xf32>
    %54 = vector.shape_cast %53 : vector<1x24x1xf32> to vector<24x1xf32>
    %55 = vector.broadcast %54 : vector<24x1xf32> to vector<24x128xf32>
    %56 = arith.mulf %28, %55 : vector<24x128xf32>
    %57 = vector.broadcast %52 : vector<24x1xf32> to vector<24x128xf32>
    %58 = arith.mulf %56, %57 : vector<24x128xf32>
    %cst_36 = arith.constant dense<0.000000e+00> : vector<128xf32>
    %59 = vector.multi_reduction <add>, %58, %cst_36 [0] : vector<24x128xf32> to vector<128xf32>
    %60 = vector.shape_cast %59 : vector<128xf32> to vector<1x128xf32>
    %c0_37 = arith.constant 0 : index
    %c0_38 = arith.constant 0 : index
    %c0_39 = arith.constant 0 : index
    %61 = vector.load %arg13[%c0_37, %c0_38, %c0_39] : memref<1x1x128xf32, #tpu.memory_space<vmem>>, vector<1x1x128xf32>
    %62 = vector.shape_cast %61 : vector<1x1x128xf32> to vector<1x128xf32>
    %63 = vector.shape_cast %60 : vector<1x128xf32> to vector<1x1x128xf32>
    tpu.vector_store %arg13[%c0_37, %c0_38, %c0_39], %63 {strides = array<i32>} : memref<1x1x128xf32, #tpu.memory_space<vmem>>, vector<1x1x128xf32>,
    return
  }
  func.func @transform_0(%arg0: i32) -> (i32, i32, i32) {
    %c0_i32 = arith.constant 0 : i32
    %c0_i32_0 = arith.constant 0 : i32
    %c0_i32_1 = arith.constant 0 : i32
    return %arg0, %c0_i32, %c0_i32_0 : i32, i32, i32
  }
  func.func @transform_1(%arg0: i32) -> (i32, i32, i32) {
    %c0_i32 = arith.constant 0 : i32
    %c0_i32_0 = arith.constant 0 : i32
    %c0_i32_1 = arith.constant 0 : i32
    return %arg0, %c0_i32, %c0_i32_0 : i32, i32, i32
  }
  func.func @transform_2(%arg0: i32) -> (i32, i32) {
    %c0_i32 = arith.constant 0 : i32
    %c0_i32_0 = arith.constant 0 : i32
    %c0_i32_1 = arith.constant 0 : i32
    return %c0_i32, %c0_i32_0 : i32, i32
  }
  func.func @transform_3(%arg0: i32) -> (i32, i32) {
    %c0_i32 = arith.constant 0 : i32
    %c0_i32_0 = arith.constant 0 : i32
    %c0_i32_1 = arith.constant 0 : i32
    return %c0_i32, %c0_i32_0 : i32, i32
  }
  func.func @transform_4(%arg0: i32) -> (i32, i32) {
    %c0_i32 = arith.constant 0 : i32
    %c0_i32_0 = arith.constant 0 : i32
    %c0_i32_1 = arith.constant 0 : i32
    return %c0_i32, %c0_i32_0 : i32, i32
  }
  func.func @transform_5(%arg0: i32) -> (i32, i32) {
    %c0_i32 = arith.constant 0 : i32
    %c0_i32_0 = arith.constant 0 : i32
    %c0_i32_1 = arith.constant 0 : i32
    return %c0_i32, %c0_i32_0 : i32, i32
  }
  func.func @transform_6(%arg0: i32) -> (i32, i32) {
    %c0_i32 = arith.constant 0 : i32
    %c0_i32_0 = arith.constant 0 : i32
    %c0_i32_1 = arith.constant 0 : i32
    return %c0_i32, %c0_i32_0 : i32, i32
  }
  func.func @transform_7(%arg0: i32) -> (i32, i32) {
    %c0_i32 = arith.constant 0 : i32
    %c0_i32_0 = arith.constant 0 : i32
    %c0_i32_1 = arith.constant 0 : i32
    return %c0_i32, %c0_i32_0 : i32, i32
  }
  func.func @transform_8(%arg0: i32) -> (i32, i32) {
    %c0_i32 = arith.constant 0 : i32
    %c0_i32_0 = arith.constant 0 : i32
    %c0_i32_1 = arith.constant 0 : i32
    return %c0_i32, %c0_i32_0 : i32, i32
  }
  func.func @transform_9(%arg0: i32) -> (i32, i32) {
    %c0_i32 = arith.constant 0 : i32
    %c0_i32_0 = arith.constant 0 : i32
    %c0_i32_1 = arith.constant 0 : i32
    return %c0_i32, %c0_i32_0 : i32, i32
  }
  func.func @transform_10(%arg0: i32) -> (i32, i32) {
    %c0_i32 = arith.constant 0 : i32
    %c0_i32_0 = arith.constant 0 : i32
    %c0_i32_1 = arith.constant 0 : i32
    return %c0_i32, %c0_i32_0 : i32, i32
  }
  func.func @transform_11(%arg0: i32) -> (i32, i32) {
    %c0_i32 = arith.constant 0 : i32
    %c0_i32_0 = arith.constant 0 : i32
    %c0_i32_1 = arith.constant 0 : i32
    return %c0_i32, %c0_i32_0 : i32, i32
  }
  func.func @transform_12(%arg0: i32) -> (i32, i32, i32) {
    %c0_i32 = arith.constant 0 : i32
    %c0_i32_0 = arith.constant 0 : i32
    %c0_i32_1 = arith.constant 0 : i32
    return %arg0, %c0_i32, %c0_i32_0 : i32, i32, i32
  }
}

module attributes {stable_mosaic.version = 11 : i64} {
  func.func @_block_proj_kernel(%arg0: i32, %arg1: memref<1x6x128xbf16, #tpu.memory_space<vmem>>, %arg2: memref<1x128x1600xbf16, #tpu.memory_space<vmem>>, %arg3: memref<1x1x1600xf32, #tpu.memory_space<vmem>>, %arg4: memref<1x6x1600xbf16, #tpu.memory_space<vmem>>) attributes {dimension_semantics = [#tpu.dimension_semantics<parallel>], iteration_bounds = array<i64: 2>, scalar_prefetch = 0 : i64, scratch_operands = 0 : i64, tpu.core_type = #tpu.core_type<tc>, window_params = [{transform_indices = @transform_0, window_bounds = array<i64: 1, 6, 128>}, {transform_indices = @transform_1, window_bounds = array<i64: 1, 128, 1600>}, {transform_indices = @transform_2, window_bounds = array<i64: 1, 1, 1600>}, {transform_indices = @transform_3, window_bounds = array<i64: 1, 6, 1600>}]} {
    %c0 = arith.constant 0 : index
    %c0_0 = arith.constant 0 : index
    %c0_1 = arith.constant 0 : index
    %0 = vector.load %arg1[%c0, %c0_0, %c0_1] : memref<1x6x128xbf16, #tpu.memory_space<vmem>>, vector<1x6x128xbf16>
    %1 = vector.shape_cast %0 : vector<1x6x128xbf16> to vector<6x128xbf16>
    %c0_2 = arith.constant 0 : index
    %c0_3 = arith.constant 0 : index
    %c0_4 = arith.constant 0 : index
    %2 = vector.load %arg2[%c0_2, %c0_3, %c0_4] : memref<1x128x1600xbf16, #tpu.memory_space<vmem>>, vector<1x128x1600xbf16>
    %3 = vector.shape_cast %2 : vector<1x128x1600xbf16> to vector<128x1600xbf16>
    %cst = arith.constant dense<0.000000e+00> : vector<6x1600xf32>
    %4 = tpu.matmul %1, %3, %cst {dimension_numbers = #tpu.dot_dimension_numbers<[1], [0], [0], [1], [0, 0, 1, 1], [], []>} : vector<6x128xbf16>, vector<128x1600xbf16>, vector<6x1600xf32> -> vector<6x1600xf32>
    %c0_5 = arith.constant 0 : index
    %c0_6 = arith.constant 0 : index
    %c0_7 = arith.constant 0 : index
    %5 = vector.load %arg3[%c0_5, %c0_6, %c0_7] : memref<1x1x1600xf32, #tpu.memory_space<vmem>>, vector<1x1x1600xf32>
    %6 = vector.shape_cast %5 : vector<1x1x1600xf32> to vector<1x1600xf32>
    %7 = vector.broadcast %6 : vector<1x1600xf32> to vector<6x1600xf32>
    %8 = arith.addf %4, %7 : vector<6x1600xf32>
    %9 = arith.truncf %8 : vector<6x1600xf32> to vector<6x1600xbf16>
    %c0_8 = arith.constant 0 : index
    %c0_9 = arith.constant 0 : index
    %c0_10 = arith.constant 0 : index
    %10 = vector.load %arg4[%c0_8, %c0_9, %c0_10] : memref<1x6x1600xbf16, #tpu.memory_space<vmem>>, vector<1x6x1600xbf16>
    %11 = vector.shape_cast %10 : vector<1x6x1600xbf16> to vector<6x1600xbf16>
    %12 = vector.shape_cast %9 : vector<6x1600xbf16> to vector<1x6x1600xbf16>
    tpu.vector_store %arg4[%c0_8, %c0_9, %c0_10], %12 {strides = array<i32>} : memref<1x6x1600xbf16, #tpu.memory_space<vmem>>, vector<1x6x1600xbf16>,
    return
  }
  func.func @transform_0(%arg0: i32) -> (i32, i32, i32) {
    %c0_i32 = arith.constant 0 : i32
    %c0_i32_0 = arith.constant 0 : i32
    %c0_i32_1 = arith.constant 0 : i32
    return %arg0, %c0_i32, %c0_i32_0 : i32, i32, i32
  }
  func.func @transform_1(%arg0: i32) -> (i32, i32, i32) {
    %c0_i32 = arith.constant 0 : i32
    %c0_i32_0 = arith.constant 0 : i32
    %c0_i32_1 = arith.constant 0 : i32
    return %arg0, %c0_i32, %c0_i32_0 : i32, i32, i32
  }
  func.func @transform_2(%arg0: i32) -> (i32, i32, i32) {
    %c0_i32 = arith.constant 0 : i32
    %c0_i32_0 = arith.constant 0 : i32
    %c0_i32_1 = arith.constant 0 : i32
    return %arg0, %c0_i32, %c0_i32_0 : i32, i32, i32
  }
  func.func @transform_3(%arg0: i32) -> (i32, i32, i32) {
    %c0_i32 = arith.constant 0 : i32
    %c0_i32_0 = arith.constant 0 : i32
    %c0_i32_1 = arith.constant 0 : i32
    return %arg0, %c0_i32, %c0_i32_0 : i32, i32, i32
  }
}

module attributes {stable_mosaic.version = 11 : i64} {
  func.func @_block_core_kernel(%arg0: i32, %arg1: memref<1x6x80xbf16, #tpu.memory_space<vmem>>, %arg2: memref<1x6x80xbf16, #tpu.memory_space<vmem>>, %arg3: memref<1x80x1200xbf16, #tpu.memory_space<vmem>>, %arg4: memref<1x1x1200xf32, #tpu.memory_space<vmem>>, %arg5: memref<1x80x1200xbf16, #tpu.memory_space<vmem>>, %arg6: memref<1x1x1200xf32, #tpu.memory_space<vmem>>, %arg7: memref<1200x80xf32, #tpu.memory_space<vmem>>, %arg8: memref<1x6x80xf32, #tpu.memory_space<vmem>>) attributes {dimension_semantics = [#tpu.dimension_semantics<parallel>], iteration_bounds = array<i64: 20>, scalar_prefetch = 0 : i64, scratch_operands = 0 : i64, tpu.core_type = #tpu.core_type<tc>, window_params = [{transform_indices = @transform_0, window_bounds = array<i64: 1, 6, 80>}, {transform_indices = @transform_1, window_bounds = array<i64: 1, 6, 80>}, {transform_indices = @transform_2, window_bounds = array<i64: 1, 80, 1200>}, {transform_indices = @transform_3, window_bounds = array<i64: 1, 1, 1200>}, {transform_indices = @transform_4, window_bounds = array<i64: 1, 80, 1200>}, {transform_indices = @transform_5, window_bounds = array<i64: 1, 1, 1200>}, {pipeline_mode = #tpu.pipeline_mode<synchronous>, transform_indices = @transform_6, window_bounds = array<i64: 1200, 80>}, {transform_indices = @transform_7, window_bounds = array<i64: 1, 6, 80>}]} {
    %c0 = arith.constant 0 : index
    %c0_0 = arith.constant 0 : index
    %c0_1 = arith.constant 0 : index
    %0 = vector.load %arg1[%c0, %c0_0, %c0_1] : memref<1x6x80xbf16, #tpu.memory_space<vmem>>, vector<1x6x80xbf16>
    %1 = vector.shape_cast %0 : vector<1x6x80xbf16> to vector<6x80xbf16>
    %c0_2 = arith.constant 0 : index
    %c0_3 = arith.constant 0 : index
    %c0_4 = arith.constant 0 : index
    %2 = vector.load %arg3[%c0_2, %c0_3, %c0_4] : memref<1x80x1200xbf16, #tpu.memory_space<vmem>>, vector<1x80x1200xbf16>
    %3 = vector.shape_cast %2 : vector<1x80x1200xbf16> to vector<80x1200xbf16>
    %cst = arith.constant dense<0.000000e+00> : vector<6x1200xf32>
    %4 = tpu.matmul %1, %3, %cst {dimension_numbers = #tpu.dot_dimension_numbers<[1], [0], [0], [1], [0, 0, 1, 1], [], []>} : vector<6x80xbf16>, vector<80x1200xbf16>, vector<6x1200xf32> -> vector<6x1200xf32>
    %c0_5 = arith.constant 0 : index
    %c0_6 = arith.constant 0 : index
    %c0_7 = arith.constant 0 : index
    %5 = vector.load %arg4[%c0_5, %c0_6, %c0_7] : memref<1x1x1200xf32, #tpu.memory_space<vmem>>, vector<1x1x1200xf32>
    %6 = vector.shape_cast %5 : vector<1x1x1200xf32> to vector<1x1200xf32>
    %7 = vector.broadcast %6 : vector<1x1200xf32> to vector<6x1200xf32>
    %8 = arith.addf %4, %7 : vector<6x1200xf32>
    %c0_8 = arith.constant 0 : index
    %c0_9 = arith.constant 0 : index
    %c0_10 = arith.constant 0 : index
    %9 = vector.load %arg2[%c0_8, %c0_9, %c0_10] : memref<1x6x80xbf16, #tpu.memory_space<vmem>>, vector<1x6x80xbf16>
    %10 = vector.shape_cast %9 : vector<1x6x80xbf16> to vector<6x80xbf16>
    %c0_11 = arith.constant 0 : index
    %c0_12 = arith.constant 0 : index
    %c0_13 = arith.constant 0 : index
    %11 = vector.load %arg5[%c0_11, %c0_12, %c0_13] : memref<1x80x1200xbf16, #tpu.memory_space<vmem>>, vector<1x80x1200xbf16>
    %12 = vector.shape_cast %11 : vector<1x80x1200xbf16> to vector<80x1200xbf16>
    %cst_14 = arith.constant dense<0.000000e+00> : vector<6x1200xf32>
    %13 = tpu.matmul %10, %12, %cst_14 {dimension_numbers = #tpu.dot_dimension_numbers<[1], [0], [0], [1], [0, 0, 1, 1], [], []>} : vector<6x80xbf16>, vector<80x1200xbf16>, vector<6x1200xf32> -> vector<6x1200xf32>
    %c0_15 = arith.constant 0 : index
    %c0_16 = arith.constant 0 : index
    %c0_17 = arith.constant 0 : index
    %14 = vector.load %arg6[%c0_15, %c0_16, %c0_17] : memref<1x1x1200xf32, #tpu.memory_space<vmem>>, vector<1x1x1200xf32>
    %15 = vector.shape_cast %14 : vector<1x1x1200xf32> to vector<1x1200xf32>
    %16 = vector.broadcast %15 : vector<1x1200xf32> to vector<6x1200xf32>
    %17 = arith.addf %13, %16 : vector<6x1200xf32>
    %18 = arith.mulf %8, %17 : vector<6x1200xf32>
    %c0_18 = arith.constant 0 : index
    %c0_19 = arith.constant 0 : index
    %19 = vector.load %arg7[%c0_18, %c0_19] : memref<1200x80xf32, #tpu.memory_space<vmem>>, vector<1200x80xf32>
    %cst_20 = arith.constant dense<0.000000e+00> : vector<6x80xf32>
    %20 = tpu.matmul %18, %19, %cst_20 {dimension_numbers = #tpu.dot_dimension_numbers<[1], [0], [0], [1], [0, 0, 1, 1], [], []>} : vector<6x1200xf32>, vector<1200x80xf32>, vector<6x80xf32> -> vector<6x80xf32>
    %cst_21 = arith.constant 0.000000e+00 : f32
    %21 = vector.broadcast %cst_21 : f32 to vector<6x80xf32>
    %22 = arith.maximumf %20, %21 : vector<6x80xf32>
    %23 = math.sqrt %22 : vector<6x80xf32>
    %cst_22 = arith.constant 0.000000e+00 : f32
    %24 = vector.broadcast %cst_22 : f32 to vector<6x80xf32>
    %25 = arith.subf %24, %20 : vector<6x80xf32>
    %cst_23 = arith.constant 0.000000e+00 : f32
    %26 = vector.broadcast %cst_23 : f32 to vector<6x80xf32>
    %27 = arith.maximumf %25, %26 : vector<6x80xf32>
    %28 = math.sqrt %27 : vector<6x80xf32>
    %29 = arith.subf %23, %28 : vector<6x80xf32>
    %30 = arith.mulf %29, %29 : vector<6x80xf32>
    %cst_24 = arith.constant dense<0.000000e+00> : vector<6xf32>
    %31 = vector.multi_reduction <add>, %30, %cst_24 [1] : vector<6x80xf32> to vector<6xf32>
    %32 = vector.shape_cast %31 : vector<6xf32> to vector<6x1xf32>
    %33 = math.sqrt %32 : vector<6x1xf32>
    %cst_25 = arith.constant 9.99999996E-13 : f32
    %34 = vector.broadcast %cst_25 : f32 to vector<6x1xf32>
    %35 = arith.maximumf %33, %34 : vector<6x1xf32>
    %36 = vector.broadcast %35 : vector<6x1xf32> to vector<6x80xf32>
    %37 = arith.divf %29, %36 : vector<6x80xf32>
    %c0_26 = arith.constant 0 : index
    %c0_27 = arith.constant 0 : index
    %c0_28 = arith.constant 0 : index
    %38 = vector.load %arg8[%c0_26, %c0_27, %c0_28] : memref<1x6x80xf32, #tpu.memory_space<vmem>>, vector<1x6x80xf32>
    %39 = vector.shape_cast %38 : vector<1x6x80xf32> to vector<6x80xf32>
    %40 = vector.shape_cast %37 : vector<6x80xf32> to vector<1x6x80xf32>
    tpu.vector_store %arg8[%c0_26, %c0_27, %c0_28], %40 {strides = array<i32>} : memref<1x6x80xf32, #tpu.memory_space<vmem>>, vector<1x6x80xf32>,
    return
  }
  func.func @transform_0(%arg0: i32) -> (i32, i32, i32) {
    %c0_i32 = arith.constant 0 : i32
    %c0_i32_0 = arith.constant 0 : i32
    %c0_i32_1 = arith.constant 0 : i32
    return %arg0, %c0_i32, %c0_i32_0 : i32, i32, i32
  }
  func.func @transform_1(%arg0: i32) -> (i32, i32, i32) {
    %c0_i32 = arith.constant 0 : i32
    %c0_i32_0 = arith.constant 0 : i32
    %c0_i32_1 = arith.constant 0 : i32
    return %arg0, %c0_i32, %c0_i32_0 : i32, i32, i32
  }
  func.func @transform_2(%arg0: i32) -> (i32, i32, i32) {
    %c0_i32 = arith.constant 0 : i32
    %c0_i32_0 = arith.constant 0 : i32
    %c0_i32_1 = arith.constant 0 : i32
    return %arg0, %c0_i32, %c0_i32_0 : i32, i32, i32
  }
  func.func @transform_3(%arg0: i32) -> (i32, i32, i32) {
    %c0_i32 = arith.constant 0 : i32
    %c0_i32_0 = arith.constant 0 : i32
    %c0_i32_1 = arith.constant 0 : i32
    return %arg0, %c0_i32, %c0_i32_0 : i32, i32, i32
  }
  func.func @transform_4(%arg0: i32) -> (i32, i32, i32) {
    %c0_i32 = arith.constant 0 : i32
    %c0_i32_0 = arith.constant 0 : i32
    %c0_i32_1 = arith.constant 0 : i32
    return %arg0, %c0_i32, %c0_i32_0 : i32, i32, i32
  }
  func.func @transform_5(%arg0: i32) -> (i32, i32, i32) {
    %c0_i32 = arith.constant 0 : i32
    %c0_i32_0 = arith.constant 0 : i32
    %c0_i32_1 = arith.constant 0 : i32
    return %arg0, %c0_i32, %c0_i32_0 : i32, i32, i32
  }
  func.func @transform_6(%arg0: i32) -> (i32, i32) {
    %c0_i32 = arith.constant 0 : i32
    %c0_i32_0 = arith.constant 0 : i32
    %c0_i32_1 = arith.constant 0 : i32
    return %c0_i32, %c0_i32_0 : i32, i32
  }
  func.func @transform_7(%arg0: i32) -> (i32, i32, i32) {
    %c0_i32 = arith.constant 0 : i32
    %c0_i32_0 = arith.constant 0 : i32
    %c0_i32_1 = arith.constant 0 : i32
    return %arg0, %c0_i32, %c0_i32_0 : i32, i32, i32
  }
}

module attributes {stable_mosaic.version = 11 : i64} {
  func.func @_linear_kernel(%arg0: i32, %arg1: i32, %arg2: memref<6x1600xbf16, #tpu.memory_space<vmem>>, %arg3: memref<1600x128xbf16, #tpu.memory_space<vmem>>, %arg4: memref<1x128xf32, #tpu.memory_space<vmem>>, %arg5: memref<6x128xf32, #tpu.memory_space<vmem>>, %arg6: memref<6x128xf32, #tpu.memory_space<vmem>>) attributes {dimension_semantics = [#tpu.dimension_semantics<parallel>, #tpu.dimension_semantics<arbitrary>], iteration_bounds = array<i64: 1, 1>, scalar_prefetch = 0 : i64, scratch_operands = 1 : i64, tpu.core_type = #tpu.core_type<tc>, window_params = [{transform_indices = @transform_0, window_bounds = array<i64: 6, 1600>}, {transform_indices = @transform_1, window_bounds = array<i64: 1600, 128>}, {pipeline_mode = #tpu.pipeline_mode<synchronous>, transform_indices = @transform_2, window_bounds = array<i64: 1, 128>}, {transform_indices = @transform_3, window_bounds = array<i64: 6, 128>}]} {
    %c0_i32 = arith.constant 0 : i32
    %0 = arith.cmpi eq, %arg1, %c0_i32 : i32
    %1 = arith.extui %0 : i1 to i32
    %c0_i32_0 = arith.constant 0 : i32
    %2 = arith.cmpi ne, %1, %c0_i32_0 : i32
    scf.if %2 {
      %cst_10 = arith.constant 0.000000e+00 : f32
      %12 = vector.broadcast %cst_10 : f32 to vector<6x128xf32>
      %c0_11 = arith.constant 0 : index
      %c0_12 = arith.constant 0 : index
      %13 = vector.load %arg6[%c0_11, %c0_12] : memref<6x128xf32, #tpu.memory_space<vmem>>, vector<6x128xf32>
      tpu.vector_store %arg6[%c0_11, %c0_12], %12 {strides = array<i32>} : memref<6x128xf32, #tpu.memory_space<vmem>>, vector<6x128xf32>,
    } else {
    }
    %c0 = arith.constant 0 : index
    %c0_1 = arith.constant 0 : index
    %3 = vector.load %arg6[%c0, %c0_1] : memref<6x128xf32, #tpu.memory_space<vmem>>, vector<6x128xf32>
    %c0_2 = arith.constant 0 : index
    %c0_3 = arith.constant 0 : index
    %4 = vector.load %arg2[%c0_2, %c0_3] : memref<6x1600xbf16, #tpu.memory_space<vmem>>, vector<6x1600xbf16>
    %c0_4 = arith.constant 0 : index
    %c0_5 = arith.constant 0 : index
    %5 = vector.load %arg3[%c0_4, %c0_5] : memref<1600x128xbf16, #tpu.memory_space<vmem>>, vector<1600x128xbf16>
    %cst = arith.constant dense<0.000000e+00> : vector<6x128xf32>
    %6 = tpu.matmul %4, %5, %cst {dimension_numbers = #tpu.dot_dimension_numbers<[1], [0], [0], [1], [0, 0, 1, 1], [], []>} : vector<6x1600xbf16>, vector<1600x128xbf16>, vector<6x128xf32> -> vector<6x128xf32>
    %7 = arith.addf %3, %6 : vector<6x128xf32>
    %c0_6 = arith.constant 0 : index
    %c0_7 = arith.constant 0 : index
    %8 = vector.load %arg6[%c0_6, %c0_7] : memref<6x128xf32, #tpu.memory_space<vmem>>, vector<6x128xf32>
    tpu.vector_store %arg6[%c0_6, %c0_7], %7 {strides = array<i32>} : memref<6x128xf32, #tpu.memory_space<vmem>>, vector<6x128xf32>,
    %c0_i32_8 = arith.constant 0 : i32
    %9 = arith.cmpi eq, %arg1, %c0_i32_8 : i32
    %10 = arith.extui %9 : i1 to i32
    %c0_i32_9 = arith.constant 0 : i32
    %11 = arith.cmpi ne, %10, %c0_i32_9 : i32
    scf.if %11 {
      %c0_10 = arith.constant 0 : index
      %c0_11 = arith.constant 0 : index
      %12 = vector.load %arg6[%c0_10, %c0_11] : memref<6x128xf32, #tpu.memory_space<vmem>>, vector<6x128xf32>
      %c0_12 = arith.constant 0 : index
      %c0_13 = arith.constant 0 : index
      %13 = vector.load %arg4[%c0_12, %c0_13] : memref<1x128xf32, #tpu.memory_space<vmem>>, vector<1x128xf32>
      %14 = vector.broadcast %13 : vector<1x128xf32> to vector<6x128xf32>
      %15 = arith.addf %12, %14 : vector<6x128xf32>
      %c0_14 = arith.constant 0 : index
      %c0_15 = arith.constant 0 : index
      %16 = vector.load %arg5[%c0_14, %c0_15] : memref<6x128xf32, #tpu.memory_space<vmem>>, vector<6x128xf32>
      tpu.vector_store %arg5[%c0_14, %c0_15], %15 {strides = array<i32>} : memref<6x128xf32, #tpu.memory_space<vmem>>, vector<6x128xf32>,
    } else {
    }
    return
  }
  func.func @transform_0(%arg0: i32, %arg1: i32) -> (i32, i32) {
    %c0_i32 = arith.constant 0 : i32
    return %arg0, %arg1 : i32, i32
  }
  func.func @transform_1(%arg0: i32, %arg1: i32) -> (i32, i32) {
    %c0_i32 = arith.constant 0 : i32
    %c0_i32_0 = arith.constant 0 : i32
    return %arg1, %c0_i32 : i32, i32
  }
  func.func @transform_2(%arg0: i32, %arg1: i32) -> (i32, i32) {
    %c0_i32 = arith.constant 0 : i32
    %c0_i32_0 = arith.constant 0 : i32
    %c0_i32_1 = arith.constant 0 : i32
    return %c0_i32, %c0_i32_0 : i32, i32
  }
  func.func @transform_3(%arg0: i32, %arg1: i32) -> (i32, i32) {
    %c0_i32 = arith.constant 0 : i32
    %c0_i32_0 = arith.constant 0 : i32
    return %arg0, %c0_i32 : i32, i32
  }
}

module attributes {stable_mosaic.version = 11 : i64} {
  func.func @_linear_kernel(%arg0: i32, %arg1: i32, %arg2: memref<6x128xbf16, #tpu.memory_space<vmem>>, %arg3: memref<128x128xbf16, #tpu.memory_space<vmem>>, %arg4: memref<1x128xf32, #tpu.memory_space<vmem>>, %arg5: memref<6x128xf32, #tpu.memory_space<vmem>>, %arg6: memref<6x128xf32, #tpu.memory_space<vmem>>) attributes {dimension_semantics = [#tpu.dimension_semantics<parallel>, #tpu.dimension_semantics<arbitrary>], iteration_bounds = array<i64: 1, 1>, scalar_prefetch = 0 : i64, scratch_operands = 1 : i64, tpu.core_type = #tpu.core_type<tc>, window_params = [{transform_indices = @transform_0, window_bounds = array<i64: 6, 128>}, {transform_indices = @transform_1, window_bounds = array<i64: 128, 128>}, {pipeline_mode = #tpu.pipeline_mode<synchronous>, transform_indices = @transform_2, window_bounds = array<i64: 1, 128>}, {transform_indices = @transform_3, window_bounds = array<i64: 6, 128>}]} {
    %c0_i32 = arith.constant 0 : i32
    %0 = arith.cmpi eq, %arg1, %c0_i32 : i32
    %1 = arith.extui %0 : i1 to i32
    %c0_i32_0 = arith.constant 0 : i32
    %2 = arith.cmpi ne, %1, %c0_i32_0 : i32
    scf.if %2 {
      %cst_10 = arith.constant 0.000000e+00 : f32
      %12 = vector.broadcast %cst_10 : f32 to vector<6x128xf32>
      %c0_11 = arith.constant 0 : index
      %c0_12 = arith.constant 0 : index
      %13 = vector.load %arg6[%c0_11, %c0_12] : memref<6x128xf32, #tpu.memory_space<vmem>>, vector<6x128xf32>
      tpu.vector_store %arg6[%c0_11, %c0_12], %12 {strides = array<i32>} : memref<6x128xf32, #tpu.memory_space<vmem>>, vector<6x128xf32>,
    } else {
    }
    %c0 = arith.constant 0 : index
    %c0_1 = arith.constant 0 : index
    %3 = vector.load %arg6[%c0, %c0_1] : memref<6x128xf32, #tpu.memory_space<vmem>>, vector<6x128xf32>
    %c0_2 = arith.constant 0 : index
    %c0_3 = arith.constant 0 : index
    %4 = vector.load %arg2[%c0_2, %c0_3] : memref<6x128xbf16, #tpu.memory_space<vmem>>, vector<6x128xbf16>
    %c0_4 = arith.constant 0 : index
    %c0_5 = arith.constant 0 : index
    %5 = vector.load %arg3[%c0_4, %c0_5] : memref<128x128xbf16, #tpu.memory_space<vmem>>, vector<128x128xbf16>
    %cst = arith.constant dense<0.000000e+00> : vector<6x128xf32>
    %6 = tpu.matmul %4, %5, %cst {dimension_numbers = #tpu.dot_dimension_numbers<[1], [0], [0], [1], [0, 0, 1, 1], [], []>} : vector<6x128xbf16>, vector<128x128xbf16>, vector<6x128xf32> -> vector<6x128xf32>
    %7 = arith.addf %3, %6 : vector<6x128xf32>
    %c0_6 = arith.constant 0 : index
    %c0_7 = arith.constant 0 : index
    %8 = vector.load %arg6[%c0_6, %c0_7] : memref<6x128xf32, #tpu.memory_space<vmem>>, vector<6x128xf32>
    tpu.vector_store %arg6[%c0_6, %c0_7], %7 {strides = array<i32>} : memref<6x128xf32, #tpu.memory_space<vmem>>, vector<6x128xf32>,
    %c0_i32_8 = arith.constant 0 : i32
    %9 = arith.cmpi eq, %arg1, %c0_i32_8 : i32
    %10 = arith.extui %9 : i1 to i32
    %c0_i32_9 = arith.constant 0 : i32
    %11 = arith.cmpi ne, %10, %c0_i32_9 : i32
    scf.if %11 {
      %c0_10 = arith.constant 0 : index
      %c0_11 = arith.constant 0 : index
      %12 = vector.load %arg6[%c0_10, %c0_11] : memref<6x128xf32, #tpu.memory_space<vmem>>, vector<6x128xf32>
      %c0_12 = arith.constant 0 : index
      %c0_13 = arith.constant 0 : index
      %13 = vector.load %arg4[%c0_12, %c0_13] : memref<1x128xf32, #tpu.memory_space<vmem>>, vector<1x128xf32>
      %14 = vector.broadcast %13 : vector<1x128xf32> to vector<6x128xf32>
      %15 = arith.addf %12, %14 : vector<6x128xf32>
      %c0_14 = arith.constant 0 : index
      %c0_15 = arith.constant 0 : index
      %16 = vector.load %arg5[%c0_14, %c0_15] : memref<6x128xf32, #tpu.memory_space<vmem>>, vector<6x128xf32>
      tpu.vector_store %arg5[%c0_14, %c0_15], %15 {strides = array<i32>} : memref<6x128xf32, #tpu.memory_space<vmem>>, vector<6x128xf32>,
    } else {
    }
    return
  }
  func.func @transform_0(%arg0: i32, %arg1: i32) -> (i32, i32) {
    %c0_i32 = arith.constant 0 : i32
    return %arg0, %arg1 : i32, i32
  }
  func.func @transform_1(%arg0: i32, %arg1: i32) -> (i32, i32) {
    %c0_i32 = arith.constant 0 : i32
    %c0_i32_0 = arith.constant 0 : i32
    return %arg1, %c0_i32 : i32, i32
  }
  func.func @transform_2(%arg0: i32, %arg1: i32) -> (i32, i32) {
    %c0_i32 = arith.constant 0 : i32
    %c0_i32_0 = arith.constant 0 : i32
    %c0_i32_1 = arith.constant 0 : i32
    return %c0_i32, %c0_i32_0 : i32, i32
  }
  func.func @transform_3(%arg0: i32, %arg1: i32) -> (i32, i32) {
    %c0_i32 = arith.constant 0 : i32
    %c0_i32_0 = arith.constant 0 : i32
    return %arg0, %c0_i32 : i32, i32
  }
}

</mosaic_0001>

<bundles_post_ra>
// kernel: hga_forward.22
= control target key start
LH: loop header
LB: loop body
LE: loop exit
PB: predicated region body
PF: predicated region fallthrough
CT: control target
= control target key end

     0   :  { %v312_v0 = vmov 0.0   ;;  %vm313_vm0 = vmmov 0   ;;  %v314_v3 = vmov 0   ;;  %vm118_vm1 = vcmask 523264   ;;  %s395_s1 = inlined_call_operand.vmem [shape: bf16[64,384], index: 1, kind: input, shape index: {}]   ;;  %s396_s0 = inlined_call_operand.vmem [shape: bf16[16,64], index: 0, kind: input, shape index: {}]   ;;  %s397_s2 = inlined_call_operand.vmem [shape: f32[1,384], index: 2, kind: input, shape index: {}]   ;;  %s398_s3 = inlined_call_operand.vmem [shape: f32[16,384], index: 3, kind: output, shape index: {}]  }
   0x1   :  { %280 = vmatprep.subr.bf16.mxu1 %v312_v0  ;;  %v295_v1 = vld [vmem:[%s395_s1 + $0x4] ss:$12 sps:$4 sm:$0xff]   ;;  %288 = vmatprep.mubr.msk.bf16.mxu1 %vm313_vm0, %v312_v0  ;;  %v297_v2 = vld [vmem:[%s395_s1 + $0x8] ss:$12 sps:$4 sm:$0xff]   ;;  %v298_v4 = vld [vmem:[%s395_s1] ss:$12 sps:$4 sm:$0xff]   ;;  %v229_v15 = vlaneseq }
   0x2   :  { %154 = vmatprep.mubr.bf16.mxu0 %v314_v3  ;;  %122 = vmatprep.subr.bf16.mxu0 %v295_v1  ;;  %v299_v5 = vld [vmem:[%s395_s1 + $0x1c] ss:$12 sps:$4 sm:$0xff]   ;;  %v301_v6 = vld [vmem:[%s395_s1 + $0x20] ss:$12 sps:$4 sm:$0xff]   ;;  %v302_v7 = vld [vmem:[%s395_s1 + $0x18] ss:$12 sps:$4 sm:$0xff]  }
   0x3   :  { %281 = vmatpush3.bf16.msra.mxu1 %v297_v2  ;;  %123 = vmatpush1.bf16.msra.mxu0 %v298_v4  ;;  %v303_v8 = vld [vmem:[%s395_s1 + $0x34] ss:$12 sps:$4 sm:$0xff]   ;;  %v305_v9 = vld [vmem:[%s395_s1 + $0x38] ss:$12 sps:$4 sm:$0xff]   ;;  %v306_v10 = vld [vmem:[%s395_s1 + $0x30] ss:$12 sps:$4 sm:$0xff]  }
   0x4   :  { %282 = vmatprep.subr.bf16.mxu1 %v312_v0  ;;  %124 = vmatprep.subr.bf16.mxu0 %v299_v5  ;;  %v307_v11 = vld [vmem:[%s395_s1 + $0x4c] ss:$12 sps:$4 sm:$0xff]   ;;  %v309_v12 = vld [vmem:[%s395_s1 + $0x50] ss:$12 sps:$4 sm:$0xff]   ;;  %v310_v13 = vld [vmem:[%s395_s1 + $0x48] ss:$12 sps:$4 sm:$0xff]  }
   0x5   :  { %v311_v14 = vld [vmem:[%s396_s0] sm:$0xff]   ;;  %v230_v16 = vshrl.u32 %v229_v15, 7 }
   0x6   :  { %v227_v18 = vld [vmem:[%s397_s2] sm:$0x7] }
   0x7   :  { %283 = vmatpush3.bf16.msra.mxu1 %v301_v6  ;;  %125 = vmatpush1.bf16.msra.mxu0 %v302_v7  ;;  %v239_v17 = vsub.s32 2, %v230_v16  ;;  %v231_v19 = vsub.s32 0, %v230_v16  ;;  %v235_v20 = vsub.s32 1, %v230_v16 }
   0x8   :  { %284 = vmatprep.subr.bf16.mxu1 %v312_v0  ;;  %126 = vmatprep.subr.bf16.mxu0 %v303_v8 }
   0x9   :  { %v240_v21 = vrot.slane %v227_v18, %v239_v17  ;;  %v232_v22 = vrot.slane %v227_v18, %v231_v19  ;;  %v236_v23 = vrot.slane %v227_v18, %v235_v20 }
   0xb   :  { %285 = vmatpush3.bf16.msra.mxu1 %v305_v9  ;;  %127 = vmatpush1.bf16.msra.mxu0 %v306_v10 }
   0xc   :  { %286 = vmatprep.subr.bf16.mxu1 %v312_v0  ;;  %128 = vmatprep.subr.bf16.mxu0 %v307_v11 }
   0xf   :  { %287 = vmatpush3.bf16.msra.mxu1 %v309_v12  ;;  %129 = vmatpush1.bf16.msra.mxu0 %v310_v13 }
  0x12   :  { %289 = vmatmul.mubr.msk.bf16.vlgmr.msra.gmra.mrb[0].mxu1 %vm118_vm1, %v311_v14  ;;  %273 = vmatmul.mubr.msk.bf16.vlgmr.msra.gmra.mrb[0].mxu0 %vm118_vm1, %v311_v14 }
  0xe5   :  { %v199_v24 = vpop.f32.mrb[0].mxu1  ;;  %v156_v26 = vpop.f32.mrb[0].mxu0 }
  0xe6   :  { %v246_v25 = vadd.f32 %v240_v21, %v199_v24  ;;  %v290_v27 = vpop.f32.mrb[1].mxu1  ;;  %v244_v28 = vadd.f32 %v232_v22, %v156_v26  ;;  %v158_v29 = vpop.f32.mrb[1].mxu0 }
  0xe7   :  { %v202_v30 = vpop.f32.mrb[2].mxu1  ;;  %v245_v31 = vadd.f32 %v236_v23, %v158_v29  ;;  %v160_v33 = vpop.f32.mrb[2].mxu0 }
  0xe8   :  { %252 = vst [vmem:[%s398_s3 + $0x10] sm:$0xff] %v246_v25  ;;  %v249_v32 = vadd.f32 %v240_v21, %v202_v30  ;;  %v291_v34 = vpop.f32.mrb[3].mxu1  ;;  %250 = vst [vmem:[%s398_s3] sm:$0xff] %v244_v28  ;;  %v247_v35 = vadd.f32 %v232_v22, %v160_v33  ;;  %v162_v36 = vpop.f32.mrb[3].mxu0 }
  0xe9   :  { %251 = vst [vmem:[%s398_s3 + $0x8] sm:$0xff] %v245_v31  ;;  %v248_v37 = vadd.f32 %v236_v23, %v162_v36 }
  0xea   :  { %255 = vst [vmem:[%s398_s3 + $0x28] sm:$0xff] %v249_v32  ;;  %253 = vst [vmem:[%s398_s3 + $0x18] sm:$0xff] %v247_v35 }
  0xeb   :  { %254 = vst [vmem:[%s398_s3 + $0x20] sm:$0xff] %v248_v37 }

// kernel: hga_forward.21
= control target key start
LH: loop header
LB: loop body
LE: loop exit
PB: predicated region body
PF: predicated region fallthrough
CT: control target
= control target key end

     0   :  { %s961_s1 = inlined_call_operand.vmem [shape: bf16[768,128], index: 1, kind: input, shape index: {}]   ;;  %s962_s0 = inlined_call_operand.vmem [shape: bf16[16,768], index: 0, kind: input, shape index: {}]   ;;  %s963_s2 = inlined_call_operand.vmem [shape: f32[1,128], index: 2, kind: input, shape index: {}]   ;;  %s964_s3 = inlined_call_operand.vmem [shape: f32[16,128], index: 3, kind: output, shape index: {}]  }
   0x1   :  { %v713_v0 = vld [vmem:[%s961_s1 + $0x40] sm:$0xff]   ;;  %v717_v4 = vld [vmem:[%s961_s1 + $0x48] sm:$0xff]   ;;  %v721_v8 = vld [vmem:[%s961_s1 + $0x50] sm:$0xff]  }
   0x2   :  { %v714_v1 = vld [vmem:[%s961_s1 + $0xc0] sm:$0xff]   ;;  %647 = vmatprep.subr.bf16.mxu0 %v713_v0  ;;  %v718_v5 = vld [vmem:[%s961_s1 + $0xc8] sm:$0xff]   ;;  %v722_v9 = vld [vmem:[%s961_s1 + $0xd0] sm:$0xff]  }
   0x3   :  { %v715_v2 = vld [vmem:[%s961_s1] sm:$0xff]   ;;  %669 = vmatprep.subr.bf16.mxu1 %v714_v1  ;;  %v719_v6 = vld [vmem:[%s961_s1 + $0x8] sm:$0xff]   ;;  %v723_v10 = vld [vmem:[%s961_s1 + $0x10] sm:$0xff]  }
   0x4   :  { %v716_v3 = vld [vmem:[%s961_s1 + $0x80] sm:$0xff]   ;;  %648 = vmatpush3.bf16.msra.mxu0 %v715_v2  ;;  %v720_v7 = vld [vmem:[%s961_s1 + $0x88] sm:$0xff]   ;;  %v724_v11 = vld [vmem:[%s961_s1 + $0x90] sm:$0xff]  }
   0x5   :  { %670 = vmatpush3.bf16.msra.mxu1 %v716_v3  ;;  %649 = vmatprep.subr.bf16.mxu0 %v717_v4  ;;  %v725_v12 = vld [vmem:[%s961_s1 + $0x58] sm:$0xff]   ;;  %v729_v16 = vld [vmem:[%s961_s1 + $0x60] sm:$0xff]   ;;  %v733_v20 = vld [vmem:[%s961_s1 + $0x68] sm:$0xff]  }
   0x6   :  { %671 = vmatprep.subr.bf16.mxu1 %v718_v5  ;;  %v726_v13 = vld [vmem:[%s961_s1 + $0xd8] sm:$0xff]   ;;  %v730_v17 = vld [vmem:[%s961_s1 + $0xe0] sm:$0xff]   ;;  %v734_v21 = vld [vmem:[%s961_s1 + $0xe8] sm:$0xff]  }
   0x7   :  { %v727_v14 = vld [vmem:[%s961_s1 + $0x18] sm:$0xff]   ;;  %v731_v18 = vld [vmem:[%s961_s1 + $0x20] sm:$0xff]   ;;  %v735_v22 = vld [vmem:[%s961_s1 + $0x28] sm:$0xff]  }
   0x8   :  { %650 = vmatpush3.bf16.msra.mxu0 %v719_v6  ;;  %v728_v15 = vld [vmem:[%s961_s1 + $0x98] sm:$0xff]   ;;  %v732_v19 = vld [vmem:[%s961_s1 + $0xa0] sm:$0xff]   ;;  %v736_v23 = vld [vmem:[%s961_s1 + $0xa8] sm:$0xff]  }
   0x9   :  { %672 = vmatpush3.bf16.msra.mxu1 %v720_v7  ;;  %651 = vmatprep.subr.bf16.mxu0 %v721_v8  ;;  %v737_v24 = vld [vmem:[%s961_s1 + $0x70] sm:$0xff]   ;;  %v741_v28 = vld [vmem:[%s961_s1 + $0x78] sm:$0xff]   ;;  %v748_v34 = vld [vmem:[%s962_s0 + $0x8] ss:$24 sps:$4 sm:$0xff]  }
   0xa   :  { %673 = vmatprep.subr.bf16.mxu1 %v722_v9  ;;  %v738_v25 = vld [vmem:[%s961_s1 + $0xf0] sm:$0xff]   ;;  %v742_v29 = vld [vmem:[%s961_s1 + $0xf8] sm:$0xff]   ;;  %v750_v35 = vld [vmem:[%s962_s0 + $0xc] ss:$24 sps:$4 sm:$0xff]  }
   0xb   :  { %v739_v26 = vld [vmem:[%s961_s1 + $0x30] sm:$0xff]   ;;  %v743_v30 = vld [vmem:[%s961_s1 + $0x38] sm:$0xff]   ;;  %v751_v36 = vld [vmem:[%s961_s1 + $0x140] sm:$0xff]   ;;  %516 = vmatprep.mubr.bf16.mxu1 %v750_v35 }
   0xc   :  { %652 = vmatpush3.bf16.msra.mxu0 %v723_v10  ;;  %v740_v27 = vld [vmem:[%s961_s1 + $0xb0] sm:$0xff]   ;;  %v744_v31 = vld [vmem:[%s961_s1 + $0xb8] sm:$0xff]   ;;  %v752_v37 = vld [vmem:[%s961_s1 + $0x100] sm:$0xff]  }
   0xd   :  { %674 = vmatpush3.bf16.msra.mxu1 %v724_v11  ;;  %653 = vmatprep.subr.bf16.mxu0 %v725_v12  ;;  %v745_v32 = vld [vmem:[%s962_s0] ss:$24 sps:$4 sm:$0xff]   ;;  %v747_v33 = vld [vmem:[%s962_s0 + $0x4] ss:$24 sps:$4 sm:$0xff]   ;;  %v753_v38 = vld [vmem:[%s961_s1 + $0x148] sm:$0xff]  }
   0xe   :  { %675 = vmatprep.subr.bf16.mxu1 %v726_v13  ;;  %475 = vmatprep.mubr.bf16.mxu0 %v747_v33  ;;  %v754_v39 = vld [vmem:[%s961_s1 + $0x108] sm:$0xff]   ;;  %v755_v40 = vld [vmem:[%s961_s1 + $0x150] sm:$0xff]   ;;  %v757_v42 = vld [vmem:[%s961_s1 + $0x158] sm:$0xff]  }
   0xf   :  { %v756_v41 = vld [vmem:[%s961_s1 + $0x110] sm:$0xff]   ;;  %v758_v43 = vld [vmem:[%s961_s1 + $0x118] sm:$0xff]   ;;  %v759_v44 = vld [vmem:[%s961_s1 + $0x160] sm:$0xff]  }
  0x10   :  { %654 = vmatpush3.bf16.msra.mxu0 %v727_v14  ;;  %v760_v45 = vld [vmem:[%s961_s1 + $0x120] sm:$0xff]   ;;  %v761_v46 = vld [vmem:[%s961_s1 + $0x168] sm:$0xff]   ;;  %v763_v49 = vld [vmem:[%s961_s1 + $0x170] sm:$0xff]  }
  0x11   :  { %676 = vmatpush3.bf16.msra.mxu1 %v728_v15  ;;  %655 = vmatprep.subr.bf16.mxu0 %v729_v16  ;;  %v769_v47 = vld [vmem:[%s962_s0 + $0x14] ss:$24 sps:$4 sm:$0xff]   ;;  %v765_v51 = vld [vmem:[%s961_s1 + $0x178] sm:$0xff]   ;;  %v767_v53 = vld [vmem:[%s962_s0 + $0x10] ss:$24 sps:$4 sm:$0xff]  }
  0x12   :  { %677 = vmatprep.subr.bf16.mxu1 %v730_v17  ;;  %v762_v48 = vld [vmem:[%s961_s1 + $0x128] sm:$0xff]   ;;  %v764_v50 = vld [vmem:[%s961_s1 + $0x130] sm:$0xff]   ;;  %v766_v52 = vld [vmem:[%s961_s1 + $0x138] sm:$0xff]  }
  0x13   :  { %v646_v8 = vld [vmem:[%s963_s2] ss:$0 sm:$0xff] }
  0x14   :  { %656 = vmatpush3.bf16.msra.mxu0 %v731_v18 }
  0x15   :  { %678 = vmatpush3.bf16.msra.mxu1 %v732_v19  ;;  %657 = vmatprep.subr.bf16.mxu0 %v733_v20 }
  0x16   :  { %679 = vmatprep.subr.bf16.mxu1 %v734_v21 }
  0x18   :  { %658 = vmatpush3.bf16.msra.mxu0 %v735_v22 }
  0x19   :  { %680 = vmatpush3.bf16.msra.mxu1 %v736_v23  ;;  %659 = vmatprep.subr.bf16.mxu0 %v737_v24 }
  0x1a   :  { %681 = vmatprep.subr.bf16.mxu1 %v738_v25 }
  0x1c   :  { %660 = vmatpush3.bf16.msra.mxu0 %v739_v26 }
  0x1d   :  { %682 = vmatpush3.bf16.msra.mxu1 %v740_v27  ;;  %661 = vmatprep.subr.bf16.mxu0 %v741_v28 }
  0x1e   :  { %683 = vmatprep.subr.bf16.mxu1 %v742_v29 }
  0x20   :  { %662 = vmatpush3.bf16.msra.mxu0 %v743_v30 }
  0x21   :  { %684 = vmatpush3.bf16.msra.mxu1 %v744_v31  ;;  %691 = vmatprep.subr.bf16.mxu0 %v751_v36 }
  0x23   :  { %476 = vmatmul.mubr.bf16.vlgmr.msra.gmra.mrb[0].mxu0 %v745_v32 }
  0x24   :  { %517 = vmatmul.mubr.bf16.vlgmr.msra.gmra.mrb[0].mxu1 %v748_v34  ;;  %692 = vmatpush3.bf16.msra.mxu0 %v752_v37 }
  0x25   :  { %693 = vmatprep.subr.bf16.mxu0 %v753_v38  ;;  %557 = vmatprep.mubr.bf16.mxu0 %v769_v47 }
  0x28   :  { %694 = vmatpush3.bf16.msra.mxu0 %v754_v39 }
  0x29   :  { %695 = vmatprep.subr.bf16.mxu0 %v755_v40 }
  0x2c   :  { %696 = vmatpush3.bf16.msra.mxu0 %v756_v41 }
  0x2d   :  { %697 = vmatprep.subr.bf16.mxu0 %v757_v42 }
  0x30   :  { %698 = vmatpush3.bf16.msra.mxu0 %v758_v43 }
  0x31   :  { %699 = vmatprep.subr.bf16.mxu0 %v759_v44 }
  0x34   :  { %700 = vmatpush3.bf16.msra.mxu0 %v760_v45 }
  0x35   :  { %701 = vmatprep.subr.bf16.mxu0 %v761_v46 }
  0x38   :  { %702 = vmatpush3.bf16.msra.mxu0 %v762_v48 }
  0x39   :  { %703 = vmatprep.subr.bf16.mxu0 %v763_v49 }
  0x3c   :  { %704 = vmatpush3.bf16.msra.mxu0 %v764_v50 }
  0x3d   :  { %705 = vmatprep.subr.bf16.mxu0 %v765_v51 }
  0x40   :  { %706 = vmatpush3.bf16.msra.mxu0 %v766_v52 }
  0x43   :  { %558 = vmatmul.mubr.bf16.vlgmr.msra.gmra.mrb[4].mxu0 %v767_v53 }
  0xf6   :  { %v663_v54 = vpop.f32.mrb[0].mxu0 }
  0xf7   :  { %v685_v55 = vpop.f32.mrb[0].mxu1  ;;  %v664_v56 = vpop.f32.mrb[1].mxu0 }
  0xf8   :  { %v665_v57 = vadd.f32 %v664_v56, %v663_v54  ;;  %v686_v58 = vpop.f32.mrb[1].mxu1  ;;  %v666_v59 = vpop.f32.mrb[2].mxu0 }
  0xf9   :  { %v687_v60 = vadd.f32 %v686_v58, %v685_v55  ;;  %v688_v61 = vpop.f32.mrb[2].mxu1  ;;  %v667_v62 = vpop.f32.mrb[3].mxu0 }
  0xfa   :  { %v668_v63 = vadd.f32 %v667_v62, %v666_v59  ;;  %v689_v0 = vpop.f32.mrb[3].mxu1 }
  0xfb   :  { %v519_v1 = vadd.f32 %v687_v60, %v665_v57  ;;  %v690_v2 = vadd.f32 %v689_v0, %v688_v61 }
  0xfd   :  { %v522_v3 = vadd.f32 %v690_v2, %v668_v63 }
 0x116   :  { %v707_v4 = vpop.f32.mrb[4].mxu0 }
 0x117   :  { %v708_v5 = vpop.f32.mrb[5].mxu0 }
 0x118   :  { %v709_v6 = vadd.f32 %v708_v5, %v707_v4  ;;  %v710_v7 = vpop.f32.mrb[6].mxu0 }
 0x119   :  { %v711_v9 = vpop.f32.mrb[7].mxu0 }
 0x11a   :  { %v560_v10 = vadd.f32 %v709_v6, %v519_v1  ;;  %v712_v11 = vadd.f32 %v711_v9, %v710_v7 }
 0x11c   :  { %v582_v12 = vadd.f32 %v646_v8, %v560_v10  ;;  %v563_v13 = vadd.f32 %v712_v11, %v522_v3 }
 0x11e   :  { %v584_v14 = vmax.f32 %v582_v12, 0.0  ;;  %v583_v15 = vadd.f32 %v646_v8, %v563_v13 }
 0x120   :  { %586 = vst [vmem:[%s964_s3] sm:$0xff] %v584_v14  ;;  %v585_v16 = vmax.f32 %v583_v15, 0.0 }
 0x122   :  { %587 = vst [vmem:[%s964_s3 + $0x8] sm:$0xff] %v585_v16 }

// kernel: hga_forward.23
= control target key start
LH: loop header
LB: loop body
LE: loop exit
PB: predicated region body
PF: predicated region fallthrough
CT: control target
= control target key end

     0   :  { %s977_s18 = smov 0   ;;  %s1201_s0 = inlined_call_operand.vmem [shape: f32[8,3,2,128], index: 0, kind: input, shape index: {}]   ;;  %s1202_s1 = inlined_call_operand.vmem [shape: f32[8,2,128], index: 1, kind: input, shape index: {}]   ;;  %s1203_s2 = inlined_call_operand.vmem [shape: f32[3,128,128], index: 2, kind: input, shape index: {}]   ;;  %s1204_s3 = inlined_call_operand.vmem [shape: f32[3,1,128], index: 3, kind: input, shape index: {}]   ;;  %s1205_s4 = inlined_call_operand.vmem [shape: f32[8,2,128], index: 4, kind: output, shape index: {0}]   ;;  %s1206_s5 = inlined_call_operand.vmem [shape: f32[2,128], index: 5, kind: output, shape index: {1}]  }
   0x1 LB: > { %s632_s19 = sadd.s32 4294967295, %s941_s18   ;;  %p636_p0 = scmp.ge.s32.totalorder %s941_s18, 1  ;;  %s941_s18 = sphi %s977_s18, %s16_s18  }
   0x2   : > { %p194_p1 = scmp.lt.s32.totalorder %s941_s18, 9 }
   0x4   : > { %p195_p2 = pnand %p636_p0, %p194_p1 }
   0x5   : > { %p225_p3 = scmp.lt.s32.totalorder (!%p195_p2), %s632_s19, 7  ;;  %p640_p4 = scmp.ne.s32.totalorder (!%p195_p2), %s632_s19, 0 }
   0x6   : > { %198 = sbr.rel (%p195_p2) target bundleno = 325 (0x145), region = 36 }
   0xd   : > { %s226_s20 = scalar_select %p225_p3, %s632_s19, 7 }
   0xe   : > { %241 = sbr.rel (%p640_p4) target bundleno = 21 (0x15), region = 40  ;;  %v943_v0 = vmov (!%p640_p4), 0.0  }
   0xf   : > { %s912_s21 = smul.u32 6, %s226_s20  ;;  %s638_s22 = sshll.u32 %s226_s20, 1  ;;  %242 = vst [vmem:[#allocation2] sm:$0x3] (!%p640_p4), %v943_v0 }
  0x10   : > { %s988_s25 = scalar_lea.vmem %s1202_s1, %s638_s22  ;;  %s993_s28 = scalar_lea.vmem %s1205_s4, %s638_s22 }
  0x11   : > { %s998_s6 = scalar_lea.vmem %s1201_s0, %s912_s21 }
  0x15 PF: > { %v245_v1 = vld [vmem:[%s1203_s2] sm:$0xff]  ;;  %v246_v2 = vld [vmem:[%s1203_s2 + $0x8] sm:$0xff]  ;;  %v247_v3 = vld [vmem:[%s1203_s2 + $0x10] sm:$0xff]  ;;  %v944_v4 = vmov 0.0|0.0   ;;  %vm945_vm0 = vmmov 0   ;;  %v946_v7 = vmov 0.0  }
  0x16   : > { %840 = vmatprep.subr.bf16.mxu0 %v944_v4  ;;  %v841_v5 = vpack.c.bf16 %v246_v2, %v245_v1  ;;  %v248_v6 = vld [vmem:[%s1203_s2 + $0x18] sm:$0xff]  ;;  %864 = vmatprep.subr.bf16.mxu1 %v944_v4  ;;  %v642_v9 = vld [vmem:[%s1203_s2 + $0x80] sm:$0xff]  ;;  %v643_v10 = vld [vmem:[%s1203_s2 + $0x88] sm:$0xff] }
  0x17   : > { %767 = vmatprep.mubr.msk.f32.mxu0 %vm945_vm0, %v946_v7  ;;  %802 = vmatprep.mubr.msk.f32.mxu1 %vm945_vm0, %v946_v7  ;;  %v844_v8 = vpack.c.bf16 %v248_v6, %v247_v3  ;;  %v249_v11 = vld [vmem:[%s1203_s2 + $0x20] sm:$0xff]  ;;  %v250_v12 = vld [vmem:[%s1203_s2 + $0x28] sm:$0xff]  ;;  %v865_v13 = vpack.c.bf16 %v643_v10, %v642_v9  ;;  %v644_v14 = vld [vmem:[%s1203_s2 + $0x90] sm:$0xff] }
  0x18   : > { %842 = vmatpush3.bf16.msra.mxu0 %v841_v5  ;;  %v645_v15 = vld [vmem:[%s1203_s2 + $0x98] sm:$0xff]  ;;  %v847_v17 = vpack.c.bf16 %v250_v12, %v249_v11  ;;  %v646_v18 = vld [vmem:[%s1203_s2 + $0xa0] sm:$0xff]  ;;  %v647_v19 = vld [vmem:[%s1203_s2 + $0xa8] sm:$0xff] }
  0x19   : > { %843 = vmatprep.subr.bf16.mxu0 %v944_v4  ;;  %866 = vmatpush3.bf16.msra.mxu1 %v865_v13  ;;  %v868_v16 = vpack.c.bf16 %v645_v15, %v644_v14  ;;  %v251_v20 = vld [vmem:[%s1203_s2 + $0x30] sm:$0xff]  ;;  %v252_v21 = vld [vmem:[%s1203_s2 + $0x38] sm:$0xff]  ;;  %v871_v22 = vpack.c.bf16 %v647_v19, %v646_v18  ;;  %v253_v26 = vld [vmem:[%s1203_s2 + $0x40] sm:$0xff] }
  0x1a   : > { %867 = vmatprep.subr.bf16.mxu1 %v944_v4  ;;  %v850_v23 = vpack.c.bf16 %v252_v21, %v251_v20  ;;  %v648_v24 = vld [vmem:[%s1203_s2 + $0xb0] sm:$0xff]  ;;  %v649_v25 = vld [vmem:[%s1203_s2 + $0xb8] sm:$0xff]  ;;  %v254_v27 = vld [vmem:[%s1203_s2 + $0x48] sm:$0xff] }
  0x1b   : > { %v874_v28 = vpack.c.bf16 %v649_v25, %v648_v24  ;;  %v853_v29 = vpack.c.bf16 %v254_v27, %v253_v26  ;;  %v650_v30 = vld [vmem:[%s1203_s2 + $0xc0] sm:$0xff]  ;;  %v651_v31 = vld [vmem:[%s1203_s2 + $0xc8] sm:$0xff]  ;;  %v255_v32 = vld [vmem:[%s1203_s2 + $0x50] sm:$0xff] }
  0x1c   : > { %845 = vmatpush3.bf16.msra.mxu0 %v844_v8  ;;  %v256_v33 = vld [vmem:[%s1203_s2 + $0x58] sm:$0xff]  ;;  %v877_v34 = vpack.c.bf16 %v651_v31, %v650_v30  ;;  %v652_v36 = vld [vmem:[%s1203_s2 + $0xd0] sm:$0xff]  ;;  %v257_v38 = vld [vmem:[%s1203_s2 + $0x60] sm:$0xff] }
  0x1d   : > { %846 = vmatprep.subr.bf16.mxu0 %v944_v4  ;;  %869 = vmatpush3.bf16.msra.mxu1 %v868_v16  ;;  %v856_v35 = vpack.c.bf16 %v256_v33, %v255_v32  ;;  %v653_v37 = vld [vmem:[%s1203_s2 + $0xd8] sm:$0xff]  ;;  %v258_v39 = vld [vmem:[%s1203_s2 + $0x68] sm:$0xff]  ;;  %v654_v42 = vld [vmem:[%s1203_s2 + $0xe0] sm:$0xff] }
  0x1e   : > { %870 = vmatprep.subr.bf16.mxu1 %v944_v4  ;;  %v880_v40 = vpack.c.bf16 %v653_v37, %v652_v36  ;;  %v859_v41 = vpack.c.bf16 %v258_v39, %v257_v38  ;;  %v655_v43 = vld [vmem:[%s1203_s2 + $0xe8] sm:$0xff]  ;;  %v259_v44 = vld [vmem:[%s1203_s2 + $0x70] sm:$0xff]  ;;  %v260_v45 = vld [vmem:[%s1203_s2 + $0x78] sm:$0xff] }
  0x1f   : > { %v883_v46 = vpack.c.bf16 %v655_v43, %v654_v42  ;;  %v862_v47 = vpack.c.bf16 %v260_v45, %v259_v44  ;;  %v656_v48 = vld [vmem:[%s1203_s2 + $0xf0] sm:$0xff]  ;;  %v657_v49 = vld [vmem:[%s1203_s2 + $0xf8] sm:$0xff]  ;;  %v660_v50 = vld [vmem:[%s1203_s2 + $0x100] sm:$0xff] }
  0x20   : > { %848 = vmatpush3.bf16.msra.mxu0 %v847_v17  ;;  %v661_v51 = vld [vmem:[%s1203_s2 + $0x108] sm:$0xff]  ;;  %v886_v52 = vpack.c.bf16 %v657_v49, %v656_v48  ;;  %v1121_v53 = vld [vmem:[#allocation2] sm:$0x3]  ;;  %v662_v55 = vld [vmem:[%s1203_s2 + $0x110] sm:$0xff] }
  0x21   : > { %849 = vmatprep.subr.bf16.mxu0 %v944_v4  ;;  %872 = vmatpush3.bf16.msra.mxu1 %v871_v22  ;;  %v889_v54 = vpack.c.bf16 %v661_v51, %v660_v50  ;;  %v663_v56 = vld [vmem:[%s1203_s2 + $0x118] sm:$0xff]  ;;  %v664_v58 = vld [vmem:[%s1203_s2 + $0x120] sm:$0xff]  ;;  %v665_v59 = vld [vmem:[%s1203_s2 + $0x128] sm:$0xff] }
  0x22   : > { %873 = vmatprep.subr.bf16.mxu1 %v944_v4  ;;  %v892_v57 = vpack.c.bf16 %v663_v56, %v662_v55  ;;  %v895_v60 = vpack.c.bf16 %v665_v59, %v664_v58  ;;  %v666_v61 = vld [vmem:[%s1203_s2 + $0x130] sm:$0xff]  ;;  %v667_v62 = vld [vmem:[%s1203_s2 + $0x138] sm:$0xff]  ;;  %v668_v0 = vld [vmem:[%s1203_s2 + $0x140] sm:$0xff] }
  0x23   : > { %v898_v63 = vpack.c.bf16 %v667_v62, %v666_v61  ;;  %v669_v1 = vld [vmem:[%s1203_s2 + $0x148] sm:$0xff]  ;;  %v670_v3 = vld [vmem:[%s1203_s2 + $0x150] sm:$0xff]  ;;  %v671_v5 = vld [vmem:[%s1203_s2 + $0x158] sm:$0xff] }
  0x24   : > { %851 = vmatpush3.bf16.msra.mxu0 %v850_v23  ;;  %v901_v2 = vpack.c.bf16 %v669_v1, %v668_v0  ;;  %v904_v6 = vpack.c.bf16 %v671_v5, %v670_v3  ;;  %v673_v8 = vld [vmem:[%s1203_s2 + $0x168] sm:$0xff]  ;;  %v674_v10 = vld [vmem:[%s1203_s2 + $0x170] sm:$0xff]  ;;  %v675_v11 = vld [vmem:[%s1203_s2 + $0x178] sm:$0xff] }
  0x25   : > { %852 = vmatprep.subr.bf16.mxu0 %v944_v4  ;;  %875 = vmatpush3.bf16.msra.mxu1 %v874_v28  ;;  %v910_v12 = vpack.c.bf16 %v675_v11, %v674_v10  ;;  %v641_v13 = vld [vmem:[%s1204_s3] ss:$0 sm:$0xff]  ;;  %v659_v18 = vld [vmem:[%s1204_s3 + $0x1] ss:$0 sm:$0xff]  ;;  %v679_v23 = vld [vmem:[%s998_s6 + $0x2] sm:$0x3] }
  0x26   : > { %876 = vmatprep.subr.bf16.mxu1 %v944_v4  ;;  %v528_v15 = vld [vmem:[%s998_s6] sm:$0x3]  ;;  %v677_v30 = vld [vmem:[%s1204_s3 + $0x2] ss:$0 sm:$0xff] }
  0x27   : > { %v244_v39 = vld [vmem:[%s988_s25] sm:$0x3] }
  0x28   : > { %854 = vmatpush3.bf16.msra.mxu0 %v853_v29 }
  0x29   : > { %855 = vmatprep.subr.bf16.mxu0 %v944_v4  ;;  %878 = vmatpush3.bf16.msra.mxu1 %v877_v34 }
  0x2a   : > { %879 = vmatprep.subr.bf16.mxu1 %v944_v4 }
  0x2c   : > { %857 = vmatpush3.bf16.msra.mxu0 %v856_v35  ;;  %v681_v35 = vld [vmem:[%s998_s6 + $0x4] sm:$0x3] }
  0x2d   : > { %858 = vmatprep.subr.bf16.mxu0 %v944_v4  ;;  %881 = vmatpush3.bf16.msra.mxu1 %v880_v40 }
  0x2e   : > { %882 = vmatprep.subr.bf16.mxu1 %v944_v4 }
  0x30   : > { %860 = vmatpush3.bf16.msra.mxu0 %v859_v41  ;;  %v555_v41 = vsub.f32 1.0, %v244_v39 }
  0x31   : > { %861 = vmatprep.subr.bf16.mxu0 %v944_v4  ;;  %884 = vmatpush3.bf16.msra.mxu1 %v883_v46 }
  0x32   : > { %885 = vmatprep.subr.bf16.mxu1 %v944_v4  ;;  %v556_v45 = vmul.f32 %v555_v41, %v1121_v53 }
  0x34   : > { %863 = vmatpush3.bf16.msra.mxu0 %v862_v47 }
  0x35   : > { %888 = vmatprep.subr.bf16.mxu0 %v944_v4  ;;  %887 = vmatpush3.bf16.msra.mxu1 %v886_v52 }
  0x37   : > { %768 = vmatmul.mubr.f32.vlgmr.msra.gmra.mrb[0].mxu0 %v1121_v53 }
  0x38   : > { %890 = vmatpush3.bf16.msra.mxu0 %v889_v54  ;;  %837 = vmatprep.mubr.msk.f32.mxu0 %vm945_vm0, %v946_v7  ;;  %v672_v7 = vld [vmem:[%s1203_s2 + $0x160] sm:$0xff] }
  0x39   : > { %891 = vmatprep.subr.bf16.mxu0 %v944_v4  ;;  %803 = vmatmul.mubr.f32.vlgmr.msra.gmra.mrb[0].mxu1 %v1121_v53  ;;  %v907_v9 = vpack.c.bf16 %v673_v8, %v672_v7 }
  0x3c   : > { %893 = vmatpush3.bf16.msra.mxu0 %v892_v57 }
  0x3d   : > { %894 = vmatprep.subr.bf16.mxu0 %v944_v4 }
  0x40   : > { %896 = vmatpush3.bf16.msra.mxu0 %v895_v60 }
  0x41   : > { %897 = vmatprep.subr.bf16.mxu0 %v944_v4 }
  0x44   : > { %899 = vmatpush3.bf16.msra.mxu0 %v898_v63 }
  0x45   : > { %900 = vmatprep.subr.bf16.mxu0 %v944_v4 }
  0x48   : > { %902 = vmatpush3.bf16.msra.mxu0 %v901_v2 }
  0x49   : > { %903 = vmatprep.subr.bf16.mxu0 %v944_v4 }
  0x4c   : > { %905 = vmatpush3.bf16.msra.mxu0 %v904_v6 }
  0x4d   : > { %906 = vmatprep.subr.bf16.mxu0 %v944_v4 }
  0x50   : > { %908 = vmatpush3.bf16.msra.mxu0 %v907_v9 }
  0x51   : > { %909 = vmatprep.subr.bf16.mxu0 %v944_v4 }
  0x54   : > { %911 = vmatpush3.bf16.msra.mxu0 %v910_v12 }
  0x57   : > { %838 = vmatmul.mubr.f32.vlgmr.msra.gmra.mrb[2].mxu0 %v1121_v53 }
 0x10a   : > { %v334_v14 = vpop.f32.mrb[0].mxu0 }
 0x10b   : > { %v335_v16 = vadd.f32 %v641_v13, %v334_v14  ;;  %v769_v17 = vpop.f32.mrb[1].mxu0 }
 0x10c   : > { %v429_v20 = vpop.f32.mrb[0].mxu1 }
 0x10d   : > { %v529_v19 = vadd.f32 %v528_v15, %v335_v16  ;;  %v430_v21 = vadd.f32 %v659_v18, %v429_v20  ;;  %v804_v22 = vpop.f32.mrb[1].mxu1 }
 0x10f   : > { %v678_v4 = vmul.f32 -1.442695, %v529_v19  ;;  %v538_v24 = vadd.f32 %v679_v23, %v430_v21 }
 0x111   : > { %925 = vpow2.f32 %v678_v4  ;;  %v680_v25 = vmul.f32 -1.442695, %v538_v24 }
 0x113   : > { %927 = vpow2.f32 %v680_v25 }
 0x11b   : > { %v926_v26 = vpop.eup %925 }
 0x11c   : > { %v533_v27 = vadd.f32 1.0, %v926_v26 }
 0x11d   : > { %v928_v28 = vpop.eup %927 }
 0x11e   : > { %929 = vrcp.f32 %v533_v27  ;;  %v542_v29 = vadd.f32 1.0, %v928_v28 }
 0x120   : > { %931 = vrcp.f32 %v542_v29 }
 0x128   : > { %v930_v34 = vpop.eup %929 }
 0x12a   : > { %v524_v31 = vpop.f32.mrb[2].mxu0  ;;  %v932_v38 = vpop.eup %931 }
 0x12b   : > { %v525_v32 = vadd.f32 %v677_v30, %v524_v31  ;;  %v839_v33 = vpop.f32.mrb[3].mxu0  ;;  %v550_v40 = vsub.f32 1.0, %v932_v38  ;;  %v552_v43 = vmul.f32 %v932_v38, %v1121_v53 }
 0x12d   : > { %v547_v36 = vmul.f32 %v930_v34, %v525_v32 }
 0x12f   : > { %v548_v37 = vadd.f32 %v681_v35, %v547_v36 }
 0x131   : > { %933 = vtanh.f32 %v548_v37 }
 0x13b   : > { %v934_v42 = vpop.eup %933 }
 0x13c   : > { %v551_v44 = vmul.f32 %v934_v42, %v550_v40 }
 0x13e   : > { %v553_v46 = vadd.f32 %v552_v43, %v551_v44 }
 0x140   : > { %v554_v47 = vmul.f32 %v553_v46, %v244_v39 }
 0x142   : > { %v557_v48 = vadd.f32 %v556_v45, %v554_v47  ;;  %559 = vst [vmem:[%s993_s28] sm:$0x3] %v554_v47 }
 0x144   : > { %558 = vst [vmem:[#allocation2] sm:$0x3] %v557_v48  ;;  %560 = vst [vmem:[%s1206_s5] sm:$0x3] %v557_v48 }
 0x145 PF: > { %s16_s18 = sadd.s32 1, %s941_s18  }
 0x146   : > { %p13_p5 = scmp.ge.s32.totalorder %s16_s18, 10  }
 0x148   :  { %15 = sbr.rel (!%p13_p5) target bundleno = 1 (0x1), region = 87 }

// kernel: hga_forward.25
= control target key start
LH: loop header
LB: loop body
LE: loop exit
PB: predicated region body
PF: predicated region fallthrough
CT: control target
= control target key end

     0   :  { %s687_s12 = smov 0   ;;  %s689_s13 = smov 0   ;;  %s766_s0 = inlined_call_operand.vmem [shape: bf16[32,64], index: 0, kind: input, shape index: {}]   ;;  %s767_s1 = inlined_call_operand.vmem [shape: bf16[64,384], index: 1, kind: input, shape index: {}]   ;;  %s768_s2 = inlined_call_operand.vmem [shape: f32[1,384], index: 2, kind: input, shape index: {}]   ;;  %s769_s3 = inlined_call_operand.vmem [shape: f32[32,384], index: 3, kind: output, shape index: {}]  }
   0x1   :  { %s691_s14 = smov 0  }
   0x2 LB: > { %s25_s15 = sadd.s32 1, %s658_s13  ;;  %p556_p0 = scmp.ge.s32.totalorder %s662_s14, 1  ;;  %s662_s14 = sphi %s691_s14, %s13_s14   ;;  %s658_s13 = sphi %s689_s13, %s771_s13   ;;  %s654_s12 = sphi %s687_s12, %s770_s12  }
   0x3   : > { %p27_p1 = scmp.ge.s32.totalorder %s25_s15, 2  ;;  %p167_p2 = scmp.lt.s32.totalorder %s662_s14, 3 }
   0x5   : > { %s773_s15 = smov (%p27_p1, %s25_s15), 0  ;;  %p168_p3 = pnand %p556_p0, %p167_p2 }
   0x6   : > { %v623_v0 = vld [vmem:[%s767_s1 + $0x4] ss:$12 sps:$4 sm:$0xff] (!%p168_p3)   ;;  %v664_v1 = vmov (!%p168_p3), 0.0   ;;  %v625_v2 = vld [vmem:[%s767_s1 + $0x8] ss:$12 sps:$4 sm:$0xff] (!%p168_p3)   ;;  %vm665_vm0 = vmmov (!%p168_p3), 0   ;;  %v439_v15 = vlaneseq (!%p168_p3) }
   0x7   : > { %171 = sbr.rel (%p168_p3) target bundleno = 242 (0xf2), region = 32  ;;  %583 = vmatprep.subr.bf16.mxu1 (!%p168_p3), %v664_v1  ;;  %591 = vmatprep.mubr.msk.bf16.mxu1 (!%p168_p3), %vm665_vm0, %v664_v1  ;;  %v626_v3 = vld [vmem:[%s767_s1] ss:$12 sps:$4 sm:$0xff] (!%p168_p3)   ;;  %s557_s22 = sshll.u32 (!%p168_p3), %s654_s12, 1  ;;  %v627_v4 = vld [vmem:[%s767_s1 + $0x1c] ss:$12 sps:$4 sm:$0xff] (!%p168_p3)  }
   0x8   : > { %332 = vmatprep.subr.bf16.mxu0 (!%p168_p3), %v623_v0  ;;  %584 = vmatpush3.bf16.msra.mxu1 (!%p168_p3), %v625_v2  ;;  %v666_v5 = vmov (!%p168_p3), 0   ;;  %v629_v6 = vld [vmem:[%s767_s1 + $0x20] ss:$12 sps:$4 sm:$0xff] (!%p168_p3)   ;;  %v630_v7 = vld [vmem:[%s767_s1 + $0x18] ss:$12 sps:$4 sm:$0xff] (!%p168_p3)   ;;  %p202_p4 = scmp.lt.s32.totalorder (!%p168_p3), %s557_s22, 3 }
   0x9   : > { %364 = vmatprep.mubr.bf16.mxu0 (!%p168_p3), %v666_v5  ;;  %333 = vmatpush1.bf16.msra.mxu0 (!%p168_p3), %v626_v3  ;;  %v631_v8 = vld [vmem:[%s767_s1 + $0x34] ss:$12 sps:$4 sm:$0xff] (!%p168_p3)   ;;  %v633_v9 = vld [vmem:[%s767_s1 + $0x38] ss:$12 sps:$4 sm:$0xff] (!%p168_p3)   ;;  %v634_v10 = vld [vmem:[%s767_s1 + $0x30] ss:$12 sps:$4 sm:$0xff] (!%p168_p3)  }
   0xa   : > { %585 = vmatprep.subr.bf16.mxu1 (!%p168_p3), %v664_v1  ;;  %334 = vmatprep.subr.bf16.mxu0 (!%p168_p3), %v627_v4  ;;  %v635_v11 = vld [vmem:[%s767_s1 + $0x4c] ss:$12 sps:$4 sm:$0xff] (!%p168_p3)   ;;  %v637_v12 = vld [vmem:[%s767_s1 + $0x50] ss:$12 sps:$4 sm:$0xff] (!%p168_p3)   ;;  %v638_v13 = vld [vmem:[%s767_s1 + $0x48] ss:$12 sps:$4 sm:$0xff] (!%p168_p3)  }
   0xb   : > { %vm328_vm1 = vcmask (!%p168_p3), 523264   ;;  %v440_v16 = vshrl.u32 (!%p168_p3), %v439_v15, 7  ;;  %v437_v18 = vld [vmem:[%s768_s2] sm:$0x7] (!%p168_p3) }
   0xc   : > { %586 = vmatpush3.bf16.msra.mxu1 (!%p168_p3), %v629_v6 }
   0xd   : > { %335 = vmatpush1.bf16.msra.mxu0 (!%p168_p3), %v630_v7  ;;  %587 = vmatprep.subr.bf16.mxu1 (!%p168_p3), %v664_v1  ;;  %v449_v17 = vsub.s32 (!%p168_p3), 2, %v440_v16  ;;  %v441_v19 = vsub.s32 (!%p168_p3), 0, %v440_v16  ;;  %v445_v20 = vsub.s32 (!%p168_p3), 1, %v440_v16 }
   0xe   : > { %s775_s22 = smov (!%p202_p4, %s557_s22), 3  ;;  %336 = vmatprep.subr.bf16.mxu0 %v631_v8 }
   0xf   : > { %s558_s10 = sshll.u32 %s775_s22, 2  ;;  %s595_s24 = smul.u32 24, %s775_s22  ;;  %v450_v21 = vrot.slane %v437_v18, %v449_v17  ;;  %v442_v22 = vrot.slane %v437_v18, %v441_v19  ;;  %v446_v23 = vrot.slane %v437_v18, %v445_v20 }
  0x10   : > { %s208_s16 = scalar_lea.vmem %s766_s0, %s558_s10  ;;  %588 = vmatpush3.bf16.msra.mxu1 %v633_v9 }
  0x11   : > { %337 = vmatpush1.bf16.msra.mxu0 %v634_v10  ;;  %589 = vmatprep.subr.bf16.mxu1 %v664_v1  ;;  %v639_v14 = vld [vmem:[%s208_s16] sm:$0xff]   ;;  %s222_s27 = scalar_lea.vmem %s769_s3, %s595_s24 }
  0x12   : > { %338 = vmatprep.subr.bf16.mxu0 %v635_v11 }
  0x14   : > { %590 = vmatpush3.bf16.msra.mxu1 %v637_v12 }
  0x15   : > { %339 = vmatpush1.bf16.msra.mxu0 %v638_v13 }
  0x17   : > { %592 = vmatmul.mubr.msk.bf16.vlgmr.msra.gmra.mrb[0].mxu1 %vm328_vm1, %v639_v14 }
  0x18   : > { %574 = vmatmul.mubr.msk.bf16.vlgmr.msra.gmra.mrb[0].mxu0 %vm328_vm1, %v639_v14 }
  0xea   : > { %v409_v24 = vpop.f32.mrb[0].mxu1 }
  0xeb   : > { %v456_v25 = vadd.f32 %v450_v21, %v409_v24  ;;  %v366_v26 = vpop.f32.mrb[0].mxu0  ;;  %v593_v27 = vpop.f32.mrb[1].mxu1 }
  0xec   : > { %v454_v28 = vadd.f32 %v442_v22, %v366_v26  ;;  %v368_v29 = vpop.f32.mrb[1].mxu0  ;;  %v412_v30 = vpop.f32.mrb[2].mxu1 }
  0xed   : > { %462 = vst [vmem:[%s222_s27 + $0x10] sm:$0xff] %v456_v25  ;;  %v455_v31 = vadd.f32 %v446_v23, %v368_v29  ;;  %v459_v32 = vadd.f32 %v450_v21, %v412_v30  ;;  %v370_v33 = vpop.f32.mrb[2].mxu0  ;;  %v594_v34 = vpop.f32.mrb[3].mxu1 }
  0xee   : > { %460 = vst [vmem:[%s222_s27] sm:$0xff] %v454_v28  ;;  %v457_v35 = vadd.f32 %v442_v22, %v370_v33  ;;  %v372_v36 = vpop.f32.mrb[3].mxu0 }
  0xef   : > { %461 = vst [vmem:[%s222_s27 + $0x8] sm:$0xff] %v455_v31  ;;  %465 = vst [vmem:[%s222_s27 + $0x28] sm:$0xff] %v459_v32  ;;  %v458_v37 = vadd.f32 %v446_v23, %v372_v36 }
  0xf0   : > { %463 = vst [vmem:[%s222_s27 + $0x18] sm:$0xff] %v457_v35 }
  0xf1   : > { %464 = vst [vmem:[%s222_s27 + $0x20] sm:$0xff] %v458_v37 }
  0xf2 PF: > { %s13_s14 = sadd.s32 1, %s662_s14   ;;  %s770_s12 = smov %s658_s13 }
  0xf3   : > { %p10_p5 = scmp.ge.s32.totalorder %s13_s14, 4   ;;  %s771_s13 = smov %s773_s15 }
  0xf5   :  { %12 = sbr.rel (!%p10_p5) target bundleno = 2 (0x2), region = 73 }

// kernel: hga_forward.24
= control target key start
LH: loop header
LB: loop body
LE: loop exit
PB: predicated region body
PF: predicated region fallthrough
CT: control target
= control target key end

     0   :  { %s995_s12 = smov 0   ;;  %s997_s13 = smov 0   ;;  %s1136_s0 = inlined_call_operand.vmem [shape: bf16[32,4096], index: 0, kind: input, shape index: {}]   ;;  %s1137_s1 = inlined_call_operand.vmem [shape: bf16[4096,128], index: 1, kind: input, shape index: {}]   ;;  %s1138_s2 = inlined_call_operand.vmem [shape: f32[1,128], index: 2, kind: input, shape index: {}]   ;;  %s1139_s3 = inlined_call_operand.vmem [shape: f32[32,128], index: 3, kind: output, shape index: {}]  }
   0x1   :  { %s999_s14 = smov 0   ;;  %s1001_s15 = smov 0  }
   0x2   :  { %s1003_s16 = smov 0   ;;  %s1005_s17 = smov 0  }
   0x3   :  { %s1007_s18 = smov 0  }
   0x4 LB: > { %s22_s19 = sadd.s32 1, %s964_s16  ;;  %s25_s20 = sadd.s32 1, %s968_s17  ;;  %s972_s18 = sphi %s1007_s18, %s13_s18   ;;  %s968_s17 = sphi %s1005_s17, %s1145_s17   ;;  %s964_s16 = sphi %s1003_s16, %s1144_s16   ;;  %s960_s15 = sphi %s1001_s15, %s1143_s15   ;;  %s956_s14 = sphi %s999_s14, %s1142_s14   ;;  %s952_s13 = sphi %s997_s13, %s1141_s13   ;;  %s948_s12 = sphi %s995_s12, %s1140_s12  }
   0x5   : > { %p23_p0 = scmp.ge.s32.totalorder %s22_s19, 8  ;;  %p41_p1 = scmp.ne.s32.totalorder %s952_s13, %s948_s12 }
   0x6   : > { %p42_p2 = scmp.eq.s32.totalorder %s972_s18, 0  ;;  %s34_s24 = sadd.s32 1, %s952_s13 }
   0x7   : > { %s1147_s19 = smov (%p23_p0, %s22_s19), 0  ;;  %s1149_s20 = smov (!%p23_p0, %s25_s20), %s968_s17 }
   0x8   : > { %p43_p3 = por %p42_p2, %p41_p1  ;;  %p27_p4 = scmp.ge.s32.totalorder %s1149_s20, 2 }
   0x9   : > { %s30_s21 = ssub.s32 %s964_s16, %s1147_s19  ;;  %p725_p6 = scmp.ge.s32.totalorder %s972_s18, 16 }
   0xa   : > { %s1151_s20 = smov (%p27_p4, %s1149_s20), 0 }
   0xb   : > { %s29_s22 = ssub.s32 %s968_s17, %s1151_s20  ;;  %143 = sbr.rel (%p725_p6) target bundleno = 27 (0x1b), region = 20 }
   0xc   : > { %s31_s23 = sor.u32 %s30_s21, %s29_s22 }
   0xd   : > { %p32_p5 = scmp.eq.s32.totalorder %s31_s23, 0 }
   0xf   : > { %s1046_s25 = scalar_select %p32_p5, %s952_s13, %s34_s24  }
  0x12   : > { %146 = sbr.rel (!%p43_p3) target bundleno = 27 (0x1b), region = 24  ;;  %s148_s26 = sand.u32 (%p43_p3), 1, %s952_s13  }
  0x13   : > { %s728_s27 = sshll.u32 (%p43_p3), %s964_s16, 2  ;;  %s726_s28 = sshll.u32 (%p43_p3), %s148_s26, 5 }
  0x14   : > { %s778_s29 = sshll.u32 (%p43_p3), %s968_s17, 6  ;;  %s150_s8 = scalar_lea.vmem (%p43_p3), [#allocation3], %s726_s28 }
  0x15   : > { %s154_s30 = sadd.s32 (%p43_p3), %s778_s29, %s728_s27 }
  0x16   : > { %s730_s4 = sshll.u32 (%p43_p3), %s154_s30, 2 }
  0x17   : > { %s156_s7 = scalar_lea.vmem (%p43_p3), %s1136_s0, %s730_s4 }
  0x18   : > { %v169_v0 = vld [vmem:[%s156_s7] sm:$0xff] (%p43_p3)  ;;  %v171_v1 = vld [vmem:[%s156_s7 + $0x8] sm:$0xff] (%p43_p3) }
  0x19   : > { %v173_v2 = vld [vmem:[%s156_s7 + $0x80] sm:$0xff]  ;;  %170 = vst [vmem:[%s150_s8] sm:$0xff] %v169_v0  ;;  %172 = vst [vmem:[%s150_s8 + $0x8] sm:$0xff] %v171_v1  ;;  %v175_v3 = vld [vmem:[%s156_s7 + $0x88] sm:$0xff] }
  0x1a   : > { %174 = vst [vmem:[%s150_s8 + $0x10] sm:$0xff] %v173_v2  ;;  %176 = vst [vmem:[%s150_s8 + $0x18] sm:$0xff] %v175_v3 }
  0x1b PF: > { %p731_p7 = scmp.ge.s32.totalorder %s972_s18, 1  ;;  %p190_p8 = scmp.lt.s32.totalorder %s972_s18, 17 }
  0x1d   : > { %p191_p9 = pnand %p731_p7, %p190_p8 }
  0x1e   : > { %s197_s9 = sand.u32 (!%p191_p9), 1, %s948_s12   ;;  %s733_s10 = sshll.u32 (!%p191_p9), %s956_s14, 6 }
  0x1f   : > { %194 = sbr.rel (%p191_p9) target bundleno = 317 (0x13d), region = 51  ;;  %s732_s11 = sshll.u32 (!%p191_p9), %s197_s9, 5 }
  0x20   : > { %p228_p10 = scmp.lt.s32.totalorder (!%p191_p9), %s733_s10, 511  ;;  %s735_s21 = sshll.u32 (!%p191_p9), %s960_s15, 1 }
  0x21   : > { %p234_p11 = scmp.lt.s32.totalorder (!%p191_p9), %s735_s21, 3  ;;  %s1070_s12 = scalar_lea.vmem (!%p191_p9), [#allocation3], %s732_s11 }
  0x22   : > { %p737_p12 = scmp.ne.s32.totalorder (!%p191_p9), %s956_s14, 0 }
  0x26   : > { %s1153_s10 = smov (!%p228_p10, %s733_s10), 511  ;;  %s1155_s21 = smov (!%p234_p11, %s735_s21), 3 }
  0x27   : > { %s734_s22 = sshll.u32 %s1153_s10, 2  ;;  %s736_s27 = sshll.u32 %s1155_s21, 3  ;;  %v974_v4 = vmov (!%p737_p12), 0.0  }
  0x28   : > { %s1063_s26 = scalar_lea.vmem %s1137_s1, %s734_s22  ;;  %s1068_s30 = scalar_lea.vmem %s1139_s3, %s736_s27  ;;  %244 = vst [vmem:[#allocation2] sm:$0xff] (!%p737_p12), %v974_v4  ;;  %245 = vst [vmem:[#allocation2 + $0x8] sm:$0xff] (!%p737_p12), %v974_v4 }
  0x29   : > { %243 = sbr.rel (%p737_p12) target bundleno = 48 (0x30), region = 59 }
  0x30 PF: > { %v880_v5 = vld [vmem:[%s1063_s26 + $0x40] sm:$0xff]   ;;  %v884_v9 = vld [vmem:[%s1063_s26 + $0x48] sm:$0xff]   ;;  %v888_v13 = vld [vmem:[%s1063_s26 + $0x50] sm:$0xff]   ;;  %p774_p13 = scmp.ne.s32.totalorder %s956_s14, 7 }
  0x31   : > { %v881_v6 = vld [vmem:[%s1063_s26 + $0xc0] sm:$0xff]   ;;  %779 = vmatprep.subr.bf16.mxu0 %v880_v5  ;;  %v885_v10 = vld [vmem:[%s1063_s26 + $0xc8] sm:$0xff]   ;;  %v889_v14 = vld [vmem:[%s1063_s26 + $0xd0] sm:$0xff]  }
  0x32   : > { %v882_v7 = vld [vmem:[%s1063_s26] sm:$0xff]   ;;  %801 = vmatprep.subr.bf16.mxu1 %v881_v6  ;;  %v886_v11 = vld [vmem:[%s1063_s26 + $0x8] sm:$0xff]   ;;  %v890_v15 = vld [vmem:[%s1063_s26 + $0x10] sm:$0xff]  }
  0x33   : > { %v883_v8 = vld [vmem:[%s1063_s26 + $0x80] sm:$0xff]   ;;  %780 = vmatpush3.bf16.msra.mxu0 %v882_v7  ;;  %v887_v12 = vld [vmem:[%s1063_s26 + $0x88] sm:$0xff]   ;;  %v891_v16 = vld [vmem:[%s1063_s26 + $0x90] sm:$0xff]  }
  0x34   : > { %802 = vmatpush3.bf16.msra.mxu1 %v883_v8  ;;  %781 = vmatprep.subr.bf16.mxu0 %v884_v9  ;;  %v892_v17 = vld [vmem:[%s1063_s26 + $0x58] sm:$0xff]   ;;  %v896_v21 = vld [vmem:[%s1063_s26 + $0x60] sm:$0xff]   ;;  %v900_v25 = vld [vmem:[%s1063_s26 + $0x68] sm:$0xff]  }
  0x35   : > { %803 = vmatprep.subr.bf16.mxu1 %v885_v10  ;;  %v893_v18 = vld [vmem:[%s1063_s26 + $0xd8] sm:$0xff]   ;;  %v897_v22 = vld [vmem:[%s1063_s26 + $0xe0] sm:$0xff]   ;;  %v901_v26 = vld [vmem:[%s1063_s26 + $0xe8] sm:$0xff]  }
  0x36   : > { %v894_v19 = vld [vmem:[%s1063_s26 + $0x18] sm:$0xff]   ;;  %v898_v23 = vld [vmem:[%s1063_s26 + $0x20] sm:$0xff]   ;;  %v902_v27 = vld [vmem:[%s1063_s26 + $0x28] sm:$0xff]  }
  0x37   : > { %782 = vmatpush3.bf16.msra.mxu0 %v886_v11  ;;  %v895_v20 = vld [vmem:[%s1063_s26 + $0x98] sm:$0xff]   ;;  %v899_v24 = vld [vmem:[%s1063_s26 + $0xa0] sm:$0xff]   ;;  %v903_v28 = vld [vmem:[%s1063_s26 + $0xa8] sm:$0xff]  }
  0x38   : > { %804 = vmatpush3.bf16.msra.mxu1 %v887_v12  ;;  %783 = vmatprep.subr.bf16.mxu0 %v888_v13  ;;  %v904_v29 = vld [vmem:[%s1063_s26 + $0x70] sm:$0xff]   ;;  %v908_v33 = vld [vmem:[%s1063_s26 + $0x78] sm:$0xff]   ;;  %v246_v50 = vld [vmem:[#allocation2] sm:$0xff] }
  0x39   : > { %805 = vmatprep.subr.bf16.mxu1 %v889_v14  ;;  %v905_v30 = vld [vmem:[%s1063_s26 + $0xf0] sm:$0xff]   ;;  %v909_v34 = vld [vmem:[%s1063_s26 + $0xf8] sm:$0xff]   ;;  %v247_v55 = vld [vmem:[#allocation2 + $0x8] sm:$0xff] }
  0x3a   : > { %v906_v31 = vld [vmem:[%s1063_s26 + $0x30] sm:$0xff]   ;;  %v910_v35 = vld [vmem:[%s1063_s26 + $0x38] sm:$0xff]   ;;  %v775_v60 = vld [vmem:[%s1138_s2] ss:$0 sm:$0xff] (!%p774_p13) }
  0x3b   : > { %784 = vmatpush3.bf16.msra.mxu0 %v890_v15  ;;  %v907_v32 = vld [vmem:[%s1063_s26 + $0xb0] sm:$0xff]   ;;  %v911_v36 = vld [vmem:[%s1063_s26 + $0xb8] sm:$0xff]  }
  0x3c   : > { %806 = vmatpush3.bf16.msra.mxu1 %v891_v16  ;;  %785 = vmatprep.subr.bf16.mxu0 %v892_v17  ;;  %v912_v37 = vld [vmem:[%s1070_s12] ss:$16 sps:$4 sm:$0xff]   ;;  %v914_v38 = vld [vmem:[%s1070_s12 + $0x4] ss:$16 sps:$4 sm:$0xff]   ;;  %v915_v39 = vld [vmem:[%s1070_s12 + $0x8] ss:$16 sps:$4 sm:$0xff]  }
  0x3d   : > { %807 = vmatprep.subr.bf16.mxu1 %v893_v18  ;;  %v917_v40 = vld [vmem:[%s1070_s12 + $0xc] ss:$16 sps:$4 sm:$0xff]   ;;  %560 = vmatprep.mubr.bf16.mxu0 %v914_v38 }
  0x3e   : > { %601 = vmatprep.mubr.bf16.mxu1 %v917_v40 }
  0x3f   : > { %786 = vmatpush3.bf16.msra.mxu0 %v894_v19 }
  0x40   : > { %808 = vmatpush3.bf16.msra.mxu1 %v895_v20  ;;  %787 = vmatprep.subr.bf16.mxu0 %v896_v21 }
  0x41   : > { %809 = vmatprep.subr.bf16.mxu1 %v897_v22 }
  0x43   : > { %788 = vmatpush3.bf16.msra.mxu0 %v898_v23 }
  0x44   : > { %810 = vmatpush3.bf16.msra.mxu1 %v899_v24  ;;  %789 = vmatprep.subr.bf16.mxu0 %v900_v25 }
  0x45   : > { %811 = vmatprep.subr.bf16.mxu1 %v901_v26 }
  0x47   : > { %790 = vmatpush3.bf16.msra.mxu0 %v902_v27 }
  0x48   : > { %812 = vmatpush3.bf16.msra.mxu1 %v903_v28  ;;  %791 = vmatprep.subr.bf16.mxu0 %v904_v29 }
  0x49   : > { %813 = vmatprep.subr.bf16.mxu1 %v905_v30 }
  0x4b   : > { %792 = vmatpush3.bf16.msra.mxu0 %v906_v31 }
  0x4c   : > { %814 = vmatpush3.bf16.msra.mxu1 %v907_v32  ;;  %793 = vmatprep.subr.bf16.mxu0 %v908_v33 }
  0x4d   : > { %815 = vmatprep.subr.bf16.mxu1 %v909_v34 }
  0x4f   : > { %794 = vmatpush3.bf16.msra.mxu0 %v910_v35 }
  0x50   : > { %816 = vmatpush3.bf16.msra.mxu1 %v911_v36 }
  0x52   : > { %561 = vmatmul.mubr.bf16.vlgmr.msra.gmra.mrb[0].mxu0 %v912_v37 }
  0x53   : > { %602 = vmatmul.mubr.bf16.vlgmr.msra.gmra.mrb[0].mxu1 %v915_v39 }
 0x125   : > { %v795_v41 = vpop.f32.mrb[0].mxu0 }
 0x126   : > { %v817_v42 = vpop.f32.mrb[0].mxu1  ;;  %v796_v43 = vpop.f32.mrb[1].mxu0 }
 0x127   : > { %v797_v44 = vadd.f32 %v796_v43, %v795_v41  ;;  %v818_v45 = vpop.f32.mrb[1].mxu1  ;;  %v798_v46 = vpop.f32.mrb[2].mxu0 }
 0x128   : > { %v819_v47 = vadd.f32 %v818_v45, %v817_v42  ;;  %v820_v48 = vpop.f32.mrb[2].mxu1  ;;  %v799_v49 = vpop.f32.mrb[3].mxu0 }
 0x129   : > { %v800_v51 = vadd.f32 %v799_v49, %v798_v46  ;;  %v821_v52 = vpop.f32.mrb[3].mxu1 }
 0x12a   : > { %v604_v53 = vadd.f32 %v819_v47, %v797_v44  ;;  %v822_v54 = vadd.f32 %v821_v52, %v820_v48  ;;  %617 = sbr.rel (%p774_p13) target bundleno = 317 (0x13d), region = 63 }
 0x12c   : > { %v610_v56 = vadd.f32 %v604_v53, %v246_v50  ;;  %v607_v57 = vadd.f32 %v822_v54, %v800_v51 }
 0x12e   : > { %612 = vst [vmem:[#allocation2] sm:$0xff] %v610_v56  ;;  %v611_v58 = vadd.f32 %v607_v57, %v247_v55 }
 0x130   : > { %613 = vst [vmem:[#allocation2 + $0x8] sm:$0xff] %v611_v58 }
 0x135   : > { %v618_v59 = vld [vmem:[#allocation2] sm:$0xff] }
 0x136   : > { %v627_v62 = vadd.f32 %v775_v60, %v618_v59 }
 0x137   : > { %v619_v61 = vld [vmem:[#allocation2 + $0x8] sm:$0xff] }
 0x138   : > { %v628_v63 = vadd.f32 %v775_v60, %v619_v61  ;;  %v629_v0 = vmax.f32 %v627_v62, 0.0 }
 0x13a   : > { %v630_v1 = vmax.f32 %v628_v63, 0.0  ;;  %631 = vst [vmem:[%s1068_s30] sm:$0xff] %v629_v0 }
 0x13c   : > { %632 = vst [vmem:[%s1068_s30 + $0x8] sm:$0xff] %v630_v1 }
 0x13d PF: > { %s13_s18 = sadd.s32 1, %s972_s18   ;;  %s1140_s12 = smov %s952_s13 }
 0x13e   : > { %p10_p0 = scmp.ge.s32.totalorder %s13_s18, 18   ;;  %s1141_s13 = smov %s1046_s25 }
 0x13f   : > { %s1142_s14 = smov %s964_s16  ;;  %s1143_s15 = smov %s968_s17 }
 0x140   : > { %s1144_s16 = smov %s1147_s19  ;;  %s1145_s17 = smov %s1151_s20 }
 0x141   :  { %12 = sbr.rel (!%p10_p0) target bundleno = 4 (0x4), region = 101 }

// kernel: reverse
= control target key start
LH: loop header
LB: loop body
LE: loop exit
PB: predicated region body
PF: predicated region fallthrough
CT: control target
= control target key end

     0   :  { %s200_s0 = inlined_call_operand.vmem [shape: f32[16,2,64], index: 0, kind: input, shape index: {}]   ;;  %s201_s1 = inlined_call_operand.vmem [shape: f32[16,2,64], index: 1, kind: output, shape index: {}]  }
   0x1   :  { %v64_v0 = vld [vmem:[%s200_s0 + $0x1e] sm:$0x3]  ;;  %v65_v1 = vld [vmem:[%s200_s0 + $0x1c] sm:$0x3]  ;;  %v67_v2 = vld [vmem:[%s200_s0 + $0x1a] sm:$0x3] }
   0x2   :  { %4 = vst [vmem:[%s201_s1] sm:$0x3] %v64_v0  ;;  %66 = vst [vmem:[%s201_s1 + $0x2] sm:$0x3] %v65_v1  ;;  %v69_v3 = vld [vmem:[%s200_s0 + $0x18] sm:$0x3] }
   0x3   :  { %68 = vst [vmem:[%s201_s1 + $0x4] sm:$0x3] %v67_v2  ;;  %v71_v4 = vld [vmem:[%s200_s0 + $0x16] sm:$0x3]  ;;  %v73_v5 = vld [vmem:[%s200_s0 + $0x14] sm:$0x3] }
   0x4   :  { %70 = vst [vmem:[%s201_s1 + $0x6] sm:$0x3] %v69_v3  ;;  %72 = vst [vmem:[%s201_s1 + $0x8] sm:$0x3] %v71_v4  ;;  %v75_v6 = vld [vmem:[%s200_s0 + $0x12] sm:$0x3] }
   0x5   :  { %74 = vst [vmem:[%s201_s1 + $0xa] sm:$0x3] %v73_v5  ;;  %v77_v7 = vld [vmem:[%s200_s0 + $0x10] sm:$0x3]  ;;  %v79_v8 = vld [vmem:[%s200_s0 + $0xe] sm:$0x3] }
   0x6   :  { %76 = vst [vmem:[%s201_s1 + $0xc] sm:$0x3] %v75_v6  ;;  %78 = vst [vmem:[%s201_s1 + $0xe] sm:$0x3] %v77_v7  ;;  %v81_v9 = vld [vmem:[%s200_s0 + $0xc] sm:$0x3] }
   0x7   :  { %80 = vst [vmem:[%s201_s1 + $0x10] sm:$0x3] %v79_v8  ;;  %v83_v10 = vld [vmem:[%s200_s0 + $0xa] sm:$0x3]  ;;  %v85_v11 = vld [vmem:[%s200_s0 + $0x8] sm:$0x3] }
   0x8   :  { %82 = vst [vmem:[%s201_s1 + $0x12] sm:$0x3] %v81_v9  ;;  %84 = vst [vmem:[%s201_s1 + $0x14] sm:$0x3] %v83_v10  ;;  %v87_v12 = vld [vmem:[%s200_s0 + $0x6] sm:$0x3] }
   0x9   :  { %86 = vst [vmem:[%s201_s1 + $0x16] sm:$0x3] %v85_v11  ;;  %v89_v13 = vld [vmem:[%s200_s0 + $0x4] sm:$0x3]  ;;  %v91_v14 = vld [vmem:[%s200_s0 + $0x2] sm:$0x3] }
   0xa   :  { %88 = vst [vmem:[%s201_s1 + $0x18] sm:$0x3] %v87_v12  ;;  %90 = vst [vmem:[%s201_s1 + $0x1a] sm:$0x3] %v89_v13  ;;  %v61_v15 = vld [vmem:[%s200_s0] sm:$0x3] }
   0xb   :  { %92 = vst [vmem:[%s201_s1 + $0x1c] sm:$0x3] %v91_v14  ;;  %93 = vst [vmem:[%s201_s1 + $0x1e] sm:$0x3] %v61_v15 }

// kernel: hga_forward.27
= control target key start
LH: loop header
LB: loop body
LE: loop exit
PB: predicated region body
PF: predicated region fallthrough
CT: control target
= control target key end

     0   :  { %s244_s6 = smov 0   ;;  %s261_s0 = inlined_call_operand.vmem [shape: f32[32,128], index: 0, kind: input, shape index: {}]   ;;  %s262_s1 = inlined_call_operand.vmem [shape: f32[32,128], index: 1, kind: output, shape index: {}]  }
   0x1 LB: > { %s203_s7 = sadd.s32 4294967295, %s232_s6   ;;  %p207_p0 = scmp.ge.s32.totalorder %s232_s6, 1  ;;  %s232_s6 = sphi %s244_s6, %s11_s6  }
   0x2   : > { %p88_p1 = scmp.lt.s32.totalorder %s232_s6, 3 }
   0x4   : > { %p89_p2 = pnand %p207_p0, %p88_p1 }
   0x5   : > { %s208_s8 = sshll.u32 (!%p89_p2), %s203_s7, 1 }
   0x6   : > { %92 = sbr.rel (%p89_p2) target bundleno = 329 (0x149), region = 24  ;;  %p109_p3 = scmp.lt.s32.totalorder (!%p89_p2), %s208_s8, 3 }
   0xd   : > { %s264_s8 = smov (!%p109_p3, %s208_s8), 3 }
   0xe   : > { %s209_s9 = sshll.u32 %s264_s8, 3 }
   0xf   : > { %s112_s12 = scalar_lea.vmem %s261_s0, %s209_s9  ;;  %s118_s15 = scalar_lea.vmem %s262_s1, %s209_s9 }
  0x10   : > { %v120_v0 = vld [vmem:[%s112_s12] sm:$0xff]  ;;  %v121_v1 = vld [vmem:[%s112_s12 + $0x8] sm:$0xff] }
  0x11   : > { %122 = vadd.xlane.f32.xlu0 %v120_v0 }
  0x15   : > { %124 = vadd.xlane.f32.xlu0 %v121_v1 }
  0x9e   : > { %v123_v2 = vpop.xlane.xlu0 %122 }
  0x9f   : > { %v127_v3 = vmul.f32 0.0078125, %v123_v2 }
  0xa1   : > { %v129_v4 = vsub.f32 %v120_v0, %v127_v3 }
  0xa2   : > { %v125_v5 = vpop.xlane.xlu0 %124 }
  0xa3   : > { %v128_v6 = vmul.f32 0.0078125, %v125_v5  ;;  %v131_v7 = vmul.f32 %v129_v4, %v129_v4 }
  0xa5   : > { %v130_v8 = vsub.f32 %v121_v1, %v128_v6  ;;  %133 = vadd.xlane.f32.xlu1 %v131_v7 }
  0xa7   : > { %v132_v9 = vmul.f32 %v130_v8, %v130_v8 }
  0xa9   : > { %135 = vadd.xlane.f32.xlu1 %v132_v9 }
 0x132   : > { %v134_v10 = vpop.xlane.xlu1 %133 }
 0x133   : > { %v137_v11 = vmul.f32 0.0078125, %v134_v10 }
 0x135   : > { %v139_v12 = vadd.f32 1e-05, %v137_v11 }
 0x136   : > { %v136_v13 = vpop.xlane.xlu1 %135 }
 0x137   : > { %222 = vrsqrt.f32 %v139_v12  ;;  %v138_v14 = vmul.f32 0.0078125, %v136_v13 }
 0x139   : > { %v140_v15 = vadd.f32 1e-05, %v138_v14 }
 0x13b   : > { %224 = vrsqrt.f32 %v140_v15 }
 0x141   : > { %v223_v16 = vpop.eup %222 }
 0x142   : > { %v143_v17 = vmul.f32 %v223_v16, %v129_v4 }
 0x144   : > { %145 = vst [vmem:[%s118_s15] sm:$0xff] %v143_v17 }
 0x145   : > { %v225_v18 = vpop.eup %224 }
 0x146   : > { %v144_v19 = vmul.f32 %v225_v18, %v130_v8 }
 0x148   : > { %146 = vst [vmem:[%s118_s15 + $0x8] sm:$0xff] %v144_v19 }
 0x149 PF: > { %s11_s6 = sadd.s32 1, %s232_s6  }
 0x14a   : > { %p8_p4 = scmp.ge.s32.totalorder %s11_s6, 4  }
 0x14c   :  { %10 = sbr.rel (!%p8_p4) target bundleno = 1 (0x1), region = 54 }

// kernel: hga_forward.26
= control target key start
LH: loop header
LB: loop body
LE: loop exit
PB: predicated region body
PF: predicated region fallthrough
CT: control target
= control target key end

     0   :  { %11 = vsyncpa [#allocation4], 0  ;;  %s1036_s18 = smov 0   ;;  %s1285_s0 = inlined_call_operand.vmem [shape: f32[16,3,2,128], index: 0, kind: input, shape index: {}]   ;;  %s1286_s1 = inlined_call_operand.vmem [shape: f32[16,2,128], index: 1, kind: input, shape index: {}]   ;;  %s1287_s2 = inlined_call_operand.vmem [shape: f32[3,128,128], index: 2, kind: input, shape index: {}]   ;;  %s1288_s3 = inlined_call_operand.vmem [shape: f32[3,1,128], index: 3, kind: input, shape index: {}]   ;;  %s1289_s4 = inlined_call_operand.vmem [shape: f32[16,2,128], index: 4, kind: output, shape index: {0}]   ;;  %s1290_s5 = inlined_call_operand.hbm [shape: f32[2,128], index: 5, kind: output, shape index: {1}]  }
   0x1 LB: > { %s1042_s19 = sadd.s32 4294967295, %s999_s18   ;;  %p655_p0 = scmp.ge.s32.totalorder %s999_s18, 1  ;;  %s999_s18 = sphi %s1036_s18, %s17_s18  }
   0x2   : > { %p195_p1 = scmp.lt.s32.totalorder %s999_s18, 17 }
   0x4   : > { %p196_p2 = pnand %p655_p0, %p195_p1 }
   0x5   : > { %p226_p3 = scmp.lt.s32.totalorder (!%p196_p2), %s1042_s19, 15  ;;  %p659_p4 = scmp.ne.s32.totalorder (!%p196_p2), %s1042_s19, 0 }
   0x6   : > { %199 = sbr.rel (%p196_p2) target bundleno = 339 (0x153), region = 36 }
   0xd   : > { %s227_s20 = scalar_select %p226_p3, %s1042_s19, 15 }
   0xe   : > { %242 = sbr.rel (%p659_p4) target bundleno = 21 (0x15), region = 40  ;;  %v1001_v0 = vmov (!%p659_p4), 0.0  }
   0xf   : > { %s933_s21 = smul.u32 6, %s227_s20  ;;  %s657_s22 = sshll.u32 %s227_s20, 1  ;;  %243 = vst [vmem:[#allocation2] sm:$0x3] (!%p659_p4), %v1001_v0 }
  0x10   : > { %s1051_s25 = scalar_lea.vmem %s1286_s1, %s657_s22  ;;  %s1056_s28 = scalar_lea.vmem %s1289_s4, %s657_s22 }
  0x11   : > { %s1061_s6 = scalar_lea.vmem %s1285_s0, %s933_s21 }
  0x15 PF: > { %v246_v1 = vld [vmem:[%s1287_s2] sm:$0xff]  ;;  %v247_v2 = vld [vmem:[%s1287_s2 + $0x8] sm:$0xff]  ;;  %v248_v3 = vld [vmem:[%s1287_s2 + $0x10] sm:$0xff]  ;;  %v1002_v4 = vmov 0.0|0.0   ;;  %vm1003_vm0 = vmmov 0   ;;  %v1004_v7 = vmov 0.0  }
  0x16   : > { %861 = vmatprep.subr.bf16.mxu0 %v1002_v4  ;;  %v862_v5 = vpack.c.bf16 %v247_v2, %v246_v1  ;;  %v249_v6 = vld [vmem:[%s1287_s2 + $0x18] sm:$0xff]  ;;  %885 = vmatprep.subr.bf16.mxu1 %v1002_v4  ;;  %v661_v9 = vld [vmem:[%s1287_s2 + $0x80] sm:$0xff]  ;;  %v662_v10 = vld [vmem:[%s1287_s2 + $0x88] sm:$0xff]  ;;  %s1005_s9 = smov [#allocation3]   ;;  %p938_p5 = scmp.eq.s32.totalorder %s1042_s19, 15 }
  0x17   : > { %788 = vmatprep.mubr.msk.f32.mxu0 %vm1003_vm0, %v1004_v7  ;;  %823 = vmatprep.mubr.msk.f32.mxu1 %vm1003_vm0, %v1004_v7  ;;  %v865_v8 = vpack.c.bf16 %v249_v6, %v248_v3  ;;  %v250_v11 = vld [vmem:[%s1287_s2 + $0x20] sm:$0xff]  ;;  %v251_v12 = vld [vmem:[%s1287_s2 + $0x28] sm:$0xff]  ;;  %v886_v13 = vpack.c.bf16 %v662_v10, %v661_v9  ;;  %v663_v14 = vld [vmem:[%s1287_s2 + $0x90] sm:$0xff]  ;;  %s576_s10 = sshll.u32 %s1005_s9, 4  ;;  %s577_s10 = int_to_ptr.vmem [resolvable:$true] %s576_s10 }
  0x18   : > { %863 = vmatpush3.bf16.msra.mxu0 %v862_v5  ;;  %v664_v15 = vld [vmem:[%s1287_s2 + $0x98] sm:$0xff]  ;;  %v868_v17 = vpack.c.bf16 %v251_v12, %v250_v11  ;;  %v665_v18 = vld [vmem:[%s1287_s2 + $0xa0] sm:$0xff]  ;;  %v666_v19 = vld [vmem:[%s1287_s2 + $0xa8] sm:$0xff]  ;;  %p970_p9 = scmp.lt.s32.totalorder %s577_s10, %s577_s10 }
  0x19   : > { %864 = vmatprep.subr.bf16.mxu0 %v1002_v4  ;;  %887 = vmatpush3.bf16.msra.mxu1 %v886_v13  ;;  %v889_v16 = vpack.c.bf16 %v664_v15, %v663_v14  ;;  %v252_v20 = vld [vmem:[%s1287_s2 + $0x30] sm:$0xff]  ;;  %v253_v21 = vld [vmem:[%s1287_s2 + $0x38] sm:$0xff]  ;;  %v892_v22 = vpack.c.bf16 %v666_v19, %v665_v18  ;;  %v254_v26 = vld [vmem:[%s1287_s2 + $0x40] sm:$0xff] }
  0x1a   : > { %888 = vmatprep.subr.bf16.mxu1 %v1002_v4  ;;  %v871_v23 = vpack.c.bf16 %v253_v21, %v252_v20  ;;  %v667_v24 = vld [vmem:[%s1287_s2 + $0xb0] sm:$0xff]  ;;  %v668_v25 = vld [vmem:[%s1287_s2 + $0xb8] sm:$0xff]  ;;  %v255_v27 = vld [vmem:[%s1287_s2 + $0x48] sm:$0xff] }
  0x1b   : > { %v895_v28 = vpack.c.bf16 %v668_v25, %v667_v24  ;;  %v874_v29 = vpack.c.bf16 %v255_v27, %v254_v26  ;;  %v669_v30 = vld [vmem:[%s1287_s2 + $0xc0] sm:$0xff]  ;;  %v670_v31 = vld [vmem:[%s1287_s2 + $0xc8] sm:$0xff]  ;;  %v256_v32 = vld [vmem:[%s1287_s2 + $0x50] sm:$0xff] }
  0x1c   : > { %866 = vmatpush3.bf16.msra.mxu0 %v865_v8  ;;  %v257_v33 = vld [vmem:[%s1287_s2 + $0x58] sm:$0xff]  ;;  %v898_v34 = vpack.c.bf16 %v670_v31, %v669_v30  ;;  %v671_v36 = vld [vmem:[%s1287_s2 + $0xd0] sm:$0xff]  ;;  %v258_v38 = vld [vmem:[%s1287_s2 + $0x60] sm:$0xff] }
  0x1d   : > { %867 = vmatprep.subr.bf16.mxu0 %v1002_v4  ;;  %890 = vmatpush3.bf16.msra.mxu1 %v889_v16  ;;  %v877_v35 = vpack.c.bf16 %v257_v33, %v256_v32  ;;  %v672_v37 = vld [vmem:[%s1287_s2 + $0xd8] sm:$0xff]  ;;  %v259_v39 = vld [vmem:[%s1287_s2 + $0x68] sm:$0xff]  ;;  %v673_v42 = vld [vmem:[%s1287_s2 + $0xe0] sm:$0xff] }
  0x1e   : > { %891 = vmatprep.subr.bf16.mxu1 %v1002_v4  ;;  %v901_v40 = vpack.c.bf16 %v672_v37, %v671_v36  ;;  %v880_v41 = vpack.c.bf16 %v259_v39, %v258_v38  ;;  %v674_v43 = vld [vmem:[%s1287_s2 + $0xe8] sm:$0xff]  ;;  %v260_v44 = vld [vmem:[%s1287_s2 + $0x70] sm:$0xff]  ;;  %v261_v45 = vld [vmem:[%s1287_s2 + $0x78] sm:$0xff] }
  0x1f   : > { %v904_v46 = vpack.c.bf16 %v674_v43, %v673_v42  ;;  %v883_v47 = vpack.c.bf16 %v261_v45, %v260_v44  ;;  %v675_v48 = vld [vmem:[%s1287_s2 + $0xf0] sm:$0xff]  ;;  %v676_v49 = vld [vmem:[%s1287_s2 + $0xf8] sm:$0xff]  ;;  %v679_v50 = vld [vmem:[%s1287_s2 + $0x100] sm:$0xff] }
  0x20   : > { %869 = vmatpush3.bf16.msra.mxu0 %v868_v17  ;;  %v680_v51 = vld [vmem:[%s1287_s2 + $0x108] sm:$0xff]  ;;  %v907_v52 = vpack.c.bf16 %v676_v49, %v675_v48  ;;  %v1185_v53 = vld [vmem:[#allocation2] sm:$0x3]  ;;  %v681_v55 = vld [vmem:[%s1287_s2 + $0x110] sm:$0xff] }
  0x21   : > { %870 = vmatprep.subr.bf16.mxu0 %v1002_v4  ;;  %893 = vmatpush3.bf16.msra.mxu1 %v892_v22  ;;  %v910_v54 = vpack.c.bf16 %v680_v51, %v679_v50  ;;  %v682_v56 = vld [vmem:[%s1287_s2 + $0x118] sm:$0xff]  ;;  %v683_v58 = vld [vmem:[%s1287_s2 + $0x120] sm:$0xff]  ;;  %v684_v59 = vld [vmem:[%s1287_s2 + $0x128] sm:$0xff] }
  0x22   : > { %894 = vmatprep.subr.bf16.mxu1 %v1002_v4  ;;  %v913_v57 = vpack.c.bf16 %v682_v56, %v681_v55  ;;  %v916_v60 = vpack.c.bf16 %v684_v59, %v683_v58  ;;  %v685_v61 = vld [vmem:[%s1287_s2 + $0x130] sm:$0xff]  ;;  %v686_v62 = vld [vmem:[%s1287_s2 + $0x138] sm:$0xff]  ;;  %v687_v0 = vld [vmem:[%s1287_s2 + $0x140] sm:$0xff] }
  0x23   : > { %v919_v63 = vpack.c.bf16 %v686_v62, %v685_v61  ;;  %v688_v1 = vld [vmem:[%s1287_s2 + $0x148] sm:$0xff]  ;;  %v689_v3 = vld [vmem:[%s1287_s2 + $0x150] sm:$0xff]  ;;  %v690_v5 = vld [vmem:[%s1287_s2 + $0x158] sm:$0xff] }
  0x24   : > { %872 = vmatpush3.bf16.msra.mxu0 %v871_v23  ;;  %v922_v2 = vpack.c.bf16 %v688_v1, %v687_v0  ;;  %v925_v6 = vpack.c.bf16 %v690_v5, %v689_v3  ;;  %v692_v8 = vld [vmem:[%s1287_s2 + $0x168] sm:$0xff]  ;;  %v693_v10 = vld [vmem:[%s1287_s2 + $0x170] sm:$0xff]  ;;  %v694_v11 = vld [vmem:[%s1287_s2 + $0x178] sm:$0xff] }
  0x25   : > { %873 = vmatprep.subr.bf16.mxu0 %v1002_v4  ;;  %896 = vmatpush3.bf16.msra.mxu1 %v895_v28  ;;  %v931_v12 = vpack.c.bf16 %v694_v11, %v693_v10  ;;  %v660_v13 = vld [vmem:[%s1288_s3] ss:$0 sm:$0xff]  ;;  %v678_v18 = vld [vmem:[%s1288_s3 + $0x1] ss:$0 sm:$0xff]  ;;  %v698_v23 = vld [vmem:[%s1061_s6 + $0x2] sm:$0x3] }
  0x26   : > { %897 = vmatprep.subr.bf16.mxu1 %v1002_v4  ;;  %v529_v15 = vld [vmem:[%s1061_s6] sm:$0x3]  ;;  %v696_v30 = vld [vmem:[%s1288_s3 + $0x2] ss:$0 sm:$0xff] }
  0x27   : > { %v245_v39 = vld [vmem:[%s1051_s25] sm:$0x3]  ;;  %s963_s25 = scalar_lea.vmem %s577_s10, 32 }
  0x28   : > { %875 = vmatpush3.bf16.msra.mxu0 %v874_v29  ;;  %p964_p6 = scmp.ne.s32.totalorder %s577_s10, %s963_s25  ;;  %p971_p10 = scmp.lt.s32.totalorder %s963_s25, %s963_s25 }
  0x29   : > { %876 = vmatprep.subr.bf16.mxu0 %v1002_v4  ;;  %899 = vmatpush3.bf16.msra.mxu1 %v898_v34 }
  0x2a   : > { %900 = vmatprep.subr.bf16.mxu1 %v1002_v4  ;;  %p965_p7 = pnand %p964_p6, %p938_p5  ;;  %p972_p11 = por %p971_p10, %p970_p9 }
  0x2c   : > { %878 = vmatpush3.bf16.msra.mxu0 %v877_v35  ;;  %v700_v35 = vld [vmem:[%s1061_s6 + $0x4] sm:$0x3]  ;;  %p966_p8 = pneg %p965_p7 }
  0x2d   : > { %879 = vmatprep.subr.bf16.mxu0 %v1002_v4  ;;  %902 = vmatpush3.bf16.msra.mxu1 %v901_v40 }
  0x2e   : > { %903 = vmatprep.subr.bf16.mxu1 %v1002_v4  ;;  %p973_p12 = pnand %p972_p11, %p966_p8 }
  0x30   : > { %881 = vmatpush3.bf16.msra.mxu0 %v880_v41  ;;  %v556_v41 = vsub.f32 1.0, %v245_v39 }
  0x31   : > { %882 = vmatprep.subr.bf16.mxu0 %v1002_v4  ;;  %905 = vmatpush3.bf16.msra.mxu1 %v904_v46 }
  0x32   : > { %906 = vmatprep.subr.bf16.mxu1 %v1002_v4  ;;  %v557_v46 = vmul.f32 %v556_v41, %v1185_v53 }
  0x34   : > { %884 = vmatpush3.bf16.msra.mxu0 %v883_v47 }
  0x35   : > { %909 = vmatprep.subr.bf16.mxu0 %v1002_v4  ;;  %908 = vmatpush3.bf16.msra.mxu1 %v907_v52 }
  0x37   : > { %789 = vmatmul.mubr.f32.vlgmr.msra.gmra.mrb[0].mxu0 %v1185_v53 }
  0x38   : > { %911 = vmatpush3.bf16.msra.mxu0 %v910_v54  ;;  %858 = vmatprep.mubr.msk.f32.mxu0 %vm1003_vm0, %v1004_v7  ;;  %v691_v7 = vld [vmem:[%s1287_s2 + $0x160] sm:$0xff] }
  0x39   : > { %912 = vmatprep.subr.bf16.mxu0 %v1002_v4  ;;  %824 = vmatmul.mubr.f32.vlgmr.msra.gmra.mrb[0].mxu1 %v1185_v53  ;;  %v928_v9 = vpack.c.bf16 %v692_v8, %v691_v7 }
  0x3c   : > { %914 = vmatpush3.bf16.msra.mxu0 %v913_v57 }
  0x3d   : > { %915 = vmatprep.subr.bf16.mxu0 %v1002_v4 }
  0x40   : > { %917 = vmatpush3.bf16.msra.mxu0 %v916_v60 }
  0x41   : > { %918 = vmatprep.subr.bf16.mxu0 %v1002_v4 }
  0x44   : > { %920 = vmatpush3.bf16.msra.mxu0 %v919_v63 }
  0x45   : > { %921 = vmatprep.subr.bf16.mxu0 %v1002_v4 }
  0x48   : > { %923 = vmatpush3.bf16.msra.mxu0 %v922_v2 }
  0x49   : > { %924 = vmatprep.subr.bf16.mxu0 %v1002_v4 }
  0x4c   : > { %926 = vmatpush3.bf16.msra.mxu0 %v925_v6 }
  0x4d   : > { %927 = vmatprep.subr.bf16.mxu0 %v1002_v4 }
  0x50   : > { %929 = vmatpush3.bf16.msra.mxu0 %v928_v9 }
  0x51   : > { %930 = vmatprep.subr.bf16.mxu0 %v1002_v4 }
  0x54   : > { %932 = vmatpush3.bf16.msra.mxu0 %v931_v12 }
  0x57   : > { %859 = vmatmul.mubr.f32.vlgmr.msra.gmra.mrb[2].mxu0 %v1185_v53 }
 0x10a   : > { %v335_v14 = vpop.f32.mrb[0].mxu0 }
 0x10b   : > { %v336_v16 = vadd.f32 %v660_v13, %v335_v14  ;;  %v790_v17 = vpop.f32.mrb[1].mxu0 }
 0x10c   : > { %v430_v20 = vpop.f32.mrb[0].mxu1 }
 0x10d   : > { %v530_v19 = vadd.f32 %v529_v15, %v336_v16  ;;  %v431_v21 = vadd.f32 %v678_v18, %v430_v20  ;;  %v825_v22 = vpop.f32.mrb[1].mxu1 }
 0x10f   : > { %v697_v4 = vmul.f32 -1.442695, %v530_v19  ;;  %v539_v24 = vadd.f32 %v698_v23, %v431_v21 }
 0x111   : > { %953 = vpow2.f32 %v697_v4  ;;  %v699_v25 = vmul.f32 -1.442695, %v539_v24 }
 0x113   : > { %955 = vpow2.f32 %v699_v25 }
 0x11b   : > { %v954_v26 = vpop.eup %953 }
 0x11c   : > { %v534_v27 = vadd.f32 1.0, %v954_v26 }
 0x11d   : > { %v956_v28 = vpop.eup %955 }
 0x11e   : > { %957 = vrcp.f32 %v534_v27  ;;  %v543_v29 = vadd.f32 1.0, %v956_v28 }
 0x120   : > { %959 = vrcp.f32 %v543_v29 }
 0x128   : > { %v958_v34 = vpop.eup %957 }
 0x12a   : > { %v525_v31 = vpop.f32.mrb[2].mxu0  ;;  %v960_v38 = vpop.eup %959 }
 0x12b   : > { %v526_v32 = vadd.f32 %v696_v30, %v525_v31  ;;  %v860_v33 = vpop.f32.mrb[3].mxu0  ;;  %v551_v40 = vsub.f32 1.0, %v960_v38  ;;  %v553_v44 = vmul.f32 %v960_v38, %v1185_v53 }
 0x12d   : > { %v548_v36 = vmul.f32 %v958_v34, %v526_v32 }
 0x12f   : > { %v549_v37 = vadd.f32 %v700_v35, %v548_v36 }
 0x131   : > { %961 = vtanh.f32 %v549_v37 }
 0x13b   : > { %v962_v42 = vpop.eup %961 }
 0x13c   : > { %v552_v43 = vmul.f32 %v962_v42, %v551_v40 }
 0x13e   : > { %v554_v45 = vadd.f32 %v553_v44, %v552_v43 }
 0x140   : > { %v555_v47 = vmul.f32 %v554_v45, %v245_v39 }
 0x142   : > { %v558_v48 = vadd.f32 %v557_v46, %v555_v47  ;;  %560 = vst [vmem:[%s1056_s28] sm:$0x3] %v555_v47 }
 0x144   : > { %559 = vst [vmem:[#allocation2] sm:$0x3] %v558_v48  ;;  %561 = vst [vmem:[#allocation3] sm:$0x3] %v558_v48 }
 0x145   : > { %976 = shalt.err (!%p973_p12)
}
 0x146   : > { %s977_s12 = scalar_lea.hbm %s1290_s5, 32 }
 0x147   : > { %p978_p13 = scmp.ne.s32.totalorder %s1290_s5, %s977_s12  ;;  %p983_p2 = scmp.lt.u32.totalorder %s977_s12, %s1290_s5 }
 0x149   : > { %p979_p0 = pnand %p978_p13, %p938_p5 }
 0x14b   : > { %p980_p1 = pneg %p979_p0 }
 0x14d   : > { %p985_p3 = pnand %p983_p2, %p980_p1 }
 0x14f   : > { %988 = shalt.err (!%p985_p3)
}
 0x150   : > { %935 = dma.vmem_to_hbm [thread:$0]  (%p938_p5), %s577_s10, 32, %s1290_s5, [#allocation4]  }
 0x151   : > { %994 = dma.done.wait (%p938_p5), [#allocation4], 32  }
 0x152   : > { %996 = vsyncadd (%p938_p5), [#allocation4], 4294967264 }
 0x153 PF: > { %s17_s18 = sadd.s32 1, %s999_s18  }
 0x154   : > { %p14_p4 = scmp.ge.s32.totalorder %s17_s18, 18  }
 0x156   :  { %16 = sbr.rel (!%p14_p4) target bundleno = 1 (0x1), region = 88 }
 0x15d   :  { %596 = vsyncpa [#allocation4], 1 }
 0x15e   :  { %598 = vsyncpa [#allocation4 + $0x1], 1 }

// kernel: hga_forward.28
= control target key start
LH: loop header
LB: loop body
LE: loop exit
PB: predicated region body
PF: predicated region fallthrough
CT: control target
= control target key end

     0   :  { %s719_s18 = smov 0   ;;  %s809_s0 = inlined_call_operand.vmem [shape: bf16[32,256], index: 0, kind: input, shape index: {}]   ;;  %s810_s1 = inlined_call_operand.vmem [shape: bf16[256,64], index: 1, kind: input, shape index: {}]   ;;  %s811_s2 = inlined_call_operand.vmem [shape: f32[1,64], index: 2, kind: input, shape index: {}]   ;;  %s812_s3 = inlined_call_operand.vmem [shape: bf16[64,128], index: 3, kind: input, shape index: {}]   ;;  %s813_s4 = inlined_call_operand.vmem [shape: f32[1,128], index: 4, kind: input, shape index: {}]   ;;  %s814_s5 = inlined_call_operand.vmem [shape: f32[32,128], index: 5, kind: output, shape index: {}]  }
   0x1 LB: > { %s565_s19 = sadd.s32 4294967295, %s685_s18   ;;  %p569_p0 = scmp.ge.s32.totalorder %s685_s18, 1  ;;  %s685_s18 = sphi %s719_s18, %s15_s18  }
   0x2   : > { %p189_p1 = scmp.lt.s32.totalorder %s685_s18, 3 }
   0x4   : > { %p190_p2 = pnand %p569_p0, %p189_p1 }
   0x5   : > { %v652_v0 = vld [vmem:[%s810_s1 + $0x40] sm:$0xff] (!%p190_p2)   ;;  %s570_s22 = sshll.u32 (!%p190_p2), %s565_s19, 1  ;;  %v654_v2 = vld [vmem:[%s810_s1 + $0x48] sm:$0xff] (!%p190_p2)   ;;  %v656_v4 = vld [vmem:[%s810_s1 + $0x50] sm:$0xff] (!%p190_p2)   ;;  %v687_v19 = vmov (!%p190_p2), 0.0   ;;  %vm688_vm0 = vmmov (!%p190_p2), 0  }
   0x6   : > { %193 = sbr.rel (%p190_p2) target bundleno = 487 (0x1e7), region = 40  ;;  %v653_v1 = vld [vmem:[%s810_s1] sm:$0xff] (!%p190_p2)   ;;  %603 = vmatprep.subr.bf16.mxu0 (!%p190_p2), %v652_v0  ;;  %v655_v3 = vld [vmem:[%s810_s1 + $0x8] sm:$0xff] (!%p190_p2)   ;;  %p219_p3 = scmp.lt.s32.totalorder (!%p190_p2), %s570_s22, 3  ;;  %v657_v5 = vld [vmem:[%s810_s1 + $0x10] sm:$0xff] (!%p190_p2)   ;;  %630 = vmatprep.subr.bf16.mxu1 (!%p190_p2), %v687_v19  ;;  %vm462_vm1 = vcmask (!%p190_p2), 523264  }
   0x7   : > { %604 = vmatpush3.bf16.msra.mxu0 (!%p190_p2), %v653_v1  ;;  %v658_v6 = vld [vmem:[%s810_s1 + $0x58] sm:$0xff] (!%p190_p2)   ;;  %v660_v8 = vld [vmem:[%s810_s1 + $0x60] sm:$0xff] (!%p190_p2)   ;;  %v662_v10 = vld [vmem:[%s810_s1 + $0x68] sm:$0xff] (!%p190_p2)   ;;  %638 = vmatprep.mubr.msk.bf16.mxu1 (!%p190_p2), %vm688_vm0, %v687_v19 }
   0x8   : > { %605 = vmatprep.subr.bf16.mxu0 (!%p190_p2), %v654_v2  ;;  %v659_v7 = vld [vmem:[%s810_s1 + $0x18] sm:$0xff] (!%p190_p2)   ;;  %v661_v9 = vld [vmem:[%s810_s1 + $0x20] sm:$0xff] (!%p190_p2)   ;;  %v663_v11 = vld [vmem:[%s810_s1 + $0x28] sm:$0xff] (!%p190_p2)  }
   0x9   : > { %v664_v13 = vld [vmem:[%s810_s1 + $0x70] sm:$0xff] (!%p190_p2)   ;;  %v666_v15 = vld [vmem:[%s810_s1 + $0x78] sm:$0xff] (!%p190_p2)   ;;  %v671_v18 = vld [vmem:[%s812_s3] sm:$0xff] (!%p190_p2)  }
   0xa   : > { %v665_v14 = vld [vmem:[%s810_s1 + $0x30] sm:$0xff] (!%p190_p2)   ;;  %v667_v16 = vld [vmem:[%s810_s1 + $0x38] sm:$0xff] (!%p190_p2)   ;;  %631 = vmatpush3.bf16.msra.mxu1 (!%p190_p2), %v671_v18  ;;  %v672_v20 = vld [vmem:[%s812_s3 + $0x8] sm:$0xff] (!%p190_p2)  }
   0xb   : > { %606 = vmatpush3.bf16.msra.mxu0 (!%p190_p2), %v655_v3  ;;  %632 = vmatprep.subr.bf16.mxu1 (!%p190_p2), %v687_v19  ;;  %v673_v21 = vld [vmem:[%s812_s3 + $0x10] sm:$0xff] (!%p190_p2)   ;;  %v674_v22 = vld [vmem:[%s812_s3 + $0x18] sm:$0xff] (!%p190_p2)   ;;  %v575_v24 = vld [vmem:[%s811_s2] ss:$0 sm:$0xff] (!%p190_p2) }
   0xc   : > { %607 = vmatprep.subr.bf16.mxu0 (!%p190_p2), %v656_v4  ;;  %v594_v35 = vld [vmem:[%s813_s4] ss:$0 sm:$0xff] (!%p190_p2) }
   0xd   : > { %s816_s22 = smov (!%p219_p3, %s570_s22), 3 }
   0xe   : > { %s602_s12 = sshll.u32 %s816_s22, 3  ;;  %633 = vmatpush3.bf16.msra.mxu1 %v672_v20 }
   0xf   : > { %608 = vmatpush3.bf16.msra.mxu0 %v657_v5  ;;  %s223_s17 = scalar_lea.vmem %s809_s0, %s602_s12  ;;  %634 = vmatprep.subr.bf16.mxu1 %v687_v19  ;;  %s229_s26 = scalar_lea.vmem %s814_s5, %s602_s12 }
  0x10   : > { %609 = vmatprep.subr.bf16.mxu0 %v658_v6  ;;  %v670_v12 = vld [vmem:[%s223_s17 + $0x4] ss:$8 sps:$4 sm:$0xff]   ;;  %v668_v17 = vld [vmem:[%s223_s17] ss:$8 sps:$4 sm:$0xff]  }
  0x11   : > { %411 = vmatprep.mubr.bf16.mxu0 %v670_v12 }
  0x12   : > { %635 = vmatpush3.bf16.msra.mxu1 %v673_v21 }
  0x13   : > { %610 = vmatpush3.bf16.msra.mxu0 %v659_v7  ;;  %636 = vmatprep.subr.bf16.mxu1 %v687_v19 }
  0x14   : > { %611 = vmatprep.subr.bf16.mxu0 %v660_v8 }
  0x16   : > { %637 = vmatpush3.bf16.msra.mxu1 %v674_v22 }
  0x17   : > { %612 = vmatpush3.bf16.msra.mxu0 %v661_v9 }
  0x18   : > { %613 = vmatprep.subr.bf16.mxu0 %v662_v10 }
  0x1b   : > { %614 = vmatpush3.bf16.msra.mxu0 %v663_v11 }
  0x1c   : > { %615 = vmatprep.subr.bf16.mxu0 %v664_v13 }
  0x1f   : > { %616 = vmatpush3.bf16.msra.mxu0 %v665_v14 }
  0x20   : > { %617 = vmatprep.subr.bf16.mxu0 %v666_v15 }
  0x23   : > { %618 = vmatpush3.bf16.msra.mxu0 %v667_v16 }
  0x26   : > { %412 = vmatmul.mubr.bf16.vlgmr.msra.gmra.mrb[0].mxu0 %v668_v17 }
  0xf9   : > { %v619_v23 = vpop.f32.mrb[0].mxu0 }
  0xfa   : > { %v620_v25 = vpop.f32.mrb[1].mxu0 }
  0xfb   : > { %v621_v26 = vadd.f32 %v620_v25, %v619_v23  ;;  %v622_v27 = vpop.f32.mrb[2].mxu0 }
  0xfc   : > { %v623_v28 = vpop.f32.mrb[3].mxu0 }
  0xfd   : > { %v414_v29 = vadd.f32 %v621_v26, %v575_v24  ;;  %v624_v30 = vadd.f32 %v623_v28, %v622_v27 }
  0xff   : > { %v417_v31 = vadd.f32 %v624_v30, %v575_v24  ;;  %675 = vtanh.f32 %v414_v29 }
 0x101   : > { %677 = vtanh.f32 %v417_v31 }
 0x109   : > { %v676_v32 = vpop.eup %675 }
 0x10b   : > { %v678_v33 = vpop.eup %677 }
 0x10c   : > { %v422_v34 = vpack.c.bf16 %v678_v33, %v676_v32 }
 0x10e   : > { %639 = vmatmul.mubr.msk.bf16.vlgmr.msra.gmra.mrb[0].mxu1 %vm462_vm1, %v422_v34 }
 0x1e1   : > { %v500_v36 = vpop.f32.mrb[0].mxu1 }
 0x1e2   : > { %v501_v37 = vadd.f32 %v594_v35, %v500_v36  ;;  %v640_v38 = vpop.f32.mrb[1].mxu1 }
 0x1e3   : > { %v503_v39 = vpop.f32.mrb[2].mxu1 }
 0x1e4   : > { %507 = vst [vmem:[%s229_s26] sm:$0xff] %v501_v37  ;;  %v504_v40 = vadd.f32 %v594_v35, %v503_v39  ;;  %v641_v41 = vpop.f32.mrb[3].mxu1 }
 0x1e6   : > { %508 = vst [vmem:[%s229_s26 + $0x8] sm:$0xff] %v504_v40 }
 0x1e7 PF: > { %s15_s18 = sadd.s32 1, %s685_s18  }
 0x1e8   : > { %p12_p4 = scmp.ge.s32.totalorder %s15_s18, 4  }
 0x1ea   :  { %14 = sbr.rel (!%p12_p4) target bundleno = 1 (0x1), region = 70 }

// kernel: hga_forward.29
= control target key start
LH: loop header
LB: loop body
LE: loop exit
PB: predicated region body
PF: predicated region fallthrough
CT: control target
= control target key end

     0   :  { %s1165_s12 = smov 0   ;;  %s1167_s13 = smov 0   ;;  %s1318_s0 = inlined_call_operand.vmem [shape: bf16[96,4096], index: 0, kind: input, shape index: {}]   ;;  %s1319_s1 = inlined_call_operand.vmem [shape: bf16[4096,128], index: 1, kind: input, shape index: {}]   ;;  %s1320_s2 = inlined_call_operand.vmem [shape: f32[1,128], index: 2, kind: input, shape index: {}]   ;;  %s1321_s3 = inlined_call_operand.vmem [shape: f32[96,128], index: 3, kind: output, shape index: {}]  }
   0x1   :  { %s1169_s14 = smov 0   ;;  %s1171_s15 = smov 0  }
   0x2   :  { %s1173_s16 = smov 0   ;;  %s1175_s17 = smov 0  }
   0x3   :  { %s1177_s18 = smov 0  }
   0x4 LB: > { %s22_s19 = sadd.s32 1, %s1134_s16  ;;  %s25_s20 = sadd.s32 1, %s1138_s17  ;;  %s1142_s18 = sphi %s1177_s18, %s13_s18   ;;  %s1138_s17 = sphi %s1175_s17, %s1327_s17   ;;  %s1134_s16 = sphi %s1173_s16, %s1326_s16   ;;  %s1130_s15 = sphi %s1171_s15, %s1325_s15   ;;  %s1126_s14 = sphi %s1169_s14, %s1324_s14   ;;  %s1122_s13 = sphi %s1167_s13, %s1323_s13   ;;  %s1118_s12 = sphi %s1165_s12, %s1322_s12  }
   0x5   : > { %p23_p0 = scmp.ge.s32.totalorder %s22_s19, 8  ;;  %p41_p1 = scmp.ne.s32.totalorder %s1122_s13, %s1118_s12 }
   0x6   : > { %p42_p2 = scmp.eq.s32.totalorder %s1142_s18, 0  ;;  %s34_s24 = sadd.s32 1, %s1122_s13 }
   0x7   : > { %s1329_s19 = smov (%p23_p0, %s22_s19), 0  ;;  %s1331_s20 = smov (!%p23_p0, %s25_s20), %s1138_s17 }
   0x8   : > { %p43_p3 = por %p42_p2, %p41_p1  ;;  %p27_p4 = scmp.ge.s32.totalorder %s1331_s20, 2 }
   0x9   : > { %s30_s21 = ssub.s32 %s1134_s16, %s1329_s19  ;;  %p853_p6 = scmp.ge.s32.totalorder %s1142_s18, 16 }
   0xa   : > { %s1333_s20 = smov (%p27_p4, %s1331_s20), 0 }
   0xb   : > { %s29_s22 = ssub.s32 %s1138_s17, %s1333_s20  ;;  %143 = sbr.rel (%p853_p6) target bundleno = 32 (0x20), region = 20 }
   0xc   : > { %s31_s23 = sor.u32 %s30_s21, %s29_s22 }
   0xd   : > { %p32_p5 = scmp.eq.s32.totalorder %s31_s23, 0 }
   0xf   : > { %s1216_s25 = scalar_select %p32_p5, %s1122_s13, %s34_s24  }
  0x12   : > { %146 = sbr.rel (!%p43_p3) target bundleno = 32 (0x20), region = 24  ;;  %s148_s26 = sand.u32 (%p43_p3), 1, %s1122_s13  }
  0x13   : > { %s979_s27 = smul.u32 (%p43_p3), 96, %s148_s26  ;;  %s854_s28 = sshll.u32 (%p43_p3), %s1134_s16, 2 }
  0x14   : > { %s910_s29 = smul.u32 (%p43_p3), 192, %s1138_s17 }
  0x15   : > { %s150_s8 = scalar_lea.vmem (%p43_p3), [#allocation3], %s979_s27 }
  0x16   : > { %s154_s30 = sadd.s32 (%p43_p3), %s910_s29, %s854_s28 }
  0x17   : > { %s856_s4 = sshll.u32 (%p43_p3), %s154_s30, 2 }
  0x18   : > { %s156_s7 = scalar_lea.vmem (%p43_p3), %s1318_s0, %s856_s4 }
  0x19   : > { %v169_v0 = vld [vmem:[%s156_s7] sm:$0xff]  ;;  %v171_v1 = vld [vmem:[%s156_s7 + $0x8] sm:$0xff] }
  0x1a   : > { %v173_v2 = vld [vmem:[%s156_s7 + $0x80] sm:$0xff]  ;;  %170 = vst [vmem:[%s150_s8] sm:$0xff] %v169_v0  ;;  %172 = vst [vmem:[%s150_s8 + $0x8] sm:$0xff] %v171_v1  ;;  %v175_v3 = vld [vmem:[%s156_s7 + $0x88] sm:$0xff] }
  0x1b   : > { %174 = vst [vmem:[%s150_s8 + $0x10] sm:$0xff] %v173_v2  ;;  %v177_v4 = vld [vmem:[%s156_s7 + $0x100] sm:$0xff]  ;;  %v179_v5 = vld [vmem:[%s156_s7 + $0x108] sm:$0xff]  ;;  %176 = vst [vmem:[%s150_s8 + $0x18] sm:$0xff] %v175_v3 }
  0x1c   : > { %178 = vst [vmem:[%s150_s8 + $0x20] sm:$0xff] %v177_v4  ;;  %180 = vst [vmem:[%s150_s8 + $0x28] sm:$0xff] %v179_v5  ;;  %v181_v6 = vld [vmem:[%s156_s7 + $0x180] sm:$0xff]  ;;  %v183_v7 = vld [vmem:[%s156_s7 + $0x188] sm:$0xff] }
  0x1d   : > { %v185_v8 = vld [vmem:[%s156_s7 + $0x200] sm:$0xff]  ;;  %182 = vst [vmem:[%s150_s8 + $0x30] sm:$0xff] %v181_v6  ;;  %184 = vst [vmem:[%s150_s8 + $0x38] sm:$0xff] %v183_v7  ;;  %v187_v9 = vld [vmem:[%s156_s7 + $0x208] sm:$0xff] }
  0x1e   : > { %186 = vst [vmem:[%s150_s8 + $0x40] sm:$0xff] %v185_v8  ;;  %v189_v10 = vld [vmem:[%s156_s7 + $0x280] sm:$0xff]  ;;  %v191_v11 = vld [vmem:[%s156_s7 + $0x288] sm:$0xff]  ;;  %188 = vst [vmem:[%s150_s8 + $0x48] sm:$0xff] %v187_v9 }
  0x1f   : > { %190 = vst [vmem:[%s150_s8 + $0x50] sm:$0xff] %v189_v10  ;;  %192 = vst [vmem:[%s150_s8 + $0x58] sm:$0xff] %v191_v11 }
  0x20 PF: > { %p857_p7 = scmp.ge.s32.totalorder %s1142_s18, 1  ;;  %p206_p8 = scmp.lt.s32.totalorder %s1142_s18, 17 }
  0x22   : > { %p207_p9 = pnand %p857_p7, %p206_p8 }
  0x23   : > { %s213_s9 = sand.u32 (!%p207_p9), 1, %s1118_s12   ;;  %s858_s10 = sshll.u32 (!%p207_p9), %s1126_s14, 6 }
  0x24   : > { %210 = sbr.rel (%p207_p9) target bundleno = 338 (0x152), region = 51  ;;  %p244_p10 = scmp.lt.s32.totalorder (!%p207_p9), %s858_s10, 511 }
  0x25   : > { %s980_s11 = smul.u32 (!%p207_p9), 96, %s213_s9  ;;  %p861_p12 = scmp.ne.s32.totalorder (!%p207_p9), %s1126_s14, 0 }
  0x26   : > { %s249_s21 = smul.u32 (!%p207_p9), 6, %s1130_s15 }
  0x27   : > { %s1240_s12 = scalar_lea.vmem (!%p207_p9), [#allocation3], %s980_s11 }
  0x28   : > { %p250_p11 = scmp.lt.s32.totalorder (!%p207_p9), %s249_s21, 11 }
  0x2b   : > { %s1335_s10 = smov (!%p244_p10, %s858_s10), 511  ;;  %s1337_s21 = smov (!%p250_p11, %s249_s21), 11 }
  0x2c   : > { %s859_s22 = sshll.u32 %s1335_s10, 2  ;;  %s860_s27 = sshll.u32 %s1337_s21, 3  ;;  %v1144_v12 = vmov (!%p861_p12), 0.0  }
  0x2d   : > { %s1233_s26 = scalar_lea.vmem %s1319_s1, %s859_s22  ;;  %s1238_s30 = scalar_lea.vmem %s1321_s3, %s860_s27  ;;  %260 = vst [vmem:[#allocation2] sm:$0xff] (!%p861_p12), %v1144_v12  ;;  %261 = vst [vmem:[#allocation2 + $0x8] sm:$0xff] (!%p861_p12), %v1144_v12 }
  0x2e   : > { %259 = sbr.rel (%p861_p12) target bundleno = 53 (0x35), region = 59  ;;  %262 = vst [vmem:[#allocation2 + $0x10] sm:$0xff] (!%p861_p12), %v1144_v12  ;;  %263 = vst [vmem:[#allocation2 + $0x18] sm:$0xff] (!%p861_p12), %v1144_v12 }
  0x2f   : > { %264 = vst [vmem:[#allocation2 + $0x20] sm:$0xff] (!%p861_p12), %v1144_v12  ;;  %265 = vst [vmem:[#allocation2 + $0x28] sm:$0xff] (!%p861_p12), %v1144_v12 }
  0x35 PF: > { %v1038_v13 = vld [vmem:[%s1233_s26 + $0x40] sm:$0xff]   ;;  %v1042_v17 = vld [vmem:[%s1233_s26 + $0x48] sm:$0xff]   ;;  %v1046_v21 = vld [vmem:[%s1233_s26 + $0x50] sm:$0xff]   ;;  %p906_p13 = scmp.ne.s32.totalorder %s1126_s14, 7 }
  0x36   : > { %v1039_v14 = vld [vmem:[%s1233_s26 + $0xc0] sm:$0xff]   ;;  %911 = vmatprep.subr.bf16.mxu0 %v1038_v13  ;;  %v1043_v18 = vld [vmem:[%s1233_s26 + $0xc8] sm:$0xff]   ;;  %v1047_v22 = vld [vmem:[%s1233_s26 + $0xd0] sm:$0xff]  }
  0x37   : > { %v1040_v15 = vld [vmem:[%s1233_s26] sm:$0xff]   ;;  %945 = vmatprep.subr.bf16.mxu1 %v1039_v14  ;;  %v1044_v19 = vld [vmem:[%s1233_s26 + $0x8] sm:$0xff]   ;;  %v1048_v23 = vld [vmem:[%s1233_s26 + $0x10] sm:$0xff]  }
  0x38   : > { %v1041_v16 = vld [vmem:[%s1233_s26 + $0x80] sm:$0xff]   ;;  %912 = vmatpush3.bf16.msra.mxu0 %v1040_v15  ;;  %v1045_v20 = vld [vmem:[%s1233_s26 + $0x88] sm:$0xff]   ;;  %v1049_v24 = vld [vmem:[%s1233_s26 + $0x90] sm:$0xff]  }
  0x39   : > { %946 = vmatpush3.bf16.msra.mxu1 %v1041_v16  ;;  %913 = vmatprep.subr.bf16.mxu0 %v1042_v17  ;;  %v1050_v25 = vld [vmem:[%s1233_s26 + $0x58] sm:$0xff]   ;;  %v1054_v29 = vld [vmem:[%s1233_s26 + $0x60] sm:$0xff]   ;;  %v1058_v33 = vld [vmem:[%s1233_s26 + $0x68] sm:$0xff]  }
  0x3a   : > { %947 = vmatprep.subr.bf16.mxu1 %v1043_v18  ;;  %v1051_v26 = vld [vmem:[%s1233_s26 + $0xd8] sm:$0xff]   ;;  %v1055_v30 = vld [vmem:[%s1233_s26 + $0xe0] sm:$0xff]   ;;  %v1059_v34 = vld [vmem:[%s1233_s26 + $0xe8] sm:$0xff]  }
  0x3b   : > { %v1052_v27 = vld [vmem:[%s1233_s26 + $0x18] sm:$0xff]   ;;  %v1056_v31 = vld [vmem:[%s1233_s26 + $0x20] sm:$0xff]   ;;  %v1060_v35 = vld [vmem:[%s1233_s26 + $0x28] sm:$0xff]  }
  0x3c   : > { %914 = vmatpush3.bf16.msra.mxu0 %v1044_v19  ;;  %v1053_v28 = vld [vmem:[%s1233_s26 + $0x98] sm:$0xff]   ;;  %v1057_v32 = vld [vmem:[%s1233_s26 + $0xa0] sm:$0xff]   ;;  %v1061_v36 = vld [vmem:[%s1233_s26 + $0xa8] sm:$0xff]  }
  0x3d   : > { %948 = vmatpush3.bf16.msra.mxu1 %v1045_v20  ;;  %915 = vmatprep.subr.bf16.mxu0 %v1046_v21  ;;  %v1062_v37 = vld [vmem:[%s1233_s26 + $0x70] sm:$0xff]   ;;  %v1066_v41 = vld [vmem:[%s1233_s26 + $0x78] sm:$0xff]   ;;  %v266_v2 = vld [vmem:[#allocation2] sm:$0xff] }
  0x3e   : > { %949 = vmatprep.subr.bf16.mxu1 %v1047_v22  ;;  %v1063_v38 = vld [vmem:[%s1233_s26 + $0xf0] sm:$0xff]   ;;  %v1067_v42 = vld [vmem:[%s1233_s26 + $0xf8] sm:$0xff]   ;;  %v267_v7 = vld [vmem:[#allocation2 + $0x8] sm:$0xff] }
  0x3f   : > { %v1064_v39 = vld [vmem:[%s1233_s26 + $0x30] sm:$0xff]   ;;  %v1068_v43 = vld [vmem:[%s1233_s26 + $0x38] sm:$0xff]  }
  0x40   : > { %916 = vmatpush3.bf16.msra.mxu0 %v1048_v23  ;;  %v1065_v40 = vld [vmem:[%s1233_s26 + $0xb0] sm:$0xff]   ;;  %v1069_v44 = vld [vmem:[%s1233_s26 + $0xb8] sm:$0xff]  }
  0x41   : > { %950 = vmatpush3.bf16.msra.mxu1 %v1049_v24  ;;  %917 = vmatprep.subr.bf16.mxu0 %v1050_v25  ;;  %v1070_v45 = vld [vmem:[%s1240_s12] ss:$16 sps:$4 sm:$0xff]   ;;  %v1072_v46 = vld [vmem:[%s1240_s12 + $0x4] ss:$16 sps:$4 sm:$0xff]   ;;  %v1073_v47 = vld [vmem:[%s1240_s12 + $0x8] ss:$16 sps:$4 sm:$0xff]  }
  0x42   : > { %951 = vmatprep.subr.bf16.mxu1 %v1051_v26  ;;  %v1075_v48 = vld [vmem:[%s1240_s12 + $0xc] ss:$16 sps:$4 sm:$0xff]   ;;  %632 = vmatprep.mubr.bf16.mxu0 %v1072_v46  ;;  %v1076_v49 = vld [vmem:[%s1240_s12 + $0x24] ss:$16 sps:$4 sm:$0xff]   ;;  %v1080_v51 = vld [vmem:[%s1240_s12 + $0x20] ss:$16 sps:$4 sm:$0xff]  }
  0x43   : > { %689 = vmatprep.mubr.bf16.mxu1 %v1075_v48  ;;  %v1078_v50 = vld [vmem:[%s1240_s12 + $0x2c] ss:$16 sps:$4 sm:$0xff]   ;;  %v1081_v52 = vld [vmem:[%s1240_s12 + $0x28] ss:$16 sps:$4 sm:$0xff]   ;;  %v1082_v53 = vld [vmem:[%s1240_s12 + $0x44] ss:$16 sps:$4 sm:$0xff]  }
  0x44   : > { %918 = vmatpush3.bf16.msra.mxu0 %v1052_v27  ;;  %v1084_v54 = vld [vmem:[%s1240_s12 + $0x4c] ss:$16 sps:$4 sm:$0xff]   ;;  %v1086_v55 = vld [vmem:[%s1240_s12 + $0x40] ss:$16 sps:$4 sm:$0xff]   ;;  %v1087_v56 = vld [vmem:[%s1240_s12 + $0x48] ss:$16 sps:$4 sm:$0xff]  }
  0x45   : > { %952 = vmatpush3.bf16.msra.mxu1 %v1053_v28  ;;  %919 = vmatprep.subr.bf16.mxu0 %v1054_v29  ;;  %v268_v20 = vld [vmem:[#allocation2 + $0x10] sm:$0xff]  ;;  %v269_v25 = vld [vmem:[#allocation2 + $0x18] sm:$0xff]  ;;  %v907_v48 = vld [vmem:[%s1320_s2] ss:$0 sm:$0xff] (!%p906_p13) }
  0x46   : > { %953 = vmatprep.subr.bf16.mxu1 %v1055_v30 }
  0x48   : > { %920 = vmatpush3.bf16.msra.mxu0 %v1056_v31 }
  0x49   : > { %954 = vmatpush3.bf16.msra.mxu1 %v1057_v32  ;;  %921 = vmatprep.subr.bf16.mxu0 %v1058_v33 }
  0x4a   : > { %955 = vmatprep.subr.bf16.mxu1 %v1059_v34 }
  0x4c   : > { %922 = vmatpush3.bf16.msra.mxu0 %v1060_v35 }
  0x4d   : > { %956 = vmatpush3.bf16.msra.mxu1 %v1061_v36  ;;  %923 = vmatprep.subr.bf16.mxu0 %v1062_v37 }
  0x4e   : > { %957 = vmatprep.subr.bf16.mxu1 %v1063_v38  ;;  %v270_v38 = vld [vmem:[#allocation2 + $0x20] sm:$0xff] }
  0x50   : > { %924 = vmatpush3.bf16.msra.mxu0 %v1064_v39 }
  0x51   : > { %958 = vmatpush3.bf16.msra.mxu1 %v1065_v40  ;;  %925 = vmatprep.subr.bf16.mxu0 %v1066_v41 }
  0x52   : > { %959 = vmatprep.subr.bf16.mxu1 %v1067_v42 }
  0x54   : > { %926 = vmatpush3.bf16.msra.mxu0 %v1068_v43  ;;  %v271_v43 = vld [vmem:[#allocation2 + $0x28] sm:$0xff] }
  0x55   : > { %960 = vmatpush3.bf16.msra.mxu1 %v1069_v44 }
  0x57   : > { %633 = vmatmul.mubr.bf16.vlgmr.msra.gmra.mrb[0].mxu0 %v1070_v45 }
  0x58   : > { %690 = vmatmul.mubr.bf16.vlgmr.msra.gmra.mrb[0].mxu1 %v1073_v47  ;;  %640 = vmatprep.mubr.bf16.mxu0 %v1076_v49 }
  0x59   : > { %697 = vmatprep.mubr.bf16.mxu1 %v1078_v50 }
  0x5f   : > { %641 = vmatmul.mubr.bf16.gmra.mrb[4].mxu0 %v1080_v51 }
  0x60   : > { %698 = vmatmul.mubr.bf16.gmra.mrb[4].mxu1 %v1081_v52  ;;  %648 = vmatprep.mubr.bf16.mxu0 %v1082_v53 }
  0x61   : > { %705 = vmatprep.mubr.bf16.mxu1 %v1084_v54 }
  0x67   : > { %649 = vmatmul.mubr.bf16.gmra.mrb[8].mxu0 %v1086_v55 }
  0x68   : > { %706 = vmatmul.mubr.bf16.gmra.mrb[8].mxu1 %v1087_v56 }
 0x12a   : > { %v927_v57 = vpop.f32.mrb[0].mxu0 }
 0x12b   : > { %v961_v58 = vpop.f32.mrb[0].mxu1  ;;  %v928_v59 = vpop.f32.mrb[1].mxu0 }
 0x12c   : > { %v929_v60 = vadd.f32 %v928_v59, %v927_v57  ;;  %v962_v61 = vpop.f32.mrb[1].mxu1  ;;  %v930_v62 = vpop.f32.mrb[2].mxu0 }
 0x12d   : > { %v963_v63 = vadd.f32 %v962_v61, %v961_v58  ;;  %v964_v0 = vpop.f32.mrb[2].mxu1  ;;  %v931_v1 = vpop.f32.mrb[3].mxu0 }
 0x12e   : > { %v932_v3 = vadd.f32 %v931_v1, %v930_v62  ;;  %v965_v4 = vpop.f32.mrb[3].mxu1 }
 0x12f   : > { %v692_v5 = vadd.f32 %v963_v63, %v929_v60  ;;  %v966_v6 = vadd.f32 %v965_v4, %v964_v0 }
 0x131   : > { %v714_v8 = vadd.f32 %v692_v5, %v266_v2  ;;  %v695_v9 = vadd.f32 %v966_v6, %v932_v3 }
 0x132   : > { %v933_v10 = vpop.f32.mrb[4].mxu0 }
 0x133   : > { %720 = vst [vmem:[#allocation2] sm:$0xff] %v714_v8  ;;  %v715_v11 = vadd.f32 %v695_v9, %v267_v7  ;;  %v967_v12 = vpop.f32.mrb[4].mxu1  ;;  %v934_v13 = vpop.f32.mrb[5].mxu0 }
 0x134   : > { %v935_v14 = vadd.f32 %v934_v13, %v933_v10  ;;  %v968_v15 = vpop.f32.mrb[5].mxu1  ;;  %v936_v16 = vpop.f32.mrb[6].mxu0 }
 0x135   : > { %721 = vst [vmem:[#allocation2 + $0x8] sm:$0xff] %v715_v11  ;;  %v969_v17 = vadd.f32 %v968_v15, %v967_v12  ;;  %v970_v18 = vpop.f32.mrb[6].mxu1  ;;  %v937_v19 = vpop.f32.mrb[7].mxu0 }
 0x136   : > { %v938_v21 = vadd.f32 %v937_v19, %v936_v16  ;;  %v971_v22 = vpop.f32.mrb[7].mxu1 }
 0x137   : > { %v700_v23 = vadd.f32 %v969_v17, %v935_v14  ;;  %v972_v24 = vadd.f32 %v971_v22, %v970_v18 }
 0x139   : > { %v716_v26 = vadd.f32 %v700_v23, %v268_v20  ;;  %v703_v27 = vadd.f32 %v972_v24, %v938_v21 }
 0x13a   : > { %v939_v28 = vpop.f32.mrb[8].mxu0  ;;  %v730_v47 = vld [vmem:[#allocation2] sm:$0xff] (!%p906_p13) }
 0x13b   : > { %722 = vst [vmem:[#allocation2 + $0x10] sm:$0xff] %v716_v26  ;;  %v717_v29 = vadd.f32 %v703_v27, %v269_v25  ;;  %v973_v30 = vpop.f32.mrb[8].mxu1  ;;  %v940_v31 = vpop.f32.mrb[9].mxu0  ;;  %v743_v50 = vadd.f32 (!%p906_p13), %v907_v48, %v730_v47 }
 0x13c   : > { %v941_v32 = vadd.f32 %v940_v31, %v939_v28  ;;  %v974_v33 = vpop.f32.mrb[9].mxu1  ;;  %v942_v34 = vpop.f32.mrb[10].mxu0  ;;  %v731_v49 = vld [vmem:[#allocation2 + $0x8] sm:$0xff] (!%p906_p13) }
 0x13d   : > { %723 = vst [vmem:[#allocation2 + $0x18] sm:$0xff] %v717_v29  ;;  %v975_v35 = vadd.f32 %v974_v33, %v973_v30  ;;  %v976_v36 = vpop.f32.mrb[10].mxu1  ;;  %v943_v37 = vpop.f32.mrb[11].mxu0  ;;  %v744_v51 = vadd.f32 (!%p906_p13), %v907_v48, %v731_v49  ;;  %v749_v59 = vmax.f32 (!%p906_p13), %v743_v50, 0.0 }
 0x13e   : > { %v944_v39 = vadd.f32 %v943_v37, %v942_v34  ;;  %v977_v40 = vpop.f32.mrb[11].mxu1 }
 0x13f   : > { %v708_v41 = vadd.f32 %v975_v35, %v941_v32  ;;  %v978_v42 = vadd.f32 %v977_v40, %v976_v36  ;;  %729 = sbr.rel (%p906_p13) target bundleno = 338 (0x152), region = 63  ;;  %v750_v60 = vmax.f32 (!%p906_p13), %v744_v51, 0.0  ;;  %755 = vst [vmem:[%s1238_s30] sm:$0xff] (!%p906_p13), %v749_v59 }
 0x141   : > { %v718_v44 = vadd.f32 %v708_v41, %v270_v38  ;;  %v711_v45 = vadd.f32 %v978_v42, %v944_v39  ;;  %756 = vst [vmem:[%s1238_s30 + $0x8] sm:$0xff] (!%p906_p13), %v750_v60 }
 0x142   : > { %v732_v52 = vld [vmem:[#allocation2 + $0x10] sm:$0xff] (!%p906_p13) }
 0x143   : > { %724 = vst [vmem:[#allocation2 + $0x20] sm:$0xff] %v718_v44  ;;  %v719_v46 = vadd.f32 %v711_v45, %v271_v43  ;;  %v745_v55 = vadd.f32 (!%p906_p13), %v907_v48, %v732_v52 }
 0x144   : > { %v733_v53 = vld [vmem:[#allocation2 + $0x18] sm:$0xff] (!%p906_p13) }
 0x145   : > { %725 = vst [vmem:[#allocation2 + $0x28] sm:$0xff] %v719_v46  ;;  %v746_v56 = vadd.f32 (!%p906_p13), %v907_v48, %v733_v53  ;;  %v751_v62 = vmax.f32 (!%p906_p13), %v745_v55, 0.0 }
 0x147   : > { %v752_v63 = vmax.f32 %v746_v56, 0.0  ;;  %757 = vst [vmem:[%s1238_s30 + $0x10] sm:$0xff] %v751_v62 }
 0x149   : > { %758 = vst [vmem:[%s1238_s30 + $0x18] sm:$0xff] %v752_v63 }
 0x14a   : > { %v734_v54 = vld [vmem:[#allocation2 + $0x20] sm:$0xff] }
 0x14b   : > { %v747_v57 = vadd.f32 %v907_v48, %v734_v54 }
 0x14c   : > { %v735_v58 = vld [vmem:[#allocation2 + $0x28] sm:$0xff] }
 0x14d   : > { %v748_v61 = vadd.f32 %v907_v48, %v735_v58  ;;  %v753_v0 = vmax.f32 %v747_v57, 0.0 }
 0x14f   : > { %v754_v1 = vmax.f32 %v748_v61, 0.0  ;;  %759 = vst [vmem:[%s1238_s30 + $0x20] sm:$0xff] %v753_v0 }
 0x151   : > { %760 = vst [vmem:[%s1238_s30 + $0x28] sm:$0xff] %v754_v1 }
 0x152 PF: > { %s13_s18 = sadd.s32 1, %s1142_s18   ;;  %s1322_s12 = smov %s1122_s13 }
 0x153   : > { %p10_p0 = scmp.ge.s32.totalorder %s13_s18, 18   ;;  %s1323_s13 = smov %s1216_s25 }
 0x154   : > { %s1324_s14 = smov %s1134_s16  ;;  %s1325_s15 = smov %s1138_s17 }
 0x155   : > { %s1326_s16 = smov %s1329_s19  ;;  %s1327_s17 = smov %s1333_s20 }
 0x156   :  { %12 = sbr.rel (!%p10_p0) target bundleno = 4 (0x4), region = 101 }

// kernel: hga_forward.30
= control target key start
LH: loop header
LB: loop body
LE: loop exit
PB: predicated region body
PF: predicated region fallthrough
CT: control target
= control target key end

     0   :  { %s843_s12 = smov 0   ;;  %s845_s13 = smov 0   ;;  %s945_s0 = inlined_call_operand.vmem [shape: bf16[96,64], index: 0, kind: input, shape index: {}]   ;;  %s946_s1 = inlined_call_operand.vmem [shape: bf16[64,384], index: 1, kind: input, shape index: {}]   ;;  %s947_s2 = inlined_call_operand.vmem [shape: f32[1,384], index: 2, kind: input, shape index: {}]   ;;  %s948_s3 = inlined_call_operand.vmem [shape: f32[96,384], index: 3, kind: output, shape index: {}]  }
   0x1   :  { %s847_s14 = smov 0  }
   0x2 LB: > { %s25_s15 = sadd.s32 1, %s814_s13  ;;  %p696_p0 = scmp.ge.s32.totalorder %s818_s14, 1  ;;  %s818_s14 = sphi %s847_s14, %s13_s14   ;;  %s814_s13 = sphi %s845_s13, %s950_s13   ;;  %s810_s12 = sphi %s843_s12, %s949_s12  }
   0x3   : > { %p27_p1 = scmp.ge.s32.totalorder %s25_s15, 2  ;;  %p167_p2 = scmp.lt.s32.totalorder %s818_s14, 3 }
   0x5   : > { %s952_s15 = smov (%p27_p1, %s25_s15), 0  ;;  %p168_p3 = pnand %p696_p0, %p167_p2 }
   0x6   : > { %v777_v0 = vld [vmem:[%s946_s1 + $0x4] ss:$12 sps:$4 sm:$0xff] (!%p168_p3)   ;;  %v820_v1 = vmov (!%p168_p3), 0.0   ;;  %v779_v2 = vld [vmem:[%s946_s1 + $0x8] ss:$12 sps:$4 sm:$0xff] (!%p168_p3)   ;;  %vm821_vm0 = vmmov (!%p168_p3), 0   ;;  %v555_v17 = vlaneseq (!%p168_p3) }
   0x7   : > { %171 = sbr.rel (%p168_p3) target bundleno = 258 (0x102), region = 32  ;;  %729 = vmatprep.subr.bf16.mxu1 (!%p168_p3), %v820_v1  ;;  %737 = vmatprep.mubr.msk.bf16.mxu1 (!%p168_p3), %vm821_vm0, %v820_v1  ;;  %v780_v3 = vld [vmem:[%s946_s1] ss:$12 sps:$4 sm:$0xff] (!%p168_p3)   ;;  %v781_v4 = vld [vmem:[%s946_s1 + $0x1c] ss:$12 sps:$4 sm:$0xff] (!%p168_p3)   ;;  %v822_v5 = vmov (!%p168_p3), 0  }
   0x8   : > { %376 = vmatprep.subr.bf16.mxu0 (!%p168_p3), %v777_v0  ;;  %s201_s22 = smul.u32 (!%p168_p3), 6, %s810_s12  ;;  %730 = vmatpush3.bf16.msra.mxu1 (!%p168_p3), %v779_v2  ;;  %v783_v6 = vld [vmem:[%s946_s1 + $0x20] ss:$12 sps:$4 sm:$0xff] (!%p168_p3)   ;;  %v784_v7 = vld [vmem:[%s946_s1 + $0x18] ss:$12 sps:$4 sm:$0xff] (!%p168_p3)   ;;  %vm366_vm1 = vcmask (!%p168_p3), 523264  }
   0x9   : > { %408 = vmatprep.mubr.bf16.mxu0 (!%p168_p3), %v822_v5  ;;  %377 = vmatpush1.bf16.msra.mxu0 (!%p168_p3), %v780_v3  ;;  %v785_v8 = vld [vmem:[%s946_s1 + $0x34] ss:$12 sps:$4 sm:$0xff] (!%p168_p3)   ;;  %v787_v9 = vld [vmem:[%s946_s1 + $0x38] ss:$12 sps:$4 sm:$0xff] (!%p168_p3)   ;;  %v788_v10 = vld [vmem:[%s946_s1 + $0x30] ss:$12 sps:$4 sm:$0xff] (!%p168_p3)  }
   0xa   : > { %731 = vmatprep.subr.bf16.mxu1 (!%p168_p3), %v820_v1  ;;  %p202_p4 = scmp.lt.s32.totalorder (!%p168_p3), %s201_s22, 11  ;;  %378 = vmatprep.subr.bf16.mxu0 (!%p168_p3), %v781_v4  ;;  %v789_v11 = vld [vmem:[%s946_s1 + $0x4c] ss:$12 sps:$4 sm:$0xff] (!%p168_p3)   ;;  %v791_v12 = vld [vmem:[%s946_s1 + $0x50] ss:$12 sps:$4 sm:$0xff] (!%p168_p3)   ;;  %v556_v18 = vshrl.u32 (!%p168_p3), %v555_v17, 7 }
   0xb   : > { %v792_v13 = vld [vmem:[%s946_s1 + $0x48] ss:$12 sps:$4 sm:$0xff] (!%p168_p3)   ;;  %v553_v20 = vld [vmem:[%s947_s2] sm:$0x7] (!%p168_p3) }
   0xc   : > { %732 = vmatpush3.bf16.msra.mxu1 (!%p168_p3), %v783_v6  ;;  %v565_v19 = vsub.s32 (!%p168_p3), 2, %v556_v18  ;;  %v557_v21 = vsub.s32 (!%p168_p3), 0, %v556_v18  ;;  %v561_v22 = vsub.s32 (!%p168_p3), 1, %v556_v18 }
   0xd   : > { %379 = vmatpush1.bf16.msra.mxu0 (!%p168_p3), %v784_v7  ;;  %733 = vmatprep.subr.bf16.mxu1 (!%p168_p3), %v820_v1 }
   0xe   : > { %s954_s22 = smov (!%p202_p4, %s201_s22), 11  ;;  %380 = vmatprep.subr.bf16.mxu0 %v785_v8  ;;  %v566_v23 = vrot.slane %v553_v20, %v565_v19  ;;  %v558_v24 = vrot.slane %v553_v20, %v557_v21  ;;  %v562_v25 = vrot.slane %v553_v20, %v561_v22 }
   0xf   : > { %s697_s10 = sshll.u32 %s954_s22, 2  ;;  %s749_s24 = smul.u32 24, %s954_s22 }
  0x10   : > { %s208_s16 = scalar_lea.vmem %s945_s0, %s697_s10  ;;  %734 = vmatpush3.bf16.msra.mxu1 %v787_v9 }
  0x11   : > { %381 = vmatpush1.bf16.msra.mxu0 %v788_v10  ;;  %735 = vmatprep.subr.bf16.mxu1 %v820_v1  ;;  %v793_v14 = vld [vmem:[%s208_s16] sm:$0xff]   ;;  %v794_v15 = vld [vmem:[%s208_s16 + $0x8] sm:$0xff]   ;;  %v795_v16 = vld [vmem:[%s208_s16 + $0x10] sm:$0xff]   ;;  %s916_s27 = scalar_lea.vmem %s948_s3, %s749_s24 }
  0x12   : > { %382 = vmatprep.subr.bf16.mxu0 %v789_v11 }
  0x14   : > { %736 = vmatpush3.bf16.msra.mxu1 %v791_v12 }
  0x15   : > { %383 = vmatpush1.bf16.msra.mxu0 %v792_v13 }
  0x17   : > { %738 = vmatmul.mubr.msk.bf16.vlgmr.msra.gmra.mrb[0].mxu1 %vm366_vm1, %v793_v14 }
  0x18   : > { %714 = vmatmul.mubr.msk.bf16.vlgmr.msra.gmra.mrb[0].mxu0 %vm366_vm1, %v793_v14  ;;  %741 = vmatprep.mubr.msk.bf16.mxu1 %vm821_vm0, %v820_v1 }
  0x19   : > { %418 = vmatprep.mubr.bf16.mxu0 %v822_v5 }
  0x1f   : > { %742 = vmatmul.mubr.msk.bf16.gmra.mrb[4].mxu1 %vm366_vm1, %v794_v15 }
  0x20   : > { %715 = vmatmul.mubr.msk.bf16.gmra.mrb[4].mxu0 %vm366_vm1, %v794_v15  ;;  %745 = vmatprep.mubr.msk.bf16.mxu1 %vm821_vm0, %v820_v1 }
  0x21   : > { %428 = vmatprep.mubr.bf16.mxu0 %v822_v5 }
  0x27   : > { %746 = vmatmul.mubr.msk.bf16.gmra.mrb[8].mxu1 %vm366_vm1, %v795_v16 }
  0x28   : > { %716 = vmatmul.mubr.msk.bf16.gmra.mrb[8].mxu0 %vm366_vm1, %v795_v16 }
  0xea   : > { %v473_v26 = vpop.f32.mrb[0].mxu1 }
  0xeb   : > { %v572_v27 = vadd.f32 %v566_v23, %v473_v26  ;;  %v410_v28 = vpop.f32.mrb[0].mxu0  ;;  %v739_v29 = vpop.f32.mrb[1].mxu1 }
  0xec   : > { %v570_v30 = vadd.f32 %v558_v24, %v410_v28  ;;  %v412_v31 = vpop.f32.mrb[1].mxu0  ;;  %v476_v32 = vpop.f32.mrb[2].mxu1 }
  0xed   : > { %590 = vst [vmem:[%s916_s27 + $0x10] sm:$0xff] %v572_v27  ;;  %v571_v33 = vadd.f32 %v562_v25, %v412_v31  ;;  %v575_v34 = vadd.f32 %v566_v23, %v476_v32  ;;  %v414_v35 = vpop.f32.mrb[2].mxu0  ;;  %v740_v36 = vpop.f32.mrb[3].mxu1 }
  0xee   : > { %588 = vst [vmem:[%s916_s27] sm:$0xff] %v570_v30  ;;  %v573_v37 = vadd.f32 %v558_v24, %v414_v35  ;;  %v416_v38 = vpop.f32.mrb[3].mxu0 }
  0xef   : > { %589 = vst [vmem:[%s916_s27 + $0x8] sm:$0xff] %v571_v33  ;;  %593 = vst [vmem:[%s916_s27 + $0x28] sm:$0xff] %v575_v34  ;;  %v574_v39 = vadd.f32 %v562_v25, %v416_v38 }
  0xf0   : > { %591 = vst [vmem:[%s916_s27 + $0x18] sm:$0xff] %v573_v37 }
  0xf1   : > { %592 = vst [vmem:[%s916_s27 + $0x20] sm:$0xff] %v574_v39 }
  0xf2   : > { %v481_v40 = vpop.f32.mrb[4].mxu1 }
  0xf3   : > { %v578_v41 = vadd.f32 %v566_v23, %v481_v40  ;;  %v420_v42 = vpop.f32.mrb[4].mxu0  ;;  %v743_v43 = vpop.f32.mrb[5].mxu1 }
  0xf4   : > { %v576_v44 = vadd.f32 %v558_v24, %v420_v42  ;;  %v422_v45 = vpop.f32.mrb[5].mxu0  ;;  %v484_v46 = vpop.f32.mrb[6].mxu1 }
  0xf5   : > { %596 = vst [vmem:[%s916_s27 + $0x40] sm:$0xff] %v578_v41  ;;  %v577_v47 = vadd.f32 %v562_v25, %v422_v45  ;;  %v581_v48 = vadd.f32 %v566_v23, %v484_v46  ;;  %v424_v49 = vpop.f32.mrb[6].mxu0  ;;  %v744_v50 = vpop.f32.mrb[7].mxu1 }
  0xf6   : > { %594 = vst [vmem:[%s916_s27 + $0x30] sm:$0xff] %v576_v44  ;;  %v579_v51 = vadd.f32 %v558_v24, %v424_v49  ;;  %v426_v52 = vpop.f32.mrb[7].mxu0 }
  0xf7   : > { %595 = vst [vmem:[%s916_s27 + $0x38] sm:$0xff] %v577_v47  ;;  %599 = vst [vmem:[%s916_s27 + $0x58] sm:$0xff] %v581_v48  ;;  %v580_v53 = vadd.f32 %v562_v25, %v426_v52 }
  0xf8   : > { %597 = vst [vmem:[%s916_s27 + $0x48] sm:$0xff] %v579_v51 }
  0xf9   : > { %598 = vst [vmem:[%s916_s27 + $0x50] sm:$0xff] %v580_v53 }
  0xfa   : > { %v489_v54 = vpop.f32.mrb[8].mxu1 }
  0xfb   : > { %v584_v55 = vadd.f32 %v566_v23, %v489_v54  ;;  %v430_v56 = vpop.f32.mrb[8].mxu0  ;;  %v747_v57 = vpop.f32.mrb[9].mxu1 }
  0xfc   : > { %v582_v58 = vadd.f32 %v558_v24, %v430_v56  ;;  %v432_v59 = vpop.f32.mrb[9].mxu0  ;;  %v492_v60 = vpop.f32.mrb[10].mxu1 }
  0xfd   : > { %602 = vst [vmem:[%s916_s27 + $0x70] sm:$0xff] %v584_v55  ;;  %v583_v61 = vadd.f32 %v562_v25, %v432_v59  ;;  %v587_v62 = vadd.f32 %v566_v23, %v492_v60  ;;  %v434_v63 = vpop.f32.mrb[10].mxu0  ;;  %v748_v0 = vpop.f32.mrb[11].mxu1 }
  0xfe   : > { %600 = vst [vmem:[%s916_s27 + $0x60] sm:$0xff] %v582_v58  ;;  %v585_v1 = vadd.f32 %v558_v24, %v434_v63  ;;  %v436_v2 = vpop.f32.mrb[11].mxu0 }
  0xff   : > { %601 = vst [vmem:[%s916_s27 + $0x68] sm:$0xff] %v583_v61  ;;  %605 = vst [vmem:[%s916_s27 + $0x88] sm:$0xff] %v587_v62  ;;  %v586_v3 = vadd.f32 %v562_v25, %v436_v2 }
 0x100   : > { %603 = vst [vmem:[%s916_s27 + $0x78] sm:$0xff] %v585_v1 }
 0x101   : > { %604 = vst [vmem:[%s916_s27 + $0x80] sm:$0xff] %v586_v3 }
 0x102 PF: > { %s13_s14 = sadd.s32 1, %s818_s14   ;;  %s949_s12 = smov %s814_s13 }
 0x103   : > { %p10_p5 = scmp.ge.s32.totalorder %s13_s14, 4   ;;  %s950_s13 = smov %s952_s15 }
 0x105   :  { %12 = sbr.rel (!%p10_p5) target bundleno = 2 (0x2), region = 73 }

// kernel: reverse.2
= control target key start
LH: loop header
LB: loop body
LE: loop exit
PB: predicated region body
PF: predicated region fallthrough
CT: control target
= control target key end

     0   :  { %s200_s0 = inlined_call_operand.vmem [shape: f32[16,6,64], index: 0, kind: input, shape index: {}]   ;;  %s201_s1 = inlined_call_operand.vmem [shape: f32[16,6,64], index: 1, kind: output, shape index: {}]  }
   0x1   :  { %v64_v0 = vld [vmem:[%s200_s0 + $0x78] sm:$0x3f]  ;;  %v65_v1 = vld [vmem:[%s200_s0 + $0x70] sm:$0x3f]  ;;  %v67_v2 = vld [vmem:[%s200_s0 + $0x68] sm:$0x3f] }
   0x2   :  { %4 = vst [vmem:[%s201_s1] sm:$0xff] %v64_v0  ;;  %66 = vst [vmem:[%s201_s1 + $0x8] sm:$0xff] %v65_v1  ;;  %v69_v3 = vld [vmem:[%s200_s0 + $0x60] sm:$0x3f]  ;;  %v71_v4 = vld [vmem:[%s200_s0 + $0x58] sm:$0x3f] }
   0x3   :  { %68 = vst [vmem:[%s201_s1 + $0x10] sm:$0xff] %v67_v2  ;;  %v73_v5 = vld [vmem:[%s200_s0 + $0x50] sm:$0x3f]  ;;  %70 = vst [vmem:[%s201_s1 + $0x18] sm:$0xff] %v69_v3  ;;  %v75_v6 = vld [vmem:[%s200_s0 + $0x48] sm:$0x3f] }
   0x4   :  { %72 = vst [vmem:[%s201_s1 + $0x20] sm:$0xff] %v71_v4  ;;  %74 = vst [vmem:[%s201_s1 + $0x28] sm:$0xff] %v73_v5  ;;  %v77_v7 = vld [vmem:[%s200_s0 + $0x40] sm:$0x3f]  ;;  %v79_v8 = vld [vmem:[%s200_s0 + $0x38] sm:$0x3f] }
   0x5   :  { %76 = vst [vmem:[%s201_s1 + $0x30] sm:$0xff] %v75_v6  ;;  %78 = vst [vmem:[%s201_s1 + $0x38] sm:$0xff] %v77_v7  ;;  %v81_v9 = vld [vmem:[%s200_s0 + $0x30] sm:$0x3f]  ;;  %v83_v10 = vld [vmem:[%s200_s0 + $0x28] sm:$0x3f] }
   0x6   :  { %80 = vst [vmem:[%s201_s1 + $0x40] sm:$0xff] %v79_v8  ;;  %v85_v11 = vld [vmem:[%s200_s0 + $0x20] sm:$0x3f]  ;;  %82 = vst [vmem:[%s201_s1 + $0x48] sm:$0xff] %v81_v9  ;;  %v87_v12 = vld [vmem:[%s200_s0 + $0x18] sm:$0x3f] }
   0x7   :  { %84 = vst [vmem:[%s201_s1 + $0x50] sm:$0xff] %v83_v10  ;;  %86 = vst [vmem:[%s201_s1 + $0x58] sm:$0xff] %v85_v11  ;;  %v89_v13 = vld [vmem:[%s200_s0 + $0x10] sm:$0x3f]  ;;  %v91_v14 = vld [vmem:[%s200_s0 + $0x8] sm:$0x3f] }
   0x8   :  { %88 = vst [vmem:[%s201_s1 + $0x60] sm:$0xff] %v87_v12  ;;  %90 = vst [vmem:[%s201_s1 + $0x68] sm:$0xff] %v89_v13  ;;  %v61_v15 = vld [vmem:[%s200_s0] sm:$0x3f] }
   0x9   :  { %92 = vst [vmem:[%s201_s1 + $0x70] sm:$0xff] %v91_v14  ;;  %93 = vst [vmem:[%s201_s1 + $0x78] sm:$0xff] %v61_v15 }

// kernel: reverse.1
= control target key start
LH: loop header
LB: loop body
LE: loop exit
PB: predicated region body
PF: predicated region fallthrough
CT: control target
= control target key end

     0   :  { %s104_s0 = inlined_call_operand.vmem [shape: f32[8,2,64], index: 0, kind: input, shape index: {}]   ;;  %s105_s1 = inlined_call_operand.vmem [shape: f32[8,2,64], index: 1, kind: output, shape index: {}]  }
   0x1   :  { %v32_v0 = vld [vmem:[%s104_s0 + $0xe] sm:$0x3]  ;;  %v33_v1 = vld [vmem:[%s104_s0 + $0xc] sm:$0x3]  ;;  %v35_v2 = vld [vmem:[%s104_s0 + $0xa] sm:$0x3] }
   0x2   :  { %4 = vst [vmem:[%s105_s1] sm:$0x3] %v32_v0  ;;  %34 = vst [vmem:[%s105_s1 + $0x2] sm:$0x3] %v33_v1  ;;  %v37_v3 = vld [vmem:[%s104_s0 + $0x8] sm:$0x3] }
   0x3   :  { %36 = vst [vmem:[%s105_s1 + $0x4] sm:$0x3] %v35_v2  ;;  %v39_v4 = vld [vmem:[%s104_s0 + $0x6] sm:$0x3]  ;;  %v41_v5 = vld [vmem:[%s104_s0 + $0x4] sm:$0x3] }
   0x4   :  { %38 = vst [vmem:[%s105_s1 + $0x6] sm:$0x3] %v37_v3  ;;  %40 = vst [vmem:[%s105_s1 + $0x8] sm:$0x3] %v39_v4  ;;  %v43_v6 = vld [vmem:[%s104_s0 + $0x2] sm:$0x3] }
   0x5   :  { %42 = vst [vmem:[%s105_s1 + $0xa] sm:$0x3] %v41_v5  ;;  %v29_v7 = vld [vmem:[%s104_s0] sm:$0x3]  ;;  %44 = vst [vmem:[%s105_s1 + $0xc] sm:$0x3] %v43_v6 }
   0x6   :  { %45 = vst [vmem:[%s105_s1 + $0xe] sm:$0x3] %v29_v7 }

// kernel: hga_forward.31
= control target key start
LH: loop header
LB: loop body
LE: loop exit
PB: predicated region body
PF: predicated region fallthrough
CT: control target
= control target key end

     0   :  { %s977_s18 = smov 0   ;;  %s1201_s0 = inlined_call_operand.vmem [shape: f32[16,3,6,128], index: 0, kind: input, shape index: {}]   ;;  %s1202_s1 = inlined_call_operand.vmem [shape: f32[16,6,128], index: 1, kind: input, shape index: {}]   ;;  %s1203_s2 = inlined_call_operand.vmem [shape: f32[3,128,128], index: 2, kind: input, shape index: {}]   ;;  %s1204_s3 = inlined_call_operand.vmem [shape: f32[3,1,128], index: 3, kind: input, shape index: {}]   ;;  %s1205_s4 = inlined_call_operand.vmem [shape: f32[16,6,128], index: 4, kind: output, shape index: {0}]   ;;  %s1206_s5 = inlined_call_operand.vmem [shape: f32[6,128], index: 5, kind: output, shape index: {1}]  }
   0x1 LB: > { %s632_s19 = sadd.s32 4294967295, %s941_s18   ;;  %p636_p0 = scmp.ge.s32.totalorder %s941_s18, 1  ;;  %s941_s18 = sphi %s977_s18, %s16_s18  }
   0x2   : > { %p194_p1 = scmp.lt.s32.totalorder %s941_s18, 17 }
   0x4   : > { %p195_p2 = pnand %p636_p0, %p194_p1 }
   0x5   : > { %p225_p3 = scmp.lt.s32.totalorder (!%p195_p2), %s632_s19, 15  ;;  %p640_p4 = scmp.ne.s32.totalorder (!%p195_p2), %s632_s19, 0 }
   0x6   : > { %198 = sbr.rel (%p195_p2) target bundleno = 325 (0x145), region = 36 }
   0xd   : > { %s226_s20 = scalar_select %p225_p3, %s632_s19, 15 }
   0xe   : > { %241 = sbr.rel (%p640_p4) target bundleno = 21 (0x15), region = 40  ;;  %v943_v0 = vmov (!%p640_p4), 0.0  }
   0xf   : > { %s912_s21 = smul.u32 24, %s226_s20  ;;  %s638_s22 = sshll.u32 %s226_s20, 3  ;;  %242 = vst [vmem:[#allocation2] sm:$0x3f] (!%p640_p4), %v943_v0 }
  0x10   : > { %s988_s25 = scalar_lea.vmem %s1202_s1, %s638_s22  ;;  %s993_s28 = scalar_lea.vmem %s1205_s4, %s638_s22 }
  0x11   : > { %s998_s6 = scalar_lea.vmem %s1201_s0, %s912_s21 }
  0x15 PF: > { %v245_v1 = vld [vmem:[%s1203_s2] sm:$0xff]  ;;  %v246_v2 = vld [vmem:[%s1203_s2 + $0x8] sm:$0xff]  ;;  %v247_v3 = vld [vmem:[%s1203_s2 + $0x10] sm:$0xff]  ;;  %v944_v4 = vmov 0.0|0.0   ;;  %vm945_vm0 = vmmov 0   ;;  %v946_v7 = vmov 0.0  }
  0x16   : > { %840 = vmatprep.subr.bf16.mxu0 %v944_v4  ;;  %v841_v5 = vpack.c.bf16 %v246_v2, %v245_v1  ;;  %v248_v6 = vld [vmem:[%s1203_s2 + $0x18] sm:$0xff]  ;;  %864 = vmatprep.subr.bf16.mxu1 %v944_v4  ;;  %v642_v9 = vld [vmem:[%s1203_s2 + $0x80] sm:$0xff]  ;;  %v643_v10 = vld [vmem:[%s1203_s2 + $0x88] sm:$0xff] }
  0x17   : > { %767 = vmatprep.mubr.msk.f32.mxu0 %vm945_vm0, %v946_v7  ;;  %802 = vmatprep.mubr.msk.f32.mxu1 %vm945_vm0, %v946_v7  ;;  %v844_v8 = vpack.c.bf16 %v248_v6, %v247_v3  ;;  %v249_v11 = vld [vmem:[%s1203_s2 + $0x20] sm:$0xff]  ;;  %v250_v12 = vld [vmem:[%s1203_s2 + $0x28] sm:$0xff]  ;;  %v865_v13 = vpack.c.bf16 %v643_v10, %v642_v9  ;;  %v644_v14 = vld [vmem:[%s1203_s2 + $0x90] sm:$0xff] }
  0x18   : > { %842 = vmatpush3.bf16.msra.mxu0 %v841_v5  ;;  %v645_v15 = vld [vmem:[%s1203_s2 + $0x98] sm:$0xff]  ;;  %v847_v17 = vpack.c.bf16 %v250_v12, %v249_v11  ;;  %v646_v18 = vld [vmem:[%s1203_s2 + $0xa0] sm:$0xff]  ;;  %v647_v19 = vld [vmem:[%s1203_s2 + $0xa8] sm:$0xff] }
  0x19   : > { %843 = vmatprep.subr.bf16.mxu0 %v944_v4  ;;  %866 = vmatpush3.bf16.msra.mxu1 %v865_v13  ;;  %v868_v16 = vpack.c.bf16 %v645_v15, %v644_v14  ;;  %v251_v20 = vld [vmem:[%s1203_s2 + $0x30] sm:$0xff]  ;;  %v252_v21 = vld [vmem:[%s1203_s2 + $0x38] sm:$0xff]  ;;  %v871_v22 = vpack.c.bf16 %v647_v19, %v646_v18  ;;  %v253_v26 = vld [vmem:[%s1203_s2 + $0x40] sm:$0xff] }
  0x1a   : > { %867 = vmatprep.subr.bf16.mxu1 %v944_v4  ;;  %v850_v23 = vpack.c.bf16 %v252_v21, %v251_v20  ;;  %v648_v24 = vld [vmem:[%s1203_s2 + $0xb0] sm:$0xff]  ;;  %v649_v25 = vld [vmem:[%s1203_s2 + $0xb8] sm:$0xff]  ;;  %v254_v27 = vld [vmem:[%s1203_s2 + $0x48] sm:$0xff] }
  0x1b   : > { %v874_v28 = vpack.c.bf16 %v649_v25, %v648_v24  ;;  %v853_v29 = vpack.c.bf16 %v254_v27, %v253_v26  ;;  %v650_v30 = vld [vmem:[%s1203_s2 + $0xc0] sm:$0xff]  ;;  %v651_v31 = vld [vmem:[%s1203_s2 + $0xc8] sm:$0xff]  ;;  %v255_v32 = vld [vmem:[%s1203_s2 + $0x50] sm:$0xff] }
  0x1c   : > { %845 = vmatpush3.bf16.msra.mxu0 %v844_v8  ;;  %v256_v33 = vld [vmem:[%s1203_s2 + $0x58] sm:$0xff]  ;;  %v877_v34 = vpack.c.bf16 %v651_v31, %v650_v30  ;;  %v652_v36 = vld [vmem:[%s1203_s2 + $0xd0] sm:$0xff]  ;;  %v257_v38 = vld [vmem:[%s1203_s2 + $0x60] sm:$0xff] }
  0x1d   : > { %846 = vmatprep.subr.bf16.mxu0 %v944_v4  ;;  %869 = vmatpush3.bf16.msra.mxu1 %v868_v16  ;;  %v856_v35 = vpack.c.bf16 %v256_v33, %v255_v32  ;;  %v653_v37 = vld [vmem:[%s1203_s2 + $0xd8] sm:$0xff]  ;;  %v258_v39 = vld [vmem:[%s1203_s2 + $0x68] sm:$0xff]  ;;  %v654_v42 = vld [vmem:[%s1203_s2 + $0xe0] sm:$0xff] }
  0x1e   : > { %870 = vmatprep.subr.bf16.mxu1 %v944_v4  ;;  %v880_v40 = vpack.c.bf16 %v653_v37, %v652_v36  ;;  %v859_v41 = vpack.c.bf16 %v258_v39, %v257_v38  ;;  %v655_v43 = vld [vmem:[%s1203_s2 + $0xe8] sm:$0xff]  ;;  %v259_v44 = vld [vmem:[%s1203_s2 + $0x70] sm:$0xff]  ;;  %v260_v45 = vld [vmem:[%s1203_s2 + $0x78] sm:$0xff] }
  0x1f   : > { %v883_v46 = vpack.c.bf16 %v655_v43, %v654_v42  ;;  %v862_v47 = vpack.c.bf16 %v260_v45, %v259_v44  ;;  %v656_v48 = vld [vmem:[%s1203_s2 + $0xf0] sm:$0xff]  ;;  %v657_v49 = vld [vmem:[%s1203_s2 + $0xf8] sm:$0xff]  ;;  %v660_v50 = vld [vmem:[%s1203_s2 + $0x100] sm:$0xff] }
  0x20   : > { %848 = vmatpush3.bf16.msra.mxu0 %v847_v17  ;;  %v661_v51 = vld [vmem:[%s1203_s2 + $0x108] sm:$0xff]  ;;  %v886_v52 = vpack.c.bf16 %v657_v49, %v656_v48  ;;  %v1121_v53 = vld [vmem:[#allocation2] sm:$0x3f]  ;;  %v662_v55 = vld [vmem:[%s1203_s2 + $0x110] sm:$0xff] }
  0x21   : > { %849 = vmatprep.subr.bf16.mxu0 %v944_v4  ;;  %872 = vmatpush3.bf16.msra.mxu1 %v871_v22  ;;  %v889_v54 = vpack.c.bf16 %v661_v51, %v660_v50  ;;  %v663_v56 = vld [vmem:[%s1203_s2 + $0x118] sm:$0xff]  ;;  %v664_v58 = vld [vmem:[%s1203_s2 + $0x120] sm:$0xff]  ;;  %v665_v59 = vld [vmem:[%s1203_s2 + $0x128] sm:$0xff] }
  0x22   : > { %873 = vmatprep.subr.bf16.mxu1 %v944_v4  ;;  %v892_v57 = vpack.c.bf16 %v663_v56, %v662_v55  ;;  %v895_v60 = vpack.c.bf16 %v665_v59, %v664_v58  ;;  %v666_v61 = vld [vmem:[%s1203_s2 + $0x130] sm:$0xff]  ;;  %v667_v62 = vld [vmem:[%s1203_s2 + $0x138] sm:$0xff]  ;;  %v668_v0 = vld [vmem:[%s1203_s2 + $0x140] sm:$0xff] }
  0x23   : > { %v898_v63 = vpack.c.bf16 %v667_v62, %v666_v61  ;;  %v669_v1 = vld [vmem:[%s1203_s2 + $0x148] sm:$0xff]  ;;  %v670_v3 = vld [vmem:[%s1203_s2 + $0x150] sm:$0xff]  ;;  %v671_v5 = vld [vmem:[%s1203_s2 + $0x158] sm:$0xff] }
  0x24   : > { %851 = vmatpush3.bf16.msra.mxu0 %v850_v23  ;;  %v901_v2 = vpack.c.bf16 %v669_v1, %v668_v0  ;;  %v904_v6 = vpack.c.bf16 %v671_v5, %v670_v3  ;;  %v673_v8 = vld [vmem:[%s1203_s2 + $0x168] sm:$0xff]  ;;  %v674_v10 = vld [vmem:[%s1203_s2 + $0x170] sm:$0xff]  ;;  %v675_v11 = vld [vmem:[%s1203_s2 + $0x178] sm:$0xff] }
  0x25   : > { %852 = vmatprep.subr.bf16.mxu0 %v944_v4  ;;  %875 = vmatpush3.bf16.msra.mxu1 %v874_v28  ;;  %v910_v12 = vpack.c.bf16 %v675_v11, %v674_v10  ;;  %v641_v13 = vld [vmem:[%s1204_s3] ss:$0 sm:$0xff]  ;;  %v659_v18 = vld [vmem:[%s1204_s3 + $0x1] ss:$0 sm:$0xff]  ;;  %v679_v23 = vld [vmem:[%s998_s6 + $0x8] sm:$0x3f] }
  0x26   : > { %876 = vmatprep.subr.bf16.mxu1 %v944_v4  ;;  %v528_v15 = vld [vmem:[%s998_s6] sm:$0x3f] }
  0x27   : > { %v677_v30 = vld [vmem:[%s1204_s3 + $0x2] ss:$0 sm:$0xff] }
  0x28   : > { %854 = vmatpush3.bf16.msra.mxu0 %v853_v29  ;;  %v244_v39 = vld [vmem:[%s988_s25] sm:$0x3f] }
  0x29   : > { %855 = vmatprep.subr.bf16.mxu0 %v944_v4  ;;  %878 = vmatpush3.bf16.msra.mxu1 %v877_v34 }
  0x2a   : > { %879 = vmatprep.subr.bf16.mxu1 %v944_v4 }
  0x2c   : > { %857 = vmatpush3.bf16.msra.mxu0 %v856_v35  ;;  %v681_v35 = vld [vmem:[%s998_s6 + $0x10] sm:$0x3f] }
  0x2d   : > { %858 = vmatprep.subr.bf16.mxu0 %v944_v4  ;;  %881 = vmatpush3.bf16.msra.mxu1 %v880_v40 }
  0x2e   : > { %882 = vmatprep.subr.bf16.mxu1 %v944_v4 }
  0x30   : > { %860 = vmatpush3.bf16.msra.mxu0 %v859_v41  ;;  %v555_v41 = vsub.f32 1.0, %v244_v39 }
  0x31   : > { %861 = vmatprep.subr.bf16.mxu0 %v944_v4  ;;  %884 = vmatpush3.bf16.msra.mxu1 %v883_v46 }
  0x32   : > { %885 = vmatprep.subr.bf16.mxu1 %v944_v4  ;;  %v556_v45 = vmul.f32 %v555_v41, %v1121_v53 }
  0x34   : > { %863 = vmatpush3.bf16.msra.mxu0 %v862_v47 }
  0x35   : > { %888 = vmatprep.subr.bf16.mxu0 %v944_v4  ;;  %887 = vmatpush3.bf16.msra.mxu1 %v886_v52 }
  0x37   : > { %768 = vmatmul.mubr.f32.vlgmr.msra.gmra.mrb[0].mxu0 %v1121_v53 }
  0x38   : > { %890 = vmatpush3.bf16.msra.mxu0 %v889_v54  ;;  %837 = vmatprep.mubr.msk.f32.mxu0 %vm945_vm0, %v946_v7  ;;  %v672_v7 = vld [vmem:[%s1203_s2 + $0x160] sm:$0xff] }
  0x39   : > { %891 = vmatprep.subr.bf16.mxu0 %v944_v4  ;;  %803 = vmatmul.mubr.f32.vlgmr.msra.gmra.mrb[0].mxu1 %v1121_v53  ;;  %v907_v9 = vpack.c.bf16 %v673_v8, %v672_v7 }
  0x3c   : > { %893 = vmatpush3.bf16.msra.mxu0 %v892_v57 }
  0x3d   : > { %894 = vmatprep.subr.bf16.mxu0 %v944_v4 }
  0x40   : > { %896 = vmatpush3.bf16.msra.mxu0 %v895_v60 }
  0x41   : > { %897 = vmatprep.subr.bf16.mxu0 %v944_v4 }
  0x44   : > { %899 = vmatpush3.bf16.msra.mxu0 %v898_v63 }
  0x45   : > { %900 = vmatprep.subr.bf16.mxu0 %v944_v4 }
  0x48   : > { %902 = vmatpush3.bf16.msra.mxu0 %v901_v2 }
  0x49   : > { %903 = vmatprep.subr.bf16.mxu0 %v944_v4 }
  0x4c   : > { %905 = vmatpush3.bf16.msra.mxu0 %v904_v6 }
  0x4d   : > { %906 = vmatprep.subr.bf16.mxu0 %v944_v4 }
  0x50   : > { %908 = vmatpush3.bf16.msra.mxu0 %v907_v9 }
  0x51   : > { %909 = vmatprep.subr.bf16.mxu0 %v944_v4 }
  0x54   : > { %911 = vmatpush3.bf16.msra.mxu0 %v910_v12 }
  0x57   : > { %838 = vmatmul.mubr.f32.vlgmr.msra.gmra.mrb[2].mxu0 %v1121_v53 }
 0x10a   : > { %v334_v14 = vpop.f32.mrb[0].mxu0 }
 0x10b   : > { %v335_v16 = vadd.f32 %v641_v13, %v334_v14  ;;  %v769_v17 = vpop.f32.mrb[1].mxu0 }
 0x10c   : > { %v429_v20 = vpop.f32.mrb[0].mxu1 }
 0x10d   : > { %v529_v19 = vadd.f32 %v528_v15, %v335_v16  ;;  %v430_v21 = vadd.f32 %v659_v18, %v429_v20  ;;  %v804_v22 = vpop.f32.mrb[1].mxu1 }
 0x10f   : > { %v678_v4 = vmul.f32 -1.442695, %v529_v19  ;;  %v538_v24 = vadd.f32 %v679_v23, %v430_v21 }
 0x111   : > { %925 = vpow2.f32 %v678_v4  ;;  %v680_v25 = vmul.f32 -1.442695, %v538_v24 }
 0x113   : > { %927 = vpow2.f32 %v680_v25 }
 0x11b   : > { %v926_v26 = vpop.eup %925 }
 0x11c   : > { %v533_v27 = vadd.f32 1.0, %v926_v26 }
 0x11d   : > { %v928_v28 = vpop.eup %927 }
 0x11e   : > { %929 = vrcp.f32 %v533_v27  ;;  %v542_v29 = vadd.f32 1.0, %v928_v28 }
 0x120   : > { %931 = vrcp.f32 %v542_v29 }
 0x128   : > { %v930_v34 = vpop.eup %929 }
 0x12a   : > { %v524_v31 = vpop.f32.mrb[2].mxu0  ;;  %v932_v38 = vpop.eup %931 }
 0x12b   : > { %v525_v32 = vadd.f32 %v677_v30, %v524_v31  ;;  %v839_v33 = vpop.f32.mrb[3].mxu0  ;;  %v550_v40 = vsub.f32 1.0, %v932_v38  ;;  %v552_v43 = vmul.f32 %v932_v38, %v1121_v53 }
 0x12d   : > { %v547_v36 = vmul.f32 %v930_v34, %v525_v32 }
 0x12f   : > { %v548_v37 = vadd.f32 %v681_v35, %v547_v36 }
 0x131   : > { %933 = vtanh.f32 %v548_v37 }
 0x13b   : > { %v934_v42 = vpop.eup %933 }
 0x13c   : > { %v551_v44 = vmul.f32 %v934_v42, %v550_v40 }
 0x13e   : > { %v553_v46 = vadd.f32 %v552_v43, %v551_v44 }
 0x140   : > { %v554_v47 = vmul.f32 %v553_v46, %v244_v39 }
 0x142   : > { %v557_v48 = vadd.f32 %v556_v45, %v554_v47  ;;  %559 = vst [vmem:[%s993_s28] sm:$0x3f] %v554_v47 }
 0x144   : > { %558 = vst [vmem:[#allocation2] sm:$0x3f] %v557_v48  ;;  %560 = vst [vmem:[%s1206_s5] sm:$0x3f] %v557_v48 }
 0x145 PF: > { %s16_s18 = sadd.s32 1, %s941_s18  }
 0x146   : > { %p13_p5 = scmp.ge.s32.totalorder %s16_s18, 18  }
 0x148   :  { %15 = sbr.rel (!%p13_p5) target bundleno = 1 (0x1), region = 87 }

// kernel: hga_forward.36
= control target key start
LH: loop header
LB: loop body
LE: loop exit
PB: predicated region body
PF: predicated region fallthrough
CT: control target
= control target key end

     0   :  { %s302_s6 = smov 0   ;;  %s326_s0 = inlined_call_operand.vmem [shape: f32[96,128], index: 0, kind: input, shape index: {}]   ;;  %s327_s1 = inlined_call_operand.vmem [shape: f32[96,128], index: 1, kind: output, shape index: {}]  }
   0x1 LB: > { %s255_s7 = sadd.s32 4294967295, %s290_s6   ;;  %p259_p0 = scmp.ge.s32.totalorder %s290_s6, 1  ;;  %s290_s6 = sphi %s302_s6, %s11_s6  }
   0x2   : > { %p88_p1 = scmp.lt.s32.totalorder %s290_s6, 3 }
   0x4   : > { %p89_p2 = pnand %p259_p0, %p88_p1 }
   0x5   : > { %s108_s8 = smul.u32 (!%p89_p2), 6, %s255_s7 }
   0x6   : > { %92 = sbr.rel (%p89_p2) target bundleno = 337 (0x151), region = 24 }
   0x7   : > { %p109_p3 = scmp.lt.s32.totalorder (!%p89_p2), %s108_s8, 11 }
   0xd   : > { %s329_s8 = smov (!%p109_p3, %s108_s8), 11 }
   0xe   : > { %s260_s9 = sshll.u32 %s329_s8, 3 }
   0xf   : > { %s112_s12 = scalar_lea.vmem %s326_s0, %s260_s9  ;;  %s118_s15 = scalar_lea.vmem %s327_s1, %s260_s9 }
  0x10   : > { %v120_v0 = vld [vmem:[%s112_s12] sm:$0xff]  ;;  %v122_v1 = vld [vmem:[%s112_s12 + $0x10] sm:$0xff]  ;;  %v121_v2 = vld [vmem:[%s112_s12 + $0x8] sm:$0xff] }
  0x11   : > { %126 = vadd.xlane.f32.xlu0 %v120_v0  ;;  %130 = vadd.xlane.f32.xlu1 %v122_v1  ;;  %v123_v3 = vld [vmem:[%s112_s12 + $0x18] sm:$0xff]  ;;  %v124_v4 = vld [vmem:[%s112_s12 + $0x20] sm:$0xff]  ;;  %v125_v5 = vld [vmem:[%s112_s12 + $0x28] sm:$0xff] }
  0x15   : > { %128 = vadd.xlane.f32.xlu0 %v121_v2  ;;  %132 = vadd.xlane.f32.xlu1 %v123_v3 }
  0x19   : > { %134 = vadd.xlane.f32.xlu0 %v124_v4  ;;  %136 = vadd.xlane.f32.xlu1 %v125_v5 }
  0x9e   : > { %v127_v6 = vpop.xlane.xlu0 %126  ;;  %v131_v7 = vpop.xlane.xlu1 %130 }
  0x9f   : > { %v139_v8 = vmul.f32 0.0078125, %v127_v6  ;;  %v141_v9 = vmul.f32 0.0078125, %v131_v7 }
  0xa1   : > { %v145_v10 = vsub.f32 %v120_v0, %v139_v8  ;;  %v147_v11 = vsub.f32 %v122_v1, %v141_v9 }
  0xa2   : > { %v129_v12 = vpop.xlane.xlu0 %128  ;;  %v133_v13 = vpop.xlane.xlu1 %132 }
  0xa3   : > { %v140_v14 = vmul.f32 0.0078125, %v129_v12  ;;  %v151_v15 = vmul.f32 %v145_v10, %v145_v10  ;;  %v142_v16 = vmul.f32 0.0078125, %v133_v13  ;;  %v153_v19 = vmul.f32 %v147_v11, %v147_v11 }
  0xa5   : > { %v146_v17 = vsub.f32 %v121_v2, %v140_v14  ;;  %157 = vadd.xlane.f32.xlu0 %v151_v15  ;;  %v148_v18 = vsub.f32 %v123_v3, %v142_v16 }
  0xa6   : > { %v135_v20 = vpop.xlane.xlu0 %134  ;;  %v137_v21 = vpop.xlane.xlu1 %136 }
  0xa7   : > { %v143_v22 = vmul.f32 0.0078125, %v135_v20  ;;  %v152_v23 = vmul.f32 %v146_v17, %v146_v17  ;;  %v144_v24 = vmul.f32 0.0078125, %v137_v21  ;;  %v154_v27 = vmul.f32 %v148_v18, %v148_v18 }
  0xa9   : > { %v149_v25 = vsub.f32 %v124_v4, %v143_v22  ;;  %161 = vadd.xlane.f32.xlu0 %v153_v19  ;;  %159 = vadd.xlane.f32.xlu1 %v152_v23  ;;  %v150_v26 = vsub.f32 %v125_v5, %v144_v24 }
  0xab   : > { %v155_v28 = vmul.f32 %v149_v25, %v149_v25  ;;  %v156_v29 = vmul.f32 %v150_v26, %v150_v26 }
  0xad   : > { %163 = vadd.xlane.f32.xlu1 %v154_v27  ;;  %165 = vadd.xlane.f32.xlu0 %v155_v28 }
  0xb1   : > { %167 = vadd.xlane.f32.xlu1 %v156_v29 }
 0x132   : > { %v158_v30 = vpop.xlane.xlu0 %157 }
 0x133   : > { %v169_v31 = vmul.f32 0.0078125, %v158_v30 }
 0x135   : > { %v175_v32 = vadd.f32 1e-05, %v169_v31 }
 0x136   : > { %v160_v33 = vpop.xlane.xlu1 %159  ;;  %v162_v34 = vpop.xlane.xlu0 %161 }
 0x137   : > { %272 = vrsqrt.f32 %v175_v32  ;;  %v170_v35 = vmul.f32 0.0078125, %v160_v33  ;;  %v171_v36 = vmul.f32 0.0078125, %v162_v34 }
 0x139   : > { %v176_v37 = vadd.f32 1e-05, %v170_v35  ;;  %v177_v38 = vadd.f32 1e-05, %v171_v36 }
 0x13a   : > { %v164_v39 = vpop.xlane.xlu1 %163  ;;  %v166_v40 = vpop.xlane.xlu0 %165 }
 0x13b   : > { %274 = vrsqrt.f32 %v176_v37  ;;  %v172_v41 = vmul.f32 0.0078125, %v164_v39  ;;  %v173_v42 = vmul.f32 0.0078125, %v166_v40 }
 0x13c   : > { %276 = vrsqrt.f32 %v177_v38 }
 0x13d   : > { %v178_v43 = vadd.f32 1e-05, %v172_v41  ;;  %v179_v44 = vadd.f32 1e-05, %v173_v42 }
 0x13e   : > { %v168_v45 = vpop.xlane.xlu1 %167 }
 0x13f   : > { %278 = vrsqrt.f32 %v178_v43  ;;  %v174_v46 = vmul.f32 0.0078125, %v168_v45 }
 0x140   : > { %280 = vrsqrt.f32 %v179_v44 }
 0x141   : > { %v273_v47 = vpop.eup %272  ;;  %v180_v48 = vadd.f32 1e-05, %v174_v46 }
 0x142   : > { %v187_v49 = vmul.f32 %v273_v47, %v145_v10 }
 0x143   : > { %282 = vrsqrt.f32 %v180_v48 }
 0x144   : > { %193 = vst [vmem:[%s118_s15] sm:$0xff] %v187_v49 }
 0x145   : > { %v275_v50 = vpop.eup %274 }
 0x146   : > { %v277_v51 = vpop.eup %276  ;;  %v188_v52 = vmul.f32 %v275_v50, %v146_v17 }
 0x147   : > { %v189_v53 = vmul.f32 %v277_v51, %v147_v11 }
 0x148   : > { %194 = vst [vmem:[%s118_s15 + $0x8] sm:$0xff] %v188_v52 }
 0x149   : > { %v279_v54 = vpop.eup %278  ;;  %195 = vst [vmem:[%s118_s15 + $0x10] sm:$0xff] %v189_v53 }
 0x14a   : > { %v281_v55 = vpop.eup %280  ;;  %v190_v56 = vmul.f32 %v279_v54, %v148_v18 }
 0x14b   : > { %v191_v57 = vmul.f32 %v281_v55, %v149_v25 }
 0x14c   : > { %196 = vst [vmem:[%s118_s15 + $0x18] sm:$0xff] %v190_v56 }
 0x14d   : > { %v283_v58 = vpop.eup %282  ;;  %197 = vst [vmem:[%s118_s15 + $0x20] sm:$0xff] %v191_v57 }
 0x14e   : > { %v192_v59 = vmul.f32 %v283_v58, %v150_v26 }
 0x150   : > { %198 = vst [vmem:[%s118_s15 + $0x28] sm:$0xff] %v192_v59 }
 0x151 PF: > { %s11_s6 = sadd.s32 1, %s290_s6  }
 0x152   : > { %p8_p4 = scmp.ge.s32.totalorder %s11_s6, 4  }
 0x154   :  { %10 = sbr.rel (!%p8_p4) target bundleno = 1 (0x1), region = 54 }

// kernel: hga_forward.35
= control target key start
LH: loop header
LB: loop body
LE: loop exit
PB: predicated region body
PF: predicated region fallthrough
CT: control target
= control target key end

     0   :  { %s65_s0 = inlined_call_operand.vmem [shape: f32[16,128], index: 0, kind: input, shape index: {}]   ;;  %s66_s1 = inlined_call_operand.vmem [shape: f32[16,128], index: 1, kind: output, shape index: {}]  }
   0x1   :  { %v8_v0 = vld [vmem:[%s65_s0] sm:$0xff]  ;;  %v9_v1 = vld [vmem:[%s65_s0 + $0x8] sm:$0xff] }
   0x2   :  { %10 = vadd.xlane.f32.xlu0 %v8_v0 }
   0x6   :  { %12 = vadd.xlane.f32.xlu0 %v9_v1 }
  0x8f   :  { %v11_v2 = vpop.xlane.xlu0 %10 }
  0x90   :  { %v15_v3 = vmul.f32 0.0078125, %v11_v2 }
  0x92   :  { %v17_v4 = vsub.f32 %v8_v0, %v15_v3 }
  0x93   :  { %v13_v5 = vpop.xlane.xlu0 %12 }
  0x94   :  { %v16_v6 = vmul.f32 0.0078125, %v13_v5  ;;  %v19_v7 = vmul.f32 %v17_v4, %v17_v4 }
  0x96   :  { %v18_v8 = vsub.f32 %v9_v1, %v16_v6  ;;  %21 = vadd.xlane.f32.xlu1 %v19_v7 }
  0x98   :  { %v20_v9 = vmul.f32 %v18_v8, %v18_v8 }
  0x9a   :  { %23 = vadd.xlane.f32.xlu1 %v20_v9 }
 0x123   :  { %v22_v10 = vpop.xlane.xlu1 %21 }
 0x124   :  { %v25_v11 = vmul.f32 0.0078125, %v22_v10 }
 0x126   :  { %v27_v12 = vadd.f32 1e-05, %v25_v11 }
 0x127   :  { %v24_v13 = vpop.xlane.xlu1 %23 }
 0x128   :  { %39 = vrsqrt.f32 %v27_v12  ;;  %v26_v14 = vmul.f32 0.0078125, %v24_v13 }
 0x12a   :  { %v28_v15 = vadd.f32 1e-05, %v26_v14 }
 0x12c   :  { %41 = vrsqrt.f32 %v28_v15 }
 0x132   :  { %v40_v16 = vpop.eup %39 }
 0x133   :  { %v31_v17 = vmul.f32 %v40_v16, %v17_v4 }
 0x135   :  { %33 = vst [vmem:[%s66_s1] sm:$0xff] %v31_v17 }
 0x136   :  { %v42_v18 = vpop.eup %41 }
 0x137   :  { %v32_v19 = vmul.f32 %v42_v18, %v18_v8 }
 0x139   :  { %34 = vst [vmem:[%s66_s1 + $0x8] sm:$0xff] %v32_v19 }

// kernel: hga_forward.37
= control target key start
LH: loop header
LB: loop body
LE: loop exit
PB: predicated region body
PF: predicated region fallthrough
CT: control target
= control target key end

     0   :  { %s1558_s23 = smov 0   ;;  %s1733_s0 = inlined_call_operand.vmem [shape: bf16[6,24,128], index: 0, kind: input, shape index: {}]   ;;  %s1734_s1 = inlined_call_operand.vmem [shape: f32[6,24,1], index: 1, kind: input, shape index: {}]   ;;  %s1735_s2 = inlined_call_operand.vmem [shape: bf16[128,128], index: 2, kind: input, shape index: {}]   ;;  %s1736_s3 = inlined_call_operand.vmem [shape: f32[1,128], index: 3, kind: input, shape index: {}]   ;;  %s1737_s4 = inlined_call_operand.vmem [shape: bf16[128,128], index: 4, kind: input, shape index: {}]   ;;  %s1738_s5 = inlined_call_operand.vmem [shape: f32[1,128], index: 5, kind: input, shape index: {}]   ;;  %s1739_s6 = inlined_call_operand.vmem [shape: bf16[128,128], index: 6, kind: input, shape index: {}]   ;;  %s1740_s7 = inlined_call_operand.vmem [shape: f32[1,128], index: 7, kind: input, shape index: {}]   ;;  %s1741_s8 = inlined_call_operand.vmem [shape: bf16[128,64], index: 8, kind: input, shape index: {}]   ;;  %s1742_s9 = inlined_call_operand.vmem [shape: f32[1,64], index: 9, kind: input, shape index: {}]   ;;  %s1743_s10 = inlined_call_operand.vmem [shape: f32[1,64], index: 10, kind: input, shape index: {}]   ;;  %s1744_s11 = inlined_call_operand.<no memory space> [shape: f32[1,1], index: 11, kind: input, shape index: {}]   ;;  %s1745_s12 = inlined_call_operand.vmem [shape: f32[6,1,128], index: 12, kind: output, shape index: {}]  }
   0x1   :  { %v17_v0 = vstv %s1744_s11 }
   0x2   :  { %18 = vst [vmem:[#allocation2] sm:$0x1] %v17_v0 }
   0x3 LB: > { %s1224_s24 = sadd.s32 4294967295, %s1487_s23   ;;  %p1228_p0 = scmp.ge.s32.totalorder %s1487_s23, 1  ;;  %s1487_s23 = sphi %s1558_s23, %s24_s23  }
   0x4   : > { %p374_p1 = scmp.lt.s32.totalorder %s1487_s23, 7 }
   0x6   : > { %p375_p2 = pnand %p1228_p0, %p374_p1 }
   0x7   : > { %v1433_v1 = vld [vmem:[%s1735_s2] sm:$0xff] (!%p375_p2)   ;;  %p419_p3 = scmp.lt.s32.totalorder (!%p375_p2), %s1224_s24, 5  ;;  %v1434_v2 = vld [vmem:[%s1735_s2 + $0x8] sm:$0xff] (!%p375_p2)   ;;  %v1435_v3 = vld [vmem:[%s1735_s2 + $0x10] sm:$0xff] (!%p375_p2)   ;;  %vm865_vm0 = vcmask (!%p375_p2), 195584   ;;  %vm872_vm1 = vcmask (!%p375_p2), 1043456  }
   0x8   : > { %378 = sbr.rel (%p375_p2) target bundleno = 1571 (0x623), region = 68  ;;  %1323 = vmatprep.subr.bf16.mxu0 (!%p375_p2), %v1433_v1  ;;  %v1436_v4 = vld [vmem:[%s1735_s2 + $0x18] sm:$0xff] (!%p375_p2)   ;;  %v1443_v6 = vld [vmem:[%s1737_s4] sm:$0xff] (!%p375_p2)   ;;  %v1444_v7 = vld [vmem:[%s1737_s4 + $0x8] sm:$0xff] (!%p375_p2)   ;;  %vm1061_vm2 = vcmask (!%p375_p2), 523264   ;;  %vm1081_vm3 = vcmask (!%p375_p2), 7168  }
   0x9   : > { %1324 = vmatpush3.bf16.msra.mxu0 (!%p375_p2), %v1433_v1  ;;  %v1437_v8 = vld [vmem:[%s1735_s2 + $0x20] sm:$0xff] (!%p375_p2)   ;;  %1343 = vmatprep.subr.bf16.mxu1 (!%p375_p2), %v1443_v6  ;;  %v1445_v9 = vld [vmem:[%s1737_s4 + $0x10] sm:$0xff] (!%p375_p2)   ;;  %v1438_v10 = vld [vmem:[%s1735_s2 + $0x28] sm:$0xff] (!%p375_p2)  }
   0xa   : > { %1325 = vmatprep.subr.bf16.mxu0 (!%p375_p2), %v1434_v2  ;;  %1344 = vmatpush3.bf16.msra.mxu1 (!%p375_p2), %v1443_v6  ;;  %v1446_v11 = vld [vmem:[%s1737_s4 + $0x18] sm:$0xff] (!%p375_p2)   ;;  %v1439_v12 = vld [vmem:[%s1735_s2 + $0x30] sm:$0xff] (!%p375_p2)   ;;  %v1447_v13 = vld [vmem:[%s1737_s4 + $0x20] sm:$0xff] (!%p375_p2)  }
   0xb   : > { %1345 = vmatprep.subr.bf16.mxu1 (!%p375_p2), %v1444_v7  ;;  %v1440_v14 = vld [vmem:[%s1735_s2 + $0x38] sm:$0xff] (!%p375_p2)   ;;  %v1448_v15 = vld [vmem:[%s1737_s4 + $0x28] sm:$0xff] (!%p375_p2)   ;;  %v1449_v17 = vld [vmem:[%s1737_s4 + $0x30] sm:$0xff] (!%p375_p2)  }
   0xc   : > { %v1450_v18 = vld [vmem:[%s1737_s4 + $0x38] sm:$0xff] (!%p375_p2)   ;;  %v1231_v19 = vld [vmem:[%s1736_s3] ss:$0 sm:$0xff] (!%p375_p2)  ;;  %v1452_v46 = vld [vmem:[%s1739_s6 + $0x8] sm:$0xff] (!%p375_p2)  }
   0xd   : > { %1326 = vmatpush3.bf16.msra.mxu0 (!%p375_p2), %v1434_v2  ;;  %v1242_v32 = vld [vmem:[%s1738_s5] ss:$0 sm:$0xff] (!%p375_p2)  ;;  %v1453_v47 = vld [vmem:[%s1739_s6 + $0x10] sm:$0xff] (!%p375_p2)   ;;  %v1454_v48 = vld [vmem:[%s1739_s6 + $0x18] sm:$0xff] (!%p375_p2)  }
   0xe   : > { %1327 = vmatprep.subr.bf16.mxu0 (!%p375_p2), %v1435_v3  ;;  %1346 = vmatpush3.bf16.msra.mxu1 (!%p375_p2), %v1444_v7  ;;  %v1451_v45 = vld [vmem:[%s1739_s6] sm:$0xff] (!%p375_p2)   ;;  %v1456_v50 = vld [vmem:[%s1739_s6 + $0x28] sm:$0xff] (!%p375_p2)   ;;  %v1457_v51 = vld [vmem:[%s1739_s6 + $0x30] sm:$0xff] (!%p375_p2)  }
   0xf   : > { %s1747_s24 = smov (!%p419_p3, %s1224_s24), 5  ;;  %1347 = vmatprep.subr.bf16.mxu1 %v1445_v9  ;;  %v1455_v49 = vld [vmem:[%s1739_s6 + $0x20] sm:$0xff]   ;;  %v1458_v52 = vld [vmem:[%s1739_s6 + $0x38] sm:$0xff]   ;;  %v1460_v7 = vld [vmem:[%s1741_s8 + $0x8] sm:$0xff]  }
  0x10   : > { %s1420_s30 = smul.u32 12, %s1747_s24  ;;  %v1251_v59 = vld [vmem:[%s1740_s7] ss:$0 sm:$0xff]  ;;  %s431_s25 = scalar_lea.vmem %s1745_s12, %s1747_s24 }
  0x11   : > { %1328 = vmatpush3.bf16.msra.mxu0 %v1435_v3  ;;  %s1421_s17 = smul.u32 24, %s1747_s24 }
  0x12   : > { %s1581_s15 = scalar_lea.vmem %s1733_s0, %s1420_s30  ;;  %1329 = vmatprep.subr.bf16.mxu0 %v1436_v4  ;;  %1348 = vmatpush3.bf16.msra.mxu1 %v1445_v9  ;;  %v1462_v9 = vld [vmem:[%s1741_s8 + $0x18] sm:$0xff]  }
  0x13   : > { %v1587_v5 = vld [vmem:[%s1581_s15] sm:$0xff]   ;;  %1349 = vmatprep.subr.bf16.mxu1 %v1446_v11  ;;  %v1621_v16 = vld [vmem:[%s1581_s15 + $0x8] ss:$0 sps:$4 sm:$0xff]   ;;  %s428_s20 = scalar_lea.vmem %s1734_s1, %s1421_s17 }
  0x14   : > { %1339 = vmatprep.mubr.bf16.mxu0 %v1587_v5 }
  0x15   : > { %1330 = vmatpush3.bf16.msra.mxu0 %v1436_v4  ;;  %v1459_v4 = vld [vmem:[%s1741_s8] sm:$0xff]  }
  0x16   : > { %1331 = vmatprep.subr.bf16.mxu0 %v1437_v8  ;;  %1350 = vmatpush3.bf16.msra.mxu1 %v1446_v11  ;;  %v1464_v11 = vld [vmem:[%s1741_s8 + $0x28] sm:$0xff]  }
  0x17   : > { %1351 = vmatprep.subr.bf16.mxu1 %v1447_v13 }
  0x19   : > { %1332 = vmatpush3.bf16.msra.mxu0 %v1437_v8  ;;  %v1461_v8 = vld [vmem:[%s1741_s8 + $0x10] sm:$0xff]  }
  0x1a   : > { %1333 = vmatprep.subr.bf16.mxu0 %v1438_v10  ;;  %1352 = vmatpush3.bf16.msra.mxu1 %v1447_v13  ;;  %v1466_v13 = vld [vmem:[%s1741_s8 + $0x38] sm:$0xff]  }
  0x1b   : > { %1353 = vmatprep.subr.bf16.mxu1 %v1448_v15 }
  0x1d   : > { %1334 = vmatpush3.bf16.msra.mxu0 %v1438_v10  ;;  %v1463_v10 = vld [vmem:[%s1741_s8 + $0x20] sm:$0xff]  }
  0x1e   : > { %1335 = vmatprep.subr.bf16.mxu0 %v1439_v12  ;;  %1354 = vmatpush3.bf16.msra.mxu1 %v1448_v15 }
  0x1f   : > { %1355 = vmatprep.subr.bf16.mxu1 %v1449_v17 }
  0x21   : > { %1336 = vmatpush3.bf16.msra.mxu0 %v1439_v12  ;;  %v1465_v12 = vld [vmem:[%s1741_s8 + $0x30] sm:$0xff]  }
  0x22   : > { %1337 = vmatprep.subr.bf16.mxu0 %v1440_v14  ;;  %1356 = vmatpush3.bf16.msra.mxu1 %v1449_v17 }
  0x23   : > { %1357 = vmatprep.subr.bf16.mxu1 %v1450_v18 }
  0x25   : > { %1338 = vmatpush3.bf16.msra.mxu0 %v1440_v14 }
  0x26   : > { %1358 = vmatpush3.bf16.msra.mxu1 %v1450_v18 }
  0x28   : > { %1340 = vmatmul.mubr.bf16.vlgmr.msra.gmra.mrb[0].mxu0 %v1621_v16 }
  0xfb   : > { %v1341_v20 = vpop.f32.mrb[0].mxu0 }
  0xfc   : > { %v560_v21 = vadd.f32 %v1341_v20, %v1231_v19  ;;  %v551_v22 = vpop.f32.mrb[1].mxu0 }
  0xfd   : > { %v552_v23 = vadd.f32 %v1231_v19, %v551_v22  ;;  %v1342_v24 = vpop.f32.mrb[2].mxu0 }
  0xfe   : > { %v554_v25 = vpop.f32.mrb[3].mxu0  ;;  %v567_v27 = vmax.f32 %v560_v21, 0.0  ;;  %v1262_v24 = vld [vmem:[%s1742_s9] ss:$0 sm:$0xff] }
  0xff   : > { %v555_v26 = vadd.f32 %v1231_v19, %v554_v25  ;;  %v565_v28 = vmax.f32 %v552_v23, 0.0  ;;  %v1489_v23 = vmov 0  }
 0x100   : > { %v569_v31 = vpack.c.bf16 %v567_v27, %v567_v27  ;;  %1431 = vset.pattern.permute.xlu1 %v1489_v23  ;;  %1432 = vset.pattern.permute.xlu0 %v1489_v23 }
 0x101   : > { %v566_v29 = vmax.f32 %v555_v26, 0.0 }
 0x103   : > { %v568_v30 = vpack.c.bf16 %v566_v29, %v565_v28 }
 0x105   : > { %1359 = vmatprep.mubr.bf16.mxu1 %v568_v30 }
 0x106   : > { %1360 = vmatmul.mubr.bf16.vlgmr.msra.gmra.mrb[0].mxu1 %v569_v31 }
 0x1d9   : > { %v1361_v33 = vpop.f32.mrb[0].mxu1 }
 0x1da   : > { %v675_v34 = vpop.f32.mrb[1].mxu1  ;;  %v684_v35 = vadd.f32 %v1361_v33, %v1242_v32 }
 0x1db   : > { %v676_v36 = vadd.f32 %v1242_v32, %v675_v34  ;;  %v1362_v37 = vpop.f32.mrb[2].mxu1 }
 0x1dc   : > { %v678_v38 = vpop.f32.mrb[3].mxu1  ;;  %v691_v40 = vmax.f32 %v684_v35, 0.0 }
 0x1dd   : > { %v679_v39 = vadd.f32 %v1242_v32, %v678_v38  ;;  %v689_v41 = vmax.f32 %v676_v36, 0.0  ;;  %v1271_v32 = vld [vmem:[%s1743_s10] ss:$0 sm:$0xff] }
 0x1de   : > { %v693_v44 = vpack.c.bf16 %v691_v40, %v691_v40 }
 0x1df   : > { %v690_v42 = vmax.f32 %v679_v39, 0.0 }
 0x1e1   : > { %v692_v43 = vpack.c.bf16 %v690_v42, %v689_v41  ;;  %v1117_v42 = vld [vmem:[%s428_s20] sm:$0xff] }
 0x1e3   : > { %1363 = vmatprep.subr.bf16.mxu1 %v692_v43  ;;  %1367 = vmatprep.mubr.bf16.mxu1 %v692_v43 }
 0x1e4   : > { %1364 = vmatpush3.bf16.xpose.msra.mxu1 %v692_v43  ;;  %v1119_v43 = vld [vmem:[%s428_s20 + $0x10] sm:$0xff] }
 0x1e5   : > { %1365 = vmatprep.subr.bf16.mxu1 %v693_v44 }
 0x1ec   : > { %1366 = vmatpush3.bf16.xpose.msra.mxu1 %v693_v44 }
 0x1ed   : > { %1371 = vmatprep.subr.bf16.mxu1 %v1451_v45 }
 0x1f3   : > { %1368 = vmatmul.mubr.bf16.vlgmr.msra.gmra.mrb[4].mxu1 %v693_v44  ;;  %v1118_v44 = vld [vmem:[%s428_s20 + $0x8] sm:$0xff] }
 0x1f4   : > { %1372 = vmatpush3.bf16.msra.mxu1 %v1451_v45  ;;  %1387 = vmatprep.mubr.bf16.mxu1 %v1587_v5  ;;  %v1272_v45 = vld [vmem:[#allocation2] ss:$0 sm:$0xff] }
 0x1f5   : > { %1373 = vmatprep.subr.bf16.mxu1 %v1452_v46 }
 0x1f8   : > { %1374 = vmatpush3.bf16.msra.mxu1 %v1452_v46 }
 0x1f9   : > { %1375 = vmatprep.subr.bf16.mxu1 %v1453_v47 }
 0x1fc   : > { %1376 = vmatpush3.bf16.msra.mxu1 %v1453_v47 }
 0x1fd   : > { %1377 = vmatprep.subr.bf16.mxu1 %v1454_v48 }
 0x200   : > { %1378 = vmatpush3.bf16.msra.mxu1 %v1454_v48 }
 0x201   : > { %1379 = vmatprep.subr.bf16.mxu1 %v1455_v49 }
 0x204   : > { %1380 = vmatpush3.bf16.msra.mxu1 %v1455_v49 }
 0x205   : > { %1381 = vmatprep.subr.bf16.mxu1 %v1456_v50 }
 0x208   : > { %1382 = vmatpush3.bf16.msra.mxu1 %v1456_v50 }
 0x209   : > { %1383 = vmatprep.subr.bf16.mxu1 %v1457_v51 }
 0x20c   : > { %1384 = vmatpush3.bf16.msra.mxu1 %v1457_v51 }
 0x20d   : > { %1385 = vmatprep.subr.bf16.mxu1 %v1458_v52 }
 0x210   : > { %1386 = vmatpush3.bf16.msra.mxu1 %v1458_v52 }
 0x213   : > { %1388 = vmatmul.mubr.bf16.vlgmr.msra.gmra.mrb[8].mxu1 %v1621_v16 }
 0x2c6   : > { %v1369_v53 = vpop.f32.mrb[4].mxu1 }
 0x2c7   : > { %v728_v54 = vpop.f32.mrb[5].mxu1  ;;  %v862_v6 = vpack.c.bf16 %v1369_v53, %v1369_v53 }
 0x2c8   : > { %v1370_v55 = vpop.f32.mrb[6].mxu1 }
 0x2c9   : > { %v731_v56 = vpop.f32.mrb[7].mxu1 }
 0x2ca   : > { %v861_v57 = vpack.c.bf16 %v731_v56, %v728_v54 }
 0x2cc   : > { %1395 = vmatprep.mubr.msk.bf16.mxu0 %vm865_vm0, %v861_v57 }
 0x2e6   : > { %v1389_v58 = vpop.f32.mrb[8].mxu1 }
 0x2e7   : > { %v847_v60 = vpop.f32.mrb[9].mxu1  ;;  %v856_v63 = vadd.f32 %v1389_v58, %v1251_v59 }
 0x2e8   : > { %v1390_v61 = vpop.f32.mrb[10].mxu1  ;;  %v848_v0 = vadd.f32 %v1251_v59, %v847_v60 }
 0x2e9   : > { %v850_v62 = vpop.f32.mrb[11].mxu1  ;;  %v864_v3 = vpack.c.bf16 %v856_v63, %v856_v63 }
 0x2ea   : > { %v851_v1 = vadd.f32 %v1251_v59, %v850_v62 }
 0x2eb   : > { %v874_v5 = vsel %vm872_vm1, %v864_v3, 0 }
 0x2ec   : > { %v863_v2 = vpack.c.bf16 %v851_v1, %v848_v0 }
 0x2ee   : > { %1391 = vmatprep.subr.bf16.mxu0 %v863_v2 }
 0x2ef   : > { %1392 = vmatpush3.bf16.msra.mxu0 %v863_v2 }
 0x2f0   : > { %1419 = vmatprep.subr.msk.bf16.mxu0 %vm872_vm1, %v864_v3 }
 0x2f3   : > { %1394 = vmatpush3.bf16.msra.mxu0 %v874_v5 }
 0x2f4   : > { %1399 = vmatprep.subr.bf16.mxu0 %v1459_v4 }
 0x2f6   : > { %1396 = vmatmul.mubr.msk.bf16.vlgmr.msra.gmra.mrb[4].mxu0 %vm865_vm0, %v862_v6 }
 0x2f7   : > { %1400 = vmatpush3.bf16.msra.mxu0 %v1459_v4 }
 0x2f8   : > { %1401 = vmatprep.subr.bf16.mxu0 %v1460_v7 }
 0x2fb   : > { %1402 = vmatpush3.bf16.msra.mxu0 %v1460_v7 }
 0x2fc   : > { %1403 = vmatprep.subr.bf16.mxu0 %v1461_v8 }
 0x2ff   : > { %1404 = vmatpush3.bf16.msra.mxu0 %v1461_v8 }
 0x300   : > { %1405 = vmatprep.subr.bf16.mxu0 %v1462_v9 }
 0x303   : > { %1406 = vmatpush3.bf16.msra.mxu0 %v1462_v9 }
 0x304   : > { %1407 = vmatprep.subr.bf16.mxu0 %v1463_v10 }
 0x307   : > { %1408 = vmatpush3.bf16.msra.mxu0 %v1463_v10 }
 0x308   : > { %1409 = vmatprep.subr.bf16.mxu0 %v1464_v11 }
 0x30b   : > { %1410 = vmatpush3.bf16.msra.mxu0 %v1464_v11 }
 0x30c   : > { %1411 = vmatprep.subr.bf16.mxu0 %v1465_v12 }
 0x30f   : > { %1412 = vmatpush3.bf16.msra.mxu0 %v1465_v12 }
 0x310   : > { %1413 = vmatprep.subr.bf16.mxu0 %v1466_v13 }
 0x313   : > { %1414 = vmatpush3.bf16.msra.mxu0 %v1466_v13 }
 0x3c9   : > { %v1397_v14 = vpop.f32.mrb[4].mxu0 }
 0x3ca   : > { %v1691_v15 = vpop.f32.mrb[5].mxu0  ;;  %v1693_v17 = vmax.f32 %v1397_v14, 0.0 }
 0x3cb   : > { %v1398_v16 = vpop.f32.mrb[6].mxu0  ;;  %v924_v19 = vmax.f32 %v1691_v15, 0.0 }
 0x3cc   : > { %v1695_v18 = vpop.f32.mrb[7].mxu0  ;;  %v928_v22 = vpack.c.bf16 %v1693_v17, %v1693_v17 }
 0x3cd   : > { %v925_v20 = vmax.f32 %v1695_v18, 0.0 }
 0x3cf   : > { %v927_v21 = vpack.c.bf16 %v925_v20, %v924_v19 }
 0x3d1   : > { %1415 = vmatprep.mubr.bf16.mxu0 %v927_v21 }
 0x3d2   : > { %1416 = vmatmul.mubr.bf16.vlgmr.msra.gmra.mrb[8].mxu0 %v928_v22 }
 0x4a5   : > { %v1417_v25 = vpop.f32.mrb[8].mxu0 }
 0x4a6   : > { %v1043_v26 = vadd.f32 %v1417_v25, %v1262_v24  ;;  %v1034_v27 = vpop.f32.mrb[9].mxu0 }
 0x4a7   : > { %v1035_v28 = vadd.f32 %v1262_v24, %v1034_v27  ;;  %v1418_v29 = vpop.f32.mrb[10].mxu0 }
 0x4a8   : > { %1467 = vtanh.f32 %v1043_v26  ;;  %v1037_v30 = vpop.f32.mrb[11].mxu0 }
 0x4a9   : > { %1469 = vtanh.f32 %v1035_v28  ;;  %v1038_v31 = vadd.f32 %v1262_v24, %v1037_v30 }
 0x4ab   : > { %1471 = vtanh.f32 %v1038_v31 }
 0x4b2   : > { %v1468_v33 = vpop.eup %1467 }
 0x4b3   : > { %v1470_v34 = vpop.eup %1469  ;;  %v1060_v35 = vmul.f32 %v1468_v33, %v1271_v32 }
 0x4b4   : > { %v1058_v36 = vmul.f32 %v1470_v34, %v1271_v32 }
 0x4b5   : > { %v1472_v37 = vpop.eup %1471  ;;  %v1068_v38 = vsel %vm1061_vm2, %v1060_v35, 0.0 }
 0x4b6   : > { %1069 = vadd.xlane.f32.xlu1 %v1068_v38  ;;  %v1062_v39 = vsel %vm1061_vm2, %v1058_v36, 0.0  ;;  %v1059_v40 = vmul.f32 %v1472_v37, %v1271_v32 }
 0x4b7   : > { %1063 = vadd.xlane.f32.xlu0 %v1062_v39 }
 0x4b8   : > { %v1065_v41 = vsel %vm1061_vm2, %v1059_v40, 0.0 }
 0x4bb   : > { %1066 = vadd.xlane.f32.xlu0 %v1065_v41 }
 0x4c7   : > { %1122 = vperm.xlu1 %1431, %v1117_v42  }
 0x4cb   : > { %1132 = vperm.xlu1 %1431, %v1119_v43  }
 0x4d1   : > { %1127 = vperm.xlu0 %1432, %v1118_v44  }
 0x543   : > { %v1070_v47 = vpop.xlane.xlu1 %1069 }
 0x544   : > { %v1064_v46 = vpop.xlane.xlu0 %1063  ;;  %v1080_v50 = vadd.f32 %v1272_v45, %v1070_v47 }
 0x545   : > { %v1078_v48 = vadd.f32 %v1272_v45, %v1064_v46 }
 0x546   : > { %v1084_v55 = vsel %vm1081_vm3, %v1080_v50, -inf }
 0x547   : > { %v1082_v52 = vsel %vm1081_vm3, %v1078_v48, -inf  ;;  %v1123_v28 = vpop.permute.xlu1 %1122 }
 0x548   : > { %v1067_v49 = vpop.xlane.xlu0 %1066  ;;  %v1135_v34 = vmul.f32 %v1123_v28, %v924_v19 }
 0x549   : > { %v1079_v51 = vadd.f32 %v1272_v45, %v1067_v49 }
 0x54b   : > { %v1083_v53 = vsel %vm1081_vm3, %v1079_v51, -inf  ;;  %v1133_v29 = vpop.permute.xlu1 %1132 }
 0x54c   : > { %v1085_v54 = vmax.f32 %v1082_v52, %v1083_v53  ;;  %v1137_v36 = vmul.f32 %v1133_v29, %v1693_v17 }
 0x54e   : > { %v1086_v56 = vmax.f32 %v1085_v54, %v1084_v55 }
 0x550   : > { %v1087_v57 = vrot.slane %v1086_v56, 4  ;;  %v1128_v30 = vpop.permute.xlu0 %1127 }
 0x551   : > { %v1136_v32 = vmul.f32 %v1128_v30, %v925_v20 }
 0x552   : > { %v1088_v58 = vmax.f32 %v1086_v56, %v1087_v57 }
 0x554   : > { %v1089_v59 = vrot.slane %v1088_v58, 2 }
 0x556   : > { %v1090_v60 = vmax.f32 %v1088_v58, %v1089_v59 }
 0x558   : > { %v1091_v61 = vrot.slane %v1090_v60, 1 }
 0x55a   : > { %v1092_v62 = vmax.f32 %v1090_v60, %v1091_v61 }
 0x55c   : > { %v1093_v63 = vsub.f32 %v1078_v48, %v1092_v62  ;;  %v1094_v0 = vsub.f32 %v1079_v51, %v1092_v62  ;;  %v1095_v1 = vsub.f32 %v1080_v50, %v1092_v62 }
 0x55e   : > { %v1096_v2 = vmul.f32 1.442695, %v1093_v63  ;;  %v1098_v3 = vmul.f32 1.442695, %v1094_v0  ;;  %v1100_v4 = vmul.f32 1.442695, %v1095_v1 }
 0x560   : > { %1473 = vpow2.f32 %v1096_v2 }
 0x561   : > { %1475 = vpow2.f32 %v1098_v3 }
 0x562   : > { %1477 = vpow2.f32 %v1100_v4 }
 0x56a   : > { %v1474_v5 = vpop.eup %1473 }
 0x56b   : > { %v1476_v6 = vpop.eup %1475  ;;  %v1102_v7 = vsel %vm1081_vm3, %v1474_v5, 0.0 }
 0x56c   : > { %v1478_v8 = vpop.eup %1477  ;;  %v1103_v9 = vsel %vm1081_vm3, %v1476_v6, 0.0 }
 0x56d   : > { %v1104_v10 = vadd.f32 %v1103_v9, %v1102_v7  ;;  %v1105_v11 = vsel %vm1081_vm3, %v1478_v8, 0.0 }
 0x56f   : > { %v1106_v12 = vadd.f32 %v1105_v11, %v1104_v10 }
 0x571   : > { %v1107_v13 = vrot.slane %v1106_v12, 4 }
 0x573   : > { %v1108_v14 = vadd.f32 %v1107_v13, %v1106_v12 }
 0x575   : > { %v1109_v16 = vrot.slane %v1108_v14, 2 }
 0x577   : > { %v1110_v21 = vadd.f32 %v1109_v16, %v1108_v14 }
 0x579   : > { %v1111_v22 = vrot.slane %v1110_v21, 1 }
 0x57b   : > { %v1112_v23 = vadd.f32 %v1111_v22, %v1110_v21 }
 0x57d   : > { %1479 = vrcp.f32 %v1112_v23 }
 0x587   : > { %v1480_v24 = vpop.eup %1479 }
 0x588   : > { %v1114_v25 = vmul.f32 %v1480_v24, %v1474_v5  ;;  %v1115_v26 = vmul.f32 %v1480_v24, %v1476_v6  ;;  %v1116_v27 = vmul.f32 %v1480_v24, %v1478_v8 }
 0x58a   : > { %1140 = vperm.xlu1 %1431, %v1114_v25  }
 0x58e   : > { %1145 = vperm.xlu1 %1431, %v1115_v26  }
 0x592   : > { %1150 = vperm.xlu1 %1431, %v1116_v27  }
 0x609   : > { %v1141_v31 = vpop.permute.xlu1 %1140 }
 0x60a   : > { %v1153_v37 = vmul.f32 %v1141_v31, %v1135_v34 }
 0x60d   : > { %v1146_v33 = vpop.permute.xlu1 %1145 }
 0x60e   : > { %v1154_v35 = vmul.f32 %v1146_v33, %v1136_v32 }
 0x610   : > { %v1156_v39 = vadd.f32 %v1154_v35, %v1153_v37 }
 0x611   : > { %v1151_v38 = vpop.permute.xlu1 %1150 }
 0x612   : > { %v1155_v40 = vmul.f32 %v1151_v38, %v1137_v36 }
 0x614   : > { %v1157_v41 = vadd.f32 %v1156_v39, %v1155_v40 }
 0x616   : > { %v1158_v42 = vrot.slane %v1157_v41, 4 }
 0x618   : > { %v1159_v43 = vadd.f32 %v1158_v42, %v1157_v41 }
 0x61a   : > { %v1160_v44 = vrot.slane %v1159_v43, 2 }
 0x61c   : > { %v1161_v45 = vadd.f32 %v1160_v44, %v1159_v43 }
 0x61e   : > { %v1162_v46 = vrot.slane %v1161_v45, 1 }
 0x620   : > { %v1163_v18 = vadd.f32 %v1162_v46, %v1161_v45 }
 0x622   : > { %1164 = vst [vmem:[%s431_s25] sm:$0x1] %v1163_v18 }
 0x623 PF: > { %s24_s23 = sadd.s32 1, %s1487_s23  }
 0x624   : > { %p21_p4 = scmp.ge.s32.totalorder %s24_s23, 8  }
 0x626   :  { %23 = sbr.rel (!%p21_p4) target bundleno = 3 (0x3), region = 101 }

// kernel: squeeze.20
= control target key start
LH: loop header
LB: loop body
LE: loop exit
PB: predicated region body
PF: predicated region fallthrough
CT: control target
= control target key end

     0   :  { %s1021_s10 = smov 3  ;;  %s1023_s11 = smov 3  ;;  %vm210_vm0 = vcmask 654336   ;;  %vm232_vm1 = vcmask 1046533   ;;  %vm236_vm2 = vcmask 1047559   ;;  %vm370_vm3 = vcmask 523264   ;;  %s1274_s0 = inlined_call_operand.vmem [shape: bf16[1,6,1600], index: 0, kind: input, shape index: {}]   ;;  %s1275_s1 = inlined_call_operand.vmem [shape: bf16[6,20,80], index: 1, kind: output, shape index: {}]  }
   0x1   :  { %v860_v0 = vld [vmem:[%s1274_s0 + $0x30] sm:$0xf]  ;;  %v958_v1 = vld [vmem:[%s1274_s0 + $0x28] sm:$0xff]   ;;  %v959_v5 = vld [vmem:[%s1274_s0 + $0x20] sm:$0xff]   ;;  %s1034_s18 = smov 96  ;;  %s1039_s21 = smov 96 }
   0x2   :  { %v17_v2 = vunpack.c.l.bf16 %v860_v0  ;;  %v891_v3 = vunpack.c.l.bf16 %v958_v1  ;;  %v892_v4 = vunpack.c.h.bf16 %v958_v1  ;;  %v960_v6 = vld [vmem:[%s1274_s0 + $0x18] sm:$0xff]   ;;  %v961_v7 = vld [vmem:[%s1274_s0 + $0x10] sm:$0xff]   ;;  %v895_v8 = vunpack.c.l.bf16 %v959_v5  ;;  %v962_v12 = vld [vmem:[%s1274_s0 + $0x8] sm:$0xff]   ;;  %s1046_s24 = smov 3  ;;  %s1048_s25 = smov 96 }
   0x3   :  { %v899_v9 = vunpack.c.l.bf16 %v960_v6  ;;  %v900_v10 = vunpack.c.h.bf16 %v960_v6  ;;  %v904_v11 = vunpack.c.h.bf16 %v961_v7  ;;  %v910_v13 = vld [vmem:[%s1274_s0] sm:$0xff]   ;;  %v907_v14 = vunpack.c.l.bf16 %v962_v12  ;;  %s1044_s0 = smov 3  ;;  %s1050_s26 = smov 96 }
   0x4   :  { %20 = vst [vmem:[#allocation1 + $0x60] sm:$0xff] %v17_v2  ;;  %36 = vst [vmem:[#allocation1 + $0x58] sm:$0xff] %v892_v4  ;;  %v908_v15 = vunpack.c.h.bf16 %v962_v12  ;;  %v903_v16 = vunpack.c.l.bf16 %v961_v7  ;;  %v911_v17 = vunpack.c.l.bf16 %v910_v13  ;;  %v912_v18 = vunpack.c.h.bf16 %v910_v13  ;;  %s1052_s27 = smov 96  ;;  %s1054_s28 = smov 96 }
   0x5   :  { %52 = vst [vmem:[#allocation1 + $0x50] sm:$0xff] %v891_v3  ;;  %84 = vst [vmem:[#allocation1 + $0x40] sm:$0xff] %v895_v8  ;;  %v896_v19 = vunpack.c.h.bf16 %v959_v5  ;;  %s1056_s29 = smov 96  ;;  %s1058_s30 = smov 96  ;;  %vm611_vm4 = vcmask 916480   ;;  %vm549_vm5 = vcmask 785408  }
   0x6   :  { %100 = vst [vmem:[#allocation1 + $0x38] sm:$0xff] %v900_v10  ;;  %116 = vst [vmem:[#allocation1 + $0x30] sm:$0xff] %v899_v9  ;;  %s1060_s2 = smov 3  ;;  %s1062_s3 = smov 12  ;;  %vm286_vm6 = vcmask 1043458   ;;  %vm291_vm7 = vcmask 1045508  }
   0x7   :  { %132 = vst [vmem:[#allocation1 + $0x28] sm:$0xff] %v904_v11  ;;  %164 = vst [vmem:[#allocation1 + $0x18] sm:$0xff] %v908_v15  ;;  %s1064_s4 = smov 48  ;;  %s1066_s5 = smov 192  ;;  %vm296_vm8 = vcmask 1047558   ;;  %vm435_vm9 = vcmask 392192  }
   0x8   :  { %180 = vst [vmem:[#allocation1 + $0x10] sm:$0xff] %v907_v14  ;;  %148 = vst [vmem:[#allocation1 + $0x20] sm:$0xff] %v903_v16  ;;  %s998_s6 = smov 48   ;;  %s1076_s7 = smov 3  ;;  %vm444_vm10 = vcmask 654720   ;;  %vm615_vm11 = vcmask 130048  }
   0x9   :  { %195 = vst [vmem:[#allocation1 + $0x8] sm:$0xff] %v912_v18  ;;  %208 = vst [vmem:[#allocation1] sm:$0xff] %v911_v17  ;;  %s1082_s8 = smov 12  ;;  %s1093_s9 = smov 48  ;;  %vm624_vm12 = vcmask 654464   ;;  %vm383_vm13 = vcmask 654848  }
   0xa   :  { %68 = vst [vmem:[#allocation1 + $0x48] sm:$0xff] %v896_v19  ;;  %s1000_s12 = smov 64   ;;  %s634_s13 = smov 3  ;;  %vm553_vm14 = vcmask 261120   ;;  %vm562_vm15 = vcmask 654592  }
   0xb   :  { %v516_v21 = vld [vmem:[#allocation1 + $0x5a] ss:$3 sm:%s1023_s11]   ;;  %v696_v26 = vld [vmem:[#allocation1 + $0x62] ss:$3 sm:%s1046_s24]   ;;  %s1100_s11 = smov 192  ;;  %s637_s14 = smov 12 }
   0xc   :  { %v513_v20 = vld [vmem:[#allocation1 + $0x52] ss:$3 sm:%s1021_s10]   ;;  %v693_v22 = vld [vmem:[#allocation1 + $0x5a] ss:$3 sm:%s1044_s0]   ;;  %s999_s10 = smov 16   ;;  %s642_s15 = smov 48 }
   0xd   :  { %v518_v23 = vsel %vm210_vm0, %v516_v21, %v513_v20  ;;  %v363_v25 = vld [vmem:[#allocation1 + $0x31] ss:$3 sm:%s1039_s21]   ;;  %v698_v32 = vsel %vm611_vm4, %v696_v26, %v693_v22  ;;  %v1087_v36 = vld.sshfl [vmem:[#allocation1 + $0x41] sm:$0xff pattern:$0x44444130]   ;;  %s647_s16 = smov 192 }
   0xe   :  { %v352_v24 = vld [vmem:[#allocation1 + $0x29] ss:$3 sm:%s1034_s18]   ;;  %519 = vrot.lane.b32.xlu1 %v518_v23, %s998_s6  ;;  %v367_v31 = vld [vmem:[#allocation1 + $0x16] sm:$0x80]   ;;  %s652_s17 = smov 3  ;;  %s655_s18 = smov 12 }
   0xf   :  { %v349_v27 = vld.sshfl [vmem:[#allocation1 + $0x10] sm:$0xff pattern:$0x44441230]   ;;  %v356_v28 = vld [vmem:[#allocation1 + $0xe] sm:$0x80]   ;;  %s1001_s19 = smov 32  }
  0x10   :  { %v354_v29 = vsel %vm232_vm1, %v352_v24, %v349_v27  ;;  %v1079_v30 = vld.sshfl [vmem:[#allocation1 + $0x18] sm:$0xff pattern:$0x44441230]   ;;  %v410_v39 = vld.sshfl [vmem:[#allocation1] sm:$0xff pattern:$0x44441230]  }
  0x11   :  { %v358_v33 = vsel %vm236_vm2, %v356_v28, %v354_v29  ;;  %v365_v34 = vsel %vm232_vm1, %v363_v25, %v1079_v30  ;;  %v393_v35 = vld.sshfl [vmem:[#allocation1 + $0x39] sm:$0xff pattern:$0x44444130]   ;;  %v417_v43 = vld [vmem:[#allocation1 - $0x2] sm:$0x80]   ;;  %s660_s20 = smov 48 }
  0x12   :  { %v369_v37 = vsel %vm236_vm2, %v367_v31, %v365_v34  ;;  %v397_v38 = vsel %vm370_vm3, %v1087_v36, %v393_v35  ;;  %v413_v40 = vld [vmem:[#allocation1 + $0x19] ss:$3 sm:%s1048_s25]   ;;  %699 = vrot.lane.b32.xlu1 %v698_v32, %s999_s10  ;;  %v424_v47 = vld [vmem:[#allocation1 + $0x21] ss:$3 sm:%s1050_s26]   ;;  %v604_v53 = vld [vmem:[#allocation1 + $0x29] ss:$3 sm:%s1054_s28]  }
  0x13   :  { %v371_v41 = vsel %vm370_vm3, %v369_v37, %v358_v33  ;;  %v415_v42 = vsel %vm232_vm1, %v413_v40, %v410_v39  ;;  %v1098_v44 = vld.sshfl [vmem:[#allocation1 + $0x8] sm:$0xff pattern:$0x44441230]   ;;  %v428_v48 = vld [vmem:[#allocation1 + $0x6] sm:$0x80]   ;;  %v606_v57 = vsel %vm232_vm1, %v604_v53, %v349_v27  ;;  %s665_s21 = smov 192 }
  0x14   :  { %v978_v45 = vpack.i.bf16 %v397_v38, %v371_v41  ;;  %v419_v46 = vsel %vm236_vm2, %v417_v43, %v415_v42  ;;  %v593_v49 = vld [vmem:[#allocation1 + $0x21] ss:$3 sm:%s1052_s27]   ;;  %v426_v50 = vsel %vm232_vm1, %v424_v47, %v1098_v44  ;;  %v608_v54 = vld [vmem:[#allocation1 + $0xe] sm:$0x80]   ;;  %v531_v58 = vld [vmem:[#allocation1 + $0x31] ss:$3 sm:%s1056_s29]  }
  0x15   :  { %v595_v51 = vsel %vm232_vm1, %v593_v49, %v1098_v44  ;;  %v597_v52 = vld [vmem:[#allocation1 + $0x6] sm:$0x80]   ;;  %v430_v55 = vsel %vm236_vm2, %v428_v48, %v426_v50  ;;  %v535_v59 = vld [vmem:[#allocation1 + $0x16] sm:$0x80]   ;;  %v542_v60 = vld [vmem:[#allocation1 + $0x39] ss:$3 sm:%s1058_s30]   ;;  %v610_v62 = vsel %vm236_vm2, %v608_v54, %v606_v57  ;;  %v533_v63 = vsel %vm232_vm1, %v531_v58, %v1079_v30 }
  0x16   :  { %979 = vrot.lane.b32.xlu0 %v978_v45, %s1000_s12  ;;  %v599_v56 = vsel %vm236_vm2, %v597_v52, %v595_v51  ;;  %v432_v61 = vsel %vm210_vm0, %v430_v55, %v419_v46  ;;  %v1119_v0 = vld.sshfl [vmem:[#allocation1 + $0x20] sm:$0xff pattern:$0x44441230]   ;;  %v546_v1 = vld [vmem:[#allocation1 + $0x1e] sm:$0x80]   ;;  %v537_v3 = vsel %vm236_vm2, %v535_v59, %v533_v63  ;;  %s261_s22 = smov 96 }
  0x17   :  { %v612_v2 = vsel %vm611_vm4, %v610_v62, %v599_v56  ;;  %v544_v4 = vsel %vm232_vm1, %v542_v60, %v1119_v0  ;;  %v1125_v5 = vld.sshfl [vmem:[#allocation1 + $0x49] sm:$0xff pattern:$0x44444130]   ;;  %v468_v11 = vld [vmem:[#allocation1 + $0x5a] ss:$-1 sm:%s1066_s5]   ;;  %s230_s23 = smov 96 }
  0x18   :  { %v455_v6 = vld [vmem:[#allocation1 + $0x29] ss:$3 sm:%s1060_s2]   ;;  %613 = vrot.lane.b32.xlu1 %v612_v2, %s999_s10  ;;  %v548_v7 = vsel %vm236_vm2, %v546_v1, %v544_v4  ;;  %v576_v8 = vsel %vm549_vm5, %v1125_v5, %v1087_v36  ;;  %v473_v14 = vld [vmem:[#allocation1 + $0x31] ss:$3 sm:%s1076_s7]   ;;  %v266_v29 = vld [vmem:[#allocation1 + $0x6] sm:$0x80]  }
  0x19   :  { %v458_v9 = vld [vmem:[#allocation1 + $0x9c] ss:$-38 sm:%s1062_s3]   ;;  %v463_v10 = vld [vmem:[#allocation1 - $0x63] ss:$36 sm:%s1064_s4]   ;;  %v550_v12 = vsel %vm549_vm5, %v548_v7, %v537_v3  ;;  %v656_v34 = vld [vmem:[#allocation1 + $0xac] ss:$-38 sm:%s655_s18]  }
  0x1a   :  { %433 = vrot.lane.b32.xlu0 %v432_v61, %s998_s6  ;;  %v460_v13 = vsel %vm286_vm6, %v458_v9, %v455_v6  ;;  %v476_v15 = vld [vmem:[#allocation1 + $0xa4] ss:$-38 sm:%s1082_s8]   ;;  %v481_v16 = vld [vmem:[#allocation1 - $0x5b] ss:$36 sm:%s1093_s9]   ;;  %v983_v17 = vpack.i.bf16 %v576_v8, %v550_v12  ;;  %s310_s0 = smov 3  ;;  %s281_s24 = smov 3 }
  0x1b   :  { %v465_v18 = vsel %vm291_vm7, %v463_v10, %v460_v13  ;;  %v478_v19 = vsel %vm286_vm6, %v476_v15, %v473_v14  ;;  %v486_v20 = vld [vmem:[#allocation1 + $0x62] ss:$-1 sm:%s1100_s11]   ;;  %v666_v39 = vld [vmem:[#allocation1 + $0x6a] ss:$-1 sm:%s665_s21]   ;;  %s284_s25 = smov 12  ;;  %s289_s26 = smov 48 }
  0x1c   :  { %v635_v21 = vld [vmem:[#allocation1 + $0x31] ss:$3 sm:%s634_s13]   ;;  %v470_v23 = vsel %vm296_vm8, %v468_v11, %v465_v18  ;;  %v483_v24 = vsel %vm291_vm7, %v481_v16, %v478_v19  ;;  %v653_v33 = vld [vmem:[#allocation1 + $0x39] ss:$3 sm:%s652_s17]   ;;  %v262_v41 = vld [vmem:[#allocation1 + $0x21] ss:$3 sm:%s261_s22]  }
  0x1d   :  { %v638_v22 = vld [vmem:[#allocation1 + $0xa4] ss:$-38 sm:%s637_s14]   ;;  %v488_v26 = vsel %vm296_vm8, %v486_v20, %v483_v24  ;;  %v643_v27 = vld [vmem:[#allocation1 - $0x5b] ss:$36 sm:%s642_s15]   ;;  %v658_v37 = vsel %vm286_vm6, %v656_v34, %v653_v33  ;;  %v264_v44 = vsel %vm232_vm1, %v262_v41, %v1098_v44  ;;  %s1002_s27 = smov 96   ;;  %s294_s28 = smov 192 }
  0x1e   :  { %v640_v25 = vsel %vm286_vm6, %v638_v22, %v635_v21  ;;  %v648_v28 = vld [vmem:[#allocation1 + $0x62] ss:$-1 sm:%s647_s16]   ;;  %984 = vrot.lane.b32.xlu0 %v983_v17, %s1001_s19  ;;  %v490_v31 = vsel %vm210_vm0, %v488_v26, %v470_v23  ;;  %v268_v47 = vsel %vm236_vm2, %v266_v29, %v264_v44  ;;  %s320_s29 = smov 96  ;;  %v325_v52 = vld [vmem:[#allocation1 + $0x1e] sm:$0x80]   ;;  %s1003_s30 = smov 112  }
  0x1f   :  { %v645_v32 = vsel %vm291_vm7, %v643_v27, %v640_v25  ;;  %491 = vrot.lane.b32.xlu1 %v490_v31, %s998_s6  ;;  %v661_v38 = vld [vmem:[#allocation1 - $0x53] ss:$36 sm:%s660_s20]   ;;  %v285_v50 = vld [vmem:[#allocation1 + $0xa4] ss:$-38 sm:%s284_s25]   ;;  %s1004_s2 = smov 80  }
  0x20   :  { %v650_v35 = vsel %vm296_vm8, %v648_v28, %v645_v32  ;;  %v663_v40 = vsel %vm291_vm7, %v661_v38, %v658_v37  ;;  %v235_v42 = vld [vmem:[#allocation1 + $0x16] sm:$0x80]   ;;  %v321_v56 = vld [vmem:[#allocation1 + $0x39] ss:$3 sm:%s320_s29]   ;;  %v221_v61 = vld [vmem:[#allocation1 + $0x50] sm:$0x3f]  }
  0x21   :  { %v668_v43 = vsel %vm296_vm8, %v666_v39, %v663_v40  ;;  %v231_v45 = vld [vmem:[#allocation1 + $0x31] ss:$3 sm:%s230_s23]   ;;  %v323_v58 = vsel %vm232_vm1, %v321_v56, %v1119_v0  ;;  %v214_v60 = vld [vmem:[#allocation1 + $0x28] sm:$0x3f]  }
  0x22   :  { %v670_v46 = vsel %vm611_vm4, %v668_v43, %v650_v35  ;;  %v233_v30 = vsel %vm232_vm1, %v231_v45, %v1079_v30  ;;  %v282_v48 = vld [vmem:[#allocation1 + $0x31] ss:$3 sm:%s281_s24]   ;;  %217 = vst.msk [vmem:[#allocation0 + $0x8] ss:$24 sm:$0xf] %vm210_vm0, %v214_v60   ;;  %v327_v63 = vsel %vm236_vm2, %v325_v52, %v323_v58 }
  0x23   :  { %671 = vrot.lane.b32.xlu0 %v670_v46, %s999_s10  ;;  %269 = vrot.lane.b32.xlu1 %v268_v47, %s1002_s27  ;;  %v237_v49 = vsel %vm236_vm2, %v235_v42, %v233_v30  ;;  %v290_v51 = vld [vmem:[#allocation1 - $0x5b] ss:$36 sm:%s289_s26]   ;;  %v287_v54 = vsel %vm286_vm6, %v285_v50, %v282_v48  ;;  %219 = vst.msk [vmem:[#allocation0 + $0x8] ss:$24 sm:$0x30] %vm210_vm0, %v214_v60  }
  0x24   :  { %v988_v36 = vpack.i.bf16 %v1087_v36, %v237_v49  ;;  %v311_v53 = vld [vmem:[#allocation1 + $0x5a] ss:$3 sm:%s310_s0]   ;;  %v292_v57 = vsel %vm291_vm7, %v290_v51, %v287_v54  ;;  %224 = vst.msk [vmem:[#allocation0 + $0x10] ss:$24 sm:$0xf] %vm210_vm0, %v221_v61   ;;  %v993_v0 = vpack.i.bf16 %v1125_v5, %v327_v63 }
  0x25   :  { %v295_v55 = vld [vmem:[#allocation1 + $0x62] ss:$-1 sm:%s294_s28]   ;;  %226 = vst.msk [vmem:[#allocation0 + $0x10] ss:$24 sm:$0x30] %vm210_vm0, %v221_v61  }
  0x26   :  { %v209_v59 = vld [vmem:[#allocation1] sm:$0x3f]   ;;  %v297_v62 = vsel %vm296_vm8, %v295_v55, %v292_v57 }
  0x27   :  { %211 = vst.msk [vmem:[#allocation0] ss:$24 sm:$0xf] %vm210_vm0, %v209_v59   ;;  %212 = vst.msk [vmem:[#allocation0] ss:$24 sm:$0x30] %vm210_vm0, %v209_v59   ;;  %989 = vrot.lane.b32.xlu0 %v988_v36, %s1003_s30  ;;  %312 = vrot.lane.b32.xlu1 %v311_v53, %s1002_s27 }
  0x2b   :  { %298 = vrot.lane.b32.xlu0 %v297_v62, %s1002_s27 }
  0x2f   :  { %994 = vrot.lane.b32.xlu0 %v993_v0, %s1004_s2 }
  0x80   :  { %v520_v1 = vpop.permute.xlu1 %519  }
  0x81   :  { %523 = vst.msk [vmem:[#allocation0 + $0x41] ss:$72 sm:$0x3] %vm435_vm9, %v520_v1  }
  0x82   :  { %526 = vst.msk [vmem:[#allocation0 + $0x41] ss:$72 sm:$0x3] %vm444_vm10, %v520_v1  }
  0x84   :  { %v700_v2 = vpop.permute.xlu1 %699  }
  0x85   :  { %703 = vst.msk [vmem:[#allocation0 + $0x43] ss:$72 sm:$0x3] %vm615_vm11, %v700_v2  }
  0x86   :  { %706 = vst.msk [vmem:[#allocation0 + $0x43] ss:$72 sm:$0x3] %vm624_vm12, %v700_v2  }
  0x88   :  { %v980_v3 = vpop.permute.xlu0 %979 }
  0x89   :  { %v982_v4 = vunpack.i.h.bf16 %v980_v3  ;;  %v981_v5 = vunpack.i.l.bf16 %v980_v3 }
  0x8a   :  { %v614_v6 = vpop.permute.xlu1 %613  }
  0x8b   :  { %402 = vst.msk [vmem:[#allocation0 + $0x24] ss:$72 sm:$0x3] %vm370_vm3, %v982_v4   ;;  %404 = vst.msk [vmem:[#allocation0 - $0x54] ss:$72 sm:$0xc] %vm370_vm3, %v982_v4  }
  0x8c   :  { %376 = vst.msk [vmem:[#allocation0 + $0x4] ss:$72 sm:$0x3] %vm370_vm3, %v981_v5   ;;  %378 = vst.msk [vmem:[#allocation0 + $0x64] ss:$-24 sm:$0xc] %vm370_vm3, %v981_v5   ;;  %v434_v7 = vpop.permute.xlu0 %433  }
  0x8d   :  { %380 = vst.msk [vmem:[#allocation0 + $0x1c4] ss:$-88 sm:$0x30] %vm370_vm3, %v981_v5   ;;  %382 = vst.msk [vmem:[#allocation0 - $0x9c] ss:$40 sm:$0xc0] %vm370_vm3, %v981_v5  }
  0x8e   :  { %407 = vst.msk [vmem:[#allocation0 + $0x24] ss:$72 sm:$0x3] %vm383_vm13, %v982_v4   ;;  %409 = vst.msk [vmem:[#allocation0 - $0x54] ss:$72 sm:$0xc] %vm383_vm13, %v982_v4  }
  0x8f   :  { %385 = vst.msk [vmem:[#allocation0 + $0x4] ss:$72 sm:$0x3] %vm383_vm13, %v981_v5   ;;  %387 = vst.msk [vmem:[#allocation0 + $0x64] ss:$-24 sm:$0xc] %vm383_vm13, %v981_v5  }
  0x90   :  { %389 = vst.msk [vmem:[#allocation0 + $0x1c4] ss:$-88 sm:$0x30] %vm383_vm13, %v981_v5   ;;  %391 = vst.msk [vmem:[#allocation0 - $0x9c] ss:$40 sm:$0xc0] %vm383_vm13, %v981_v5   ;;  %v985_v8 = vpop.permute.xlu0 %984 }
  0x91   :  { %617 = vst.msk [vmem:[#allocation0 + $0x3] ss:$72 sm:$0x3] %vm615_vm11, %v614_v6   ;;  %619 = vst.msk [vmem:[#allocation0 + $0x63] ss:$-24 sm:$0xc] %vm615_vm11, %v614_v6   ;;  %v987_v9 = vunpack.i.h.bf16 %v985_v8  ;;  %v986_v10 = vunpack.i.l.bf16 %v985_v8  ;;  %v492_v11 = vpop.permute.xlu1 %491  }
  0x92   :  { %621 = vst.msk [vmem:[#allocation0 + $0x1c3] ss:$-88 sm:$0x30] %vm615_vm11, %v614_v6   ;;  %623 = vst.msk [vmem:[#allocation0 - $0x9d] ss:$40 sm:$0xc0] %vm615_vm11, %v614_v6  }
  0x93   :  { %437 = vst.msk [vmem:[#allocation0 + $0x1] ss:$72 sm:$0x3] %vm435_vm9, %v434_v7   ;;  %439 = vst.msk [vmem:[#allocation0 + $0x61] ss:$-24 sm:$0xc] %vm435_vm9, %v434_v7  }
  0x94   :  { %441 = vst.msk [vmem:[#allocation0 + $0x1c1] ss:$-88 sm:$0x30] %vm435_vm9, %v434_v7   ;;  %443 = vst.msk [vmem:[#allocation0 - $0x9f] ss:$40 sm:$0xc0] %vm435_vm9, %v434_v7  }
  0x95   :  { %626 = vst.msk [vmem:[#allocation0 + $0x3] ss:$72 sm:$0x3] %vm624_vm12, %v614_v6   ;;  %628 = vst.msk [vmem:[#allocation0 + $0x63] ss:$-24 sm:$0xc] %vm624_vm12, %v614_v6   ;;  %v672_v12 = vpop.permute.xlu0 %671   ;;  %v270_v13 = vpop.permute.xlu1 %269  }
  0x96   :  { %630 = vst.msk [vmem:[#allocation0 + $0x1c3] ss:$-88 sm:$0x30] %vm624_vm12, %v614_v6   ;;  %632 = vst.msk [vmem:[#allocation0 - $0x9d] ss:$40 sm:$0xc0] %vm624_vm12, %v614_v6  }
  0x97   :  { %446 = vst.msk [vmem:[#allocation0 + $0x1] ss:$72 sm:$0x3] %vm444_vm10, %v434_v7   ;;  %448 = vst.msk [vmem:[#allocation0 + $0x61] ss:$-24 sm:$0xc] %vm444_vm10, %v434_v7  }
  0x98   :  { %450 = vst.msk [vmem:[#allocation0 + $0x1c1] ss:$-88 sm:$0x30] %vm444_vm10, %v434_v7   ;;  %452 = vst.msk [vmem:[#allocation0 - $0x9f] ss:$40 sm:$0xc0] %vm444_vm10, %v434_v7  }
  0x99   :  { %495 = vst.msk [vmem:[#allocation0 + $0x21] ss:$72 sm:$0x3] %vm435_vm9, %v492_v11   ;;  %497 = vst.msk [vmem:[#allocation0 - $0x3f] ss:$40 sm:$0xc] %vm435_vm9, %v492_v11   ;;  %v990_v14 = vpop.permute.xlu0 %989  ;;  %v313_v15 = vpop.permute.xlu1 %312  }
  0x9a   :  { %499 = vst.msk [vmem:[#allocation0 + $0x1e1] ss:$-88 sm:$0x30] %vm435_vm9, %v492_v11   ;;  %501 = vst.msk [vmem:[#allocation0 + $0x101] ss:$-24 sm:$0xc0] %vm435_vm9, %v492_v11   ;;  %v992_v16 = vunpack.i.h.bf16 %v990_v14  ;;  %v991_v17 = vunpack.i.l.bf16 %v990_v14 }
  0x9b   :  { %581 = vst.msk [vmem:[#allocation0 + $0x26] ss:$72 sm:$0x3] %vm553_vm14, %v987_v9   ;;  %583 = vst.msk [vmem:[#allocation0 - $0x52] ss:$72 sm:$0xc] %vm553_vm14, %v987_v9  }
  0x9c   :  { %555 = vst.msk [vmem:[#allocation0 + $0x6] ss:$72 sm:$0x3] %vm553_vm14, %v986_v10   ;;  %557 = vst.msk [vmem:[#allocation0 + $0x66] ss:$-24 sm:$0xc] %vm553_vm14, %v986_v10  }
  0x9d   :  { %559 = vst.msk [vmem:[#allocation0 + $0x1c6] ss:$-88 sm:$0x30] %vm553_vm14, %v986_v10   ;;  %561 = vst.msk [vmem:[#allocation0 - $0x9a] ss:$40 sm:$0xc0] %vm553_vm14, %v986_v10   ;;  %v299_v18 = vpop.permute.xlu0 %298  }
  0x9e   :  { %504 = vst.msk [vmem:[#allocation0 + $0x21] ss:$72 sm:$0x3] %vm444_vm10, %v492_v11   ;;  %506 = vst.msk [vmem:[#allocation0 - $0x3f] ss:$40 sm:$0xc] %vm444_vm10, %v492_v11  }
  0x9f   :  { %508 = vst.msk [vmem:[#allocation0 + $0x1e1] ss:$-88 sm:$0x30] %vm444_vm10, %v492_v11   ;;  %510 = vst.msk [vmem:[#allocation0 + $0x101] ss:$-24 sm:$0xc0] %vm444_vm10, %v492_v11  }
  0xa0   :  { %586 = vst.msk [vmem:[#allocation0 + $0x26] ss:$72 sm:$0x3] %vm562_vm15, %v987_v9   ;;  %588 = vst.msk [vmem:[#allocation0 - $0x52] ss:$72 sm:$0xc] %vm562_vm15, %v987_v9  }
  0xa1   :  { %564 = vst.msk [vmem:[#allocation0 + $0x6] ss:$72 sm:$0x3] %vm562_vm15, %v986_v10   ;;  %566 = vst.msk [vmem:[#allocation0 + $0x66] ss:$-24 sm:$0xc] %vm562_vm15, %v986_v10   ;;  %v995_v19 = vpop.permute.xlu0 %994 }
  0xa2   :  { %568 = vst.msk [vmem:[#allocation0 + $0x1c6] ss:$-88 sm:$0x30] %vm562_vm15, %v986_v10   ;;  %570 = vst.msk [vmem:[#allocation0 - $0x9a] ss:$40 sm:$0xc0] %vm562_vm15, %v986_v10   ;;  %v997_v20 = vunpack.i.h.bf16 %v995_v19  ;;  %v996_v21 = vunpack.i.l.bf16 %v995_v19 }
  0xa3   :  { %675 = vst.msk [vmem:[#allocation0 + $0x23] ss:$72 sm:$0x3] %vm615_vm11, %v672_v12   ;;  %677 = vst.msk [vmem:[#allocation0 - $0x3d] ss:$40 sm:$0xc] %vm615_vm11, %v672_v12  }
  0xa4   :  { %679 = vst.msk [vmem:[#allocation0 + $0x1e3] ss:$-88 sm:$0x30] %vm615_vm11, %v672_v12   ;;  %681 = vst.msk [vmem:[#allocation0 + $0x103] ss:$-24 sm:$0xc0] %vm615_vm11, %v672_v12  }
  0xa5   :  { %273 = vst.msk [vmem:[#allocation0 + $0x2] ss:$72 sm:$0x3] %vm210_vm0, %v270_v13   ;;  %275 = vst.msk [vmem:[#allocation0 + $0x62] ss:$-24 sm:$0xc] %vm210_vm0, %v270_v13  }
  0xa6   :  { %277 = vst.msk [vmem:[#allocation0 + $0x1c2] ss:$-88 sm:$0x30] %vm210_vm0, %v270_v13   ;;  %279 = vst.msk [vmem:[#allocation0 - $0x9e] ss:$40 sm:$0xc0] %vm210_vm0, %v270_v13  }
  0xa7   :  { %684 = vst.msk [vmem:[#allocation0 + $0x23] ss:$72 sm:$0x3] %vm624_vm12, %v672_v12   ;;  %686 = vst.msk [vmem:[#allocation0 - $0x3d] ss:$40 sm:$0xc] %vm624_vm12, %v672_v12  }
  0xa8   :  { %688 = vst.msk [vmem:[#allocation0 + $0x1e3] ss:$-88 sm:$0x30] %vm624_vm12, %v672_v12   ;;  %690 = vst.msk [vmem:[#allocation0 + $0x103] ss:$-24 sm:$0xc0] %vm624_vm12, %v672_v12  }
  0xa9   :  { %316 = vst.msk [vmem:[#allocation0 + $0x42] ss:$72 sm:$0x3] %vm210_vm0, %v313_v15   ;;  %255 = vst.msk [vmem:[#allocation0 + $0x25] ss:$72 sm:$0x3] %vm210_vm0, %v992_v16  }
  0xaa   :  { %257 = vst.msk [vmem:[#allocation0 - $0x53] ss:$72 sm:$0xc] %vm210_vm0, %v992_v16   ;;  %242 = vst.msk [vmem:[#allocation0 + $0x5] ss:$72 sm:$0x3] %vm210_vm0, %v991_v17  }
  0xab   :  { %244 = vst.msk [vmem:[#allocation0 + $0x65] ss:$-24 sm:$0xc] %vm210_vm0, %v991_v17   ;;  %246 = vst.msk [vmem:[#allocation0 + $0x1c5] ss:$-88 sm:$0x30] %vm210_vm0, %v991_v17  }
  0xac   :  { %248 = vst.msk [vmem:[#allocation0 - $0x9b] ss:$40 sm:$0xc0] %vm210_vm0, %v991_v17   ;;  %302 = vst.msk [vmem:[#allocation0 + $0x22] ss:$72 sm:$0x3] %vm210_vm0, %v299_v18  }
  0xad   :  { %304 = vst.msk [vmem:[#allocation0 - $0x3e] ss:$40 sm:$0xc] %vm210_vm0, %v299_v18   ;;  %306 = vst.msk [vmem:[#allocation0 + $0x1e2] ss:$-88 sm:$0x30] %vm210_vm0, %v299_v18  }
  0xae   :  { %308 = vst.msk [vmem:[#allocation0 + $0x102] ss:$-24 sm:$0xc0] %vm210_vm0, %v299_v18   ;;  %345 = vst.msk [vmem:[#allocation0 + $0x27] ss:$72 sm:$0x3] %vm210_vm0, %v997_v20  }
  0xaf   :  { %347 = vst.msk [vmem:[#allocation0 - $0x51] ss:$72 sm:$0xc] %vm210_vm0, %v997_v20   ;;  %332 = vst.msk [vmem:[#allocation0 + $0x7] ss:$72 sm:$0x3] %vm210_vm0, %v996_v21  }
  0xb0   :  { %334 = vst.msk [vmem:[#allocation0 + $0x67] ss:$-24 sm:$0xc] %vm210_vm0, %v996_v21   ;;  %336 = vst.msk [vmem:[#allocation0 + $0x1c7] ss:$-88 sm:$0x30] %vm210_vm0, %v996_v21  }
  0xb1   :  { %338 = vst.msk [vmem:[#allocation0 - $0x99] ss:$40 sm:$0xc0] %vm210_vm0, %v996_v21   ;;  %v764_v22 = vld [vmem:[#allocation0 + $0x40] sm:$0xff]  ;;  %v827_v28 = vld [vmem:[#allocation0 + $0x88] sm:$0xff] }
  0xb4   :  { %v722_v23 = vld [vmem:[#allocation0 + $0x10] sm:$0xff]  ;;  %v743_v24 = vld [vmem:[#allocation0 + $0x28] sm:$0xff] }
  0xb5   :  { %v799_v26 = vld [vmem:[#allocation0 + $0x68] sm:$0xff]  ;;  %v785_v29 = vld [vmem:[#allocation0 + $0x58] sm:$0xff]  ;;  %v806_v31 = vld [vmem:[#allocation0 + $0x70] sm:$0xff] }
  0xb6   :  { %v757_v25 = vld [vmem:[#allocation0 + $0x38] sm:$0xff]  ;;  %v711_v34 = vld [vmem:[#allocation0] sm:$0xff]  ;;  %v771_v41 = vld [vmem:[#allocation0 + $0x48] sm:$0xff] }
  0xb7   :  { %v750_v27 = vld [vmem:[#allocation0 + $0x30] sm:$0xff]  ;;  %v792_v33 = vld [vmem:[#allocation0 + $0x60] sm:$0xff]  ;;  %v716_v35 = vld [vmem:[#allocation0 + $0x8] sm:$0xff]  ;;  %v936_v44 = vpack.c.bf16 %v771_v41, %v764_v22 }
  0xb8   :  { %v931_v32 = vpack.c.bf16 %v757_v25, %v750_v27  ;;  %v946_v37 = vpack.c.bf16 %v799_v26, %v792_v33  ;;  %v916_v38 = vpack.c.bf16 %v716_v35, %v711_v34  ;;  %v729_v39 = vld [vmem:[#allocation0 + $0x18] sm:$0xff]  ;;  %v736_v40 = vld [vmem:[#allocation0 + $0x20] sm:$0xff]  ;;  %v778_v45 = vld [vmem:[#allocation0 + $0x50] sm:$0xff] }
  0xb9   :  { %v921_v42 = vpack.c.bf16 %v729_v39, %v722_v23  ;;  %v926_v43 = vpack.c.bf16 %v743_v24, %v736_v40  ;;  %v813_v46 = vld [vmem:[#allocation0 + $0x78] sm:$0xff]  ;;  %v820_v47 = vld [vmem:[#allocation0 + $0x80] sm:$0xff]  ;;  %v941_v30 = vpack.c.bf16 %v785_v29, %v778_v45  ;;  %966 = vst [vmem:[%s1275_s1 + $0x20] sm:$0xff] %v936_v44  }
  0xba   :  { %965 = vst [vmem:[%s1275_s1 + $0x18] sm:$0xff] %v931_v32   ;;  %968 = vst [vmem:[%s1275_s1 + $0x30] sm:$0xff] %v946_v37   ;;  %v951_v48 = vpack.c.bf16 %v813_v46, %v806_v31  ;;  %v956_v49 = vpack.c.bf16 %v827_v28, %v820_v47 }
  0xbb   :  { %917 = vst [vmem:[%s1275_s1] sm:$0xff] %v916_v38   ;;  %963 = vst [vmem:[%s1275_s1 + $0x8] sm:$0xff] %v921_v42  }
  0xbc   :  { %964 = vst [vmem:[%s1275_s1 + $0x10] sm:$0xff] %v926_v43   ;;  %967 = vst [vmem:[%s1275_s1 + $0x28] sm:$0xff] %v941_v30  }
  0xbd   :  { %969 = vst [vmem:[%s1275_s1 + $0x38] sm:$0xff] %v951_v48   ;;  %970 = vst [vmem:[%s1275_s1 + $0x40] sm:$0xff] %v956_v49  }

// kernel: hga_forward.32
= control target key start
LH: loop header
LB: loop body
LE: loop exit
PB: predicated region body
PF: predicated region fallthrough
CT: control target
= control target key end

     0   :  { %s1696_s12 = smov 0   ;;  %s1858_s0 = inlined_call_operand.vmem [shape: bf16[2,6,128], index: 0, kind: input, shape index: {}]   ;;  %s1859_s1 = inlined_call_operand.vmem [shape: bf16[2,128,1600], index: 1, kind: input, shape index: {}]   ;;  %s1860_s2 = inlined_call_operand.vmem [shape: f32[2,1,1600], index: 2, kind: input, shape index: {}]   ;;  %s1861_s3 = inlined_call_operand.vmem [shape: bf16[2,6,1600], index: 3, kind: output, shape index: {}]  }
   0x1 LB: > { %s1342_s13 = sadd.s32 4294967295, %s1671_s12   ;;  %p1346_p0 = scmp.ge.s32.totalorder %s1671_s12, 1  ;;  %s1671_s12 = sphi %s1696_s12, %s13_s12  }
   0x2   : > { %p155_p1 = scmp.lt.s32.totalorder %s1671_s12, 3 }
   0x4   : > { %p156_p2 = pnand %p1346_p0, %p155_p1 }
   0x5   : > { %p187_p3 = scmp.lt.s32.totalorder (!%p156_p2), %s1342_s13, 1  ;;  %v1673_v0 = vmov (!%p156_p2), 0   ;;  %vm1675_vm0 = vmmov (!%p156_p2), 0   ;;  %vm1261_vm1 = vcmask (!%p156_p2), 518144  }
   0x6   : > { %159 = sbr.rel (%p156_p2) target bundleno = 363 (0x16b), region = 32  ;;  %948 = vmatprep.mubr.bf16.mxu0 (!%p156_p2), %v1673_v0  ;;  %989 = vmatprep.mubr.bf16.mxu1 (!%p156_p2), %v1673_v0 }
   0xd   : > { %s1863_s13 = smov (!%p187_p3, %s1342_s13), 1 }
   0xe   : > { %s1499_s14 = smul.u32 832, %s1863_s13  ;;  %s1347_s18 = sshll.u32 %s1863_s13, 2 }
   0xf   : > { %s190_s21 = scalar_lea.vmem %s1858_s0, %s1347_s18  ;;  %s1500_s22 = smul.u32 13, %s1863_s13 }
  0x10   : > { %s1712_s17 = scalar_lea.vmem %s1859_s1, %s1499_s14  ;;  %v1746_v29 = vld [vmem:[%s190_s21] sm:$0x7]  ;;  %s1501_s26 = smul.u32 52, %s1863_s13 }
  0x11   : > { %v1513_v1 = vld [vmem:[%s1712_s17 + $0x4] ss:$52 sps:$4 sm:$0xff]   ;;  %v1515_v2 = vld [vmem:[%s1712_s17] ss:$52 sps:$4 sm:$0xff]   ;;  %v1518_v4 = vld [vmem:[%s1712_s17 + $0x68] ss:$52 sps:$4 sm:$0xff]   ;;  %s199_s25 = scalar_lea.vmem %s1860_s2, %s1500_s22 }
  0x12   : > { %916 = vmatprep.subr.bf16.mxu0 %v1513_v1  ;;  %v1516_v3 = vld [vmem:[%s1712_s17 + $0x6c] ss:$52 sps:$4 sm:$0xff]   ;;  %v1519_v5 = vld [vmem:[%s1712_s17 + $0xd4] ss:$52 sps:$4 sm:$0xff]   ;;  %v1521_v6 = vld [vmem:[%s1712_s17 + $0xd0] ss:$52 sps:$4 sm:$0xff]   ;;  %s1845_s29 = scalar_lea.vmem %s1861_s3, %s1501_s26 }
  0x13   : > { %917 = vmatpush1.bf16.msra.mxu0 %v1515_v2  ;;  %v1522_v7 = vld [vmem:[%s1712_s17 + $0x13c] ss:$52 sps:$4 sm:$0xff]   ;;  %v1524_v8 = vld [vmem:[%s1712_s17 + $0x138] ss:$52 sps:$4 sm:$0xff]   ;;  %v1540_v12 = vld [vmem:[%s1712_s17 + $0x74] ss:$52 sps:$4 sm:$0xff]  }
  0x14   : > { %918 = vmatprep.subr.bf16.mxu0 %v1516_v3  ;;  %v1525_v9 = vld [vmem:[%s1712_s17 + $0x1a4] ss:$52 sps:$4 sm:$0xff]   ;;  %v1536_v10 = vld [vmem:[%s1712_s17 + $0xc] ss:$52 sps:$4 sm:$0xff]   ;;  %v1539_v11 = vld [vmem:[%s1712_s17 + $0x8] ss:$52 sps:$4 sm:$0xff]  }
  0x15   : > { %957 = vmatprep.subr.bf16.mxu1 %v1536_v10  ;;  %v1527_v13 = vld [vmem:[%s1712_s17 + $0x1a0] ss:$52 sps:$4 sm:$0xff]   ;;  %v1545_v14 = vld [vmem:[%s1712_s17 + $0x70] ss:$52 sps:$4 sm:$0xff]   ;;  %v1551_v17 = vld [vmem:[%s1712_s17 + $0xd8] ss:$52 sps:$4 sm:$0xff]  }
  0x16   : > { %958 = vmatpush1.bf16.msra.mxu1 %v1539_v11  ;;  %v1546_v15 = vld [vmem:[%s1712_s17 + $0xdc] ss:$52 sps:$4 sm:$0xff]   ;;  %v1528_v16 = vld [vmem:[%s1712_s17 + $0x20c] ss:$52 sps:$4 sm:$0xff]   ;;  %v1552_v19 = vld [vmem:[%s1712_s17 + $0x144] ss:$52 sps:$4 sm:$0xff]  }
  0x17   : > { %919 = vmatpush1.bf16.msra.mxu0 %v1518_v4  ;;  %959 = vmatprep.subr.bf16.mxu1 %v1540_v12  ;;  %v1530_v18 = vld [vmem:[%s1712_s17 + $0x208] ss:$52 sps:$4 sm:$0xff]   ;;  %v1533_v21 = vld [vmem:[%s1712_s17 + $0x270] ss:$52 sps:$4 sm:$0xff]   ;;  %v1557_v22 = vld [vmem:[%s1712_s17 + $0x140] ss:$52 sps:$4 sm:$0xff]  }
  0x18   : > { %920 = vmatprep.subr.bf16.mxu0 %v1519_v5  ;;  %v1531_v20 = vld [vmem:[%s1712_s17 + $0x274] ss:$52 sps:$4 sm:$0xff]   ;;  %v1558_v23 = vld [vmem:[%s1712_s17 + $0x1ac] ss:$52 sps:$4 sm:$0xff]   ;;  %v1534_v24 = vld [vmem:[%s1712_s17 + $0x2dc] ss:$52 sps:$4 sm:$0xff]  }
  0x19   : > { %v1563_v25 = vld [vmem:[%s1712_s17 + $0x1a8] ss:$52 sps:$4 sm:$0xff]   ;;  %v1538_v26 = vld [vmem:[%s1712_s17 + $0x2d8] ss:$52 sps:$4 sm:$0xff]   ;;  %v1569_v30 = vld [vmem:[%s1712_s17 + $0x210] ss:$52 sps:$4 sm:$0xff]  }
  0x1a   : > { %960 = vmatpush1.bf16.msra.mxu1 %v1545_v14  ;;  %v1564_v27 = vld [vmem:[%s1712_s17 + $0x214] ss:$52 sps:$4 sm:$0xff]   ;;  %v1542_v31 = vld [vmem:[%s1712_s17 + $0x10] ss:$52 sps:$4 sm:$0xff]   ;;  %v1575_v34 = vld [vmem:[%s1712_s17 + $0x278] ss:$52 sps:$4 sm:$0xff]  }
  0x1b   : > { %921 = vmatpush1.bf16.msra.mxu0 %v1521_v6  ;;  %961 = vmatprep.subr.bf16.mxu1 %v1546_v15  ;;  %v1544_v28 = vld [vmem:[%s1712_s17 + $0x14] ss:$52 sps:$4 sm:$0xff]   ;;  %v1570_v32 = vld [vmem:[%s1712_s17 + $0x27c] ss:$52 sps:$4 sm:$0xff]   ;;  %v1548_v35 = vld [vmem:[%s1712_s17 + $0x78] ss:$52 sps:$4 sm:$0xff]  }
  0x1c   : > { %922 = vmatprep.subr.bf16.mxu0 %v1522_v7  ;;  %v1550_v33 = vld [vmem:[%s1712_s17 + $0x7c] ss:$52 sps:$4 sm:$0xff]   ;;  %v1576_v36 = vld [vmem:[%s1712_s17 + $0x2e4] ss:$52 sps:$4 sm:$0xff]   ;;  %v1581_v38 = vld [vmem:[%s1712_s17 + $0x2e0] ss:$52 sps:$4 sm:$0xff]  }
  0x1d   : > { %v1556_v37 = vld [vmem:[%s1712_s17 + $0xe4] ss:$52 sps:$4 sm:$0xff]   ;;  %v1554_v39 = vld [vmem:[%s1712_s17 + $0xe0] ss:$52 sps:$4 sm:$0xff]   ;;  %v1587_v40 = vld [vmem:[%s1712_s17 + $0x1c] ss:$52 sps:$4 sm:$0xff]  }
  0x1e   : > { %962 = vmatpush1.bf16.msra.mxu1 %v1551_v17  ;;  %v1562_v41 = vld [vmem:[%s1712_s17 + $0x14c] ss:$52 sps:$4 sm:$0xff]   ;;  %v1560_v43 = vld [vmem:[%s1712_s17 + $0x148] ss:$52 sps:$4 sm:$0xff]   ;;  %v1590_v44 = vld [vmem:[%s1712_s17 + $0x84] ss:$52 sps:$4 sm:$0xff]  }
  0x1f   : > { %923 = vmatpush1.bf16.msra.mxu0 %v1524_v8  ;;  %963 = vmatprep.subr.bf16.mxu1 %v1552_v19  ;;  %v1585_v42 = vld [vmem:[%s1712_s17 + $0x18] ss:$52 sps:$4 sm:$0xff]   ;;  %v1568_v45 = vld [vmem:[%s1712_s17 + $0x1b4] ss:$52 sps:$4 sm:$0xff]   ;;  %v1566_v47 = vld [vmem:[%s1712_s17 + $0x1b0] ss:$52 sps:$4 sm:$0xff]  }
  0x20   : > { %924 = vmatprep.subr.bf16.mxu0 %v1525_v9  ;;  %v1588_v46 = vld [vmem:[%s1712_s17 + $0x80] ss:$52 sps:$4 sm:$0xff]   ;;  %v1574_v49 = vld [vmem:[%s1712_s17 + $0x21c] ss:$52 sps:$4 sm:$0xff]   ;;  %v1572_v51 = vld [vmem:[%s1712_s17 + $0x218] ss:$52 sps:$4 sm:$0xff]  }
  0x21   : > { %v1596_v48 = vld [vmem:[%s1712_s17 + $0xec] ss:$52 sps:$4 sm:$0xff]   ;;  %v1594_v50 = vld [vmem:[%s1712_s17 + $0xe8] ss:$52 sps:$4 sm:$0xff]   ;;  %v1580_v53 = vld [vmem:[%s1712_s17 + $0x284] ss:$52 sps:$4 sm:$0xff]  }
  0x22   : > { %964 = vmatpush1.bf16.msra.mxu1 %v1557_v22  ;;  %v1602_v52 = vld [vmem:[%s1712_s17 + $0x154] ss:$52 sps:$4 sm:$0xff]   ;;  %v1600_v54 = vld [vmem:[%s1712_s17 + $0x150] ss:$52 sps:$4 sm:$0xff]   ;;  %v1584_v57 = vld [vmem:[%s1712_s17 + $0x2ec] ss:$52 sps:$4 sm:$0xff]  }
  0x23   : > { %925 = vmatpush1.bf16.msra.mxu0 %v1527_v13  ;;  %965 = vmatprep.subr.bf16.mxu1 %v1558_v23  ;;  %v1578_v55 = vld [vmem:[%s1712_s17 + $0x280] ss:$52 sps:$4 sm:$0xff]   ;;  %v1608_v56 = vld [vmem:[%s1712_s17 + $0x1bc] ss:$52 sps:$4 sm:$0xff]   ;;  %v1606_v59 = vld [vmem:[%s1712_s17 + $0x1b8] ss:$52 sps:$4 sm:$0xff]  }
  0x24   : > { %926 = vmatprep.subr.bf16.mxu0 %v1528_v16  ;;  %v1582_v58 = vld [vmem:[%s1712_s17 + $0x2e8] ss:$52 sps:$4 sm:$0xff]   ;;  %v1614_v60 = vld [vmem:[%s1712_s17 + $0x224] ss:$52 sps:$4 sm:$0xff]   ;;  %v1591_v62 = vld [vmem:[%s1712_s17 + $0x20] ss:$52 sps:$4 sm:$0xff]  }
  0x25   : > { %v1593_v61 = vld [vmem:[%s1712_s17 + $0x24] ss:$52 sps:$4 sm:$0xff]   ;;  %v1612_v63 = vld [vmem:[%s1712_s17 + $0x220] ss:$52 sps:$4 sm:$0xff]   ;;  %v1618_v3 = vld [vmem:[%s1712_s17 + $0x288] ss:$52 sps:$4 sm:$0xff]  }
  0x26   : > { %966 = vmatpush1.bf16.msra.mxu1 %v1563_v25  ;;  %v1620_v1 = vld [vmem:[%s1712_s17 + $0x28c] ss:$52 sps:$4 sm:$0xff]   ;;  %v1597_v4 = vld [vmem:[%s1712_s17 + $0x88] ss:$52 sps:$4 sm:$0xff]   ;;  %v1603_v7 = vld [vmem:[%s1712_s17 + $0xf0] ss:$52 sps:$4 sm:$0xff]  }
  0x27   : > { %927 = vmatpush1.bf16.msra.mxu0 %v1530_v18  ;;  %967 = vmatprep.subr.bf16.mxu1 %v1564_v27  ;;  %v1599_v2 = vld [vmem:[%s1712_s17 + $0x8c] ss:$52 sps:$4 sm:$0xff]   ;;  %v1626_v5 = vld [vmem:[%s1712_s17 + $0x2f4] ss:$52 sps:$4 sm:$0xff]   ;;  %v1624_v8 = vld [vmem:[%s1712_s17 + $0x2f0] ss:$52 sps:$4 sm:$0xff]  }
  0x28   : > { %928 = vmatprep.subr.bf16.mxu0 %v1531_v20  ;;  %v1605_v6 = vld [vmem:[%s1712_s17 + $0xf4] ss:$52 sps:$4 sm:$0xff]   ;;  %v1635_v9 = vld [vmem:[%s1712_s17 + $0x2c] ss:$52 sps:$4 sm:$0xff]   ;;  %v1611_v10 = vld [vmem:[%s1712_s17 + $0x15c] ss:$52 sps:$4 sm:$0xff]  }
  0x29   : > { %v1633_v11 = vld [vmem:[%s1712_s17 + $0x28] ss:$52 sps:$4 sm:$0xff]   ;;  %v1609_v12 = vld [vmem:[%s1712_s17 + $0x158] ss:$52 sps:$4 sm:$0xff]   ;;  %v1636_v15 = vld [vmem:[%s1712_s17 + $0x90] ss:$52 sps:$4 sm:$0xff]  }
  0x2a   : > { %968 = vmatpush1.bf16.msra.mxu1 %v1569_v30  ;;  %v1638_v13 = vld [vmem:[%s1712_s17 + $0x94] ss:$52 sps:$4 sm:$0xff]   ;;  %v1617_v14 = vld [vmem:[%s1712_s17 + $0x1c4] ss:$52 sps:$4 sm:$0xff]   ;;  %v1642_v17 = vld [vmem:[%s1712_s17 + $0xfc] ss:$52 sps:$4 sm:$0xff]  }
  0x2b   : > { %929 = vmatpush1.bf16.msra.mxu0 %v1533_v21  ;;  %969 = vmatprep.subr.bf16.mxu1 %v1570_v32  ;;  %v1615_v16 = vld [vmem:[%s1712_s17 + $0x1c0] ss:$52 sps:$4 sm:$0xff]   ;;  %v1640_v19 = vld [vmem:[%s1712_s17 + $0xf8] ss:$52 sps:$4 sm:$0xff]   ;;  %v1621_v20 = vld [vmem:[%s1712_s17 + $0x228] ss:$52 sps:$4 sm:$0xff]  }
  0x2c   : > { %930 = vmatprep.subr.bf16.mxu0 %v1534_v24  ;;  %v1623_v18 = vld [vmem:[%s1712_s17 + $0x22c] ss:$52 sps:$4 sm:$0xff]   ;;  %v1646_v21 = vld [vmem:[%s1712_s17 + $0x164] ss:$52 sps:$4 sm:$0xff]   ;;  %v1632_v25 = vld [vmem:[%s1712_s17 + $0x2fc] ss:$52 sps:$4 sm:$0xff]  }
  0x2d   : > { %v1644_v22 = vld [vmem:[%s1712_s17 + $0x160] ss:$52 sps:$4 sm:$0xff]   ;;  %v1627_v23 = vld [vmem:[%s1712_s17 + $0x290] ss:$52 sps:$4 sm:$0xff]   ;;  %v1630_v27 = vld [vmem:[%s1712_s17 + $0x2f8] ss:$52 sps:$4 sm:$0xff]  }
  0x2e   : > { %970 = vmatpush1.bf16.msra.mxu1 %v1575_v34  ;;  %v1650_v24 = vld [vmem:[%s1712_s17 + $0x1cc] ss:$52 sps:$4 sm:$0xff]   ;;  %v1652_v30 = vld [vmem:[%s1712_s17 + $0x230] ss:$52 sps:$4 sm:$0xff]  }
  0x2f   : > { %931 = vmatpush1.bf16.msra.mxu0 %v1538_v26  ;;  %971 = vmatprep.subr.bf16.mxu1 %v1576_v36  ;;  %v1648_v26 = vld [vmem:[%s1712_s17 + $0x1c8] ss:$52 sps:$4 sm:$0xff]   ;;  %v1656_v34 = vld [vmem:[%s1712_s17 + $0x298] ss:$52 sps:$4 sm:$0xff]  }
  0x30   : > { %998 = vmatprep.subr.bf16.mxu0 %v1544_v28  ;;  %v1654_v28 = vld [vmem:[%s1712_s17 + $0x234] ss:$52 sps:$4 sm:$0xff]   ;;  %v1658_v32 = vld [vmem:[%s1712_s17 + $0x29c] ss:$52 sps:$4 sm:$0xff]   ;;  %v1662_v36 = vld [vmem:[%s1712_s17 + $0x304] ss:$52 sps:$4 sm:$0xff]  }
  0x32   : > { %949 = vmatmul.mubr.bf16.vlgmr.msra.gmra.mrb[0].mxu0 %v1746_v29  ;;  %972 = vmatpush1.bf16.msra.mxu1 %v1581_v38  ;;  %v1647_v38 = vld [vmem:[%s1712_s17 + $0x100] ss:$52 sps:$4 sm:$0xff]  }
  0x33   : > { %999 = vmatpush1.bf16.msra.mxu0 %v1542_v31  ;;  %1030 = vmatprep.mubr.bf16.mxu0 %v1673_v0  ;;  %v1639_v31 = vld [vmem:[%s1712_s17 + $0x30] ss:$52 sps:$4 sm:$0xff]  }
  0x34   : > { %1000 = vmatprep.subr.bf16.mxu0 %v1550_v33  ;;  %1039 = vmatprep.subr.bf16.mxu1 %v1587_v40  ;;  %v1674_v33 = vmov 0.0   ;;  %v1655_v40 = vld [vmem:[%s1712_s17 + $0x1d0] ss:$52 sps:$4 sm:$0xff]  }
  0x35   : > { %990 = vmatmul.mubr.bf16.vlgmr.msra.gmra.mrb[0].mxu1 %v1746_v29 }
  0x36   : > { %1040 = vmatpush1.bf16.msra.mxu1 %v1585_v42  ;;  %1071 = vmatprep.mubr.bf16.mxu1 %v1673_v0  ;;  %v1663_v42 = vld [vmem:[%s1712_s17 + $0x2a0] ss:$52 sps:$4 sm:$0xff]  }
  0x37   : > { %1001 = vmatpush1.bf16.msra.mxu0 %v1548_v35  ;;  %1041 = vmatprep.subr.bf16.mxu1 %v1590_v44  ;;  %v1643_v35 = vld [vmem:[%s1712_s17 + $0x98] ss:$52 sps:$4 sm:$0xff]   ;;  %v323_v44 = vlaneseq }
  0x38   : > { %1002 = vmatprep.subr.bf16.mxu0 %v1556_v37  ;;  %v1660_v37 = vld [vmem:[%s1712_s17 + $0x300] ss:$52 sps:$4 sm:$0xff]  }
  0x3a   : > { %1042 = vmatpush1.bf16.msra.mxu1 %v1588_v46 }
  0x3b   : > { %1003 = vmatpush1.bf16.msra.mxu0 %v1554_v39  ;;  %1043 = vmatprep.subr.bf16.mxu1 %v1596_v48  ;;  %v1651_v39 = vld [vmem:[%s1712_s17 + $0x168] ss:$52 sps:$4 sm:$0xff]  }
  0x3c   : > { %1004 = vmatprep.subr.bf16.mxu0 %v1562_v41  ;;  %v1659_v41 = vld [vmem:[%s1712_s17 + $0x238] ss:$52 sps:$4 sm:$0xff]  }
  0x3e   : > { %1044 = vmatpush1.bf16.msra.mxu1 %v1594_v50 }
  0x3f   : > { %1005 = vmatpush1.bf16.msra.mxu0 %v1560_v43  ;;  %1045 = vmatprep.subr.bf16.mxu1 %v1602_v52  ;;  %v1664_v43 = vld [vmem:[%s1712_s17 + $0x308] ss:$52 sps:$4 sm:$0xff]  }
  0x40   : > { %1006 = vmatprep.subr.bf16.mxu0 %v1568_v45  ;;  %v324_v45 = vshrl.u32 %v323_v44, 7 }
  0x42   : > { %1046 = vmatpush1.bf16.msra.mxu1 %v1600_v54  ;;  %v325_v46 = vsub.s32 0, %v324_v45 }
  0x43   : > { %1007 = vmatpush1.bf16.msra.mxu0 %v1566_v47  ;;  %1047 = vmatprep.subr.bf16.mxu1 %v1608_v56  ;;  %v320_v47 = vld [vmem:[%s199_s25 + $0x8] sm:$0x1f] }
  0x44   : > { %1008 = vmatprep.subr.bf16.mxu0 %v1574_v49  ;;  %v358_v48 = vrot.slane %v320_v47, %v325_v46  ;;  %v329_v49 = vsub.s32 1, %v324_v45 }
  0x46   : > { %1048 = vmatpush1.bf16.msra.mxu1 %v1606_v59  ;;  %v362_v50 = vrot.slane %v320_v47, %v329_v49 }
  0x47   : > { %1009 = vmatpush1.bf16.msra.mxu0 %v1572_v51  ;;  %1049 = vmatprep.subr.bf16.mxu1 %v1614_v60  ;;  %v333_v51 = vsub.s32 2, %v324_v45 }
  0x48   : > { %1010 = vmatprep.subr.bf16.mxu0 %v1580_v53  ;;  %v337_v53 = vsub.s32 3, %v324_v45 }
  0x49   : > { %v366_v52 = vrot.slane %v320_v47, %v333_v51 }
  0x4a   : > { %1050 = vmatpush1.bf16.msra.mxu1 %v1612_v63  ;;  %v370_v54 = vrot.slane %v320_v47, %v337_v53 }
  0x4b   : > { %1011 = vmatpush1.bf16.msra.mxu0 %v1578_v55  ;;  %1051 = vmatprep.subr.bf16.mxu1 %v1620_v1  ;;  %v341_v55 = vsub.s32 4, %v324_v45 }
  0x4c   : > { %1012 = vmatprep.subr.bf16.mxu0 %v1584_v57 }
  0x4d   : > { %v1839_v56 = vrot.slane %v320_v47, %v341_v55 }
  0x4e   : > { %1052 = vmatpush1.bf16.msra.mxu1 %v1618_v3 }
  0x4f   : > { %1013 = vmatpush1.bf16.msra.mxu0 %v1582_v58  ;;  %1053 = vmatprep.subr.bf16.mxu1 %v1626_v5 }
  0x50   : > { %1080 = vmatprep.subr.bf16.mxu0 %v1593_v61 }
  0x52   : > { %1031 = vmatmul.mubr.bf16.vlgmr.msra.gmra.mrb[4].mxu0 %v1746_v29  ;;  %1054 = vmatpush1.bf16.msra.mxu1 %v1624_v8 }
  0x53   : > { %1081 = vmatpush1.bf16.msra.mxu0 %v1591_v62  ;;  %1112 = vmatprep.mubr.bf16.mxu0 %v1673_v0 }
  0x54   : > { %1082 = vmatprep.subr.bf16.mxu0 %v1599_v2  ;;  %1121 = vmatprep.subr.bf16.mxu1 %v1635_v9 }
  0x55   : > { %1072 = vmatmul.mubr.bf16.vlgmr.msra.gmra.mrb[4].mxu1 %v1746_v29 }
  0x56   : > { %1122 = vmatpush1.bf16.msra.mxu1 %v1633_v11  ;;  %1153 = vmatprep.mubr.bf16.mxu1 %v1673_v0  ;;  %v1629_v0 = vld [vmem:[%s1712_s17 + $0x294] ss:$52 sps:$4 sm:$0xff]  }
  0x57   : > { %1083 = vmatpush1.bf16.msra.mxu0 %v1597_v4  ;;  %1123 = vmatprep.subr.bf16.mxu1 %v1638_v13 }
  0x58   : > { %1084 = vmatprep.subr.bf16.mxu0 %v1605_v6 }
  0x5a   : > { %1124 = vmatpush1.bf16.msra.mxu1 %v1636_v15 }
  0x5b   : > { %1085 = vmatpush1.bf16.msra.mxu0 %v1603_v7  ;;  %1125 = vmatprep.subr.bf16.mxu1 %v1642_v17 }
  0x5c   : > { %1086 = vmatprep.subr.bf16.mxu0 %v1611_v10 }
  0x5e   : > { %1126 = vmatpush1.bf16.msra.mxu1 %v1640_v19 }
  0x5f   : > { %1087 = vmatpush1.bf16.msra.mxu0 %v1609_v12  ;;  %1127 = vmatprep.subr.bf16.mxu1 %v1646_v21  ;;  %v345_v12 = vsub.s32 5, %v324_v45 }
  0x60   : > { %1088 = vmatprep.subr.bf16.mxu0 %v1617_v14 }
  0x62   : > { %1128 = vmatpush1.bf16.msra.mxu1 %v1644_v22  ;;  %v353_v22 = vsub.s32 7, %v324_v45 }
  0x63   : > { %1089 = vmatpush1.bf16.msra.mxu0 %v1615_v16  ;;  %1129 = vmatprep.subr.bf16.mxu1 %v1650_v24 }
  0x64   : > { %1090 = vmatprep.subr.bf16.mxu0 %v1623_v18 }
  0x66   : > { %1130 = vmatpush1.bf16.msra.mxu1 %v1648_v26 }
  0x67   : > { %1091 = vmatpush1.bf16.msra.mxu0 %v1621_v20  ;;  %1131 = vmatprep.subr.bf16.mxu1 %v1654_v28 }
  0x68   : > { %1092 = vmatprep.subr.bf16.mxu0 %v1629_v0  ;;  %v349_v0 = vsub.s32 6, %v324_v45 }
  0x6a   : > { %1132 = vmatpush1.bf16.msra.mxu1 %v1652_v30 }
  0x6b   : > { %1093 = vmatpush1.bf16.msra.mxu0 %v1627_v23  ;;  %1133 = vmatprep.subr.bf16.mxu1 %v1658_v32 }
  0x6c   : > { %1094 = vmatprep.subr.bf16.mxu0 %v1632_v25 }
  0x6e   : > { %1134 = vmatpush1.bf16.msra.mxu1 %v1656_v34 }
  0x6f   : > { %1095 = vmatpush1.bf16.msra.mxu0 %v1630_v27  ;;  %1135 = vmatprep.subr.bf16.mxu1 %v1662_v36 }
  0x70   : > { %1479 = vmatprep.subr.bf16.mxu0 %v1674_v33 }
  0x72   : > { %1113 = vmatmul.mubr.bf16.vlgmr.msra.gmra.mrb[8].mxu0 %v1746_v29  ;;  %1136 = vmatpush1.bf16.msra.mxu1 %v1660_v37 }
  0x73   : > { %1480 = vmatpush3.bf16.msra.mxu0 %v1639_v31  ;;  %1495 = vmatprep.mubr.msk.bf16.mxu0 %vm1675_vm0, %v1674_v33 }
  0x74   : > { %1481 = vmatprep.subr.bf16.mxu0 %v1674_v33 }
  0x75   : > { %1154 = vmatmul.mubr.bf16.vlgmr.msra.gmra.mrb[8].mxu1 %v1746_v29 }
  0x77   : > { %1482 = vmatpush3.bf16.msra.mxu0 %v1643_v35 }
  0x78   : > { %1483 = vmatprep.subr.bf16.mxu0 %v1674_v33 }
  0x7b   : > { %1484 = vmatpush3.bf16.msra.mxu0 %v1647_v38 }
  0x7c   : > { %1485 = vmatprep.subr.bf16.mxu0 %v1674_v33 }
  0x7f   : > { %1486 = vmatpush3.bf16.msra.mxu0 %v1651_v39 }
  0x80   : > { %1487 = vmatprep.subr.bf16.mxu0 %v1674_v33 }
  0x83   : > { %1488 = vmatpush3.bf16.msra.mxu0 %v1655_v40 }
  0x84   : > { %1489 = vmatprep.subr.bf16.mxu0 %v1674_v33 }
  0x87   : > { %1490 = vmatpush3.bf16.msra.mxu0 %v1659_v41 }
  0x88   : > { %1491 = vmatprep.subr.bf16.mxu0 %v1674_v33 }
  0x8b   : > { %1492 = vmatpush3.bf16.msra.mxu0 %v1663_v42 }
  0x8c   : > { %1493 = vmatprep.subr.bf16.mxu0 %v1674_v33 }
  0x8f   : > { %1494 = vmatpush3.bf16.msra.mxu0 %v1664_v43 }
  0x92   : > { %1496 = vmatmul.mubr.bf16.vlgmr.msra.gmra.mrb[12].mxu0 %v1746_v29  ;;  %v319_v29 = vld [vmem:[%s199_s25] sm:$0xff] }
  0x93   : > { %v326_v57 = vrot.slane %v319_v29, %v325_v46  ;;  %v330_v58 = vrot.slane %v319_v29, %v329_v49  ;;  %v334_v3 = vrot.slane %v319_v29, %v333_v51  ;;  %v338_v4 = vrot.slane %v319_v29, %v337_v53 }
  0x94   : > { %v342_v13 = vrot.slane %v319_v29, %v341_v55  ;;  %v346_v14 = vrot.slane %v319_v29, %v345_v12  ;;  %v350_v23 = vrot.slane %v319_v29, %v349_v0  ;;  %v354_v24 = vrot.slane %v319_v29, %v353_v22 }
 0x105   : > { %v950_v59 = vpop.f32.mrb[0].mxu0 }
 0x106   : > { %v951_v60 = vadd.f32 %v950_v59, %v326_v57  ;;  %v952_v61 = vpop.f32.mrb[1].mxu0 }
 0x107   : > { %v953_v62 = vadd.f32 %v952_v61, %v330_v58  ;;  %v954_v63 = vpop.f32.mrb[2].mxu0 }
 0x108   : > { %v955_v1 = vpop.f32.mrb[3].mxu0  ;;  %v991_v5 = vpop.f32.mrb[0].mxu1 }
 0x109   : > { %v1463_v2 = vpack.c.bf16 %v953_v62, %v951_v60  ;;  %v992_v6 = vadd.f32 %v991_v5, %v334_v3  ;;  %v993_v7 = vpop.f32.mrb[1].mxu1 }
 0x10a   : > { %v994_v8 = vadd.f32 %v993_v7, %v338_v4  ;;  %v995_v9 = vpop.f32.mrb[2].mxu1 }
 0x10b   : > { %1255 = vst [vmem:[%s1845_s29] sm:$0x77] %v1463_v2  ;;  %v996_v10 = vpop.f32.mrb[3].mxu1 }
 0x10c   : > { %v1464_v11 = vpack.c.bf16 %v994_v8, %v992_v6 }
 0x10e   : > { %1256 = vst [vmem:[%s1845_s29 + $0x8] sm:$0x77] %v1464_v11 }
 0x125   : > { %v1032_v15 = vpop.f32.mrb[4].mxu0 }
 0x126   : > { %v1033_v16 = vadd.f32 %v1032_v15, %v342_v13  ;;  %v1034_v17 = vpop.f32.mrb[5].mxu0 }
 0x127   : > { %v1035_v18 = vadd.f32 %v1034_v17, %v346_v14  ;;  %v1036_v19 = vpop.f32.mrb[6].mxu0 }
 0x128   : > { %v1037_v20 = vpop.f32.mrb[7].mxu0  ;;  %v1073_v25 = vpop.f32.mrb[4].mxu1 }
 0x129   : > { %v1465_v21 = vpack.c.bf16 %v1035_v18, %v1033_v16  ;;  %v1074_v26 = vadd.f32 %v1073_v25, %v350_v23  ;;  %v1075_v27 = vpop.f32.mrb[5].mxu1 }
 0x12a   : > { %v1076_v28 = vadd.f32 %v1075_v27, %v354_v24  ;;  %v1077_v30 = vpop.f32.mrb[6].mxu1 }
 0x12b   : > { %1257 = vst [vmem:[%s1845_s29 + $0x10] sm:$0x77] %v1465_v21  ;;  %v1078_v31 = vpop.f32.mrb[7].mxu1 }
 0x12c   : > { %v1466_v32 = vpack.c.bf16 %v1076_v28, %v1074_v26 }
 0x12e   : > { %1258 = vst [vmem:[%s1845_s29 + $0x18] sm:$0x77] %v1466_v32 }
 0x145   : > { %v1114_v33 = vpop.f32.mrb[8].mxu0 }
 0x146   : > { %v1115_v34 = vadd.f32 %v1114_v33, %v358_v48  ;;  %v1116_v35 = vpop.f32.mrb[9].mxu0 }
 0x147   : > { %v1117_v36 = vadd.f32 %v1116_v35, %v362_v50  ;;  %v1118_v37 = vpop.f32.mrb[10].mxu0 }
 0x148   : > { %v1119_v38 = vpop.f32.mrb[11].mxu0  ;;  %v1155_v40 = vpop.f32.mrb[8].mxu1 }
 0x149   : > { %v1467_v39 = vpack.c.bf16 %v1117_v36, %v1115_v34  ;;  %v1156_v41 = vadd.f32 %v1155_v40, %v366_v52  ;;  %v1157_v42 = vpop.f32.mrb[9].mxu1 }
 0x14a   : > { %v1158_v43 = vadd.f32 %v1157_v42, %v370_v54  ;;  %v1159_v44 = vpop.f32.mrb[10].mxu1 }
 0x14b   : > { %1259 = vst [vmem:[%s1845_s29 + $0x20] sm:$0x77] %v1467_v39  ;;  %v1160_v45 = vpop.f32.mrb[11].mxu1 }
 0x14c   : > { %v1468_v46 = vpack.c.bf16 %v1158_v43, %v1156_v41 }
 0x14e   : > { %1260 = vst [vmem:[%s1845_s29 + $0x28] sm:$0x77] %v1468_v46 }
 0x165   : > { %v1196_v47 = vpop.f32.mrb[12].mxu0 }
 0x166   : > { %v1197_v49 = vadd.f32 %v1196_v47, %v1839_v56  ;;  %v1497_v51 = vpop.f32.mrb[13].mxu0 }
 0x167   : > { %v1199_v48 = vpop.f32.mrb[14].mxu0 }
 0x168   : > { %v1469_v50 = vpack.c.bf16 %v1197_v49, %v1197_v49  ;;  %v1498_v53 = vpop.f32.mrb[15].mxu0 }
 0x16a   : > { %1262 = vst.msk [vmem:[%s1845_s29 + $0x30] sm:$0x7] %vm1261_vm1, %v1469_v50 }
 0x16b PF: > { %s13_s12 = sadd.s32 1, %s1671_s12  }
 0x16c   : > { %p10_p4 = scmp.ge.s32.totalorder %s13_s12, 4  }
 0x16e   :  { %12 = sbr.rel (!%p10_p4) target bundleno = 1 (0x1), region = 68 }

// kernel: hga_forward.41
= control target key start
LH: loop header
LB: loop body
LE: loop exit
PB: predicated region body
PF: predicated region fallthrough
CT: control target
= control target key end

     0   :  { %v193_v0 = vmov 0.0   ;;  %vm194_vm0 = vmmov 0   ;;  %s248_s1 = inlined_call_operand.vmem [shape: bf16[128,128], index: 1, kind: input, shape index: {}]   ;;  %s249_s0 = inlined_call_operand.vmem [shape: bf16[6,128], index: 0, kind: input, shape index: {}]   ;;  %s250_s2 = inlined_call_operand.vmem [shape: f32[1,128], index: 2, kind: input, shape index: {}]   ;;  %s251_s3 = inlined_call_operand.vmem [shape: f32[6,128], index: 3, kind: output, shape index: {}]  }
   0x1   :  { %163 = vmatprep.subr.bf16.mxu0 %v193_v0  ;;  %19 = vst [vmem:[#allocation2] sm:$0x3f] %v193_v0  ;;  %v185_v1 = vld [vmem:[%s248_s1] sm:$0xff]   ;;  %179 = vmatprep.mubr.msk.bf16.mxu0 %vm194_vm0, %v193_v0  ;;  %v186_v2 = vld [vmem:[%s248_s1 + $0x8] sm:$0xff]   ;;  %v187_v3 = vld [vmem:[%s248_s1 + $0x10] sm:$0xff]  }
   0x2   :  { %164 = vmatpush3.bf16.msra.mxu0 %v185_v1  ;;  %v188_v4 = vld [vmem:[%s248_s1 + $0x18] sm:$0xff]   ;;  %v189_v5 = vld [vmem:[%s248_s1 + $0x20] sm:$0xff]   ;;  %v190_v6 = vld [vmem:[%s248_s1 + $0x28] sm:$0xff]  }
   0x3   :  { %165 = vmatprep.subr.bf16.mxu0 %v193_v0  ;;  %v191_v7 = vld [vmem:[%s248_s1 + $0x30] sm:$0xff]   ;;  %v192_v8 = vld [vmem:[%s248_s1 + $0x38] sm:$0xff]   ;;  %v21_v9 = vld [vmem:[%s249_s0] sm:$0x7] }
   0x4   :  { %v153_v16 = vld [vmem:[%s250_s2] ss:$0 sm:$0xff] }
   0x6   :  { %166 = vmatpush3.bf16.msra.mxu0 %v186_v2 }
   0x7   :  { %167 = vmatprep.subr.bf16.mxu0 %v193_v0 }
   0x8   :  { %v20_v10 = vld [vmem:[#allocation2] sm:$0x3f] }
   0xa   :  { %168 = vmatpush3.bf16.msra.mxu0 %v187_v3 }
   0xb   :  { %169 = vmatprep.subr.bf16.mxu0 %v193_v0 }
   0xe   :  { %170 = vmatpush3.bf16.msra.mxu0 %v188_v4 }
   0xf   :  { %171 = vmatprep.subr.bf16.mxu0 %v193_v0 }
  0x12   :  { %172 = vmatpush3.bf16.msra.mxu0 %v189_v5 }
  0x13   :  { %173 = vmatprep.subr.bf16.mxu0 %v193_v0 }
  0x16   :  { %174 = vmatpush3.bf16.msra.mxu0 %v190_v6 }
  0x17   :  { %175 = vmatprep.subr.bf16.mxu0 %v193_v0 }
  0x1a   :  { %176 = vmatpush3.bf16.msra.mxu0 %v191_v7 }
  0x1b   :  { %177 = vmatprep.subr.bf16.mxu0 %v193_v0 }
  0x1e   :  { %178 = vmatpush3.bf16.msra.mxu0 %v192_v8 }
  0x21   :  { %180 = vmatmul.mubr.bf16.vlgmr.msra.gmra.mrb[0].mxu0 %v21_v9 }
  0xf4   :  { %v120_v11 = vpop.f32.mrb[0].mxu0 }
  0xf5   :  { %v126_v12 = vadd.f32 %v120_v11, %v20_v10  ;;  %v181_v13 = vpop.f32.mrb[1].mxu0 }
  0xf6   :  { %v123_v14 = vpop.f32.mrb[2].mxu0 }
  0xf7   :  { %127 = vst [vmem:[#allocation2] sm:$0x3f] %v126_v12  ;;  %v182_v15 = vpop.f32.mrb[3].mxu0 }
  0xfe   :  { %v131_v17 = vld [vmem:[#allocation2] sm:$0x3f] }
  0xff   :  { %v139_v18 = vadd.f32 %v153_v16, %v131_v17 }
 0x101   :  { %140 = vst [vmem:[%s251_s3] sm:$0x3f] %v139_v18 }

// kernel: hga_forward.33
= control target key start
LH: loop header
LB: loop body
LE: loop exit
PB: predicated region body
PF: predicated region fallthrough
CT: control target
= control target key end

     0   :  { %s2798_s24 = smov 0   ;;  %s3519_s0 = inlined_call_operand.vmem [shape: bf16[20,6,80], index: 0, kind: input, shape index: {}]   ;;  %s3520_s1 = inlined_call_operand.vmem [shape: bf16[20,6,80], index: 1, kind: input, shape index: {}]   ;;  %s3521_s2 = inlined_call_operand.vmem [shape: bf16[20,80,1200], index: 2, kind: input, shape index: {}]   ;;  %s3522_s3 = inlined_call_operand.vmem [shape: f32[20,1,1200], index: 3, kind: input, shape index: {}]   ;;  %s3523_s4 = inlined_call_operand.vmem [shape: bf16[20,80,1200], index: 4, kind: input, shape index: {}]   ;;  %s3524_s5 = inlined_call_operand.vmem [shape: f32[20,1,1200], index: 5, kind: input, shape index: {}]   ;;  %s3525_s6 = inlined_call_operand.vmem [shape: f32[1200,80], index: 6, kind: input, shape index: {}]   ;;  %s3526_s7 = inlined_call_operand.vmem [shape: f32[20,6,80], index: 7, kind: output, shape index: {}]  }
   0x1 LB: > { %s2154_s25 = sadd.s32 4294967295, %s2754_s24   ;;  %p2158_p0 = scmp.ge.s32.totalorder %s2754_s24, 1  ;;  %s2754_s24 = sphi %s2798_s24, %s17_s24  }
   0x2   : > { %p283_p1 = scmp.lt.s32.totalorder %s2754_s24, 21 }
   0x4   : > { %p284_p2 = pnand %p2158_p0, %p283_p1 }
   0x5   : > { %p335_p3 = scmp.lt.s32.totalorder (!%p284_p2), %s2154_s25, 19  ;;  %v2756_v0 = vmov (!%p284_p2), 0   ;;  %vm721_vm0 = vcmask (!%p284_p2), 654336   ;;  %vm1653_vm1 = vcmask (!%p284_p2), 392192   ;;  %vm2026_vm6 = vcmask (!%p284_p2), 652288  }
   0x6   : > { %287 = sbr.rel (%p284_p2) target bundleno = 803 (0x323), region = 48  ;;  %757 = vmatprep.mubr.bf16.mxu1 (!%p284_p2), %v2756_v0  ;;  %839 = vmatprep.mubr.bf16.mxu0 (!%p284_p2), %v2756_v0 }
   0xd   : > { %s3528_s25 = smov (!%p335_p3, %s2154_s25), 19 }
   0xe   : > { %s2578_s26 = smul.u32 400, %s3528_s25  ;;  %s2159_s30 = sshll.u32 %s3528_s25, 2 }
   0xf   : > { %s338_s10 = scalar_lea.vmem %s3519_s0, %s2159_s30  ;;  %s342_s16 = scalar_lea.vmem %s3520_s1, %s2159_s30 }
  0x10   : > { %s2816_s29 = scalar_lea.vmem %s3521_s2, %s2578_s26  ;;  %v2846_v23 = vld [vmem:[%s338_s10] sm:$0x7]  ;;  %s2869_s13 = scalar_lea.vmem %s3523_s4, %s2578_s26 }
  0x11   : > { %v2590_v1 = vld [vmem:[%s2816_s29 + $0x4] ss:$40 sps:$4 sm:$0xff]   ;;  %v2592_v2 = vld [vmem:[%s2816_s29 + $0x14] ss:$40 sps:$4 sm:$0xff]   ;;  %v2594_v3 = vld [vmem:[%s2816_s29] ss:$40 sps:$4 sm:$0xff]  }
  0x12   : > { %725 = vmatprep.subr.bf16.mxu1 %v2590_v1  ;;  %v2595_v4 = vld [vmem:[%s2816_s29 + $0x10] ss:$40 sps:$4 sm:$0xff]   ;;  %807 = vmatprep.subr.bf16.mxu0 %v2592_v2  ;;  %v2596_v5 = vld [vmem:[%s2816_s29 + $0x54] ss:$40 sps:$4 sm:$0xff]   ;;  %v2598_v6 = vld [vmem:[%s2816_s29 + $0x64] ss:$40 sps:$4 sm:$0xff]  }
  0x13   : > { %726 = vmatpush1.bf16.msra.mxu1 %v2594_v3  ;;  %808 = vmatpush1.bf16.msra.mxu0 %v2595_v4  ;;  %v2600_v7 = vld [vmem:[%s2816_s29 + $0x50] ss:$40 sps:$4 sm:$0xff]   ;;  %v2601_v8 = vld [vmem:[%s2816_s29 + $0x60] ss:$40 sps:$4 sm:$0xff]   ;;  %v2602_v9 = vld [vmem:[%s2816_s29 + $0xa4] ss:$40 sps:$4 sm:$0xff]  }
  0x14   : > { %727 = vmatprep.subr.bf16.mxu1 %v2596_v5  ;;  %809 = vmatprep.subr.bf16.mxu0 %v2598_v6  ;;  %v2604_v10 = vld [vmem:[%s2816_s29 + $0xb4] ss:$40 sps:$4 sm:$0xff]   ;;  %v2606_v11 = vld [vmem:[%s2816_s29 + $0xa0] ss:$40 sps:$4 sm:$0xff]   ;;  %v2607_v12 = vld [vmem:[%s2816_s29 + $0xb0] ss:$40 sps:$4 sm:$0xff]  }
  0x15   : > { %v2608_v13 = vld [vmem:[%s2816_s29 + $0xf4] ss:$40 sps:$4 sm:$0xff]   ;;  %v2610_v14 = vld [vmem:[%s2816_s29 + $0x104] ss:$40 sps:$4 sm:$0xff]   ;;  %v2612_v15 = vld [vmem:[%s2816_s29 + $0xf0] ss:$40 sps:$4 sm:$0xff]  }
  0x16   : > { %v2613_v16 = vld [vmem:[%s2816_s29 + $0x100] ss:$40 sps:$4 sm:$0xff]   ;;  %v2614_v17 = vld [vmem:[%s2816_s29 + $0x144] ss:$40 sps:$4 sm:$0xff]   ;;  %v2616_v18 = vld [vmem:[%s2816_s29 + $0x154] ss:$40 sps:$4 sm:$0xff]  }
  0x17   : > { %728 = vmatpush1.bf16.msra.mxu1 %v2600_v7  ;;  %810 = vmatpush1.bf16.msra.mxu0 %v2601_v8  ;;  %v2618_v19 = vld [vmem:[%s2816_s29 + $0x140] ss:$40 sps:$4 sm:$0xff]   ;;  %v2619_v20 = vld [vmem:[%s2816_s29 + $0x150] ss:$40 sps:$4 sm:$0xff]   ;;  %v2622_v21 = vld [vmem:[%s2816_s29 + $0xc] ss:$40 sps:$4 sm:$0xff]  }
  0x18   : > { %729 = vmatprep.subr.bf16.mxu1 %v2602_v9  ;;  %811 = vmatprep.subr.bf16.mxu0 %v2604_v10  ;;  %v2625_v22 = vld [vmem:[%s2816_s29 + $0x24] ss:$40 sps:$4 sm:$0xff]   ;;  %v2620_v24 = vld [vmem:[%s2816_s29 + $0x8] ss:$40 sps:$4 sm:$0xff]   ;;  %v2631_v27 = vld [vmem:[%s2816_s29 + $0x74] ss:$40 sps:$4 sm:$0xff]  }
  0x19   : > { %v2623_v25 = vld [vmem:[%s2816_s29 + $0x20] ss:$40 sps:$4 sm:$0xff]   ;;  %v2628_v26 = vld [vmem:[%s2816_s29 + $0x5c] ss:$40 sps:$4 sm:$0xff]   ;;  %v2629_v29 = vld [vmem:[%s2816_s29 + $0x70] ss:$40 sps:$4 sm:$0xff]  }
  0x1a   : > { %v2626_v28 = vld [vmem:[%s2816_s29 + $0x58] ss:$40 sps:$4 sm:$0xff]   ;;  %v2634_v30 = vld [vmem:[%s2816_s29 + $0xac] ss:$40 sps:$4 sm:$0xff]   ;;  %v2632_v32 = vld [vmem:[%s2816_s29 + $0xa8] ss:$40 sps:$4 sm:$0xff]  }
  0x1b   : > { %730 = vmatpush1.bf16.msra.mxu1 %v2606_v11  ;;  %812 = vmatpush1.bf16.msra.mxu0 %v2607_v12  ;;  %v2637_v31 = vld [vmem:[%s2816_s29 + $0xc4] ss:$40 sps:$4 sm:$0xff]   ;;  %v2635_v33 = vld [vmem:[%s2816_s29 + $0xc0] ss:$40 sps:$4 sm:$0xff]   ;;  %v2643_v35 = vld [vmem:[%s2816_s29 + $0x114] ss:$40 sps:$4 sm:$0xff]  }
  0x1c   : > { %731 = vmatprep.subr.bf16.mxu1 %v2608_v13  ;;  %813 = vmatprep.subr.bf16.mxu0 %v2610_v14  ;;  %v2640_v34 = vld [vmem:[%s2816_s29 + $0xfc] ss:$40 sps:$4 sm:$0xff]   ;;  %v2638_v36 = vld [vmem:[%s2816_s29 + $0xf8] ss:$40 sps:$4 sm:$0xff]   ;;  %v2646_v38 = vld [vmem:[%s2816_s29 + $0x14c] ss:$40 sps:$4 sm:$0xff]  }
  0x1d   : > { %v2641_v37 = vld [vmem:[%s2816_s29 + $0x110] ss:$40 sps:$4 sm:$0xff]   ;;  %v2649_v39 = vld [vmem:[%s2816_s29 + $0x164] ss:$40 sps:$4 sm:$0xff]   ;;  %v2647_v41 = vld [vmem:[%s2816_s29 + $0x160] ss:$40 sps:$4 sm:$0xff]  }
  0x1e   : > { %v2644_v40 = vld [vmem:[%s2816_s29 + $0x148] ss:$40 sps:$4 sm:$0xff]   ;;  %v2652_v42 = vld [vmem:[%s2816_s29 + $0x1c] ss:$40 sps:$4 sm:$0xff]   ;;  %v2655_v43 = vld [vmem:[%s2869_s13 + $0xc] ss:$40 sps:$4 sm:$0xff]  }
  0x1f   : > { %732 = vmatpush1.bf16.msra.mxu1 %v2612_v15  ;;  %814 = vmatpush1.bf16.msra.mxu0 %v2613_v16  ;;  %v2650_v44 = vld [vmem:[%s2816_s29 + $0x18] ss:$40 sps:$4 sm:$0xff]   ;;  %v2653_v45 = vld [vmem:[%s2869_s13 + $0x8] ss:$40 sps:$4 sm:$0xff]   ;;  %v2658_v46 = vld [vmem:[%s2816_s29 + $0x6c] ss:$40 sps:$4 sm:$0xff]  }
  0x20   : > { %733 = vmatprep.subr.bf16.mxu1 %v2614_v17  ;;  %815 = vmatprep.subr.bf16.mxu0 %v2616_v18  ;;  %v2661_v47 = vld [vmem:[%s2869_s13 + $0x5c] ss:$40 sps:$4 sm:$0xff]   ;;  %v2656_v48 = vld [vmem:[%s2816_s29 + $0x68] ss:$40 sps:$4 sm:$0xff]   ;;  %v2659_v49 = vld [vmem:[%s2869_s13 + $0x58] ss:$40 sps:$4 sm:$0xff]  }
  0x21   : > { %v2664_v50 = vld [vmem:[%s2816_s29 + $0xbc] ss:$40 sps:$4 sm:$0xff]   ;;  %v2667_v51 = vld [vmem:[%s2869_s13 + $0xac] ss:$40 sps:$4 sm:$0xff]   ;;  %v2662_v52 = vld [vmem:[%s2816_s29 + $0xb8] ss:$40 sps:$4 sm:$0xff]  }
  0x22   : > { %v2665_v53 = vld [vmem:[%s2869_s13 + $0xa8] ss:$40 sps:$4 sm:$0xff]   ;;  %v2670_v54 = vld [vmem:[%s2816_s29 + $0x10c] ss:$40 sps:$4 sm:$0xff]   ;;  %v2673_v55 = vld [vmem:[%s2869_s13 + $0xfc] ss:$40 sps:$4 sm:$0xff]  }
  0x23   : > { %734 = vmatpush1.bf16.msra.mxu1 %v2618_v19  ;;  %816 = vmatpush1.bf16.msra.mxu0 %v2619_v20  ;;  %v2668_v56 = vld [vmem:[%s2816_s29 + $0x108] ss:$40 sps:$4 sm:$0xff]   ;;  %v2671_v57 = vld [vmem:[%s2869_s13 + $0xf8] ss:$40 sps:$4 sm:$0xff]   ;;  %v2676_v58 = vld [vmem:[%s2816_s29 + $0x15c] ss:$40 sps:$4 sm:$0xff]  }
  0x24   : > { %766 = vmatprep.subr.bf16.mxu1 %v2622_v21  ;;  %889 = vmatprep.subr.bf16.mxu0 %v2625_v22  ;;  %v2679_v59 = vld [vmem:[%s2869_s13 + $0x14c] ss:$40 sps:$4 sm:$0xff]   ;;  %v2674_v60 = vld [vmem:[%s2816_s29 + $0x158] ss:$40 sps:$4 sm:$0xff]   ;;  %v2677_v61 = vld [vmem:[%s2869_s13 + $0x148] ss:$40 sps:$4 sm:$0xff]  }
  0x25   : > { %v2682_v62 = vld [vmem:[%s2869_s13 + $0x4] ss:$40 sps:$4 sm:$0xff]   ;;  %v2912_v1 = vld [vmem:[%s342_s16] sm:$0x7]  ;;  %v2688_v4 = vld [vmem:[%s2869_s13 + $0x54] ss:$40 sps:$4 sm:$0xff]  }
  0x26   : > { %2214 = vmatmul.mubr.msk.bf16.vlgmr.msra.gmra.mrb[0].mxu1 %vm721_vm0, %v2846_v23  ;;  %2216 = vmatmul.mubr.msk.bf16.vlgmr.msra.gmra.mrb[0].mxu0 %vm721_vm0, %v2846_v23  ;;  %v2685_v63 = vld [vmem:[%s2869_s13 + $0x1c] ss:$40 sps:$4 sm:$0xff]   ;;  %v2680_v2 = vld [vmem:[%s2869_s13] ss:$40 sps:$4 sm:$0xff]   ;;  %v2691_v5 = vld [vmem:[%s2869_s13 + $0x6c] ss:$40 sps:$4 sm:$0xff]  }
  0x27   : > { %767 = vmatpush1.bf16.msra.mxu1 %v2620_v24  ;;  %890 = vmatpush1.bf16.msra.mxu0 %v2623_v25  ;;  %v2683_v3 = vld [vmem:[%s2869_s13 + $0x18] ss:$40 sps:$4 sm:$0xff]   ;;  %v2689_v7 = vld [vmem:[%s2869_s13 + $0x68] ss:$40 sps:$4 sm:$0xff]   ;;  %v2694_v8 = vld [vmem:[%s2869_s13 + $0xa4] ss:$40 sps:$4 sm:$0xff]  }
  0x28   : > { %768 = vmatprep.subr.bf16.mxu1 %v2628_v26  ;;  %891 = vmatprep.subr.bf16.mxu0 %v2631_v27  ;;  %v2686_v6 = vld [vmem:[%s2869_s13 + $0x50] ss:$40 sps:$4 sm:$0xff]   ;;  %v2697_v9 = vld [vmem:[%s2869_s13 + $0xbc] ss:$40 sps:$4 sm:$0xff]   ;;  %v2692_v10 = vld [vmem:[%s2869_s13 + $0xa0] ss:$40 sps:$4 sm:$0xff]  }
  0x29   : > { %798 = vmatprep.mubr.bf16.mxu1 %v2756_v0  ;;  %921 = vmatprep.mubr.bf16.mxu0 %v2756_v0  ;;  %v2695_v11 = vld [vmem:[%s2869_s13 + $0xb8] ss:$40 sps:$4 sm:$0xff]   ;;  %v2700_v12 = vld [vmem:[%s2869_s13 + $0xf4] ss:$40 sps:$4 sm:$0xff]   ;;  %v2701_v15 = vld [vmem:[%s2869_s13 + $0x108] ss:$40 sps:$4 sm:$0xff]  }
  0x2a   : > { %v2703_v13 = vld [vmem:[%s2869_s13 + $0x10c] ss:$40 sps:$4 sm:$0xff]   ;;  %v2698_v14 = vld [vmem:[%s2869_s13 + $0xf0] ss:$40 sps:$4 sm:$0xff]   ;;  %v2709_v17 = vld [vmem:[%s2869_s13 + $0x15c] ss:$40 sps:$4 sm:$0xff]  }
  0x2b   : > { %769 = vmatpush1.bf16.msra.mxu1 %v2626_v28  ;;  %892 = vmatpush1.bf16.msra.mxu0 %v2629_v29  ;;  %v2706_v16 = vld [vmem:[%s2869_s13 + $0x144] ss:$40 sps:$4 sm:$0xff]   ;;  %v2704_v18 = vld [vmem:[%s2869_s13 + $0x140] ss:$40 sps:$4 sm:$0xff]   ;;  %v2712_v20 = vld [vmem:[%s2869_s13 + $0x14] ss:$40 sps:$4 sm:$0xff]  }
  0x2c   : > { %770 = vmatprep.subr.bf16.mxu1 %v2634_v30  ;;  %893 = vmatprep.subr.bf16.mxu0 %v2637_v31  ;;  %v2707_v19 = vld [vmem:[%s2869_s13 + $0x158] ss:$40 sps:$4 sm:$0xff]   ;;  %v2715_v22 = vld [vmem:[%s2869_s13 + $0x64] ss:$40 sps:$4 sm:$0xff]   ;;  %v2718_v24 = vld [vmem:[%s2869_s13 + $0xb4] ss:$40 sps:$4 sm:$0xff]  }
  0x2d   : > { %v2710_v21 = vld [vmem:[%s2869_s13 + $0x10] ss:$40 sps:$4 sm:$0xff]   ;;  %v2721_v26 = vld [vmem:[%s2869_s13 + $0x104] ss:$40 sps:$4 sm:$0xff]   ;;  %v2719_v27 = vld [vmem:[%s2869_s13 + $0x100] ss:$40 sps:$4 sm:$0xff]  }
  0x2e   : > { %v2716_v25 = vld [vmem:[%s2869_s13 + $0xb0] ss:$40 sps:$4 sm:$0xff]   ;;  %v2724_v28 = vld [vmem:[%s2869_s13 + $0x154] ss:$40 sps:$4 sm:$0xff]   ;;  %v2727_v30 = vld [vmem:[%s2869_s13 + $0x24] ss:$40 sps:$4 sm:$0xff]  }
  0x2f   : > { %771 = vmatpush1.bf16.msra.mxu1 %v2632_v32  ;;  %894 = vmatpush1.bf16.msra.mxu0 %v2635_v33  ;;  %v2722_v29 = vld [vmem:[%s2869_s13 + $0x150] ss:$40 sps:$4 sm:$0xff]   ;;  %v2725_v31 = vld [vmem:[%s2869_s13 + $0x20] ss:$40 sps:$4 sm:$0xff]   ;;  %v2730_v32 = vld [vmem:[%s2869_s13 + $0x74] ss:$40 sps:$4 sm:$0xff]  }
  0x30   : > { %772 = vmatprep.subr.bf16.mxu1 %v2640_v34  ;;  %895 = vmatprep.subr.bf16.mxu0 %v2643_v35  ;;  %v2728_v33 = vld [vmem:[%s2869_s13 + $0x70] ss:$40 sps:$4 sm:$0xff]   ;;  %v2733_v34 = vld [vmem:[%s2869_s13 + $0xc4] ss:$40 sps:$4 sm:$0xff]   ;;  %v2731_v35 = vld [vmem:[%s2869_s13 + $0xc0] ss:$40 sps:$4 sm:$0xff]  }
  0x31   : > { %s2579_s29 = smul.u32 10, %s3528_s25  ;;  %s2163_s21 = sshll.u32 %s3528_s25, 3 }
  0x32   : > { %s364_s26 = scalar_lea.vmem %s3526_s7, %s2163_s21 }
  0x33   : > { %773 = vmatpush1.bf16.msra.mxu1 %v2638_v36  ;;  %896 = vmatpush1.bf16.msra.mxu0 %v2641_v37  ;;  %v2736_v36 = vld [vmem:[%s2869_s13 + $0x114] ss:$40 sps:$4 sm:$0xff]   ;;  %v2734_v37 = vld [vmem:[%s2869_s13 + $0x110] ss:$40 sps:$4 sm:$0xff]   ;;  %s3190_s9 = scalar_lea.vmem %s3524_s5, %s2579_s29  ;;  %s3195_s12 = scalar_lea.vmem %s3522_s3, %s2579_s29 }
  0x34   : > { %774 = vmatprep.subr.bf16.mxu1 %v2646_v38  ;;  %897 = vmatprep.subr.bf16.mxu0 %v2649_v39  ;;  %v2739_v38 = vld [vmem:[%s2869_s13 + $0x164] ss:$40 sps:$4 sm:$0xff]  }
  0x35   : > { %v1551_v39 = vld [vmem:[%s3525_s6 + $0x180] sm:$0xff] }
  0x37   : > { %775 = vmatpush1.bf16.msra.mxu1 %v2644_v40  ;;  %898 = vmatpush1.bf16.msra.mxu0 %v2647_v41  ;;  %v1552_v40 = vld [vmem:[%s3525_s6 + $0x188] sm:$0xff] }
  0x38   : > { %848 = vmatprep.subr.bf16.mxu1 %v2652_v42  ;;  %1329 = vmatprep.subr.bf16.mxu0 %v2655_v43  ;;  %v2449_v41 = vpack.c.bf16 %v1552_v40, %v1551_v39  ;;  %v1535_v42 = vld [vmem:[%s3525_s6 + $0x100] sm:$0xff]  ;;  %v1536_v43 = vld [vmem:[%s3525_s6 + $0x108] sm:$0xff]  ;;  %v1549_v39 = vld [vmem:[%s3525_s6 + $0x170] sm:$0xff] }
  0x39   : > { %v1550_v40 = vld [vmem:[%s3525_s6 + $0x178] sm:$0xff] }
  0x3a   : > { %2215 = vmatmul.mubr.msk.bf16.vlgmr.msra.gmra.mrb[4].mxu1 %vm721_vm0, %v2846_v23  ;;  %2218 = vmatmul.mubr.msk.bf16.vlgmr.msra.gmra.mrb[4].mxu0 %vm721_vm0, %v2846_v23 }
  0x3b   : > { %849 = vmatpush1.bf16.msra.mxu1 %v2650_v44  ;;  %1330 = vmatpush1.bf16.msra.mxu0 %v2653_v45  ;;  %v1553_v44 = vld [vmem:[%s3525_s6 + $0x190] sm:$0xff]  ;;  %v1554_v45 = vld [vmem:[%s3525_s6 + $0x198] sm:$0xff] }
  0x3c   : > { %850 = vmatprep.subr.bf16.mxu1 %v2658_v46  ;;  %1331 = vmatprep.subr.bf16.mxu0 %v2661_v47  ;;  %v2451_v46 = vpack.c.bf16 %v1536_v43, %v1535_v42  ;;  %v2453_v47 = vpack.c.bf16 %v1554_v45, %v1553_v44  ;;  %v1526_v42 = vld [vmem:[%s3525_s6 + $0xb8] sm:$0xff]  ;;  %v1615_v43 = vld [vmem:[%s3525_s6 + $0x380] sm:$0xff]  ;;  %v1616_v45 = vld [vmem:[%s3525_s6 + $0x388] sm:$0xff] }
  0x3d   : > { %880 = vmatprep.mubr.bf16.mxu1 %v2756_v0  ;;  %1361 = vmatprep.mubr.bf16.mxu0 %v2756_v0 }
  0x3f   : > { %851 = vmatpush1.bf16.msra.mxu1 %v2656_v48  ;;  %1332 = vmatpush1.bf16.msra.mxu0 %v2659_v49  ;;  %v1537_v48 = vld [vmem:[%s3525_s6 + $0x110] sm:$0xff]  ;;  %v1538_v49 = vld [vmem:[%s3525_s6 + $0x118] sm:$0xff] }
  0x40   : > { %852 = vmatprep.subr.bf16.mxu1 %v2664_v50  ;;  %1333 = vmatprep.subr.bf16.mxu0 %v2667_v51  ;;  %v2455_v50 = vpack.c.bf16 %v1538_v49, %v1537_v48  ;;  %v1555_v51 = vld [vmem:[%s3525_s6 + $0x1a0] sm:$0xff]  ;;  %v2513_v48 = vpack.c.bf16 %v1616_v45, %v1615_v43 }
  0x41   : > { %v1599_v45 = vld [vmem:[%s3525_s6 + $0x300] sm:$0xff] }
  0x43   : > { %853 = vmatpush1.bf16.msra.mxu1 %v2662_v52  ;;  %1334 = vmatpush1.bf16.msra.mxu0 %v2665_v53  ;;  %v1556_v52 = vld [vmem:[%s3525_s6 + $0x1a8] sm:$0xff] }
  0x44   : > { %854 = vmatprep.subr.bf16.mxu1 %v2670_v54  ;;  %1335 = vmatprep.subr.bf16.mxu0 %v2673_v55  ;;  %v2457_v53 = vpack.c.bf16 %v1556_v52, %v1555_v51  ;;  %v1539_v54 = vld [vmem:[%s3525_s6 + $0x120] sm:$0xff]  ;;  %v1540_v55 = vld [vmem:[%s3525_s6 + $0x128] sm:$0xff] }
  0x45   : > { %v1528_v51 = vld [vmem:[%s3525_s6 + $0xc8] sm:$0xff] }
  0x47   : > { %855 = vmatpush1.bf16.msra.mxu1 %v2668_v56  ;;  %1336 = vmatpush1.bf16.msra.mxu0 %v2671_v57  ;;  %v2459_v56 = vpack.c.bf16 %v1540_v55, %v1539_v54  ;;  %v1557_v57 = vld [vmem:[%s3525_s6 + $0x1b0] sm:$0xff]  ;;  %v1512_v54 = vld [vmem:[%s3525_s6 + $0x48] sm:$0xff] }
  0x48   : > { %856 = vmatprep.subr.bf16.mxu1 %v2676_v58  ;;  %1337 = vmatprep.subr.bf16.mxu0 %v2679_v59  ;;  %v1558_v58 = vld [vmem:[%s3525_s6 + $0x1b8] sm:$0xff]  ;;  %v1541_v59 = vld [vmem:[%s3525_s6 + $0x130] sm:$0xff] }
  0x4b   : > { %857 = vmatpush1.bf16.msra.mxu1 %v2674_v60  ;;  %1338 = vmatpush1.bf16.msra.mxu0 %v2677_v61  ;;  %v2461_v60 = vpack.c.bf16 %v1558_v58, %v1557_v57  ;;  %v1542_v61 = vld [vmem:[%s3525_s6 + $0x138] sm:$0xff] }
  0x4c   : > { %1288 = vmatprep.subr.bf16.mxu1 %v2682_v62  ;;  %1411 = vmatprep.subr.bf16.mxu0 %v2685_v63  ;;  %v1559_v62 = vld [vmem:[%s3525_s6 + $0x1c0] sm:$0xff]  ;;  %v1560_v63 = vld [vmem:[%s3525_s6 + $0x1c8] sm:$0xff]  ;;  %v1530_v57 = vld [vmem:[%s3525_s6 + $0xd8] sm:$0xff] }
  0x4e   : > { %2217 = vmatmul.mubr.msk.bf16.vlgmr.msra.gmra.mrb[8].mxu1 %vm721_vm0, %v2846_v23  ;;  %2270 = vmatmul.mubr.msk.bf16.vlgmr.msra.gmra.mrb[8].mxu0 %vm721_vm0, %v2912_v1  ;;  %v2713_v23 = vld [vmem:[%s2869_s13 + $0x60] ss:$40 sps:$4 sm:$0xff]  }
  0x4f   : > { %1289 = vmatpush1.bf16.msra.mxu1 %v2680_v2  ;;  %1412 = vmatpush1.bf16.msra.mxu0 %v2683_v3  ;;  %v2463_v2 = vpack.c.bf16 %v1542_v61, %v1541_v59  ;;  %v1543_v3 = vld [vmem:[%s3525_s6 + $0x140] sm:$0xff]  ;;  %v1513_v59 = vld [vmem:[%s3525_s6 + $0x50] sm:$0xff] }
  0x50   : > { %1290 = vmatprep.subr.bf16.mxu1 %v2688_v4  ;;  %1413 = vmatprep.subr.bf16.mxu0 %v2691_v5  ;;  %v1520_v4 = vld [vmem:[%s3525_s6 + $0x88] sm:$0xff]  ;;  %v2465_v5 = vpack.c.bf16 %v1560_v63, %v1559_v62  ;;  %v1531_v62 = vld [vmem:[%s3525_s6 + $0xe0] sm:$0xff] }
  0x51   : > { %1320 = vmatprep.mubr.bf16.mxu1 %v2756_v0  ;;  %1443 = vmatprep.mubr.bf16.mxu0 %v2756_v0  ;;  %v1532_v63 = vld [vmem:[%s3525_s6 + $0xe8] sm:$0xff] }
  0x53   : > { %1291 = vmatpush1.bf16.msra.mxu1 %v2686_v6  ;;  %1414 = vmatpush1.bf16.msra.mxu0 %v2689_v7  ;;  %v1544_v6 = vld [vmem:[%s3525_s6 + $0x148] sm:$0xff] }
  0x54   : > { %1292 = vmatprep.subr.bf16.mxu1 %v2694_v8  ;;  %1415 = vmatprep.subr.bf16.mxu0 %v2697_v9  ;;  %v1503_v8 = vld [vmem:[%s3525_s6] sm:$0xff]  ;;  %v1504_v9 = vld [vmem:[%s3525_s6 + $0x8] sm:$0xff] }
  0x57   : > { %1293 = vmatpush1.bf16.msra.mxu1 %v2692_v10  ;;  %1416 = vmatpush1.bf16.msra.mxu0 %v2695_v11  ;;  %v1561_v10 = vld [vmem:[%s3525_s6 + $0x1d0] sm:$0xff]  ;;  %v1562_v11 = vld [vmem:[%s3525_s6 + $0x1d8] sm:$0xff] }
  0x58   : > { %1294 = vmatprep.subr.bf16.mxu1 %v2700_v12  ;;  %1417 = vmatprep.subr.bf16.mxu0 %v2703_v13  ;;  %v2419_v12 = vpack.c.bf16 %v1504_v9, %v1503_v8  ;;  %v1521_v13 = vld [vmem:[%s3525_s6 + $0x90] sm:$0xff]  ;;  %v1518_v9 = vld [vmem:[%s3525_s6 + $0x78] sm:$0xff] }
  0x59   : > { %v1517_v8 = vld [vmem:[%s3525_s6 + $0x70] sm:$0xff] }
  0x5b   : > { %1295 = vmatpush1.bf16.msra.mxu1 %v2698_v14  ;;  %1418 = vmatpush1.bf16.msra.mxu0 %v2701_v15  ;;  %v1522_v14 = vld [vmem:[%s3525_s6 + $0x98] sm:$0xff]  ;;  %v2467_v15 = vpack.c.bf16 %v1544_v6, %v1543_v3  ;;  %v1516_v3 = vld [vmem:[%s3525_s6 + $0x68] sm:$0xff] }
  0x5c   : > { %1296 = vmatprep.subr.bf16.mxu1 %v2706_v16  ;;  %1419 = vmatprep.subr.bf16.mxu0 %v2709_v17  ;;  %v2421_v16 = vpack.c.bf16 %v1522_v14, %v1521_v13  ;;  %v1505_v17 = vld [vmem:[%s3525_s6 + $0x10] sm:$0xff]  ;;  %v1534_v6 = vld [vmem:[%s3525_s6 + $0xf8] sm:$0xff] }
  0x5f   : > { %1297 = vmatpush1.bf16.msra.mxu1 %v2704_v18  ;;  %1420 = vmatpush1.bf16.msra.mxu0 %v2707_v19  ;;  %v1506_v18 = vld [vmem:[%s3525_s6 + $0x18] sm:$0xff]  ;;  %v2469_v19 = vpack.c.bf16 %v1562_v11, %v1561_v10  ;;  %v2447_v10 = vpack.c.bf16 %v1518_v9, %v1517_v8  ;;  %v1583_v11 = vld [vmem:[%s3525_s6 + $0x280] sm:$0xff] }
  0x60   : > { %1370 = vmatprep.subr.bf16.mxu1 %v2712_v20  ;;  %v1545_v20 = vld [vmem:[%s3525_s6 + $0x150] sm:$0xff] }
  0x62   : > { %2269 = vmatmul.mubr.msk.bf16.vlgmr.msra.gmra.mrb[12].mxu1 %vm721_vm0, %v2912_v1  ;;  %2272 = vmatmul.mubr.msk.bf16.vlgmr.msra.gmra.mrb[12].mxu0 %vm721_vm0, %v2912_v1 }
  0x63   : > { %1371 = vmatpush1.bf16.msra.mxu1 %v2710_v21  ;;  %1402 = vmatprep.mubr.bf16.mxu1 %v2756_v0  ;;  %v1546_v21 = vld [vmem:[%s3525_s6 + $0x158] sm:$0xff] }
  0x64   : > { %1372 = vmatprep.subr.bf16.mxu1 %v2715_v22  ;;  %v2423_v22 = vpack.c.bf16 %v1506_v18, %v1505_v17 }
  0x67   : > { %1373 = vmatpush1.bf16.msra.mxu1 %v2713_v23  ;;  %v1563_v23 = vld [vmem:[%s3525_s6 + $0x1e0] sm:$0xff] }
  0x68   : > { %1374 = vmatprep.subr.bf16.mxu1 %v2718_v24  ;;  %v1564_v24 = vld [vmem:[%s3525_s6 + $0x1e8] sm:$0xff] }
  0x6b   : > { %1375 = vmatpush1.bf16.msra.mxu1 %v2716_v25  ;;  %v2471_v25 = vpack.c.bf16 %v1546_v21, %v1545_v20 }
  0x6c   : > { %1376 = vmatprep.subr.bf16.mxu1 %v2721_v26  ;;  %v2473_v26 = vpack.c.bf16 %v1564_v24, %v1563_v23 }
  0x6f   : > { %1377 = vmatpush1.bf16.msra.mxu1 %v2719_v27  ;;  %v1547_v27 = vld [vmem:[%s3525_s6 + $0x160] sm:$0xff] }
  0x70   : > { %1378 = vmatprep.subr.bf16.mxu1 %v2724_v28  ;;  %v1548_v28 = vld [vmem:[%s3525_s6 + $0x168] sm:$0xff] }
  0x73   : > { %1379 = vmatpush1.bf16.msra.mxu1 %v2722_v29  ;;  %v2475_v29 = vpack.c.bf16 %v1548_v28, %v1547_v27 }
  0x74   : > { %1452 = vmatprep.subr.bf16.mxu1 %v2727_v30  ;;  %v1523_v30 = vld [vmem:[%s3525_s6 + $0xa0] sm:$0xff] }
  0x76   : > { %2271 = vmatmul.mubr.msk.bf16.vlgmr.msra.gmra.mrb[16].mxu1 %vm721_vm0, %v2912_v1 }
  0x77   : > { %1453 = vmatpush1.bf16.msra.mxu1 %v2725_v31  ;;  %1484 = vmatprep.mubr.bf16.mxu1 %v2756_v0  ;;  %v2737_v0 = vld [vmem:[%s2869_s13 + $0x160] ss:$40 sps:$4 sm:$0xff]  }
  0x78   : > { %1454 = vmatprep.subr.bf16.mxu1 %v2730_v32  ;;  %v1524_v31 = vld [vmem:[%s3525_s6 + $0xa8] sm:$0xff]  ;;  %v1565_v32 = vld [vmem:[%s3525_s6 + $0x1f0] sm:$0xff] }
  0x7b   : > { %1455 = vmatpush1.bf16.msra.mxu1 %v2728_v33  ;;  %v2425_v33 = vpack.c.bf16 %v1524_v31, %v1523_v30  ;;  %v421_v30 = vlaneseq }
  0x7c   : > { %1456 = vmatprep.subr.bf16.mxu1 %v2733_v34  ;;  %v1566_v34 = vld [vmem:[%s3525_s6 + $0x1f8] sm:$0xff] }
  0x7d   : > { %v3185_v31 = vshrl.u32 %v421_v30, 7  ;;  %v1625_v30 = vld [vmem:[%s3525_s6 + $0x3d0] sm:$0xff] }
  0x7f   : > { %1457 = vmatpush1.bf16.msra.mxu1 %v2731_v35  ;;  %v1507_v35 = vld [vmem:[%s3525_s6 + $0x20] sm:$0xff]  ;;  %v447_v8 = vsub.s32 6, %v3185_v31 }
  0x80   : > { %1458 = vmatprep.subr.bf16.mxu1 %v2736_v36  ;;  %v1508_v36 = vld [vmem:[%s3525_s6 + $0x28] sm:$0xff] }
  0x83   : > { %1459 = vmatpush1.bf16.msra.mxu1 %v2734_v37  ;;  %v2477_v37 = vpack.c.bf16 %v1566_v34, %v1565_v32  ;;  %v431_v32 = vsub.s32 2, %v3185_v31  ;;  %v3200_v34 = vld [vmem:[%s3190_s9] sm:$0xff] }
  0x84   : > { %1460 = vmatprep.subr.bf16.mxu1 %v2739_v38  ;;  %v2427_v38 = vpack.c.bf16 %v1508_v36, %v1507_v35  ;;  %v3203_v35 = vld [vmem:[%s3195_s12] sm:$0xff] }
  0x85   : > { %v432_v36 = vrot.slane %v3203_v35, %v431_v32 }
  0x87   : > { %1461 = vmatpush1.bf16.msra.mxu1 %v2737_v0  ;;  %v2479_v0 = vpack.c.bf16 %v1550_v40, %v1549_v39 }
  0x88   : > { %2450 = vmatprep.subr.bf16.mxu1 %v2449_v41  ;;  %v1525_v41 = vld [vmem:[%s3525_s6 + $0xb0] sm:$0xff] }
  0x89   : > { %v2429_v44 = vpack.c.bf16 %v1526_v42, %v1525_v41 }
  0x8a   : > { %2273 = vmatmul.mubr.msk.bf16.vlgmr.msra.gmra.mrb[20].mxu1 %vm721_vm0, %v2912_v1  ;;  %v1519_v1 = vld [vmem:[%s3525_s6 + $0x80] sm:$0xff] }
  0x8b   : > { %2452 = vmatpush3.bf16.msra.mxu1 %v2451_v46  ;;  %v2417_v7 = vpack.c.bf16 %v1520_v4, %v1519_v1  ;;  %v1509_v46 = vld [vmem:[%s3525_s6 + $0x30] sm:$0xff]  ;;  %v2441_v1 = vpack.c.bf16 %v1532_v63, %v1531_v62  ;;  %v1620_v62 = vld [vmem:[%s3525_s6 + $0x3a8] sm:$0xff] }
  0x8c   : > { %2454 = vmatprep.subr.bf16.mxu1 %v2453_v47  ;;  %v1510_v47 = vld [vmem:[%s3525_s6 + $0x38] sm:$0xff] }
  0x8d   : > { %2418 = vmatprep.subr.bf16.mxu0 %v2417_v7  ;;  %v2431_v49 = vpack.c.bf16 %v1510_v47, %v1509_v46  ;;  %v1600_v46 = vld [vmem:[%s3525_s6 + $0x308] sm:$0xff] }
  0x8e   : > { %2420 = vmatpush3.bf16.msra.mxu0 %v2419_v12  ;;  %v1584_v12 = vld [vmem:[%s3525_s6 + $0x288] sm:$0xff] }
  0x8f   : > { %2456 = vmatpush3.bf16.msra.mxu1 %v2455_v50  ;;  %2422 = vmatprep.subr.bf16.mxu0 %v2421_v16  ;;  %v1527_v50 = vld [vmem:[%s3525_s6 + $0xc0] sm:$0xff]  ;;  %v2481_v13 = vpack.c.bf16 %v1584_v12, %v1583_v11  ;;  %v1606_v11 = vld [vmem:[%s3525_s6 + $0x338] sm:$0xff]  ;;  %v3260_v12 = vsub.s32 1, %v3185_v31 }
  0x90   : > { %2458 = vmatprep.subr.bf16.mxu1 %v2457_v53  ;;  %v2433_v52 = vpack.c.bf16 %v1528_v51, %v1527_v50  ;;  %v1511_v53 = vld [vmem:[%s3525_s6 + $0x40] sm:$0xff]  ;;  %v1617_v50 = vld [vmem:[%s3525_s6 + $0x390] sm:$0xff]  ;;  %v1618_v51 = vld [vmem:[%s3525_s6 + $0x398] sm:$0xff] }
  0x91   : > { %v2435_v55 = vpack.c.bf16 %v1512_v54, %v1511_v53 }
  0x92   : > { %2424 = vmatpush3.bf16.msra.mxu0 %v2423_v22 }
  0x93   : > { %2460 = vmatpush3.bf16.msra.mxu1 %v2459_v56  ;;  %2426 = vmatprep.subr.bf16.mxu0 %v2425_v33  ;;  %v1529_v56 = vld [vmem:[%s3525_s6 + $0xd0] sm:$0xff]  ;;  %v435_v33 = vsub.s32 3, %v3185_v31 }
  0x94   : > { %2462 = vmatprep.subr.bf16.mxu1 %v2461_v60  ;;  %v2437_v58 = vpack.c.bf16 %v1530_v57, %v1529_v56  ;;  %v1514_v60 = vld [vmem:[%s3525_s6 + $0x58] sm:$0xff]  ;;  %v2515_v57 = vpack.c.bf16 %v1600_v46, %v1599_v45  ;;  %v1568_v45 = vld [vmem:[%s3525_s6 + $0x208] sm:$0xff] }
  0x95   : > { %v2439_v61 = vpack.c.bf16 %v1514_v60, %v1513_v59  ;;  %v1000_v39 = vrot.slane %v3200_v34, %v435_v33  ;;  %v1601_v59 = vld [vmem:[%s3525_s6 + $0x310] sm:$0xff]  ;;  %v1602_v60 = vld [vmem:[%s3525_s6 + $0x318] sm:$0xff] }
  0x96   : > { %2428 = vmatpush3.bf16.msra.mxu0 %v2427_v38  ;;  %v436_v38 = vrot.slane %v3203_v35, %v435_v33  ;;  %v2519_v63 = vpack.c.bf16 %v1602_v60, %v1601_v59  ;;  %v428_v33 = vrot.slane %v3203_v35, %v3260_v12  ;;  %v1627_v59 = vld [vmem:[%s3525_s6 + $0x3e0] sm:$0xff]  ;;  %v1628_v60 = vld [vmem:[%s3525_s6 + $0x3e8] sm:$0xff] }
  0x97   : > { %2464 = vmatpush3.bf16.msra.mxu1 %v2463_v2  ;;  %2430 = vmatprep.subr.bf16.mxu0 %v2429_v44  ;;  %v1515_v2 = vld [vmem:[%s3525_s6 + $0x60] sm:$0xff] }
  0x98   : > { %2466 = vmatprep.subr.bf16.mxu1 %v2465_v5  ;;  %v2443_v4 = vpack.c.bf16 %v1516_v3, %v1515_v2  ;;  %v1533_v5 = vld [vmem:[%s3525_s6 + $0xf0] sm:$0xff]  ;;  %v1603_v2 = vld [vmem:[%s3525_s6 + $0x320] sm:$0xff]  ;;  %v1604_v3 = vld [vmem:[%s3525_s6 + $0x328] sm:$0xff] }
  0x99   : > { %v2445_v7 = vpack.c.bf16 %v1534_v6, %v1533_v5  ;;  %v1622_v5 = vld [vmem:[%s3525_s6 + $0x3b8] sm:$0xff]  ;;  %v3250_v6 = vsub.s32 0, %v3185_v31 }
  0x9a   : > { %2432 = vmatpush3.bf16.msra.mxu0 %v2431_v49 }
  0x9b   : > { %2468 = vmatpush3.bf16.msra.mxu1 %v2467_v15  ;;  %2434 = vmatprep.subr.bf16.mxu0 %v2433_v52 }
  0x9c   : > { %2470 = vmatprep.subr.bf16.mxu1 %v2469_v19 }
  0x9e   : > { %2436 = vmatpush3.bf16.msra.mxu0 %v2435_v55 }
  0x9f   : > { %2472 = vmatpush3.bf16.msra.mxu1 %v2471_v25  ;;  %2438 = vmatprep.subr.bf16.mxu0 %v2437_v58  ;;  %v2517_v58 = vpack.c.bf16 %v1618_v51, %v1617_v50 }
  0xa0   : > { %2474 = vmatprep.subr.bf16.mxu1 %v2473_v26 }
  0xa2   : > { %2440 = vmatpush3.bf16.msra.mxu0 %v2439_v61  ;;  %v1619_v61 = vld [vmem:[%s3525_s6 + $0x3a0] sm:$0xff] }
  0xa3   : > { %2476 = vmatpush3.bf16.msra.mxu1 %v2475_v29  ;;  %2442 = vmatprep.subr.bf16.mxu0 %v2441_v1  ;;  %v2521_v1 = vpack.c.bf16 %v1620_v62, %v1619_v61 }
  0xa4   : > { %2478 = vmatprep.subr.bf16.mxu1 %v2477_v37  ;;  %v996_v37 = vrot.slane %v3200_v34, %v431_v32  ;;  %v1626_v32 = vld [vmem:[%s3525_s6 + $0x3d8] sm:$0xff] }
  0xa6   : > { %2444 = vmatpush3.bf16.msra.mxu0 %v2443_v4  ;;  %v1621_v4 = vld [vmem:[%s3525_s6 + $0x3b0] sm:$0xff] }
  0xa7   : > { %2480 = vmatpush3.bf16.msra.mxu1 %v2479_v0  ;;  %2446 = vmatprep.subr.bf16.mxu0 %v2445_v7  ;;  %v2523_v7 = vpack.c.bf16 %v1604_v3, %v1603_v2  ;;  %v2525_v9 = vpack.c.bf16 %v1622_v5, %v1621_v4  ;;  %v1569_v5 = vld [vmem:[%s3525_s6 + $0x210] sm:$0xff] }
  0xa8   : > { %2514 = vmatprep.subr.bf16.mxu1 %v2513_v48 }
  0xaa   : > { %2448 = vmatpush3.bf16.msra.mxu0 %v2447_v10  ;;  %v1605_v10 = vld [vmem:[%s3525_s6 + $0x330] sm:$0xff] }
  0xab   : > { %2482 = vmatprep.subr.bf16.mxu0 %v2481_v13  ;;  %v451_v13 = vsub.s32 7, %v3185_v31 }
  0xf9   : > { %v3172_v14 = vpop.f32.mrb[0].mxu1  ;;  %v3174_v15 = vpop.f32.mrb[0].mxu0 }
  0xfa   : > { %v3176_v16 = vpop.f32.mrb[1].mxu1  ;;  %v3178_v17 = vpop.f32.mrb[1].mxu0 }
  0xfb   : > { %v763_v18 = vpop.f32.mrb[2].mxu1  ;;  %v845_v19 = vpop.f32.mrb[2].mxu0 }
  0xfc   : > { %v764_v20 = vpop.f32.mrb[3].mxu1  ;;  %v846_v21 = vpop.f32.mrb[3].mxu0  ;;  %v1623_v18 = vld [vmem:[%s3525_s6 + $0x3c0] sm:$0xff]  ;;  %v1624_v19 = vld [vmem:[%s3525_s6 + $0x3c8] sm:$0xff] }
  0xfd   : > { %v424_v20 = vrot.slane %v3203_v35, %v3250_v6  ;;  %v2527_v21 = vpack.c.bf16 %v1606_v11, %v1605_v10  ;;  %v1611_v10 = vld [vmem:[%s3525_s6 + $0x360] sm:$0xff]  ;;  %v1612_v11 = vld [vmem:[%s3525_s6 + $0x368] sm:$0xff] }
  0xff   : > { %v760_v46 = vadd.f32 %v3172_v14, %v424_v20  ;;  %v762_v14 = vadd.f32 %v3176_v16, %v428_v33  ;;  %v1630_v20 = vld [vmem:[%s3525_s6 + $0x3f8] sm:$0xff] }
 0x100   : > { %v1590_v33 = vld [vmem:[%s3525_s6 + $0x2b8] sm:$0xff] }
 0x10d   : > { %v800_v22 = vpop.f32.mrb[4].mxu1  ;;  %v3180_v23 = vpop.f32.mrb[4].mxu0 }
 0x10e   : > { %v802_v24 = vpop.f32.mrb[5].mxu1  ;;  %v3182_v25 = vpop.f32.mrb[5].mxu0  ;;  %v801_v41 = vadd.f32 %v800_v22, %v432_v36  ;;  %v1607_v22 = vld [vmem:[%s3525_s6 + $0x340] sm:$0xff]  ;;  %v452_v36 = vrot.slane %v3203_v35, %v451_v13 }
 0x10f   : > { %v804_v26 = vpop.f32.mrb[6].mxu1  ;;  %v927_v27 = vpop.f32.mrb[6].mxu0  ;;  %v803_v47 = vadd.f32 %v802_v24, %v436_v38  ;;  %v448_v24 = vrot.slane %v3203_v35, %v447_v8  ;;  %v1016_v38 = vrot.slane %v3200_v34, %v451_v13  ;;  %v1587_v13 = vld [vmem:[%s3525_s6 + $0x2a0] sm:$0xff] }
 0x110   : > { %v805_v28 = vpop.f32.mrb[7].mxu1  ;;  %v928_v29 = vpop.f32.mrb[7].mxu0  ;;  %v988_v26 = vrot.slane %v3200_v34, %v3250_v6  ;;  %v1012_v27 = vrot.slane %v3200_v34, %v447_v8 }
 0x111   : > { %v2529_v28 = vpack.c.bf16 %v1624_v19, %v1623_v18  ;;  %v1608_v29 = vld [vmem:[%s3525_s6 + $0x348] sm:$0xff]  ;;  %v1629_v19 = vld [vmem:[%s3525_s6 + $0x3f0] sm:$0xff] }
 0x112   : > { %v1588_v18 = vld [vmem:[%s3525_s6 + $0x2a8] sm:$0xff] }
 0x121   : > { %v3209_v40 = vpop.f32.mrb[8].mxu1  ;;  %v1363_v0 = vpop.f32.mrb[8].mxu0 }
 0x122   : > { %v1364_v42 = vadd.f32 %v1363_v0, %v996_v37  ;;  %v3211_v43 = vpop.f32.mrb[9].mxu1  ;;  %v1365_v44 = vpop.f32.mrb[9].mxu0  ;;  %v992_v37 = vrot.slane %v3200_v34, %v3260_v12 }
 0x123   : > { %v1366_v48 = vadd.f32 %v1365_v44, %v1000_v39  ;;  %v886_v49 = vpop.f32.mrb[10].mxu1  ;;  %v1367_v52 = vpop.f32.mrb[10].mxu0  ;;  %v1567_v44 = vld [vmem:[%s3525_s6 + $0x200] sm:$0xff] }
 0x124   : > { %v1495_v53 = vmul.f32 %v1364_v42, %v801_v41  ;;  %v887_v54 = vpop.f32.mrb[11].mxu1  ;;  %v1368_v55 = vpop.f32.mrb[11].mxu0  ;;  %v2531_v41 = vpack.c.bf16 %v1608_v29, %v1607_v22  ;;  %v2533_v42 = vpack.c.bf16 %v1626_v32, %v1625_v30  ;;  %v1609_v52 = vld [vmem:[%s3525_s6 + $0x350] sm:$0xff]  ;;  %v2483_v3 = vpack.c.bf16 %v1568_v45, %v1567_v44  ;;  %v1614_v30 = vld [vmem:[%s3525_s6 + $0x378] sm:$0xff]  ;;  %v1591_v44 = vld [vmem:[%s3525_s6 + $0x2c0] sm:$0xff] }
 0x125   : > { %v1496_v56 = vmul.f32 %v1366_v48, %v803_v47  ;;  %v883_v47 = vadd.f32 %v3209_v40, %v448_v24  ;;  %v1585_v54 = vld [vmem:[%s3525_s6 + $0x290] sm:$0xff]  ;;  %v885_v40 = vadd.f32 %v3211_v43, %v452_v36  ;;  %v2539_v22 = vpack.c.bf16 %v1612_v11, %v1611_v10  ;;  %v1571_v24 = vld [vmem:[%s3525_s6 + $0x220] sm:$0xff]  ;;  %v1592_v45 = vld [vmem:[%s3525_s6 + $0x2c8] sm:$0xff] }
 0x126   : > { %v1613_v29 = vld [vmem:[%s3525_s6 + $0x370] sm:$0xff]  ;;  %v1582_v10 = vld [vmem:[%s3525_s6 + $0x278] sm:$0xff] }
 0x127   : > { %1791 = vmatprep.mubr.f32.mxu1 %v1496_v56  ;;  %v1589_v32 = vld [vmem:[%s3525_s6 + $0x2b0] sm:$0xff] }
 0x128   : > { %1792 = vmatmul.mubr.f32.vlgmr.msra.gmra.mrb[24].mxu1 %v1495_v53  ;;  %v1610_v53 = vld [vmem:[%s3525_s6 + $0x358] sm:$0xff] }
 0x129   : > { %2516 = vmatpush3.bf16.msra.mxu1 %v2515_v57  ;;  %v2535_v4 = vpack.c.bf16 %v1610_v53, %v1609_v52  ;;  %v1593_v53 = vld [vmem:[%s3525_s6 + $0x2d0] sm:$0xff] }
 0x12a   : > { %2518 = vmatprep.subr.bf16.mxu1 %v2517_v58  ;;  %v1586_v58 = vld [vmem:[%s3525_s6 + $0x298] sm:$0xff] }
 0x12b   : > { %v2485_v8 = vpack.c.bf16 %v1586_v58, %v1585_v54  ;;  %v1594_v54 = vld [vmem:[%s3525_s6 + $0x2d8] sm:$0xff] }
 0x12c   : > { %v1578_v58 = vld [vmem:[%s3525_s6 + $0x258] sm:$0xff] }
 0x12d   : > { %2520 = vmatpush3.bf16.msra.mxu1 %v2519_v63 }
 0x12e   : > { %2522 = vmatprep.subr.bf16.mxu1 %v2521_v1 }
 0x131   : > { %2524 = vmatpush3.bf16.msra.mxu1 %v2523_v7  ;;  %v1570_v7 = vld [vmem:[%s3525_s6 + $0x218] sm:$0xff] }
 0x132   : > { %2526 = vmatprep.subr.bf16.mxu1 %v2525_v9  ;;  %v2537_v9 = vpack.c.bf16 %v1628_v60, %v1627_v59 }
 0x135   : > { %2528 = vmatpush3.bf16.msra.mxu1 %v2527_v21  ;;  %v1322_v39 = vpop.f32.mrb[12].mxu1  ;;  %v1445_v0 = vpop.f32.mrb[12].mxu0  ;;  %v2487_v21 = vpack.c.bf16 %v1570_v7, %v1569_v5  ;;  %v1598_v5 = vld [vmem:[%s3525_s6 + $0x2f8] sm:$0xff] }
 0x136   : > { %v1323_v48 = vadd.f32 %v1322_v39, %v988_v26  ;;  %v1446_v49 = vadd.f32 %v1445_v0, %v1012_v27  ;;  %v1324_v50 = vpop.f32.mrb[13].mxu1  ;;  %v1447_v51 = vpop.f32.mrb[13].mxu0  ;;  %2530 = vmatprep.subr.bf16.mxu1 %v2529_v28  ;;  %v2489_v26 = vpack.c.bf16 %v1588_v18, %v1587_v13  ;;  %v2541_v27 = vpack.c.bf16 %v1630_v20, %v1629_v19  ;;  %v1572_v28 = vld [vmem:[%s3525_s6 + $0x228] sm:$0xff]  ;;  %v1573_v0 = vld [vmem:[%s3525_s6 + $0x230] sm:$0xff]  ;;  %v1631_v13 = vld [vmem:[%s3525_s6 + $0x400] sm:$0xff] }
 0x137   : > { %v1325_v55 = vadd.f32 %v1324_v50, %v992_v37  ;;  %v1448_v56 = vadd.f32 %v1447_v51, %v1016_v38  ;;  %v1326_v57 = vpop.f32.mrb[14].mxu1  ;;  %v1449_v61 = vpop.f32.mrb[14].mxu0  ;;  %v2491_v36 = vpack.c.bf16 %v1572_v28, %v1571_v24  ;;  %v2543_v37 = vpack.c.bf16 %v1614_v30, %v1613_v29  ;;  %v1576_v50 = vld [vmem:[%s3525_s6 + $0x248] sm:$0xff]  ;;  %v1634_v28 = vld [vmem:[%s3525_s6 + $0x418] sm:$0xff] }
 0x138   : > { %v1493_v62 = vmul.f32 %v1323_v48, %v760_v46  ;;  %v1499_v16 = vmul.f32 %v1446_v49, %v883_v47  ;;  %v1327_v63 = vpop.f32.mrb[15].mxu1  ;;  %v1450_v43 = vpop.f32.mrb[15].mxu0  ;;  %v439_v38 = vsub.s32 4, %v3185_v31  ;;  %v2493_v39 = vpack.c.bf16 %v1590_v33, %v1589_v32  ;;  %v1595_v61 = vld [vmem:[%s3525_s6 + $0x2e0] sm:$0xff]  ;;  %v1632_v18 = vld [vmem:[%s3525_s6 + $0x408] sm:$0xff] }
 0x139   : > { %v1494_v1 = vmul.f32 %v1325_v55, %v762_v14  ;;  %v1500_v2 = vmul.f32 %v1448_v56, %v885_v40  ;;  %2532 = vmatpush3.bf16.msra.mxu1 %v2531_v41  ;;  %v1574_v41 = vld [vmem:[%s3525_s6 + $0x238] sm:$0xff]  ;;  %v2497_v49 = vpack.c.bf16 %v1592_v45, %v1591_v44  ;;  %v418_v19 = vld [vmem:[%s3195_s12 + $0x8] sm:$0x3]  ;;  %v2757_v24 = vmov 0.0|0.0  }
 0x13a   : > { %2534 = vmatprep.subr.bf16.mxu1 %v2533_v42  ;;  %v443_v42 = vsub.s32 5, %v3185_v31  ;;  %v2495_v46 = vpack.c.bf16 %v1574_v41, %v1573_v0  ;;  %v440_v47 = vrot.slane %v3203_v35, %v439_v38  ;;  %v1004_v48 = vrot.slane %v3200_v34, %v439_v38  ;;  %v1575_v31 = vld [vmem:[%s3525_s6 + $0x240] sm:$0xff]  ;;  %v982_v20 = vld [vmem:[%s3190_s9 + $0x8] sm:$0x3] }
 0x13b   : > { %1721 = vmatprep.mubr.f32.mxu0 %v1494_v1  ;;  %1931 = vmatprep.mubr.f32.mxu1 %v1500_v2  ;;  %v2499_v40 = vpack.c.bf16 %v1576_v50, %v1575_v31  ;;  %v460_v29 = vrot.slane %v418_v19, %v3260_v12  ;;  %v1024_v30 = vrot.slane %v982_v20, %v3260_v12  ;;  %v1635_v38 = vld [vmem:[%s3525_s6 + $0x420] sm:$0xff]  ;;  %v1641_v50 = vld [vmem:[%s3525_s6 + $0x450] sm:$0xff] }
 0x13c   : > { %1722 = vmatmul.mubr.f32.vlgmr.msra.gmra.mrb[16].mxu0 %v1493_v62  ;;  %v444_v51 = vrot.slane %v3203_v35, %v443_v42  ;;  %v1008_v52 = vrot.slane %v3200_v34, %v443_v42  ;;  %v842_v55 = vadd.f32 %v3174_v15, %v440_v47  ;;  %v2501_v35 = vpack.c.bf16 %v1594_v54, %v1593_v53  ;;  %v1577_v34 = vld [vmem:[%s3525_s6 + $0x250] sm:$0xff]  ;;  %v1596_v15 = vld [vmem:[%s3525_s6 + $0x2e8] sm:$0xff]  ;;  %v1638_v47 = vld [vmem:[%s3525_s6 + $0x438] sm:$0xff] }
 0x13d   : > { %2484 = vmatpush3.bf16.msra.mxu0 %v2483_v3  ;;  %2536 = vmatpush3.bf16.msra.mxu1 %v2535_v4  ;;  %v2503_v1 = vpack.c.bf16 %v1578_v58, %v1577_v34  ;;  %v2505_v2 = vpack.c.bf16 %v1596_v15, %v1595_v61  ;;  %v1580_v3 = vld [vmem:[%s3525_s6 + $0x268] sm:$0xff]  ;;  %v1597_v4 = vld [vmem:[%s3525_s6 + $0x2f0] sm:$0xff]  ;;  %v926_v12 = vadd.f32 %v3182_v25, %v460_v29  ;;  %v1643_v53 = vld [vmem:[%s3525_s6 + $0x460] sm:$0xff] }
 0x13e   : > { %2486 = vmatprep.subr.bf16.mxu0 %v2485_v8  ;;  %2538 = vmatprep.subr.bf16.mxu1 %v2537_v9  ;;  %v844_v59 = vadd.f32 %v3178_v17, %v444_v51  ;;  %v1579_v17 = vld [vmem:[%s3525_s6 + $0x260] sm:$0xff]  ;;  %v2509_v8 = vpack.c.bf16 %v1598_v5, %v1597_v4  ;;  %v1581_v9 = vld [vmem:[%s3525_s6 + $0x270] sm:$0xff]  ;;  %v1642_v51 = vld [vmem:[%s3525_s6 + $0x458] sm:$0xff] }
 0x13f   : > { %v2507_v7 = vpack.c.bf16 %v1580_v3, %v1579_v17  ;;  %v2511_v11 = vpack.c.bf16 %v1582_v10, %v1581_v9  ;;  %v1644_v54 = vld [vmem:[%s3525_s6 + $0x468] sm:$0xff]  ;;  %v1649_v58 = vld [vmem:[%s3525_s6 + $0x490] sm:$0xff]  ;;  %v1651_v61 = vld [vmem:[%s3525_s6 + $0x4a0] sm:$0xff] }
 0x140   : > { %v1652_v15 = vld [vmem:[%s3525_s6 + $0x4a8] sm:$0xff] }
 0x141   : > { %2488 = vmatpush3.bf16.msra.mxu0 %v2487_v21  ;;  %2540 = vmatpush3.bf16.msra.mxu1 %v2539_v22  ;;  %v2546_v21 = vpack.c.bf16 %v1632_v18, %v1631_v13  ;;  %v456_v22 = vrot.slane %v418_v19, %v3250_v6 }
 0x142   : > { %2490 = vmatprep.subr.bf16.mxu0 %v2489_v26  ;;  %2542 = vmatprep.subr.bf16.mxu1 %v2541_v27  ;;  %v1020_v26 = vrot.slane %v982_v20, %v3250_v6  ;;  %v1633_v27 = vld [vmem:[%s3525_s6 + $0x410] sm:$0xff] }
 0x143   : > { %v2549_v33 = vpack.c.bf16 %v1634_v28, %v1633_v27 }
 0x145   : > { %2492 = vmatpush3.bf16.msra.mxu0 %v2491_v36  ;;  %2544 = vmatpush3.bf16.msra.mxu1 %v2543_v37  ;;  %v924_v36 = vadd.f32 %v3180_v23, %v456_v22 }
 0x146   : > { %2494 = vmatprep.subr.bf16.mxu0 %v2493_v39  ;;  %v1636_v39 = vld [vmem:[%s3525_s6 + $0x428] sm:$0xff] }
 0x147   : > { %v2552_v45 = vpack.c.bf16 %v1636_v39, %v1635_v38 }
 0x148   : > { %1932 = vmatmul.mubr.f32.vlgmr.msra.gmra.mrb[26].mxu1 %v1499_v16 }
 0x149   : > { %2496 = vmatpush3.bf16.msra.mxu0 %v2495_v46  ;;  %v1404_v14 = vpop.f32.mrb[16].mxu1  ;;  %v1637_v46 = vld [vmem:[%s3525_s6 + $0x430] sm:$0xff] }
 0x14a   : > { %v1405_v56 = vadd.f32 %v1404_v14, %v1004_v48  ;;  %v1406_v57 = vpop.f32.mrb[17].mxu1  ;;  %2498 = vmatprep.subr.bf16.mxu0 %v2497_v49  ;;  %v2555_v25 = vpack.c.bf16 %v1638_v47, %v1637_v46  ;;  %v1639_v48 = vld [vmem:[%s3525_s6 + $0x440] sm:$0xff]  ;;  %v1640_v49 = vld [vmem:[%s3525_s6 + $0x448] sm:$0xff]  ;;  %v2564_v14 = vpack.c.bf16 %v1644_v54, %v1643_v53 }
 0x14b   : > { %v1407_v60 = vadd.f32 %v1406_v57, %v1008_v52  ;;  %v1408_v62 = vpop.f32.mrb[18].mxu1  ;;  %v2558_v31 = vpack.c.bf16 %v1640_v49, %v1639_v48  ;;  %v2561_v52 = vpack.c.bf16 %v1642_v51, %v1641_v50  ;;  %v1647_v57 = vld [vmem:[%s3525_s6 + $0x480] sm:$0xff] }
 0x14c   : > { %v1497_v16 = vmul.f32 %v1405_v56, %v842_v55  ;;  %v1409_v63 = vpop.f32.mrb[19].mxu1  ;;  %v1646_v55 = vld [vmem:[%s3525_s6 + $0x478] sm:$0xff]  ;;  %v2576_v62 = vpack.c.bf16 %v1652_v15, %v1651_v61 }
 0x14d   : > { %v1498_v43 = vmul.f32 %v1407_v60, %v844_v59  ;;  %2500 = vmatpush3.bf16.msra.mxu0 %v2499_v40  ;;  %v1645_v40 = vld [vmem:[%s3525_s6 + $0x470] sm:$0xff]  ;;  %v1650_v59 = vld [vmem:[%s3525_s6 + $0x498] sm:$0xff] }
 0x14e   : > { %2502 = vmatprep.subr.bf16.mxu0 %v2501_v35  ;;  %v2567_v56 = vpack.c.bf16 %v1646_v55, %v1645_v40  ;;  %v1648_v35 = vld [vmem:[%s3525_s6 + $0x488] sm:$0xff]  ;;  %v2573_v60 = vpack.c.bf16 %v1650_v59, %v1649_v58 }
 0x14f   : > { %1861 = vmatprep.mubr.f32.mxu0 %v1498_v43  ;;  %v2570_v34 = vpack.c.bf16 %v1648_v35, %v1647_v57 }
 0x151   : > { %2504 = vmatpush3.bf16.msra.mxu0 %v2503_v1 }
 0x152   : > { %2506 = vmatprep.subr.bf16.mxu0 %v2505_v2 }
 0x155   : > { %2508 = vmatpush3.bf16.msra.mxu0 %v2507_v7 }
 0x156   : > { %2510 = vmatprep.subr.bf16.mxu0 %v2509_v8 }
 0x159   : > { %2512 = vmatpush3.bf16.msra.mxu0 %v2511_v11 }
 0x15a   : > { %2545 = vmatprep.subr.bf16.mxu0 %v2757_v24 }
 0x15c   : > { %1862 = vmatmul.mubr.f32.vlgmr.msra.gmra.mrb[18].mxu0 %v1497_v16 }
 0x15d   : > { %2547 = vmatpush1.bf16.msra.mxu0 %v2546_v21  ;;  %v1486_v32 = vpop.f32.mrb[20].mxu1 }
 0x15e   : > { %v1487_v37 = vadd.f32 %v1486_v32, %v1020_v26  ;;  %v1488_v6 = vpop.f32.mrb[21].mxu1  ;;  %2548 = vmatprep.subr.bf16.mxu0 %v2757_v24 }
 0x15f   : > { %v1489_v0 = vadd.f32 %v1488_v6, %v1024_v30  ;;  %v1490_v41 = vpop.f32.mrb[22].mxu1 }
 0x160   : > { %v1501_v42 = vmul.f32 %v1487_v37, %v924_v36  ;;  %v1491_v44 = vpop.f32.mrb[23].mxu1 }
 0x161   : > { %v1502_v23 = vmul.f32 %v1489_v0, %v926_v12  ;;  %2550 = vmatpush1.bf16.msra.mxu0 %v2549_v33 }
 0x162   : > { %2551 = vmatprep.subr.bf16.mxu0 %v2757_v24 }
 0x163   : > { %2274 = vmatprep.mubr.msk.f32.mxu0 %vm1653_vm1, %v1502_v23 }
 0x165   : > { %2553 = vmatpush1.bf16.msra.mxu0 %v2552_v45 }
 0x166   : > { %2554 = vmatprep.subr.bf16.mxu0 %v2757_v24 }
 0x169   : > { %2556 = vmatpush1.bf16.msra.mxu0 %v2555_v25 }
 0x16a   : > { %2557 = vmatprep.subr.bf16.mxu0 %v2757_v24 }
 0x16d   : > { %2559 = vmatpush1.bf16.msra.mxu0 %v2558_v31 }
 0x16e   : > { %2560 = vmatprep.subr.bf16.mxu0 %v2757_v24 }
 0x171   : > { %2562 = vmatpush1.bf16.msra.mxu0 %v2561_v52 }
 0x172   : > { %2563 = vmatprep.subr.bf16.mxu0 %v2757_v24 }
 0x175   : > { %2565 = vmatpush1.bf16.msra.mxu0 %v2564_v14 }
 0x176   : > { %2566 = vmatprep.subr.bf16.mxu0 %v2757_v24 }
 0x179   : > { %2568 = vmatpush1.bf16.msra.mxu0 %v2567_v56 }
 0x17a   : > { %2569 = vmatprep.subr.bf16.mxu0 %v2757_v24 }
 0x17d   : > { %2571 = vmatpush1.bf16.msra.mxu0 %v2570_v34 }
 0x17e   : > { %2572 = vmatprep.subr.bf16.mxu0 %v2757_v24 }
 0x181   : > { %2574 = vmatpush1.bf16.msra.mxu0 %v2573_v60 }
 0x182   : > { %2575 = vmatprep.subr.bf16.mxu0 %v2757_v24 }
 0x185   : > { %2577 = vmatpush1.bf16.msra.mxu0 %v2576_v62 }
 0x188   : > { %2002 = vmatmul.mubr.f32.vlgmr.msra.gmra.mrb[20].mxu0 %v1501_v42 }
 0x1fb   : > { %v2344_v16 = vpop.f32.mrb[24].mxu1 }
 0x1fc   : > { %v2345_v63 = vpop.f32.mrb[25].mxu1 }
 0x1fd   : > { %v2346_v43 = vadd.f32 %v2345_v63, %v2344_v16 }
 0x20f   : > { %v2309_v1 = vpop.f32.mrb[16].mxu0 }
 0x210   : > { %v2310_v2 = vpop.f32.mrb[17].mxu0 }
 0x211   : > { %v2311_v17 = vadd.f32 %v2310_v2, %v2309_v1 }
 0x213   : > { %v1794_v3 = vadd.f32 %v2346_v43, %v2311_v17 }
 0x21b   : > { %v2414_v4 = vpop.f32.mrb[26].mxu1 }
 0x21c   : > { %v2415_v5 = vpop.f32.mrb[27].mxu1 }
 0x21d   : > { %v2416_v7 = vadd.f32 %v2415_v5, %v2414_v4 }
 0x22f   : > { %v2379_v8 = vpop.f32.mrb[18].mxu0 }
 0x230   : > { %v2380_v9 = vpop.f32.mrb[19].mxu0 }
 0x231   : > { %v2381_v10 = vadd.f32 %v2380_v9, %v2379_v8 }
 0x233   : > { %v1864_v11 = vadd.f32 %v2381_v10, %v1794_v3 }
 0x235   : > { %v1934_v13 = vadd.f32 %v2416_v7, %v1864_v11 }
 0x25b   : > { %v2003_v18 = vpop.f32.mrb[20].mxu0 }
 0x25c   : > { %v2004_v19 = vadd.f32 %v2003_v18, %v1934_v13  ;;  %v2005_v20 = vpop.f32.mrb[21].mxu0 }
 0x25e   : > { %v2007_v21 = vmax.f32 %v2004_v19, 0.0  ;;  %v2015_v22 = vsub.f32 0.0, %v2004_v19 }
 0x260   : > { %2740 = vrsqrt.f32 %v2007_v21  ;;  %v2016_v24 = vmax.f32 %v2015_v22, 0.0  ;;  %vm2010_vm2 = vcmp.eq.f32.partialorder %v2007_v21, inf  ;;  %v2013_v32 = vand.u32 2147483648, %v2007_v21 }
 0x261   : > { %vm2012_vm4 = vcmp.eq.f32.partialorder %v2007_v21, 0.0 }
 0x262   : > { %2742 = vrsqrt.f32 %v2016_v24  ;;  %vm2019_vm3 = vcmp.eq.f32.partialorder %v2016_v24, inf  ;;  %v2022_v33 = vand.u32 2147483648, %v2016_v24  ;;  %vm2021_vm5 = vcmp.eq.f32.partialorder %v2016_v24, 0.0 }
 0x26a   : > { %v2741_v26 = vpop.eup %2740 }
 0x26b   : > { %v2009_v27 = vmul.f32 %v2741_v26, %v2007_v21 }
 0x26c   : > { %v2743_v28 = vpop.eup %2742 }
 0x26d   : > { %v2011_v29 = vsel %vm2010_vm2, %v2007_v21, %v2009_v27  ;;  %v2018_v30 = vmul.f32 %v2743_v28, %v2016_v24 }
 0x26e   : > { %v2014_v37 = vsel %vm2012_vm4, %v2013_v32, %v2011_v29 }
 0x26f   : > { %v2020_v36 = vsel %vm2019_vm3, %v2016_v24, %v2018_v30 }
 0x270   : > { %v2023_v6 = vsel %vm2021_vm5, %v2022_v33, %v2020_v36 }
 0x271   : > { %v2024_v38 = vsub.f32 %v2014_v37, %v2023_v6 }
 0x273   : > { %v2025_v39 = vmul.f32 %v2024_v38, %v2024_v38 }
 0x275   : > { %v2027_v12 = vsel %vm2026_vm6, %v2025_v39, 0.0 }
 0x276   : > { %2028 = vadd.xlane.f32.xlu0 %v2027_v12 }
 0x303   : > { %v2029_v0 = vpop.xlane.xlu0 %2028 }
 0x304   : > { %2744 = vrsqrt.f32 %v2029_v0  ;;  %vm2032_vm7 = vcmp.eq.f32.partialorder %v2029_v0, inf  ;;  %v2035_v44 = vand.u32 2147483648, %v2029_v0  ;;  %vm2034_vm8 = vcmp.eq.f32.partialorder %v2029_v0, 0.0 }
 0x30e   : > { %v2745_v41 = vpop.eup %2744 }
 0x30f   : > { %v2031_v42 = vmul.f32 %v2745_v41, %v2029_v0 }
 0x311   : > { %v2033_v23 = vsel %vm2032_vm7, %v2029_v0, %v2031_v42 }
 0x312   : > { %v2036_v45 = vsel %vm2034_vm8, %v2035_v44, %v2033_v23 }
 0x313   : > { %v2037_v46 = vmax.f32 %v2036_v45, 1e-12 }
 0x315   : > { %2746 = vrcp.f32 %v2037_v46 }
 0x31f   : > { %v2747_v47 = vpop.eup %2746 }
 0x320   : > { %v2039_v25 = vmul.f32 %v2747_v47, %v2024_v38 }
 0x322   : > { %2040 = vst.msk [vmem:[%s364_s26] sm:$0x3f] %vm2026_vm6, %v2039_v25 }
 0x323 PF: > { %s17_s24 = sadd.s32 1, %s2754_s24  }
 0x324   : > { %p14_p4 = scmp.ge.s32.totalorder %s17_s24, 22  }
 0x326   :  { %16 = sbr.rel (!%p14_p4) target bundleno = 1 (0x1), region = 93 }

// kernel: hga_forward.34
= control target key start
LH: loop header
LB: loop body
LE: loop exit
PB: predicated region body
PF: predicated region fallthrough
CT: control target
= control target key end

     0   :  { %v1555_v1 = vmov 0.0   ;;  %vm1556_vm0 = vmmov 0   ;;  %vm873_vm1 = vcmask 523264   ;;  %s1910_s1 = inlined_call_operand.vmem [shape: bf16[1600,128], index: 1, kind: input, shape index: {}]   ;;  %s1911_s0 = inlined_call_operand.vmem [shape: bf16[6,1600], index: 0, kind: input, shape index: {}]   ;;  %s1912_s2 = inlined_call_operand.vmem [shape: f32[1,128], index: 2, kind: input, shape index: {}]   ;;  %s1913_s3 = inlined_call_operand.vmem [shape: f32[6,128], index: 3, kind: output, shape index: {}]  }
   0x1   :  { %v1442_v0 = vld [vmem:[%s1910_s1 + $0x40] sm:$0xff]   ;;  %19 = vst [vmem:[#allocation2] sm:$0x3f] %v1555_v1  ;;  %v1446_v5 = vld [vmem:[%s1910_s1 + $0x48] sm:$0xff]   ;;  %v1450_v9 = vld [vmem:[%s1910_s1 + $0x50] sm:$0xff]  }
   0x2   :  { %v1443_v2 = vld [vmem:[%s1910_s1 + $0xc0] sm:$0xff]   ;;  %1291 = vmatprep.subr.bf16.mxu0 %v1442_v0  ;;  %v1447_v6 = vld [vmem:[%s1910_s1 + $0xc8] sm:$0xff]   ;;  %v1451_v10 = vld [vmem:[%s1910_s1 + $0xd0] sm:$0xff]  }
   0x3   :  { %v1444_v3 = vld [vmem:[%s1910_s1] sm:$0xff]   ;;  %1313 = vmatprep.subr.bf16.mxu1 %v1443_v2  ;;  %v1448_v7 = vld [vmem:[%s1910_s1 + $0x8] sm:$0xff]   ;;  %v1452_v11 = vld [vmem:[%s1910_s1 + $0x10] sm:$0xff]  }
   0x4   :  { %v1445_v4 = vld [vmem:[%s1910_s1 + $0x80] sm:$0xff]   ;;  %1292 = vmatpush3.bf16.msra.mxu0 %v1444_v3  ;;  %v1449_v8 = vld [vmem:[%s1910_s1 + $0x88] sm:$0xff]   ;;  %v1453_v12 = vld [vmem:[%s1910_s1 + $0x90] sm:$0xff]  }
   0x5   :  { %1314 = vmatpush3.bf16.msra.mxu1 %v1445_v4  ;;  %1293 = vmatprep.subr.bf16.mxu0 %v1446_v5  ;;  %v1454_v13 = vld [vmem:[%s1910_s1 + $0x58] sm:$0xff]   ;;  %v1458_v17 = vld [vmem:[%s1910_s1 + $0x60] sm:$0xff]   ;;  %v1462_v21 = vld [vmem:[%s1910_s1 + $0x68] sm:$0xff]  }
   0x6   :  { %1315 = vmatprep.subr.bf16.mxu1 %v1447_v6  ;;  %v1455_v14 = vld [vmem:[%s1910_s1 + $0xd8] sm:$0xff]   ;;  %v1459_v18 = vld [vmem:[%s1910_s1 + $0xe0] sm:$0xff]   ;;  %v1463_v22 = vld [vmem:[%s1910_s1 + $0xe8] sm:$0xff]  }
   0x7   :  { %v1456_v15 = vld [vmem:[%s1910_s1 + $0x18] sm:$0xff]   ;;  %v1460_v19 = vld [vmem:[%s1910_s1 + $0x20] sm:$0xff]   ;;  %v1464_v23 = vld [vmem:[%s1910_s1 + $0x28] sm:$0xff]  }
   0x8   :  { %1294 = vmatpush3.bf16.msra.mxu0 %v1448_v7  ;;  %v1457_v16 = vld [vmem:[%s1910_s1 + $0x98] sm:$0xff]   ;;  %v1461_v20 = vld [vmem:[%s1910_s1 + $0xa0] sm:$0xff]   ;;  %v1465_v24 = vld [vmem:[%s1910_s1 + $0xa8] sm:$0xff]  }
   0x9   :  { %1316 = vmatpush3.bf16.msra.mxu1 %v1449_v8  ;;  %1295 = vmatprep.subr.bf16.mxu0 %v1450_v9  ;;  %v1466_v25 = vld [vmem:[%s1910_s1 + $0x70] sm:$0xff]   ;;  %v1470_v29 = vld [vmem:[%s1910_s1 + $0x78] sm:$0xff]   ;;  %v21_v33 = vld [vmem:[%s1911_s0] sm:$0x77] }
   0xa   :  { %1317 = vmatprep.subr.bf16.mxu1 %v1451_v10  ;;  %v1467_v26 = vld [vmem:[%s1910_s1 + $0xf0] sm:$0xff]   ;;  %v1471_v30 = vld [vmem:[%s1910_s1 + $0xf8] sm:$0xff]   ;;  %v22_v34 = vld [vmem:[%s1911_s0 + $0x8] sm:$0x77]  ;;  %v1176_v35 = vcombine.low %v21_v33, %v21_v33  ;;  %v1177_v36 = vcombine.high %v21_v33, %v21_v33 }
   0xb   :  { %v1468_v27 = vld [vmem:[%s1910_s1 + $0x30] sm:$0xff]   ;;  %v1472_v31 = vld [vmem:[%s1910_s1 + $0x38] sm:$0xff]   ;;  %v1178_v37 = vcombine.low %v22_v34, %v22_v34  ;;  %v1179_v38 = vcombine.high %v22_v34, %v22_v34  ;;  %v1478_v39 = vld [vmem:[%s1910_s1 + $0x140] sm:$0xff]  }
   0xc   :  { %1296 = vmatpush3.bf16.msra.mxu0 %v1452_v11  ;;  %v1469_v28 = vld [vmem:[%s1910_s1 + $0xb0] sm:$0xff]   ;;  %v1473_v32 = vld [vmem:[%s1910_s1 + $0xb8] sm:$0xff]   ;;  %v1479_v40 = vld [vmem:[%s1910_s1 + $0x100] sm:$0xff]   ;;  %909 = vmatprep.mubr.bf16.mxu0 %v1177_v36 }
   0xd   :  { %1318 = vmatpush3.bf16.msra.mxu1 %v1453_v12  ;;  %1297 = vmatprep.subr.bf16.mxu0 %v1454_v13  ;;  %v1480_v41 = vld [vmem:[%s1910_s1 + $0x1c0] sm:$0xff]   ;;  %v1482_v43 = vld [vmem:[%s1910_s1 + $0x148] sm:$0xff]   ;;  %v1486_v47 = vld [vmem:[%s1910_s1 + $0x150] sm:$0xff]  }
   0xe   :  { %1319 = vmatprep.subr.bf16.mxu1 %v1455_v14  ;;  %949 = vmatprep.mubr.bf16.mxu1 %v1179_v38  ;;  %v1481_v42 = vld [vmem:[%s1910_s1 + $0x180] sm:$0xff]   ;;  %v1483_v44 = vld [vmem:[%s1910_s1 + $0x108] sm:$0xff]   ;;  %v1487_v48 = vld [vmem:[%s1910_s1 + $0x110] sm:$0xff]  }
   0xf   :  { %v1484_v45 = vld [vmem:[%s1910_s1 + $0x1c8] sm:$0xff]   ;;  %v1488_v49 = vld [vmem:[%s1910_s1 + $0x1d0] sm:$0xff]   ;;  %v1490_v51 = vld [vmem:[%s1910_s1 + $0x158] sm:$0xff]  }
  0x10   :  { %1298 = vmatpush3.bf16.msra.mxu0 %v1456_v15  ;;  %v1485_v46 = vld [vmem:[%s1910_s1 + $0x188] sm:$0xff]   ;;  %v1489_v50 = vld [vmem:[%s1910_s1 + $0x190] sm:$0xff]   ;;  %v1491_v52 = vld [vmem:[%s1910_s1 + $0x118] sm:$0xff]  }
  0x11   :  { %1320 = vmatpush3.bf16.msra.mxu1 %v1457_v16  ;;  %1299 = vmatprep.subr.bf16.mxu0 %v1458_v17  ;;  %v1492_v53 = vld [vmem:[%s1910_s1 + $0x1d8] sm:$0xff]   ;;  %v1494_v55 = vld [vmem:[%s1910_s1 + $0x160] sm:$0xff]   ;;  %v1498_v59 = vld [vmem:[%s1910_s1 + $0x168] sm:$0xff]  }
  0x12   :  { %1321 = vmatprep.subr.bf16.mxu1 %v1459_v18  ;;  %v1493_v54 = vld [vmem:[%s1910_s1 + $0x198] sm:$0xff]   ;;  %v1495_v56 = vld [vmem:[%s1910_s1 + $0x120] sm:$0xff]   ;;  %v1499_v60 = vld [vmem:[%s1910_s1 + $0x128] sm:$0xff]  }
  0x13   :  { %v1496_v57 = vld [vmem:[%s1910_s1 + $0x1e0] sm:$0xff]   ;;  %v1500_v61 = vld [vmem:[%s1910_s1 + $0x1e8] sm:$0xff]   ;;  %v1502_v63 = vld [vmem:[%s1910_s1 + $0x170] sm:$0xff]  }
  0x14   :  { %1300 = vmatpush3.bf16.msra.mxu0 %v1460_v19  ;;  %v1497_v58 = vld [vmem:[%s1910_s1 + $0x1a0] sm:$0xff]   ;;  %v1501_v62 = vld [vmem:[%s1910_s1 + $0x1a8] sm:$0xff]   ;;  %v1503_v0 = vld [vmem:[%s1910_s1 + $0x130] sm:$0xff]  }
  0x15   :  { %1322 = vmatpush3.bf16.msra.mxu1 %v1461_v20  ;;  %1301 = vmatprep.subr.bf16.mxu0 %v1462_v21  ;;  %v1504_v2 = vld [vmem:[%s1910_s1 + $0x1f0] sm:$0xff]   ;;  %v1506_v4 = vld [vmem:[%s1910_s1 + $0x178] sm:$0xff]   ;;  %v1512_v11 = vld [vmem:[%s1910_s1 + $0x240] sm:$0xff]  }
  0x16   :  { %1323 = vmatprep.subr.bf16.mxu1 %v1463_v22  ;;  %v1505_v3 = vld [vmem:[%s1910_s1 + $0x1b0] sm:$0xff]   ;;  %v1507_v5 = vld [vmem:[%s1910_s1 + $0x138] sm:$0xff]   ;;  %v1515_v15 = vld [vmem:[%s1910_s1 + $0x200] sm:$0xff]  }
  0x17   :  { %v1508_v6 = vld [vmem:[%s1910_s1 + $0x1f8] sm:$0xff]   ;;  %v23_v7 = vld [vmem:[%s1911_s0 + $0x10] sm:$0x77]  ;;  %v1516_v16 = vld [vmem:[%s1910_s1 + $0x2c0] sm:$0xff]  }
  0x18   :  { %1302 = vmatpush3.bf16.msra.mxu0 %v1464_v23  ;;  %v1181_v8 = vcombine.high %v23_v7, %v23_v7  ;;  %v1511_v9 = vld [vmem:[%s1910_s1 + $0x1b8] sm:$0xff]   ;;  %v1180_v10 = vcombine.low %v23_v7, %v23_v7  ;;  %v1517_v17 = vld [vmem:[%s1910_s1 + $0x280] sm:$0xff]   ;;  %v1518_v18 = vld [vmem:[%s1910_s1 + $0x248] sm:$0xff]  }
  0x19   :  { %1324 = vmatpush3.bf16.msra.mxu1 %v1465_v24  ;;  %1303 = vmatprep.subr.bf16.mxu0 %v1466_v25  ;;  %v24_v12 = vld [vmem:[%s1911_s0 + $0x18] sm:$0x77]  ;;  %v1519_v19 = vld [vmem:[%s1910_s1 + $0x208] sm:$0xff]   ;;  %v1522_v22 = vld [vmem:[%s1910_s1 + $0x250] sm:$0xff]  }
  0x1a   :  { %1325 = vmatprep.subr.bf16.mxu1 %v1467_v26  ;;  %v1182_v13 = vcombine.low %v24_v12, %v24_v12  ;;  %v1183_v14 = vcombine.high %v24_v12, %v24_v12  ;;  %v1520_v20 = vld [vmem:[%s1910_s1 + $0x2c8] sm:$0xff]   ;;  %v1523_v23 = vld [vmem:[%s1910_s1 + $0x210] sm:$0xff]   ;;  %v1526_v26 = vld [vmem:[%s1910_s1 + $0x258] sm:$0xff]  }
  0x1b   :  { %v1521_v21 = vld [vmem:[%s1910_s1 + $0x288] sm:$0xff]   ;;  %v1524_v24 = vld [vmem:[%s1910_s1 + $0x2d0] sm:$0xff]   ;;  %v1533_v33 = vld [vmem:[%s1910_s1 + $0x2a0] sm:$0xff]  }
  0x1c   :  { %1304 = vmatpush3.bf16.msra.mxu0 %v1468_v27  ;;  %v1525_v25 = vld [vmem:[%s1910_s1 + $0x290] sm:$0xff]   ;;  %v1527_v27 = vld [vmem:[%s1910_s1 + $0x218] sm:$0xff]   ;;  %v1534_v34 = vld [vmem:[%s1910_s1 + $0x268] sm:$0xff]  }
  0x1d   :  { %1326 = vmatpush3.bf16.msra.mxu1 %v1469_v28  ;;  %1305 = vmatprep.subr.bf16.mxu0 %v1470_v29  ;;  %v1528_v28 = vld [vmem:[%s1910_s1 + $0x2d8] sm:$0xff]   ;;  %v1536_v36 = vld [vmem:[%s1910_s1 + $0x2e8] sm:$0xff]   ;;  %v1538_v38 = vld [vmem:[%s1910_s1 + $0x270] sm:$0xff]  }
  0x1e   :  { %1327 = vmatprep.subr.bf16.mxu1 %v1471_v30  ;;  %v1529_v29 = vld [vmem:[%s1910_s1 + $0x298] sm:$0xff]   ;;  %v1530_v30 = vld [vmem:[%s1910_s1 + $0x260] sm:$0xff]  }
  0x20   :  { %1306 = vmatpush3.bf16.msra.mxu0 %v1472_v31  ;;  %v1531_v31 = vld [vmem:[%s1910_s1 + $0x220] sm:$0xff]  }
  0x21   :  { %1328 = vmatpush3.bf16.msra.mxu1 %v1473_v32  ;;  %1335 = vmatprep.subr.bf16.mxu0 %v1478_v39  ;;  %v1532_v32 = vld [vmem:[%s1910_s1 + $0x2e0] sm:$0xff]   ;;  %v1539_v39 = vld [vmem:[%s1910_s1 + $0x230] sm:$0xff]  }
  0x22   :  { %1357 = vmatprep.subr.bf16.mxu1 %v1480_v41  ;;  %v1541_v41 = vld [vmem:[%s1910_s1 + $0x2b0] sm:$0xff]  }
  0x23   :  { %910 = vmatmul.mubr.bf16.vlgmr.msra.gmra.mrb[0].mxu0 %v1176_v35  ;;  %v1535_v35 = vld [vmem:[%s1910_s1 + $0x228] sm:$0xff]  }
  0x24   :  { %950 = vmatmul.mubr.bf16.vlgmr.msra.gmra.mrb[0].mxu1 %v1178_v37  ;;  %1336 = vmatpush3.bf16.msra.mxu0 %v1479_v40  ;;  %v1537_v37 = vld [vmem:[%s1910_s1 + $0x2a8] sm:$0xff]   ;;  %v1540_v40 = vld [vmem:[%s1910_s1 + $0x2f0] sm:$0xff]  }
  0x25   :  { %1358 = vmatpush3.bf16.msra.mxu1 %v1481_v42  ;;  %1337 = vmatprep.subr.bf16.mxu0 %v1482_v43  ;;  %v1542_v42 = vld [vmem:[%s1910_s1 + $0x278] sm:$0xff]  }
  0x26   :  { %1359 = vmatprep.subr.bf16.mxu1 %v1484_v45  ;;  %989 = vmatprep.mubr.bf16.mxu0 %v1181_v8  ;;  %v1543_v43 = vld [vmem:[%s1910_s1 + $0x238] sm:$0xff]   ;;  %v25_v45 = vld [vmem:[%s1911_s0 + $0x20] sm:$0x77] }
  0x27   :  { %1029 = vmatprep.mubr.bf16.mxu1 %v1183_v14 }
  0x28   :  { %1338 = vmatpush3.bf16.msra.mxu0 %v1483_v44  ;;  %v1544_v44 = vld [vmem:[%s1910_s1 + $0x2f8] sm:$0xff]  }
  0x29   :  { %1360 = vmatpush3.bf16.msra.mxu1 %v1485_v46  ;;  %1339 = vmatprep.subr.bf16.mxu0 %v1486_v47  ;;  %v1184_v46 = vcombine.low %v25_v45, %v25_v45  ;;  %v1185_v47 = vcombine.high %v25_v45, %v25_v45 }
  0x2a   :  { %1361 = vmatprep.subr.bf16.mxu1 %v1488_v49  ;;  %v26_v49 = vld [vmem:[%s1911_s0 + $0x28] sm:$0x77] }
  0x2c   :  { %1340 = vmatpush3.bf16.msra.mxu0 %v1487_v48  ;;  %v1547_v48 = vld [vmem:[%s1910_s1 + $0x2b8] sm:$0xff]  }
  0x2d   :  { %1362 = vmatpush3.bf16.msra.mxu1 %v1489_v50  ;;  %1341 = vmatprep.subr.bf16.mxu0 %v1490_v51  ;;  %v1187_v50 = vcombine.high %v26_v49, %v26_v49  ;;  %v1550_v51 = vld [vmem:[%s1910_s1 + $0x300] sm:$0xff]  }
  0x2e   :  { %1363 = vmatprep.subr.bf16.mxu1 %v1492_v53  ;;  %v1551_v53 = vld [vmem:[%s1910_s1 + $0x308] sm:$0xff]  }
  0x30   :  { %1342 = vmatpush3.bf16.msra.mxu0 %v1491_v52  ;;  %v1186_v52 = vcombine.low %v26_v49, %v26_v49 }
  0x31   :  { %1364 = vmatpush3.bf16.msra.mxu1 %v1493_v54  ;;  %1343 = vmatprep.subr.bf16.mxu0 %v1494_v55  ;;  %v1552_v54 = vld [vmem:[%s1910_s1 + $0x310] sm:$0xff]   ;;  %v1553_v55 = vld [vmem:[%s1910_s1 + $0x318] sm:$0xff]  }
  0x32   :  { %1365 = vmatprep.subr.bf16.mxu1 %v1496_v57 }
  0x34   :  { %1344 = vmatpush3.bf16.msra.mxu0 %v1495_v56  ;;  %v1554_v56 = vld [vmem:[%s1911_s0 + $0x30] ss:$0 sps:$4 sm:$0x77]  }
  0x35   :  { %1366 = vmatpush3.bf16.msra.mxu1 %v1497_v58  ;;  %1345 = vmatprep.subr.bf16.mxu0 %v1498_v59 }
  0x36   :  { %1367 = vmatprep.subr.bf16.mxu1 %v1500_v61 }
  0x38   :  { %1346 = vmatpush3.bf16.msra.mxu0 %v1499_v60 }
  0x39   :  { %1368 = vmatpush3.bf16.msra.mxu1 %v1501_v62  ;;  %1347 = vmatprep.subr.bf16.mxu0 %v1502_v63 }
  0x3a   :  { %1369 = vmatprep.subr.bf16.mxu1 %v1504_v2 }
  0x3c   :  { %1348 = vmatpush3.bf16.msra.mxu0 %v1503_v0 }
  0x3d   :  { %1370 = vmatpush3.bf16.msra.mxu1 %v1505_v3  ;;  %1349 = vmatprep.subr.bf16.mxu0 %v1506_v4 }
  0x3e   :  { %1371 = vmatprep.subr.bf16.mxu1 %v1508_v6 }
  0x40   :  { %1350 = vmatpush3.bf16.msra.mxu0 %v1507_v5 }
  0x41   :  { %1372 = vmatpush3.bf16.msra.mxu1 %v1511_v9  ;;  %1379 = vmatprep.subr.bf16.mxu0 %v1512_v11 }
  0x42   :  { %1401 = vmatprep.subr.bf16.mxu1 %v1516_v16 }
  0x43   :  { %990 = vmatmul.mubr.bf16.vlgmr.msra.gmra.mrb[4].mxu0 %v1180_v10 }
  0x44   :  { %1380 = vmatpush3.bf16.msra.mxu0 %v1515_v15  ;;  %1030 = vmatmul.mubr.bf16.vlgmr.msra.gmra.mrb[4].mxu1 %v1182_v13 }
  0x45   :  { %1402 = vmatpush3.bf16.msra.mxu1 %v1517_v17  ;;  %1381 = vmatprep.subr.bf16.mxu0 %v1518_v18 }
  0x46   :  { %1403 = vmatprep.subr.bf16.mxu1 %v1520_v20  ;;  %1069 = vmatprep.mubr.bf16.mxu0 %v1185_v47 }
  0x47   :  { %1109 = vmatprep.mubr.bf16.mxu1 %v1187_v50 }
  0x48   :  { %1382 = vmatpush3.bf16.msra.mxu0 %v1519_v19 }
  0x49   :  { %1404 = vmatpush3.bf16.msra.mxu1 %v1521_v21  ;;  %1383 = vmatprep.subr.bf16.mxu0 %v1522_v22 }
  0x4a   :  { %1405 = vmatprep.subr.bf16.mxu1 %v1524_v24 }
  0x4c   :  { %1384 = vmatpush3.bf16.msra.mxu0 %v1523_v23 }
  0x4d   :  { %1406 = vmatpush3.bf16.msra.mxu1 %v1525_v25  ;;  %1385 = vmatprep.subr.bf16.mxu0 %v1526_v26 }
  0x4e   :  { %1407 = vmatprep.subr.bf16.mxu1 %v1528_v28  ;;  %v20_v28 = vld [vmem:[#allocation2] sm:$0x3f] }
  0x50   :  { %1386 = vmatpush3.bf16.msra.mxu0 %v1527_v27 }
  0x51   :  { %1408 = vmatpush3.bf16.msra.mxu1 %v1529_v29  ;;  %1387 = vmatprep.subr.bf16.mxu0 %v1530_v30 }
  0x52   :  { %1409 = vmatprep.subr.bf16.mxu1 %v1532_v32 }
  0x54   :  { %1388 = vmatpush3.bf16.msra.mxu0 %v1531_v31 }
  0x55   :  { %1410 = vmatpush3.bf16.msra.mxu1 %v1533_v33  ;;  %1389 = vmatprep.subr.bf16.mxu0 %v1534_v34 }
  0x56   :  { %1411 = vmatprep.subr.bf16.mxu1 %v1536_v36 }
  0x58   :  { %1390 = vmatpush3.bf16.msra.mxu0 %v1535_v35  ;;  %v1290_v35 = vld [vmem:[%s1912_s2] ss:$0 sm:$0xff] }
  0x59   :  { %1412 = vmatpush3.bf16.msra.mxu1 %v1537_v37  ;;  %1391 = vmatprep.subr.bf16.mxu0 %v1538_v38 }
  0x5a   :  { %1413 = vmatprep.subr.bf16.mxu1 %v1540_v40 }
  0x5c   :  { %1392 = vmatpush3.bf16.msra.mxu0 %v1539_v39 }
  0x5d   :  { %1414 = vmatpush3.bf16.msra.mxu1 %v1541_v41  ;;  %1393 = vmatprep.subr.bf16.mxu0 %v1542_v42 }
  0x5e   :  { %1415 = vmatprep.subr.bf16.mxu1 %v1544_v44 }
  0x60   :  { %1394 = vmatpush3.bf16.msra.mxu0 %v1543_v43 }
  0x61   :  { %1428 = vmatprep.subr.bf16.mxu0 %v1555_v1  ;;  %1416 = vmatpush3.bf16.msra.mxu1 %v1547_v48 }
  0x63   :  { %1070 = vmatmul.mubr.bf16.vlgmr.msra.gmra.mrb[8].mxu0 %v1184_v46 }
  0x64   :  { %1429 = vmatpush3.bf16.msra.mxu0 %v1550_v51  ;;  %1436 = vmatprep.mubr.msk.bf16.mxu0 %vm1556_vm0, %v1555_v1 }
  0x65   :  { %1110 = vmatmul.mubr.bf16.vlgmr.msra.gmra.mrb[8].mxu1 %v1186_v52  ;;  %1430 = vmatprep.subr.bf16.mxu0 %v1555_v1 }
  0x68   :  { %1431 = vmatpush3.bf16.msra.mxu0 %v1551_v53 }
  0x69   :  { %1432 = vmatprep.subr.bf16.mxu0 %v1555_v1 }
  0x6c   :  { %1433 = vmatpush3.bf16.msra.mxu0 %v1552_v54 }
  0x6d   :  { %1434 = vmatprep.subr.bf16.mxu0 %v1555_v1 }
  0x70   :  { %1435 = vmatpush3.bf16.msra.mxu0 %v1553_v55 }
  0x73   :  { %1437 = vmatmul.mubr.msk.bf16.vlgmr.msra.gmra.mrb[12].mxu0 %vm873_vm1, %v1554_v56 }
  0xf6   :  { %v1307_v57 = vpop.f32.mrb[0].mxu0 }
  0xf7   :  { %v1329_v58 = vpop.f32.mrb[0].mxu1  ;;  %v1308_v59 = vpop.f32.mrb[1].mxu0 }
  0xf8   :  { %v1330_v60 = vpop.f32.mrb[1].mxu1  ;;  %v1309_v61 = vadd.f32 %v1308_v59, %v1307_v57  ;;  %v1310_v63 = vpop.f32.mrb[2].mxu0 }
  0xf9   :  { %v1331_v62 = vadd.f32 %v1330_v60, %v1329_v58  ;;  %v1332_v0 = vpop.f32.mrb[2].mxu1  ;;  %v1311_v2 = vpop.f32.mrb[3].mxu0 }
  0xfa   :  { %v1333_v3 = vpop.f32.mrb[3].mxu1 }
  0xfb   :  { %v952_v4 = vadd.f32 %v1331_v62, %v1309_v61 }
 0x116   :  { %v1351_v5 = vpop.f32.mrb[4].mxu0 }
 0x117   :  { %v1352_v1 = vpop.f32.mrb[5].mxu0  ;;  %v1373_v6 = vpop.f32.mrb[4].mxu1 }
 0x118   :  { %v1353_v7 = vadd.f32 %v1352_v1, %v1351_v5  ;;  %v1354_v8 = vpop.f32.mrb[6].mxu0  ;;  %v1374_v9 = vpop.f32.mrb[5].mxu1 }
 0x119   :  { %v1355_v10 = vpop.f32.mrb[7].mxu0  ;;  %v1375_v11 = vadd.f32 %v1374_v9, %v1373_v6  ;;  %v1376_v12 = vpop.f32.mrb[6].mxu1 }
 0x11a   :  { %v992_v13 = vadd.f32 %v1353_v7, %v952_v4  ;;  %v1377_v14 = vpop.f32.mrb[7].mxu1 }
 0x11c   :  { %v1032_v15 = vadd.f32 %v1375_v11, %v992_v13 }
 0x136   :  { %v1395_v16 = vpop.f32.mrb[8].mxu0 }
 0x137   :  { %v1396_v17 = vpop.f32.mrb[9].mxu0 }
 0x138   :  { %v1397_v18 = vadd.f32 %v1396_v17, %v1395_v16  ;;  %v1398_v19 = vpop.f32.mrb[10].mxu0  ;;  %v1417_v20 = vpop.f32.mrb[8].mxu1 }
 0x139   :  { %v1399_v21 = vpop.f32.mrb[11].mxu0  ;;  %v1418_v22 = vpop.f32.mrb[9].mxu1 }
 0x13a   :  { %v1072_v23 = vadd.f32 %v1397_v18, %v1032_v15  ;;  %v1419_v24 = vadd.f32 %v1418_v22, %v1417_v20  ;;  %v1420_v25 = vpop.f32.mrb[10].mxu1 }
 0x13b   :  { %v1421_v26 = vpop.f32.mrb[11].mxu1 }
 0x13c   :  { %v1112_v27 = vadd.f32 %v1419_v24, %v1072_v23 }
 0x146   :  { %v1151_v29 = vpop.f32.mrb[12].mxu0 }
 0x147   :  { %v1152_v30 = vadd.f32 %v1151_v29, %v1112_v27  ;;  %v1438_v31 = vpop.f32.mrb[13].mxu0 }
 0x148   :  { %v1154_v32 = vpop.f32.mrb[14].mxu0 }
 0x149   :  { %v1157_v33 = vadd.f32 %v1152_v30, %v20_v28  ;;  %v1439_v34 = vpop.f32.mrb[15].mxu0 }
 0x14b   :  { %1158 = vst [vmem:[#allocation2] sm:$0x3f] %v1157_v33 }
 0x152   :  { %v1162_v36 = vld [vmem:[#allocation2] sm:$0x3f] }
 0x153   :  { %v1170_v37 = vadd.f32 %v1290_v35, %v1162_v36 }
 0x155   :  { %1171 = vst [vmem:[%s1913_s3] sm:$0x3f] %v1170_v37 }

</bundles_post_ra>
